<compile_context>
chip_gen: v6e
topology: v6e:2x2x1
jax: 0.10.0
libtpu: 0.0.40
codegen_flags: <defaults>
</compile_context>

<pallas_src>
import jax
import jax.numpy as jnp
from jax.experimental import pallas as pl
from jax.experimental.pallas import tpu as pltpu


def _decoder_kernel(x_ref, w1_ref, b1_ref, w2_ref, b2_ref, w3_ref, b3_ref, o_ref):
    """One node-tile of the MLP: Linear -> ReLU -> Linear -> ReLU -> Linear."""
    cd = w1_ref.dtype  # matmul compute dtype (bf16 on the fast path)

    # Layer 1: Linear + ReLU (f32 accumulation, f32 bias/ReLU)
    h = jnp.dot(x_ref[...], w1_ref[...], preferred_element_type=jnp.float32)
    h = jnp.maximum(h + b1_ref[...], 0.0)
    # Layer 2: Linear + ReLU
    h = jnp.dot(h.astype(cd), w2_ref[...], preferred_element_type=jnp.float32)
    h = jnp.maximum(h + b2_ref[...], 0.0)
    # Output layer: Linear (Identity activation)
    out = jnp.dot(h.astype(cd), w3_ref[...], preferred_element_type=jnp.float32)
    o_ref[...] = (out + b3_ref[...]).astype(o_ref.dtype)


def _round_up(x, m):
    return (x + m - 1) // m * m


def _num_tensorcores():
    """Best-effort count of TensorCores per device (grid shards over them)."""
    try:
        kind = (getattr(jax.devices()[0], "device_kind", "") or "").lower()
        if "v7" in kind:                       # v7x: 2 TCs per chip
            return 2
        if "v4" in kind or "v5p" in kind:      # megacore chips: 2 TCs fused
            return 2
        return 1                               # v5e / v6e: 1 TC
    except Exception:
        return 1


def decoder_forward(x, params, *, tile_m=None, compute_dtype=jnp.bfloat16):
    """Pallas implementation of Decoder.forward(x).

    x:       (N, node_in)
    params:  dict with w1 (node_in, H), b1 (H,) or (1, H), w2 (H, H), b2,
             w3 (H, node_out), b3   (float32, PyTorch-style)
    Returns: (N, node_out) float32
    """
    N, node_in = x.shape
    hidden = params["w1"].shape[1]
    node_out = params["w3"].shape[1]

    # Cast matmul operands once outside the kernel (weights are a few KB).
    # Biases stay f32 (and are forced to (1, F)) so bias-add/ReLU happen on
    # the f32 accumulator.
    if compute_dtype is not None and x.dtype != compute_dtype:
        # NOTE: for peak bandwidth the caller should already pass bf16 x; this
        # cast adds an extra HBM round trip of x when it is needed.
        x = x.astype(compute_dtype)
    cd = x.dtype
    w1 = params["w1"].astype(cd)
    w2 = params["w2"].astype(cd)
    w3 = params["w3"].astype(cd)
    b1 = jnp.reshape(params["b1"].astype(jnp.float32), (1, hidden))
    b2 = jnp.reshape(params["b2"].astype(jnp.float32), (1, hidden))
    b3 = jnp.reshape(params["b3"].astype(jnp.float32), (1, node_out))

    # Tile selection: minimum number of grid steps (1 on single-TC chips,
    # 2 on megacore chips so both TensorCores get one step each).
    if tile_m is None:
        tile_m = pl.cdiv(N, _num_tensorcores())
    tm = max(8, min(_round_up(tile_m, 8), _round_up(N, 8)))
    grid = (pl.cdiv(N, tm),)   # partial last block handled by Pallas (no jnp.pad)

    # Weights/biases: full-array blocks with constant index_map -> Pallas keeps
    # them resident in VMEM across all grid steps (no per-step re-DMA).
    full2d = lambda shape: pl.BlockSpec(shape, lambda i: (0, 0))

    flops = 2 * N * (node_in * hidden + hidden * hidden + hidden * node_out)
    bytes_accessed = (
        N * node_in * x.dtype.itemsize                     # x read
        + (node_in * hidden + hidden * hidden + hidden * node_out) * w1.dtype.itemsize
        + (2 * hidden + node_out) * 4                      # biases (f32)
        + N * node_out * 4                                 # output write (f32)
    )

    out = pl.pallas_call(
        _decoder_kernel,
        out_shape=jax.ShapeDtypeStruct((N, node_out), jnp.float32),
        grid_spec=pltpu.PrefetchScalarGridSpec(
            num_scalar_prefetch=0,
            grid=grid,
            in_specs=[
                pl.BlockSpec((tm, node_in), lambda i: (i, 0)),   # x tile
                full2d((node_in, hidden)),    # w1
                full2d((1, hidden)),          # b1
                full2d((hidden, hidden)),     # w2
                full2d((1, hidden)),          # b2
                full2d((hidden, node_out)),   # w3
                full2d((1, node_out)),        # b3
            ],
            out_specs=pl.BlockSpec((tm, node_out), lambda i: (i, 0)),
        ),
        compiler_params=pltpu.CompilerParams(
            dimension_semantics=("parallel",),   # shards grid across 2-TC chips
        ),
        cost_estimate=pl.CostEstimate(
            flops=flops, transcendentals=0, bytes_accessed=bytes_accessed),
    )(x, w1, b1, w2, b2, w3, b3)

    return out


def init_decoder_params(key, node_in, node_out, mlp_num_layers, mlp_hidden_dim):
    """Deterministic init matching the Linear layer shapes of build_mlp."""
    sizes = [node_in] + [mlp_hidden_dim] * mlp_num_layers + [node_out]
    keys = jax.random.split(key, len(sizes) - 1)
    params = {}
    for idx, (fan_in, fan_out) in enumerate(zip(sizes[:-1], sizes[1:]), start=1):
        kw, kb = jax.random.split(keys[idx - 1])
        bound = 1.0 / jnp.sqrt(fan_in)
        params[f"w{idx}"] = jax.random.uniform(
            kw, (fan_in, fan_out), jnp.float32, -bound, bound)
        params[f"b{idx}"] = jax.random.uniform(
            kb, (1, fan_out), jnp.float32, -bound, bound)
    return params


def decoder_ref(x, params, compute_dtype=jnp.bfloat16):
    """Precision-matched JAX reference (same casts, f32 accumulation)."""
    cd = compute_dtype if compute_dtype is not None else x.dtype
    h = jnp.dot(x.astype(cd), params["w1"].astype(cd),
                preferred_element_type=jnp.float32)
    h = jnp.maximum(h + params["b1"].reshape(1, -1), 0.0)
    h = jnp.dot(h.astype(cd), params["w2"].astype(cd),
                preferred_element_type=jnp.float32)
    h = jnp.maximum(h + params["b2"].reshape(1, -1), 0.0)
    out = jnp.dot(h.astype(cd), params["w3"].astype(cd),
                  preferred_element_type=jnp.float32)
    return out + params["b3"].reshape(1, -1)


if __name__ == "__main__":
    # learning_to_simulate-style sizes: node_in=16, 2 hidden layers of 32, node_out=3.
    # N=4096 nodes -> grid=(1,) on v5e/v6e, grid=(2,) (one step per TC) on v7x.
    N, node_in, node_out = 4096, 16, 3
    mlp_num_layers, mlp_hidden_dim = 2, 32

    key = jax.random.PRNGKey(0)
    kx, kp = jax.random.split(key)
    # Supply x already in bf16 so the kernel's dominant HBM read is half-width.
    x = jax.random.normal(kx, (N, node_in), jnp.float32).astype(jnp.bfloat16)
    params = init_decoder_params(kp, node_in, node_out, mlp_num_layers, mlp_hidden_dim)

    out = decoder_forward(x, params)
    out = jax.block_until_ready(out)

    ref = decoder_ref(x, params)
    assert out.shape == (N, node_out)
    assert out.dtype == jnp.float32
    assert jnp.allclose(out, ref, atol=1e-3, rtol=1e-3), "mismatch vs JAX reference"

    # Also exercise a non-divisible N to confirm the partial-last-block path.
    N2 = 1000
    x2 = jax.random.normal(jax.random.PRNGKey(1), (N2, node_in), jnp.float32).astype(jnp.bfloat16)
    out2 = jax.block_until_ready(decoder_forward(x2, params))
    assert out2.shape == (N2, node_out)
    assert jnp.allclose(out2, decoder_ref(x2, params), atol=1e-3, rtol=1e-3)

    print("KERNEL_OK")
</pallas_src>

<mosaic_0001>
module attributes {stable_mosaic.version = 11 : i64} {
  func.func @_decoder_kernel(%arg0: i32, %arg1: memref<4096x16xbf16, #tpu.memory_space<vmem>>, %arg2: memref<16x32xbf16, #tpu.memory_space<vmem>>, %arg3: memref<1x32xf32, #tpu.memory_space<vmem>>, %arg4: memref<32x32xbf16, #tpu.memory_space<vmem>>, %arg5: memref<1x32xf32, #tpu.memory_space<vmem>>, %arg6: memref<32x3xbf16, #tpu.memory_space<vmem>>, %arg7: memref<1x3xf32, #tpu.memory_space<vmem>>, %arg8: memref<4096x3xf32, #tpu.memory_space<vmem>>) attributes {dimension_semantics = [#tpu.dimension_semantics<parallel>], iteration_bounds = array<i64: 1>, scalar_prefetch = 0 : i64, scratch_operands = 0 : i64, tpu.core_type = #tpu.core_type<tc>, window_params = [{transform_indices = @transform_0, window_bounds = array<i64: 4096, 16>}, {pipeline_mode = #tpu.pipeline_mode<synchronous>, transform_indices = @transform_1, window_bounds = array<i64: 16, 32>}, {pipeline_mode = #tpu.pipeline_mode<synchronous>, transform_indices = @transform_2, window_bounds = array<i64: 1, 32>}, {pipeline_mode = #tpu.pipeline_mode<synchronous>, transform_indices = @transform_3, window_bounds = array<i64: 32, 32>}, {pipeline_mode = #tpu.pipeline_mode<synchronous>, transform_indices = @transform_4, window_bounds = array<i64: 1, 32>}, {pipeline_mode = #tpu.pipeline_mode<synchronous>, transform_indices = @transform_5, window_bounds = array<i64: 32, 3>}, {pipeline_mode = #tpu.pipeline_mode<synchronous>, transform_indices = @transform_6, window_bounds = array<i64: 1, 3>}, {transform_indices = @transform_7, window_bounds = array<i64: 4096, 3>}]} {
    %c0 = arith.constant 0 : index
    %c0_0 = arith.constant 0 : index
    %0 = vector.load %arg1[%c0, %c0_0] : memref<4096x16xbf16, #tpu.memory_space<vmem>>, vector<4096x16xbf16>
    %c0_1 = arith.constant 0 : index
    %c0_2 = arith.constant 0 : index
    %1 = vector.load %arg2[%c0_1, %c0_2] : memref<16x32xbf16, #tpu.memory_space<vmem>>, vector<16x32xbf16>
    %cst = arith.constant dense<0.000000e+00> : vector<4096x32xf32>
    %2 = tpu.matmul %0, %1, %cst {dimension_numbers = #tpu.dot_dimension_numbers<[1], [0], [0], [1], [0, 0, 1, 1], [], []>} : vector<4096x16xbf16>, vector<16x32xbf16>, vector<4096x32xf32> -> vector<4096x32xf32>
    %c0_3 = arith.constant 0 : index
    %c0_4 = arith.constant 0 : index
    %3 = vector.load %arg3[%c0_3, %c0_4] : memref<1x32xf32, #tpu.memory_space<vmem>>, vector<1x32xf32>
    %4 = vector.broadcast %3 : vector<1x32xf32> to vector<4096x32xf32>
    %5 = arith.addf %2, %4 : vector<4096x32xf32>
    %cst_5 = arith.constant 0.000000e+00 : f32
    %6 = vector.broadcast %cst_5 : f32 to vector<4096x32xf32>
    %7 = arith.maximumf %5, %6 : vector<4096x32xf32>
    %8 = arith.truncf %7 : vector<4096x32xf32> to vector<4096x32xbf16>
    %c0_6 = arith.constant 0 : index
    %c0_7 = arith.constant 0 : index
    %9 = vector.load %arg4[%c0_6, %c0_7] : memref<32x32xbf16, #tpu.memory_space<vmem>>, vector<32x32xbf16>
    %cst_8 = arith.constant dense<0.000000e+00> : vector<4096x32xf32>
    %10 = tpu.matmul %8, %9, %cst_8 {dimension_numbers = #tpu.dot_dimension_numbers<[1], [0], [0], [1], [0, 0, 1, 1], [], []>} : vector<4096x32xbf16>, vector<32x32xbf16>, vector<4096x32xf32> -> vector<4096x32xf32>
    %c0_9 = arith.constant 0 : index
    %c0_10 = arith.constant 0 : index
    %11 = vector.load %arg5[%c0_9, %c0_10] : memref<1x32xf32, #tpu.memory_space<vmem>>, vector<1x32xf32>
    %12 = vector.broadcast %11 : vector<1x32xf32> to vector<4096x32xf32>
    %13 = arith.addf %10, %12 : vector<4096x32xf32>
    %cst_11 = arith.constant 0.000000e+00 : f32
    %14 = vector.broadcast %cst_11 : f32 to vector<4096x32xf32>
    %15 = arith.maximumf %13, %14 : vector<4096x32xf32>
    %16 = arith.truncf %15 : vector<4096x32xf32> to vector<4096x32xbf16>
    %c0_12 = arith.constant 0 : index
    %c0_13 = arith.constant 0 : index
    %17 = vector.load %arg6[%c0_12, %c0_13] : memref<32x3xbf16, #tpu.memory_space<vmem>>, vector<32x3xbf16>
    %cst_14 = arith.constant dense<0.000000e+00> : vector<4096x3xf32>
    %18 = tpu.matmul %16, %17, %cst_14 {dimension_numbers = #tpu.dot_dimension_numbers<[1], [0], [0], [1], [0, 0, 1, 1], [], []>} : vector<4096x32xbf16>, vector<32x3xbf16>, vector<4096x3xf32> -> vector<4096x3xf32>
    %c0_15 = arith.constant 0 : index
    %c0_16 = arith.constant 0 : index
    %19 = vector.load %arg7[%c0_15, %c0_16] : memref<1x3xf32, #tpu.memory_space<vmem>>, vector<1x3xf32>
    %20 = vector.broadcast %19 : vector<1x3xf32> to vector<4096x3xf32>
    %21 = arith.addf %18, %20 : vector<4096x3xf32>
    %c0_17 = arith.constant 0 : index
    %c0_18 = arith.constant 0 : index
    %22 = vector.load %arg8[%c0_17, %c0_18] : memref<4096x3xf32, #tpu.memory_space<vmem>>, vector<4096x3xf32>
    tpu.vector_store %arg8[%c0_17, %c0_18], %21 {strides = array<i32>} : memref<4096x3xf32, #tpu.memory_space<vmem>>, vector<4096x3xf32>,
    return
  }
  func.func @transform_0(%arg0: i32) -> (i32, i32) {
    %c0_i32 = arith.constant 0 : i32
    %c0_i32_0 = arith.constant 0 : i32
    return %arg0, %c0_i32 : i32, i32
  }
  func.func @transform_1(%arg0: i32) -> (i32, i32) {
    %c0_i32 = arith.constant 0 : i32
    %c0_i32_0 = arith.constant 0 : i32
    %c0_i32_1 = arith.constant 0 : i32
    return %c0_i32, %c0_i32_0 : i32, i32
  }
  func.func @transform_2(%arg0: i32) -> (i32, i32) {
    %c0_i32 = arith.constant 0 : i32
    %c0_i32_0 = arith.constant 0 : i32
    %c0_i32_1 = arith.constant 0 : i32
    return %c0_i32, %c0_i32_0 : i32, i32
  }
  func.func @transform_3(%arg0: i32) -> (i32, i32) {
    %c0_i32 = arith.constant 0 : i32
    %c0_i32_0 = arith.constant 0 : i32
    %c0_i32_1 = arith.constant 0 : i32
    return %c0_i32, %c0_i32_0 : i32, i32
  }
  func.func @transform_4(%arg0: i32) -> (i32, i32) {
    %c0_i32 = arith.constant 0 : i32
    %c0_i32_0 = arith.constant 0 : i32
    %c0_i32_1 = arith.constant 0 : i32
    return %c0_i32, %c0_i32_0 : i32, i32
  }
  func.func @transform_5(%arg0: i32) -> (i32, i32) {
    %c0_i32 = arith.constant 0 : i32
    %c0_i32_0 = arith.constant 0 : i32
    %c0_i32_1 = arith.constant 0 : i32
    return %c0_i32, %c0_i32_0 : i32, i32
  }
  func.func @transform_6(%arg0: i32) -> (i32, i32) {
    %c0_i32 = arith.constant 0 : i32
    %c0_i32_0 = arith.constant 0 : i32
    %c0_i32_1 = arith.constant 0 : i32
    return %c0_i32, %c0_i32_0 : i32, i32
  }
  func.func @transform_7(%arg0: i32) -> (i32, i32) {
    %c0_i32 = arith.constant 0 : i32
    %c0_i32_0 = arith.constant 0 : i32
    return %arg0, %c0_i32 : i32, i32
  }
}

</mosaic_0001>

<bundles_post_ra>
// kernel: tpu_custom_call.1
= control target key start
LH: loop header
LB: loop body
LE: loop exit
PB: predicated region body
PF: predicated region fallthrough
CT: control target
= control target key end

     0   :  { %12 = vsyncpa [#allocation3], 0  ;;  %s22374_s0 = inlined_call_operand.vmem [shape: bf16[4096,16], index: 0, kind: input, shape index: {}]   ;;  %s22375_s1 = inlined_call_operand.hbm [shape: bf16[16,32], index: 1, kind: input, shape index: {}]   ;;  %s22376_s2 = inlined_call_operand.hbm [shape: f32[1,32], index: 2, kind: input, shape index: {}]   ;;  %s22377_s3 = inlined_call_operand.hbm [shape: bf16[32,32], index: 3, kind: input, shape index: {}]   ;;  %s22378_s4 = inlined_call_operand.hbm [shape: f32[1,32], index: 4, kind: input, shape index: {}]   ;;  %s22379_s5 = inlined_call_operand.vmem [shape: bf16[32,3], index: 5, kind: input, shape index: {}]   ;;  %s22380_s6 = inlined_call_operand.hbm [shape: f32[1,3], index: 6, kind: input, shape index: {}]   ;;  %s22381_s7 = inlined_call_operand.vmem [shape: f32[4096,3], index: 7, kind: output, shape index: {}]  }
   0x1   :  { %13 = vsyncpa [#allocation5], 0 }
   0x2   :  { %14 = vsyncpa [#allocation8], 0  ;;  %s16292_s24 = smov [#allocation4]   ;;  %s16293_s26 = smov [#allocation7]  }
   0x3   :  { %s35_s25 = sshll.u32 %s16292_s24, 4  ;;  %s57_s27 = sshll.u32 %s16293_s26, 4  ;;  %s36_s25 = int_to_ptr.vmem [resolvable:$true] %s35_s25  ;;  %s58_s27 = int_to_ptr.vmem [resolvable:$true] %s57_s27 }
   0x4   :  { %s16194_s28 = scalar_lea.vmem %s36_s25, 16  ;;  %s16198_s29 = scalar_lea.vmem %s36_s25, 32 }
   0x5   :  { %p16195_p0 = scmp.ne.s32.totalorder %s36_s25, %s16194_s28  ;;  %p16199_p1 = scmp.lt.s32.totalorder %s36_s25, %s36_s25 }
   0x6   :  { %p16200_p2 = scmp.lt.s32.totalorder %s16198_s29, %s16194_s28 }
   0x8   :  { %p16201_p3 = por %p16200_p2, %p16199_p1 }
   0xa   :  { %p16202_p4 = pnand %p16201_p3, %p16195_p0 }
   0xc   :  { %16205 = shalt.err (!%p16202_p4)
}
   0xd   :  { %38 = dma.hbm_to_vmem [thread:$0]  %s22376_s2, 16, %s36_s25, [#allocation5]  }
   0xe   :  { %s16214_s9 = scalar_lea.vmem %s58_s27, 16  ;;  %s16218_s10 = scalar_lea.vmem %s58_s27, 32 }
   0xf   :  { %p16215_p5 = scmp.ne.s32.totalorder %s58_s27, %s16214_s9  ;;  %p16219_p6 = scmp.lt.s32.totalorder %s58_s27, %s58_s27 }
  0x10   :  { %p16220_p7 = scmp.lt.s32.totalorder %s16218_s10, %s16214_s9 }
  0x12   :  { %p16221_p8 = por %p16220_p7, %p16219_p6 }
  0x14   :  { %p16222_p9 = pnand %p16221_p8, %p16215_p5 }
  0x16   :  { %16225 = shalt.err (!%p16222_p9)
}
  0x17   :  { %60 = dma.hbm_to_vmem [thread:$0]  %s22378_s4, 16, %s58_s27, [#allocation8]  }
  0x18   :  { %s16294_s13 = smov [#allocation2]  }
  0x19   :  { %s22_s14 = sshll.u32 %s16294_s13, 4  ;;  %s23_s14 = int_to_ptr.vmem [resolvable:$true] %s22_s14 }
  0x1a   :  { %s16234_s15 = scalar_lea.vmem %s23_s14, 128  ;;  %p16239_p11 = scmp.lt.s32.totalorder %s23_s14, %s23_s14 }
  0x1b   :  { %p16235_p10 = scmp.ne.s32.totalorder %s23_s14, %s16234_s15  ;;  %p16240_p12 = scmp.lt.s32.totalorder %s16234_s15, %s16234_s15 }
  0x1d   :  { %p16241_p13 = por %p16240_p12, %p16239_p11 }
  0x1f   :  { %p16242_p0 = pnand %p16241_p13, %p16235_p10 }
  0x21   :  { %16245 = shalt.err (!%p16242_p0)
}
  0x22   :  { %s16295_s2 = smov 64   ;;  %s16296_s16 = smov 4  }
  0x23   :  { %28 = dma.hbm_to_vmem [thread:$0]  %s22375_s1, 128, %s23_s14, [#allocation3], %s16295_s2, %s16295_s2, %s16296_s16  }
  0x24   :  { %s16297_s19 = smov [#allocation6]   ;;  %s16298_s4 = smov [#allocation9]  }
  0x25   :  { %s44_s20 = sshll.u32 %s16297_s19, 4  ;;  %s69_s21 = sshll.u32 %s16298_s4, 4  ;;  %s45_s20 = int_to_ptr.vmem [resolvable:$true] %s44_s20  ;;  %s70_s21 = int_to_ptr.vmem [resolvable:$true] %s69_s21 }
  0x26   :  { %s16254_s22 = scalar_lea.vmem %s45_s20, 256  ;;  %p16259_p2 = scmp.lt.s32.totalorder %s45_s20, %s45_s20 }
  0x27   :  { %p16255_p1 = scmp.ne.s32.totalorder %s45_s20, %s16254_s22  ;;  %p16260_p3 = scmp.lt.s32.totalorder %s16254_s22, %s16254_s22 }
  0x29   :  { %p16261_p4 = por %p16260_p3, %p16259_p2 }
  0x2b   :  { %p16262_p5 = pnand %p16261_p4, %p16255_p1 }
  0x2d   :  { %16265 = shalt.err (!%p16262_p5)
}
  0x2e   :  { %50 = dma.hbm_to_vmem [thread:$0]  %s22377_s3, 256, %s45_s20, [#allocation5], %s16295_s2, %s16295_s2, %s16296_s16  }
  0x2f   :  { %s16274_s25 = scalar_lea.vmem %s70_s21, 16  ;;  %s16278_s1 = scalar_lea.vmem %s70_s21, 32 }
  0x30   :  { %p16275_p6 = scmp.ne.s32.totalorder %s70_s21, %s16274_s25  ;;  %p16279_p7 = scmp.lt.s32.totalorder %s70_s21, %s70_s21 }
  0x31   :  { %p16280_p8 = scmp.lt.s32.totalorder %s16278_s1, %s16274_s25 }
  0x33   :  { %p16281_p9 = por %p16280_p8, %p16279_p7 }
  0x35   :  { %p16282_p10 = pnand %p16281_p9, %p16275_p6 }
  0x37   :  { %16285 = shalt.err (!%p16282_p10)
}
  0x38   :  { %72 = dma.hbm_to_vmem [thread:$0]  %s22380_s6, 16, %s70_s21, [#allocation8]  }
  0x39   :  { %16286 = dma.done.wait [#allocation3], 128  }
  0x3a   :  { %16287 = vsyncadd [#allocation3], 4294967168 }
  0x3b   :  { %16288 = dma.done.wait [#allocation5], 272  }
  0x3c   :  { %16289 = vsyncadd [#allocation5], 4294967024 }
  0x3d   :  { %16290 = dma.done.wait [#allocation8], 32  }
  0x3e   :  { %16291 = vsyncadd [#allocation8], 4294967264  ;;  %v15907_v0 = vld [vmem:[#allocation2] sm:$0xff]   ;;  %vm1896_vm0 = vcmask 130048   ;;  %v15909_v2 = vld [vmem:[%s22374_s0 + $0x408] sm:$0xff]   ;;  %vm5537_vm1 = vcmask 261120  }
  0x3f   :  { %v15908_v1 = vld [vmem:[%s22374_s0 + $0x400] sm:$0xff]   ;;  %15898 = vmatprep.subr.bf16.mxu1 %v15907_v0  ;;  %14352 = vmatprep.subr.bf16.mxu0 %v15907_v0  ;;  %v15910_v3 = vld [vmem:[#allocation6 + $0x8] sm:$0xff]   ;;  %v15914_v7 = vld [vmem:[%s22374_s0 + $0x428] sm:$0xff]   ;;  %vm12027_vm2 = vcmask 23552  }
  0x40   :  { %15899 = vmatpush3.bf16.msra.mxu1 %v15907_v0  ;;  %14610 = vmatprep.mubr.msk.bf16.mxu1 %vm1896_vm0, %v15908_v1  ;;  %v15911_v4 = vld [vmem:[%s22374_s0 + $0x410] sm:$0xff]   ;;  %v15912_v5 = vld [vmem:[%s22374_s0 + $0x418] sm:$0xff]   ;;  %v15913_v6 = vld [vmem:[%s22374_s0 + $0x420] sm:$0xff]  }
  0x41   :  { %14353 = vmatpush3.bf16.msra.mxu0 %v15907_v0  ;;  %14866 = vmatprep.subr.bf16.mxu1 %v15910_v3  ;;  %v15915_v8 = vld [vmem:[%s22374_s0 + $0x430] sm:$0xff]   ;;  %v15916_v9 = vld [vmem:[%s22374_s0 + $0x438] sm:$0xff]   ;;  %v15917_v10 = vld [vmem:[%s22374_s0 + $0x440] sm:$0xff]  }
  0x42   :  { %v15918_v11 = vld [vmem:[%s22374_s0 + $0x448] sm:$0xff]   ;;  %v15919_v12 = vld [vmem:[%s22374_s0 + $0x450] sm:$0xff]   ;;  %v15920_v13 = vld [vmem:[%s22374_s0 + $0x458] sm:$0xff]  }
  0x43   :  { %14611 = vmatmul.mubr.msk.bf16.vlgmr.msra.gmra.mxu1 %vm1896_vm0, %v15909_v2  ;;  %v15921_v14 = vld [vmem:[%s22374_s0 + $0x460] sm:$0xff]   ;;  %v15922_v15 = vld [vmem:[%s22374_s0 + $0x468] sm:$0xff]   ;;  %v15923_v16 = vld [vmem:[%s22374_s0 + $0x470] sm:$0xff]  }
  0x44   :  { %14867 = vmatpush3.bf16.msra.mxu1 %v15910_v3  ;;  %14614 = vmatprep.mubr.msk.bf16.mxu1 %vm1896_vm0, %v15911_v4  ;;  %v15924_v17 = vld [vmem:[%s22374_s0 + $0x478] sm:$0xff]   ;;  %v15925_v18 = vld [vmem:[%s22374_s0 + $0x480] sm:$0xff]   ;;  %v15926_v19 = vld [vmem:[%s22374_s0 + $0x488] sm:$0xff]  }
  0x45   :  { %v15927_v20 = vld [vmem:[%s22374_s0 + $0x490] sm:$0xff]   ;;  %v15928_v21 = vld [vmem:[%s22374_s0 + $0x498] sm:$0xff]   ;;  %v15929_v22 = vld [vmem:[%s22374_s0 + $0x4a0] sm:$0xff]  }
  0x46   :  { %v15960_v23 = vld [vmem:[%s22374_s0] sm:$0xff]   ;;  %v15962_v24 = vld [vmem:[%s22374_s0 + $0x8] sm:$0xff]   ;;  %v15931_v26 = vld [vmem:[%s22374_s0 + $0x4b0] sm:$0xff]  }
  0x47   :  { %14354 = vmatprep.mubr.msk.bf16.mxu0 %vm1896_vm0, %v15960_v23  ;;  %v15930_v25 = vld [vmem:[%s22374_s0 + $0x4a8] sm:$0xff]   ;;  %v15965_v27 = vld [vmem:[%s22374_s0 + $0x10] sm:$0xff]   ;;  %v15967_v28 = vld [vmem:[%s22374_s0 + $0x18] sm:$0xff]  }
  0x48   :  { %14355 = vmatmul.mubr.msk.bf16.vlgmr.msra.gmra.mxu0 %vm1896_vm0, %v15962_v24  ;;  %v15932_v29 = vld [vmem:[%s22374_s0 + $0x4b8] sm:$0xff]   ;;  %v15963_v30 = vld [vmem:[%s22379_s5 + $0x8] sm:$0xff]   ;;  %v15933_v31 = vld [vmem:[%s22374_s0 + $0x4c0] sm:$0xff]  }
  0x49   :  { %14358 = vmatprep.mubr.msk.bf16.mxu0 %vm1896_vm0, %v15965_v27  ;;  %15382 = vmatprep.subr.bf16.mxu0 %v15963_v30  ;;  %v15969_v32 = vld [vmem:[%s22374_s0 + $0x20] sm:$0xff]   ;;  %v15971_v33 = vld [vmem:[%s22374_s0 + $0x28] sm:$0xff]   ;;  %v15935_v35 = vld [vmem:[%s22374_s0 + $0x4d0] sm:$0xff]  }
  0x4a   :  { %15383 = vmatpush3.bf16.msra.mxu0 %v15963_v30  ;;  %v15934_v34 = vld [vmem:[%s22374_s0 + $0x4c8] sm:$0xff]   ;;  %v15973_v36 = vld [vmem:[%s22374_s0 + $0x30] sm:$0xff]   ;;  %v15975_v37 = vld [vmem:[%s22374_s0 + $0x38] sm:$0xff]  }
  0x4b   :  { %14615 = vmatmul.mubr.msk.bf16.gmra.mxu1 %vm1896_vm0, %v15912_v5  ;;  %v15936_v38 = vld [vmem:[%s22374_s0 + $0x4d8] sm:$0xff]   ;;  %v15937_v39 = vld [vmem:[%s22374_s0 + $0x4e0] sm:$0xff]   ;;  %v15979_v41 = vld [vmem:[%s22374_s0 + $0x48] sm:$0xff]  }
  0x4c   :  { %14618 = vmatprep.mubr.msk.bf16.mxu1 %vm1896_vm0, %v15913_v6  ;;  %v15977_v40 = vld [vmem:[%s22374_s0 + $0x40] sm:$0xff]   ;;  %v15938_v42 = vld [vmem:[%s22374_s0 + $0x4e8] sm:$0xff]   ;;  %v15939_v43 = vld [vmem:[%s22374_s0 + $0x4f0] sm:$0xff]  }
  0x4d   :  { %v15981_v44 = vld [vmem:[%s22374_s0 + $0x50] sm:$0xff]   ;;  %v15983_v45 = vld [vmem:[%s22374_s0 + $0x58] sm:$0xff]   ;;  %v15941_v47 = vld [vmem:[%s22374_s0 + $0x500] sm:$0xff]  }
  0x4e   :  { %v15940_v46 = vld [vmem:[%s22374_s0 + $0x4f8] sm:$0xff]   ;;  %v15985_v48 = vld [vmem:[%s22374_s0 + $0x60] sm:$0xff]   ;;  %v15987_v49 = vld [vmem:[%s22374_s0 + $0x68] sm:$0xff]  }
  0x4f   :  { %v15942_v50 = vld [vmem:[%s22374_s0 + $0x508] sm:$0xff]   ;;  %v15943_v51 = vld [vmem:[%s22374_s0 + $0x510] sm:$0xff]   ;;  %v15992_v53 = vld [vmem:[%s22374_s0 + $0x78] sm:$0xff]  }
  0x50   :  { %14359 = vmatmul.mubr.msk.bf16.gmra.mxu0 %vm1896_vm0, %v15967_v28  ;;  %v15989_v52 = vld [vmem:[%s22374_s0 + $0x70] sm:$0xff]   ;;  %v15944_v54 = vld [vmem:[%s22374_s0 + $0x518] sm:$0xff]   ;;  %v15945_v56 = vld [vmem:[%s22374_s0 + $0x520] sm:$0xff]  }
  0x51   :  { %14362 = vmatprep.mubr.msk.bf16.mxu0 %vm1896_vm0, %v15969_v32  ;;  %v15991_v55 = vld [vmem:[#allocation6] sm:$0xff]   ;;  %v15994_v57 = vld [vmem:[%s22374_s0 + $0x80] sm:$0xff]   ;;  %v16000_v62 = vld [vmem:[%s22374_s0 + $0x98] sm:$0xff]  }
  0x52   :  { %14868 = vmatprep.subr.bf16.mxu1 %v15991_v55  ;;  %v15996_v58 = vld [vmem:[%s22374_s0 + $0x88] sm:$0xff]   ;;  %v15947_v60 = vld [vmem:[%s22374_s0 + $0x530] sm:$0xff]   ;;  %v15948_v63 = vld [vmem:[%s22374_s0 + $0x538] sm:$0xff]  }
  0x53   :  { %14619 = vmatmul.mubr.msk.bf16.gmra.mxu1 %vm1896_vm0, %v15914_v7  ;;  %v15946_v59 = vld [vmem:[%s22374_s0 + $0x528] sm:$0xff]   ;;  %v15998_v61 = vld [vmem:[%s22374_s0 + $0x90] sm:$0xff]   ;;  %v15949_v0 = vld [vmem:[%s22374_s0 + $0x540] sm:$0xff]  }
  0x54   :  { %14622 = vmatprep.mubr.msk.bf16.mxu1 %vm1896_vm0, %v15915_v8  ;;  %14869 = vmatpush3.bf16.msra.mxu1 %v15991_v55  ;;  %v16002_v1 = vld [vmem:[%s22374_s0 + $0xa0] sm:$0xff]   ;;  %v16004_v2 = vld [vmem:[%s22374_s0 + $0xa8] sm:$0xff]   ;;  %v15951_v4 = vld [vmem:[%s22374_s0 + $0x550] sm:$0xff]  }
  0x55   :  { %v15950_v3 = vld [vmem:[%s22374_s0 + $0x548] sm:$0xff]   ;;  %v16006_v5 = vld [vmem:[%s22374_s0 + $0xb0] sm:$0xff]   ;;  %v16008_v6 = vld [vmem:[%s22374_s0 + $0xb8] sm:$0xff]  }
  0x56   :  { %v15952_v7 = vld [vmem:[%s22374_s0 + $0x558] sm:$0xff]   ;;  %v15953_v8 = vld [vmem:[%s22374_s0 + $0x560] sm:$0xff]  }
  0x57   :  { %v16024_v23 = vld [vmem:[%s22374_s0 + $0xf8] sm:$0xff]   ;;  %v16026_v32 = vld [vmem:[%s22374_s0 + $0x100] sm:$0xff]  }
  0x58   :  { %14363 = vmatmul.mubr.msk.bf16.gmra.mxu0 %vm1896_vm0, %v15971_v33  ;;  %v15961_v27 = vld [vmem:[%s22374_s0 + $0x598] sm:$0xff]  }
  0x59   :  { %14366 = vmatprep.mubr.msk.bf16.mxu0 %vm1896_vm0, %v15973_v36 }
  0x5b   :  { %14623 = vmatmul.mubr.msk.bf16.gmra.mxu1 %vm1896_vm0, %v15916_v9  ;;  %v16010_v9 = vld [vmem:[%s22374_s0 + $0xc0] sm:$0xff]  }
  0x5c   :  { %14626 = vmatprep.mubr.msk.bf16.mxu1 %vm1896_vm0, %v15917_v10  ;;  %v16012_v10 = vld [vmem:[%s22374_s0 + $0xc8] sm:$0xff]  }
  0x60   :  { %14367 = vmatmul.mubr.msk.bf16.gmra.mxu0 %vm1896_vm0, %v15975_v37 }
  0x61   :  { %14370 = vmatprep.mubr.msk.bf16.mxu0 %vm1896_vm0, %v15977_v40 }
  0x63   :  { %14627 = vmatmul.mubr.msk.bf16.gmra.mxu1 %vm1896_vm0, %v15918_v11  ;;  %v15954_v11 = vld [vmem:[%s22374_s0 + $0x568] sm:$0xff]  }
  0x64   :  { %14630 = vmatprep.mubr.msk.bf16.mxu1 %vm1896_vm0, %v15919_v12  ;;  %v15955_v12 = vld [vmem:[%s22374_s0 + $0x570] sm:$0xff]  }
  0x68   :  { %14371 = vmatmul.mubr.msk.bf16.gmra.mxu0 %vm1896_vm0, %v15979_v41 }
  0x69   :  { %14374 = vmatprep.mubr.msk.bf16.mxu0 %vm1896_vm0, %v15981_v44 }
  0x6b   :  { %14631 = vmatmul.mubr.msk.bf16.gmra.mxu1 %vm1896_vm0, %v15920_v13  ;;  %v16014_v13 = vld [vmem:[%s22374_s0 + $0xd0] sm:$0xff]  }
  0x6c   :  { %14634 = vmatprep.mubr.msk.bf16.mxu1 %vm1896_vm0, %v15921_v14  ;;  %v16016_v14 = vld [vmem:[%s22374_s0 + $0xd8] sm:$0xff]  }
  0x70   :  { %14375 = vmatmul.mubr.msk.bf16.gmra.mxu0 %vm1896_vm0, %v15983_v45  ;;  %v15966_v45 = vld [vmem:[%s22374_s0 + $0x5a8] sm:$0xff]  }
  0x71   :  { %14378 = vmatprep.mubr.msk.bf16.mxu0 %vm1896_vm0, %v15985_v48 }
  0x73   :  { %14635 = vmatmul.mubr.msk.bf16.gmra.mxu1 %vm1896_vm0, %v15922_v15  ;;  %v15956_v15 = vld [vmem:[%s22374_s0 + $0x578] sm:$0xff]  }
  0x74   :  { %14638 = vmatprep.mubr.msk.bf16.mxu1 %vm1896_vm0, %v15923_v16  ;;  %v15957_v16 = vld [vmem:[%s22374_s0 + $0x580] sm:$0xff]  }
  0x78   :  { %14379 = vmatmul.mubr.msk.bf16.gmra.mxu0 %vm1896_vm0, %v15987_v49  ;;  %v15968_v49 = vld [vmem:[%s22374_s0 + $0x5b0] sm:$0xff]  }
  0x79   :  { %14382 = vmatprep.mubr.msk.bf16.mxu0 %vm1896_vm0, %v15989_v52  ;;  %v16032_v52 = vld [vmem:[%s22374_s0 + $0x118] sm:$0xff]  }
  0x7b   :  { %14639 = vmatmul.mubr.msk.bf16.gmra.mxu1 %vm1896_vm0, %v15924_v17  ;;  %v16018_v17 = vld [vmem:[%s22374_s0 + $0xe0] sm:$0xff]  }
  0x7c   :  { %14642 = vmatprep.mubr.msk.bf16.mxu1 %vm1896_vm0, %v15925_v18  ;;  %v16020_v18 = vld [vmem:[%s22374_s0 + $0xe8] sm:$0xff]  }
  0x80   :  { %14383 = vmatmul.mubr.msk.bf16.gmra.mxu0 %vm1896_vm0, %v15992_v53 }
  0x81   :  { %14386 = vmatprep.mubr.msk.bf16.mxu0 %vm1896_vm0, %v15994_v57 }
  0x83   :  { %14643 = vmatmul.mubr.msk.bf16.gmra.mxu1 %vm1896_vm0, %v15926_v19  ;;  %v15958_v19 = vld [vmem:[%s22374_s0 + $0x588] sm:$0xff]  }
  0x84   :  { %14646 = vmatprep.mubr.msk.bf16.mxu1 %vm1896_vm0, %v15927_v20  ;;  %v15959_v20 = vld [vmem:[%s22374_s0 + $0x590] sm:$0xff]  }
  0x88   :  { %14387 = vmatmul.mubr.msk.bf16.gmra.mxu0 %vm1896_vm0, %v15996_v58 }
  0x89   :  { %14390 = vmatprep.mubr.msk.bf16.mxu0 %vm1896_vm0, %v15998_v61 }
  0x8b   :  { %14647 = vmatmul.mubr.msk.bf16.gmra.mxu1 %vm1896_vm0, %v15928_v21  ;;  %v16022_v21 = vld [vmem:[%s22374_s0 + $0xf0] sm:$0xff]  }
  0x8c   :  { %14650 = vmatprep.mubr.msk.bf16.mxu1 %vm1896_vm0, %v15929_v22  ;;  %v16682_v22 = vld [vmem:[#allocation4] ss:$0 sm:$0xff] }
  0x90   :  { %14391 = vmatmul.mubr.msk.bf16.gmra.mxu0 %vm1896_vm0, %v16000_v62 }
  0x91   :  { %14394 = vmatprep.mubr.msk.bf16.mxu0 %vm1896_vm0, %v16002_v1 }
  0x93   :  { %14651 = vmatmul.mubr.msk.bf16.gmra.mxu1 %vm1896_vm0, %v15930_v25 }
  0x94   :  { %14654 = vmatprep.mubr.msk.bf16.mxu1 %vm1896_vm0, %v15931_v26 }
  0x98   :  { %14395 = vmatmul.mubr.msk.bf16.gmra.mxu0 %vm1896_vm0, %v16004_v2 }
  0x99   :  { %14398 = vmatprep.mubr.msk.bf16.mxu0 %vm1896_vm0, %v16006_v5 }
  0x9b   :  { %14655 = vmatmul.mubr.msk.bf16.gmra.mxu1 %vm1896_vm0, %v15932_v29 }
  0x9c   :  { %14658 = vmatprep.mubr.msk.bf16.mxu1 %vm1896_vm0, %v15933_v31  ;;  %v15964_v31 = vld [vmem:[%s22374_s0 + $0x5a0] sm:$0xff]  }
  0xa0   :  { %14399 = vmatmul.mubr.msk.bf16.gmra.mxu0 %vm1896_vm0, %v16008_v6  ;;  %v16036_v6 = vld [vmem:[%s22374_s0 + $0x128] sm:$0xff]  }
  0xa1   :  { %14402 = vmatprep.mubr.msk.bf16.mxu0 %vm1896_vm0, %v16010_v9 }
  0xa3   :  { %14659 = vmatmul.mubr.msk.bf16.gmra.mxu1 %vm1896_vm0, %v15934_v34  ;;  %v16028_v34 = vld [vmem:[%s22374_s0 + $0x108] sm:$0xff]  }
  0xa4   :  { %14662 = vmatprep.mubr.msk.bf16.mxu1 %vm1896_vm0, %v15935_v35 }
  0xa8   :  { %14403 = vmatmul.mubr.msk.bf16.gmra.mxu0 %vm1896_vm0, %v16012_v10 }
  0xa9   :  { %14406 = vmatprep.mubr.msk.bf16.mxu0 %vm1896_vm0, %v16014_v13 }
  0xab   :  { %14663 = vmatmul.mubr.msk.bf16.gmra.mxu1 %vm1896_vm0, %v15936_v38 }
  0xac   :  { %14666 = vmatprep.mubr.msk.bf16.mxu1 %vm1896_vm0, %v15937_v39 }
  0xb0   :  { %14407 = vmatmul.mubr.msk.bf16.gmra.mxu0 %vm1896_vm0, %v16016_v14 }
  0xb1   :  { %14410 = vmatprep.mubr.msk.bf16.mxu0 %vm1896_vm0, %v16018_v17 }
  0xb3   :  { %14667 = vmatmul.mubr.msk.bf16.gmra.mxu1 %vm1896_vm0, %v15938_v42 }
  0xb4   :  { %14670 = vmatprep.mubr.msk.bf16.mxu1 %vm1896_vm0, %v15939_v43 }
  0xb8   :  { %14411 = vmatmul.mubr.msk.bf16.gmra.mxu0 %vm1896_vm0, %v16020_v18  ;;  %v15974_v18 = vld [vmem:[%s22374_s0 + $0x5c8] sm:$0xff]  }
  0xb9   :  { %14414 = vmatprep.mubr.msk.bf16.mxu0 %vm1896_vm0, %v16022_v21  ;;  %v15976_v21 = vld [vmem:[%s22374_s0 + $0x5d0] sm:$0xff]  }
  0xbb   :  { %14671 = vmatmul.mubr.msk.bf16.gmra.mxu1 %vm1896_vm0, %v15940_v46 }
  0xbc   :  { %14674 = vmatprep.mubr.msk.bf16.mxu1 %vm1896_vm0, %v15941_v47 }
  0xc0   :  { %14415 = vmatmul.mubr.msk.bf16.gmra.mxu0 %vm1896_vm0, %v16024_v23  ;;  %v16038_v23 = vld [vmem:[%s22374_s0 + $0x130] sm:$0xff]  }
  0xc1   :  { %14418 = vmatprep.mubr.msk.bf16.mxu0 %vm1896_vm0, %v16026_v32 }
  0xc3   :  { %14675 = vmatmul.mubr.msk.bf16.gmra.mxu1 %vm1896_vm0, %v15942_v50  ;;  %v16030_v50 = vld [vmem:[%s22374_s0 + $0x110] sm:$0xff]  }
  0xc4   :  { %14678 = vmatprep.mubr.msk.bf16.mxu1 %vm1896_vm0, %v15943_v51 }
  0xc8   :  { %14419 = vmatmul.mubr.msk.bf16.gmra.mxu0 %vm1896_vm0, %v16028_v34 }
  0xc9   :  { %14422 = vmatprep.mubr.msk.bf16.mxu0 %vm1896_vm0, %v16030_v50 }
  0xcb   :  { %14679 = vmatmul.mubr.msk.bf16.gmra.mxu1 %vm1896_vm0, %v15944_v54 }
  0xcc   :  { %14682 = vmatprep.mubr.msk.bf16.mxu1 %vm1896_vm0, %v15945_v56 }
  0xd0   :  { %14423 = vmatmul.mubr.msk.bf16.gmra.mxu0 %vm1896_vm0, %v16032_v52 }
  0xd3   :  { %14683 = vmatmul.mubr.msk.bf16.gmra.mxu1 %vm1896_vm0, %v15946_v59 }
  0xd4   :  { %14686 = vmatprep.mubr.msk.bf16.mxu1 %vm1896_vm0, %v15947_v60 }
  0xdb   :  { %14687 = vmatmul.mubr.msk.bf16.gmra.mxu1 %vm1896_vm0, %v15948_v63 }
  0xdc   :  { %14690 = vmatprep.mubr.msk.bf16.mxu1 %vm1896_vm0, %v15949_v0  ;;  %v15970_v0 = vld [vmem:[%s22374_s0 + $0x5b8] sm:$0xff]  }
  0xe3   :  { %14691 = vmatmul.mubr.msk.bf16.gmra.mxu1 %vm1896_vm0, %v15950_v3  ;;  %v15972_v3 = vld [vmem:[%s22374_s0 + $0x5c0] sm:$0xff]  }
  0xe4   :  { %14694 = vmatprep.mubr.msk.bf16.mxu1 %vm1896_vm0, %v15951_v4  ;;  %v16034_v4 = vld [vmem:[%s22374_s0 + $0x120] sm:$0xff]  }
  0xe5   :  { %14426 = vmatprep.mubr.msk.bf16.mxu0 %vm1896_vm0, %v16034_v4 }
  0xe6   :  { %14427 = vmatmul.mubr.msk.bf16.gmra.mxu0 %vm1896_vm0, %v16036_v6 }
  0xe7   :  { %14430 = vmatprep.mubr.msk.bf16.mxu0 %vm1896_vm0, %v16038_v23 }
  0xeb   :  { %14695 = vmatmul.mubr.msk.bf16.gmra.mxu1 %vm1896_vm0, %v15952_v7 }
  0xec   :  { %14698 = vmatprep.mubr.msk.bf16.mxu1 %vm1896_vm0, %v15953_v8 }
  0xf3   :  { %14699 = vmatmul.mubr.msk.bf16.gmra.mxu1 %vm1896_vm0, %v15954_v11 }
  0xf4   :  { %14702 = vmatprep.mubr.msk.bf16.mxu1 %vm1896_vm0, %v15955_v12 }
  0xfb   :  { %14703 = vmatmul.mubr.msk.bf16.gmra.mxu1 %vm1896_vm0, %v15956_v15 }
  0xfc   :  { %14706 = vmatprep.mubr.msk.bf16.mxu1 %vm1896_vm0, %v15957_v16 }
 0x103   :  { %v14612_v24 = vpop.f32.mrf.mxu1  ;;  %14707 = vmatmul.mubr.msk.bf16.gmra.mxu1 %vm1896_vm0, %v15958_v19 }
 0x104   :  { %14710 = vmatprep.mubr.msk.bf16.mxu1 %vm1896_vm0, %v15959_v20  ;;  %v3732_v26 = vadd.f32 %v14612_v24, %v16682_v22 }
 0x105   :  { %v3723_v25 = vpop.f32.mrf.mxu1 }
 0x106   :  { %v3724_v29 = vadd.f32 %v16682_v22, %v3723_v25  ;;  %v5004_v35 = vmax.f32 %v3732_v26, 0.0  ;;  %v16040_v25 = vld [vmem:[%s22374_s0 + $0x138] sm:$0xff]  }
 0x107   :  { %v14613_v28 = vpop.f32.mrf.mxu1  ;;  %14431 = vmatmul.mubr.msk.bf16.gmra.mxu0 %vm1896_vm0, %v16040_v25 }
 0x108   :  { %v3735_v30 = vadd.f32 %v14613_v28, %v16682_v22  ;;  %v5002_v39 = vmax.f32 %v3724_v29, 0.0 }
 0x109   :  { %v3726_v33 = vpop.f32.mrf.mxu1 }
 0x10a   :  { %v5005_v36 = vmax.f32 %v3735_v30, 0.0  ;;  %v3727_v37 = vadd.f32 %v16682_v22, %v3726_v33 }
 0x10b   :  { %v14616_v38 = vpop.f32.mrf.mxu1  ;;  %14711 = vmatmul.mubr.msk.bf16.gmra.mxu1 %vm1896_vm0, %v15961_v27 }
 0x10c   :  { %v16710_v40 = vpack.c.bf16 %v5005_v36, %v5004_v35  ;;  %v5003_v41 = vmax.f32 %v3727_v37, 0.0  ;;  %14714 = vmatprep.mubr.msk.bf16.mxu1 %vm1896_vm0, %v15964_v31  ;;  %v3748_v44 = vadd.f32 %v14616_v38, %v16682_v22  ;;  %v15978_v37 = vld [vmem:[%s22374_s0 + $0x5d8] sm:$0xff]  }
 0x10d   :  { %v3739_v42 = vpop.f32.mrf.mxu1 }
 0x10e   :  { %22382 = vst [vmem:[#allocation13_spill] sm:$0xff] %v16710_v40  ;;  %v16713_v43 = vpack.c.bf16 %v5003_v41, %v5002_v39  ;;  %v3740_v47 = vadd.f32 %v16682_v22, %v3739_v42  ;;  %v5008_v53 = vmax.f32 %v3748_v44, 0.0  ;;  %v15980_v41 = vld [vmem:[%s22374_s0 + $0x5e0] sm:$0xff]  }
 0x10f   :  { %v14617_v46 = vpop.f32.mrf.mxu1  ;;  %v16042_v42 = vld [vmem:[%s22374_s0 + $0x140] sm:$0xff]  }
 0x110   :  { %22383 = vst [vmem:[#allocation14_spill] sm:$0xff] %v16713_v43  ;;  %v3751_v48 = vadd.f32 %v14617_v46, %v16682_v22  ;;  %v5006_v57 = vmax.f32 %v3740_v47, 0.0  ;;  %14434 = vmatprep.mubr.msk.bf16.mxu0 %vm1896_vm0, %v16042_v42 }
 0x111   :  { %v3742_v51 = vpop.f32.mrf.mxu1 }
 0x112   :  { %v5009_v54 = vmax.f32 %v3751_v48, 0.0  ;;  %v3743_v55 = vadd.f32 %v16682_v22, %v3742_v51 }
 0x113   :  { %v14620_v56 = vpop.f32.mrf.mxu1  ;;  %14715 = vmatmul.mubr.msk.bf16.gmra.mxu1 %vm1896_vm0, %v15966_v45  ;;  %v16044_v45 = vld [vmem:[%s22374_s0 + $0x148] sm:$0xff]  }
 0x114   :  { %v16734_v58 = vpack.c.bf16 %v5009_v54, %v5008_v53  ;;  %v5007_v59 = vmax.f32 %v3743_v55, 0.0  ;;  %14718 = vmatprep.mubr.msk.bf16.mxu1 %vm1896_vm0, %v15968_v49  ;;  %v3764_v62 = vadd.f32 %v14620_v56, %v16682_v22  ;;  %14435 = vmatmul.mubr.msk.bf16.gmra.mxu0 %vm1896_vm0, %v16044_v45 }
 0x115   :  { %v3755_v60 = vpop.f32.mrf.mxu1 }
 0x116   :  { %22384 = vst [vmem:[#allocation15_spill] sm:$0xff] %v16734_v58  ;;  %v16737_v61 = vpack.c.bf16 %v5007_v59, %v5006_v57  ;;  %v3756_v1 = vadd.f32 %v16682_v22, %v3755_v60  ;;  %v5012_v7 = vmax.f32 %v3764_v62, 0.0  ;;  %v15982_v57 = vld [vmem:[%s22374_s0 + $0x5e8] sm:$0xff]   ;;  %v15984_v62 = vld [vmem:[%s22374_s0 + $0x5f0] sm:$0xff]  }
 0x117   :  { %v14621_v63 = vpop.f32.mrf.mxu1 }
 0x118   :  { %22385 = vst [vmem:[#allocation16_spill] sm:$0xff] %v16737_v61  ;;  %v3767_v2 = vadd.f32 %v14621_v63, %v16682_v22  ;;  %v5010_v11 = vmax.f32 %v3756_v1, 0.0  ;;  %v16046_v63 = vld [vmem:[%s22374_s0 + $0x150] sm:$0xff]   ;;  %v16048_v1 = vld [vmem:[%s22374_s0 + $0x158] sm:$0xff]  }
 0x119   :  { %v3758_v5 = vpop.f32.mrf.mxu1  ;;  %14438 = vmatprep.mubr.msk.bf16.mxu0 %vm1896_vm0, %v16046_v63  ;;  %v15997_v63 = vld [vmem:[%s22374_s0 + $0x620] sm:$0xff]  }
 0x11a   :  { %v5013_v8 = vmax.f32 %v3767_v2, 0.0  ;;  %v3759_v9 = vadd.f32 %v16682_v22, %v3758_v5 }
 0x11b   :  { %v14624_v10 = vpop.f32.mrf.mxu1  ;;  %14719 = vmatmul.mubr.msk.bf16.gmra.mxu1 %vm1896_vm0, %v15970_v0 }
 0x11c   :  { %v16758_v12 = vpack.c.bf16 %v5013_v8, %v5012_v7  ;;  %v5011_v13 = vmax.f32 %v3759_v9, 0.0  ;;  %14722 = vmatprep.mubr.msk.bf16.mxu1 %vm1896_vm0, %v15972_v3  ;;  %v3780_v16 = vadd.f32 %v14624_v10, %v16682_v22  ;;  %14439 = vmatmul.mubr.msk.bf16.gmra.mxu0 %vm1896_vm0, %v16048_v1 }
 0x11d   :  { %v3771_v14 = vpop.f32.mrf.mxu1 }
 0x11e   :  { %22386 = vst [vmem:[#allocation17_spill] sm:$0xff] %v16758_v12  ;;  %v16761_v15 = vpack.c.bf16 %v5011_v13, %v5010_v11  ;;  %v3772_v19 = vadd.f32 %v16682_v22, %v3771_v14  ;;  %v5016_v26 = vmax.f32 %v3780_v16, 0.0  ;;  %v15986_v14 = vld [vmem:[%s22374_s0 + $0x5f8] sm:$0xff]  }
 0x11f   :  { %v14625_v17 = vpop.f32.mrf.mxu1 }
 0x120   :  { %22387 = vst [vmem:[#allocation18_spill] sm:$0xff] %v16761_v15  ;;  %v3783_v20 = vadd.f32 %v14625_v17, %v16682_v22  ;;  %v5014_v30 = vmax.f32 %v3772_v19, 0.0  ;;  %v16050_v19 = vld [vmem:[%s22374_s0 + $0x160] sm:$0xff]  }
 0x121   :  { %v3774_v24 = vpop.f32.mrf.mxu1  ;;  %14442 = vmatprep.mubr.msk.bf16.mxu0 %vm1896_vm0, %v16050_v19 }
 0x122   :  { %v5017_v27 = vmax.f32 %v3783_v20, 0.0  ;;  %v3775_v28 = vadd.f32 %v16682_v22, %v3774_v24 }
 0x123   :  { %v14628_v29 = vpop.f32.mrf.mxu1  ;;  %14723 = vmatmul.mubr.msk.bf16.gmra.mxu1 %vm1896_vm0, %v15974_v18  ;;  %v15988_v18 = vld [vmem:[%s22374_s0 + $0x600] sm:$0xff]  }
 0x124   :  { %v16782_v31 = vpack.c.bf16 %v5017_v27, %v5016_v26  ;;  %v5015_v32 = vmax.f32 %v3775_v28, 0.0  ;;  %14726 = vmatprep.mubr.msk.bf16.mxu1 %vm1896_vm0, %v15976_v21  ;;  %v3796_v35 = vadd.f32 %v14628_v29, %v16682_v22  ;;  %v16052_v21 = vld [vmem:[%s22374_s0 + $0x168] sm:$0xff]  }
 0x125   :  { %v3787_v33 = vpop.f32.mrf.mxu1  ;;  %14443 = vmatmul.mubr.msk.bf16.gmra.mxu0 %vm1896_vm0, %v16052_v21  ;;  %v15999_v21 = vld [vmem:[%s22374_s0 + $0x628] sm:$0xff]  }
 0x126   :  { %22388 = vst [vmem:[#allocation19_spill] sm:$0xff] %v16782_v31  ;;  %v16785_v34 = vpack.c.bf16 %v5015_v32, %v5014_v30  ;;  %v3788_v38 = vadd.f32 %v16682_v22, %v3787_v33  ;;  %v5020_v46 = vmax.f32 %v3796_v35, 0.0 }
 0x127   :  { %v14629_v36 = vpop.f32.mrf.mxu1 }
 0x128   :  { %22389 = vst [vmem:[#allocation20_spill] sm:$0xff] %v16785_v34  ;;  %v3799_v39 = vadd.f32 %v14629_v36, %v16682_v22  ;;  %v5018_v50 = vmax.f32 %v3788_v38, 0.0  ;;  %v15990_v36 = vld [vmem:[%s22374_s0 + $0x608] sm:$0xff]  }
 0x129   :  { %v3790_v44 = vpop.f32.mrf.mxu1 }
 0x12a   :  { %v5021_v47 = vmax.f32 %v3799_v39, 0.0  ;;  %v3791_v48 = vadd.f32 %v16682_v22, %v3790_v44  ;;  %v15993_v39 = vld [vmem:[%s22374_s0 + $0x610] sm:$0xff]   ;;  %v16056_v44 = vld [vmem:[%s22374_s0 + $0x178] sm:$0xff]  }
 0x12b   :  { %v14632_v49 = vpop.f32.mrf.mxu1  ;;  %14727 = vmatmul.mubr.msk.bf16.gmra.mxu1 %vm1896_vm0, %v15978_v37 }
 0x12c   :  { %v16806_v51 = vpack.c.bf16 %v5021_v47, %v5020_v46  ;;  %v5019_v52 = vmax.f32 %v3791_v48, 0.0  ;;  %14730 = vmatprep.mubr.msk.bf16.mxu1 %vm1896_vm0, %v15980_v41  ;;  %v3812_v55 = vadd.f32 %v14632_v49, %v16682_v22  ;;  %v16054_v41 = vld [vmem:[%s22374_s0 + $0x170] sm:$0xff]  }
 0x12d   :  { %v3803_v53 = vpop.f32.mrf.mxu1  ;;  %14446 = vmatprep.mubr.msk.bf16.mxu0 %vm1896_vm0, %v16054_v41 }
 0x12e   :  { %22390 = vst [vmem:[#allocation21_spill] sm:$0xff] %v16806_v51  ;;  %v16809_v54 = vpack.c.bf16 %v5019_v52, %v5018_v50  ;;  %v3804_v59 = vadd.f32 %v16682_v22, %v3803_v53  ;;  %v5024_v2 = vmax.f32 %v3812_v55, 0.0  ;;  %14447 = vmatmul.mubr.msk.bf16.gmra.mxu0 %vm1896_vm0, %v16056_v44 }
 0x12f   :  { %v14633_v56 = vpop.f32.mrf.mxu1 }
 0x130   :  { %22391 = vst [vmem:[#allocation22_spill] sm:$0xff] %v16809_v54  ;;  %v3815_v60 = vadd.f32 %v14633_v56, %v16682_v22  ;;  %v5022_v6 = vmax.f32 %v3804_v59, 0.0  ;;  %v15995_v59 = vld [vmem:[%s22374_s0 + $0x618] sm:$0xff]  }
 0x131   :  { %v3806_v0 = vpop.f32.mrf.mxu1 }
 0x132   :  { %v5025_v3 = vmax.f32 %v3815_v60, 0.0  ;;  %v3807_v4 = vadd.f32 %v16682_v22, %v3806_v0  ;;  %v16058_v0 = vld [vmem:[%s22374_s0 + $0x180] sm:$0xff]  }
 0x133   :  { %v14636_v5 = vpop.f32.mrf.mxu1  ;;  %14731 = vmatmul.mubr.msk.bf16.gmra.mxu1 %vm1896_vm0, %v15982_v57  ;;  %14450 = vmatprep.mubr.msk.bf16.mxu0 %vm1896_vm0, %v16058_v0  ;;  %v16003_v0 = vld [vmem:[%s22374_s0 + $0x638] sm:$0xff]  }
 0x134   :  { %v16830_v7 = vpack.c.bf16 %v5025_v3, %v5024_v2  ;;  %v5023_v8 = vmax.f32 %v3807_v4, 0.0  ;;  %14734 = vmatprep.mubr.msk.bf16.mxu1 %vm1896_vm0, %v15984_v62  ;;  %v3828_v11 = vadd.f32 %v14636_v5, %v16682_v22  ;;  %v16060_v2 = vld [vmem:[%s22374_s0 + $0x188] sm:$0xff]  }
 0x135   :  { %v3819_v9 = vpop.f32.mrf.mxu1 }
 0x136   :  { %22392 = vst [vmem:[#allocation23_spill] sm:$0xff] %v16830_v7  ;;  %v16833_v10 = vpack.c.bf16 %v5023_v8, %v5022_v6  ;;  %v3820_v16 = vadd.f32 %v16682_v22, %v3819_v9  ;;  %v5028_v23 = vmax.f32 %v3828_v11, 0.0  ;;  %v14356_v8 = vpop.f32.mrf.mxu0  ;;  %14451 = vmatmul.mubr.msk.bf16.gmra.mxu0 %vm1896_vm0, %v16060_v2 }
 0x137   :  { %v14637_v13 = vpop.f32.mrf.mxu1  ;;  %v2708_v19 = vadd.f32 %v14356_v8, %v16682_v22 }
 0x138   :  { %22393 = vst [vmem:[#allocation24_spill] sm:$0xff] %v16833_v10  ;;  %v3831_v17 = vadd.f32 %v14637_v13, %v16682_v22  ;;  %v5026_v27 = vmax.f32 %v3820_v16, 0.0 }
 0x139   :  { %v3822_v20 = vpop.f32.mrf.mxu1 }
 0x13a   :  { %v5029_v24 = vmax.f32 %v3831_v17, 0.0  ;;  %v3823_v25 = vadd.f32 %v16682_v22, %v3822_v20  ;;  %v2699_v17 = vpop.f32.mrf.mxu0 }
 0x13b   :  { %v14640_v26 = vpop.f32.mrf.mxu1  ;;  %14735 = vmatmul.mubr.msk.bf16.gmra.mxu1 %vm1896_vm0, %v15986_v14 }
 0x13c   :  { %v16854_v28 = vpack.c.bf16 %v5029_v24, %v5028_v23  ;;  %v5027_v29 = vmax.f32 %v3823_v25, 0.0  ;;  %14738 = vmatprep.mubr.msk.bf16.mxu1 %vm1896_vm0, %v15988_v18  ;;  %v3844_v33 = vadd.f32 %v14640_v26, %v16682_v22  ;;  %v14357_v23 = vpop.f32.mrf.mxu0  ;;  %v16001_v26 = vld [vmem:[%s22374_s0 + $0x630] sm:$0xff]  }
 0x13d   :  { %v3835_v30 = vpop.f32.mrf.mxu1  ;;  %v2711_v41 = vadd.f32 %v14357_v23, %v16682_v22 }
 0x13e   :  { %22394 = vst [vmem:[#allocation25_spill] sm:$0xff] %v16854_v28  ;;  %v16857_v32 = vpack.c.bf16 %v5027_v29, %v5026_v27  ;;  %v3836_v37 = vadd.f32 %v16682_v22, %v3835_v30  ;;  %v5032_v45 = vmax.f32 %v3844_v33, 0.0  ;;  %v2700_v27 = vadd.f32 %v16682_v22, %v2699_v17  ;;  %v16062_v29 = vld [vmem:[%s22374_s0 + $0x190] sm:$0xff]   ;;  %v16068_v17 = vld [vmem:[%s22374_s0 + $0x1a8] sm:$0xff]  }
 0x13f   :  { %v14641_v35 = vpop.f32.mrf.mxu1  ;;  %14454 = vmatprep.mubr.msk.bf16.mxu0 %vm1896_vm0, %v16062_v29 }
 0x140   :  { %22395 = vst [vmem:[#allocation26_spill] sm:$0xff] %v16857_v32  ;;  %v3847_v38 = vadd.f32 %v14641_v35, %v16682_v22  ;;  %v5030_v49 = vmax.f32 %v3836_v37, 0.0  ;;  %v2702_v35 = vpop.f32.mrf.mxu0  ;;  %v4746_v44 = vmax.f32 %v2700_v27, 0.0 }
 0x141   :  { %v3838_v42 = vpop.f32.mrf.mxu1 }
 0x142   :  { %v5033_v46 = vmax.f32 %v3847_v38, 0.0  ;;  %v3839_v47 = vadd.f32 %v16682_v22, %v3838_v42 }
 0x143   :  { %v14644_v48 = vpop.f32.mrf.mxu1  ;;  %14739 = vmatmul.mubr.msk.bf16.gmra.mxu1 %vm1896_vm0, %v15990_v36  ;;  %v16064_v36 = vld [vmem:[%s22374_s0 + $0x198] sm:$0xff]  }
 0x144   :  { %v16878_v50 = vpack.c.bf16 %v5033_v46, %v5032_v45  ;;  %v5031_v52 = vmax.f32 %v3839_v47, 0.0  ;;  %14742 = vmatprep.mubr.msk.bf16.mxu1 %vm1896_vm0, %v15993_v39  ;;  %v3860_v56 = vadd.f32 %v14644_v48, %v16682_v22  ;;  %v4748_v39 = vmax.f32 %v2708_v19, 0.0  ;;  %v14360_v46 = vpop.f32.mrf.mxu0  ;;  %14455 = vmatmul.mubr.msk.bf16.gmra.mxu0 %vm1896_vm0, %v16064_v36 }
 0x145   :  { %v3851_v53 = vpop.f32.mrf.mxu1  ;;  %v2703_v45 = vadd.f32 %v16682_v22, %v2702_v35  ;;  %v2724_v2 = vadd.f32 %v14360_v46, %v16682_v22 }
 0x146   :  { %22396 = vst [vmem:[#allocation27_spill] sm:$0xff] %v16878_v50  ;;  %v16881_v55 = vpack.c.bf16 %v5031_v52, %v5030_v49  ;;  %v3852_v60 = vadd.f32 %v16682_v22, %v3851_v53  ;;  %v5036_v3 = vmax.f32 %v3860_v56, 0.0  ;;  %v4749_v52 = vmax.f32 %v2711_v41, 0.0 }
 0x147   :  { %v14645_v57 = vpop.f32.mrf.mxu1 }
 0x148   :  { %22397 = vst [vmem:[#allocation28_spill] sm:$0xff] %v16881_v55  ;;  %v3863_v62 = vadd.f32 %v14645_v57, %v16682_v22  ;;  %v5034_v9 = vmax.f32 %v3852_v60, 0.0  ;;  %v4747_v57 = vmax.f32 %v2703_v45, 0.0  ;;  %v16007_v45 = vld [vmem:[%s22374_s0 + $0x648] sm:$0xff]  }
 0x149   :  { %v3854_v1 = vpop.f32.mrf.mxu1 }
 0x14a   :  { %v5037_v4 = vmax.f32 %v3863_v62, 0.0  ;;  %v3855_v5 = vadd.f32 %v16682_v22, %v3854_v1  ;;  %v16936_v62 = vpack.c.bf16 %v4749_v52, %v4748_v39  ;;  %v16941_v1 = vpack.c.bf16 %v4747_v57, %v4746_v44 }
 0x14b   :  { %v14648_v6 = vpop.f32.mrf.mxu1  ;;  %14743 = vmatmul.mubr.msk.bf16.gmra.mxu1 %vm1896_vm0, %v15995_v59  ;;  %v2715_v59 = vpop.f32.mrf.mxu0 }
 0x14c   :  { %v16902_v11 = vpack.c.bf16 %v5037_v4, %v5036_v3  ;;  %v5035_v13 = vmax.f32 %v3855_v5, 0.0  ;;  %14746 = vmatprep.mubr.msk.bf16.mxu1 %vm1896_vm0, %v15997_v63  ;;  %v3876_v14 = vadd.f32 %v14648_v6, %v16682_v22  ;;  %v16005_v6 = vld [vmem:[%s22374_s0 + $0x640] sm:$0xff]   ;;  %v2716_v8 = vadd.f32 %v16682_v22, %v2715_v59  ;;  %v16070_v59 = vld [vmem:[%s22374_s0 + $0x1b0] sm:$0xff]  }
 0x14d   :  { %v3867_v16 = vpop.f32.mrf.mxu1  ;;  %v14361_v3 = vpop.f32.mrf.mxu0 }
 0x14e   :  { %22398 = vst [vmem:[#allocation29_spill] sm:$0xff] %v16902_v11  ;;  %v16906_v18 = vpack.c.bf16 %v5035_v13, %v5034_v9  ;;  %v3868_v24 = vadd.f32 %v16682_v22, %v3867_v16  ;;  %v5040_v30 = vmax.f32 %v3876_v14, 0.0  ;;  %v16066_v9 = vld [vmem:[%s22374_s0 + $0x1a0] sm:$0xff]   ;;  %v2727_v23 = vadd.f32 %v14361_v3, %v16682_v22  ;;  %v16072_v3 = vld [vmem:[%s22374_s0 + $0x1b8] sm:$0xff]  }
 0x14f   :  { %v14649_v20 = vpop.f32.mrf.mxu1  ;;  %v2718_v16 = vpop.f32.mrf.mxu0  ;;  %14458 = vmatprep.mubr.msk.bf16.mxu0 %vm1896_vm0, %v16066_v9 }
 0x150   :  { %22399 = vst [vmem:[#allocation30_spill] sm:$0xff] %v16906_v18  ;;  %v3879_v25 = vadd.f32 %v14649_v20, %v16682_v22  ;;  %v5038_v47 = vmax.f32 %v3868_v24, 0.0  ;;  %14459 = vmatmul.mubr.msk.bf16.gmra.mxu0 %vm1896_vm0, %v16068_v17  ;;  %v4753_v35 = vmax.f32 %v2727_v23, 0.0 }
 0x151   :  { %v3870_v33 = vpop.f32.mrf.mxu1  ;;  %v14364_v27 = vpop.f32.mrf.mxu0  ;;  %14462 = vmatprep.mubr.msk.bf16.mxu0 %vm1896_vm0, %v16070_v59 }
 0x152   :  { %v5041_v37 = vmax.f32 %v3879_v25, 0.0  ;;  %v3871_v38 = vadd.f32 %v16682_v22, %v3870_v33  ;;  %v4750_v25 = vmax.f32 %v2716_v8, 0.0 }
 0x153   :  { %v14652_v42 = vpop.f32.mrf.mxu1  ;;  %14747 = vmatmul.mubr.msk.bf16.gmra.mxu1 %vm1896_vm0, %v15999_v21  ;;  %v4752_v21 = vmax.f32 %v2724_v2, 0.0  ;;  %v2731_v39 = vpop.f32.mrf.mxu0 }
 0x154   :  { %v16930_v48 = vpack.c.bf16 %v5041_v37, %v5040_v30  ;;  %v5039_v49 = vmax.f32 %v3871_v38, 0.0  ;;  %14750 = vmatprep.mubr.msk.bf16.mxu1 %vm1896_vm0, %v16001_v26  ;;  %v3892_v53 = vadd.f32 %v14652_v42, %v16682_v22  ;;  %v2719_v26 = vadd.f32 %v16682_v22, %v2718_v16 }
 0x155   :  { %v3883_v56 = vpop.f32.mrf.mxu1  ;;  %v16968_v42 = vpack.c.bf16 %v4753_v35, %v4752_v21  ;;  %v2732_v57 = vadd.f32 %v16682_v22, %v2731_v39  ;;  %v16011_v35 = vld [vmem:[%s22374_s0 + $0x658] sm:$0xff]  }
 0x156   :  { %22400 = vst [vmem:[#allocation31_spill] sm:$0xff] %v16930_v48  ;;  %v16934_v60 = vpack.c.bf16 %v5039_v49, %v5038_v47  ;;  %v3884_v4 = vadd.f32 %v16682_v22, %v3883_v56  ;;  %v5044_v13 = vmax.f32 %v3892_v53, 0.0  ;;  %v4751_v38 = vmax.f32 %v2719_v26, 0.0  ;;  %v14365_v49 = vpop.f32.mrf.mxu0  ;;  %v16009_v56 = vld [vmem:[%s22374_s0 + $0x650] sm:$0xff]  }
 0x157   :  { %v14653_v63 = vpop.f32.mrf.mxu1  ;;  %v2740_v47 = vadd.f32 %v14364_v27, %v16682_v22  ;;  %v2743_v8 = vadd.f32 %v14365_v49, %v16682_v22  ;;  %v16074_v49 = vld [vmem:[%s22374_s0 + $0x1c0] sm:$0xff]  }
 0x158   :  { %22401 = vst [vmem:[#allocation32_spill] sm:$0xff] %v16934_v60  ;;  %v3895_v5 = vadd.f32 %v14653_v63, %v16682_v22  ;;  %v5042_v29 = vmax.f32 %v3884_v4, 0.0  ;;  %v16973_v46 = vpack.c.bf16 %v4751_v38, %v4750_v25  ;;  %v2734_v2 = vpop.f32.mrf.mxu0  ;;  %14463 = vmatmul.mubr.msk.bf16.gmra.mxu0 %vm1896_vm0, %v16072_v3 }
 0x159   :  { %v3886_v14 = vpop.f32.mrf.mxu1  ;;  %v4757_v21 = vmax.f32 %v2743_v8, 0.0  ;;  %14466 = vmatprep.mubr.msk.bf16.mxu0 %vm1896_vm0, %v16074_v49 }
 0x15a   :  { %v5045_v19 = vmax.f32 %v3895_v5, 0.0  ;;  %v3887_v20 = vadd.f32 %v16682_v22, %v3886_v14  ;;  %v2735_v14 = vadd.f32 %v16682_v22, %v2734_v2  ;;  %v14368_v16 = vpop.f32.mrf.mxu0 }
 0x15b   :  { %v14656_v24 = vpop.f32.mrf.mxu1  ;;  %14751 = vmatmul.mubr.msk.bf16.gmra.mxu1 %vm1896_vm0, %v16003_v0 }
 0x15c   :  { %v16962_v30 = vpack.c.bf16 %v5045_v19, %v5044_v13  ;;  %v5043_v33 = vmax.f32 %v3887_v20, 0.0  ;;  %14754 = vmatprep.mubr.msk.bf16.mxu1 %vm1896_vm0, %v16005_v6  ;;  %v3908_v36 = vadd.f32 %v14656_v24, %v16682_v22  ;;  %v4756_v6 = vmax.f32 %v2740_v47, 0.0  ;;  %v2747_v26 = vpop.f32.mrf.mxu0 }
 0x15d   :  { %v3899_v37 = vpop.f32.mrf.mxu1  ;;  %v4754_v13 = vmax.f32 %v2732_v57, 0.0  ;;  %v4755_v25 = vmax.f32 %v2735_v14, 0.0  ;;  %v2748_v47 = vadd.f32 %v16682_v22, %v2747_v26  ;;  %v16076_v57 = vld [vmem:[%s22374_s0 + $0x1c8] sm:$0xff]  }
 0x15e   :  { %22402 = vst [vmem:[#allocation33_spill] sm:$0xff] %v16962_v30  ;;  %v16966_v41 = vpack.c.bf16 %v5043_v33, %v5042_v29  ;;  %v3900_v52 = vadd.f32 %v16682_v22, %v3899_v37  ;;  %v5048_v63 = vmax.f32 %v3908_v36, 0.0  ;;  %v17000_v29 = vpack.c.bf16 %v4757_v21, %v4756_v6  ;;  %v14369_v38 = vpop.f32.mrf.mxu0  ;;  %v16015_v26 = vld [vmem:[%s22374_s0 + $0x668] sm:$0xff]  }
 0x15f   :  { %v14657_v44 = vpop.f32.mrf.mxu1  ;;  %v17005_v36 = vpack.c.bf16 %v4755_v25, %v4754_v13  ;;  %v2756_v37 = vadd.f32 %v14368_v16, %v16682_v22  ;;  %v2759_v2 = vadd.f32 %v14369_v38, %v16682_v22 }
 0x160   :  { %22403 = vst [vmem:[#allocation34_spill] sm:$0xff] %v16966_v41  ;;  %v3911_v53 = vadd.f32 %v14657_v44, %v16682_v22  ;;  %v5046_v17 = vmax.f32 %v3900_v52, 0.0  ;;  %14467 = vmatmul.mubr.msk.bf16.gmra.mxu0 %vm1896_vm0, %v16076_v57 }
 0x161   :  { %v3902_v0 = vpop.f32.mrf.mxu1  ;;  %v4761_v14 = vmax.f32 %v2759_v2, 0.0 }
 0x162   :  { %v5049_v4 = vmax.f32 %v3911_v53, 0.0  ;;  %v3903_v5 = vadd.f32 %v16682_v22, %v3902_v0  ;;  %v4760_v0 = vmax.f32 %v2756_v37, 0.0 }
 0x163   :  { %v14660_v9 = vpop.f32.mrf.mxu1  ;;  %14755 = vmatmul.mubr.msk.bf16.gmra.mxu1 %vm1896_vm0, %v16007_v45  ;;  %v16013_v45 = vld [vmem:[%s22374_s0 + $0x660] sm:$0xff]  }
 0x164   :  { %v16994_v19 = vpack.c.bf16 %v5049_v4, %v5048_v63  ;;  %v5047_v20 = vmax.f32 %v3903_v5, 0.0  ;;  %14758 = vmatprep.mubr.msk.bf16.mxu1 %vm1896_vm0, %v16009_v56  ;;  %v3924_v23 = vadd.f32 %v14660_v9, %v16682_v22  ;;  %v2750_v56 = vpop.f32.mrf.mxu0  ;;  %v4758_v4 = vmax.f32 %v2748_v47, 0.0  ;;  %v16078_v47 = vld [vmem:[%s22374_s0 + $0x1d0] sm:$0xff]  }
 0x165   :  { %v3915_v24 = vpop.f32.mrf.mxu1  ;;  %v2751_v5 = vadd.f32 %v16682_v22, %v2750_v56  ;;  %v16080_v56 = vld [vmem:[%s22374_s0 + $0x1d8] sm:$0xff]   ;;  %14470 = vmatprep.mubr.msk.bf16.mxu0 %vm1896_vm0, %v16078_v47 }
 0x166   :  { %22404 = vst [vmem:[#allocation35_spill] sm:$0xff] %v16994_v19  ;;  %v16998_v27 = vpack.c.bf16 %v5047_v20, %v5046_v17  ;;  %v3916_v39 = vadd.f32 %v16682_v22, %v3915_v24  ;;  %v5052_v52 = vmax.f32 %v3924_v23, 0.0  ;;  %v14372_v6 = vpop.f32.mrf.mxu0  ;;  %v17032_v24 = vpack.c.bf16 %v4761_v14, %v4760_v0 }
 0x167   :  { %v14661_v33 = vpop.f32.mrf.mxu1  ;;  %v4759_v20 = vmax.f32 %v2751_v5, 0.0 }
 0x168   :  { %22405 = vst [vmem:[#allocation36_spill] sm:$0xff] %v16998_v27  ;;  %v3927_v44 = vadd.f32 %v14661_v33, %v16682_v22  ;;  %v5050_v8 = vmax.f32 %v3916_v39, 0.0  ;;  %v2763_v21 = vpop.f32.mrf.mxu0  ;;  %14471 = vmatmul.mubr.msk.bf16.gmra.mxu0 %vm1896_vm0, %v16080_v56 }
 0x169   :  { %v3918_v53 = vpop.f32.mrf.mxu1  ;;  %v17037_v33 = vpack.c.bf16 %v4759_v20, %v4758_v4 }
 0x16a   :  { %v5053_v59 = vmax.f32 %v3927_v44, 0.0  ;;  %v3919_v63 = vadd.f32 %v16682_v22, %v3918_v53  ;;  %v14373_v37 = vpop.f32.mrf.mxu0  ;;  %v16017_v44 = vld [vmem:[%s22374_s0 + $0x670] sm:$0xff]  }
 0x16b   :  { %v14664_v3 = vpop.f32.mrf.mxu1  ;;  %14759 = vmatmul.mubr.msk.bf16.gmra.mxu1 %vm1896_vm0, %v16011_v35  ;;  %v2772_v35 = vadd.f32 %v14372_v6, %v16682_v22  ;;  %v2775_v0 = vadd.f32 %v14373_v37, %v16682_v22  ;;  %v16019_v37 = vld [vmem:[%s22374_s0 + $0x678] sm:$0xff]  }
 0x16c   :  { %v17026_v9 = vpack.c.bf16 %v5053_v59, %v5052_v52  ;;  %v5051_v13 = vmax.f32 %v3919_v63, 0.0  ;;  %14762 = vmatprep.mubr.msk.bf16.mxu1 %vm1896_vm0, %v16013_v45  ;;  %v3940_v16 = vadd.f32 %v14664_v3, %v16682_v22  ;;  %v2764_v45 = vadd.f32 %v16682_v22, %v2763_v21  ;;  %v2766_v53 = vpop.f32.mrf.mxu0 }
 0x16d   :  { %v3931_v17 = vpop.f32.mrf.mxu1  ;;  %v4764_v63 = vmax.f32 %v2772_v35, 0.0  ;;  %v2767_v4 = vadd.f32 %v16682_v22, %v2766_v53  ;;  %v4765_v14 = vmax.f32 %v2775_v0, 0.0  ;;  %v16082_v53 = vld [vmem:[%s22374_s0 + $0x1e0] sm:$0xff]  }
 0x16e   :  { %22406 = vst [vmem:[#allocation37_spill] sm:$0xff] %v17026_v9  ;;  %v17030_v23 = vpack.c.bf16 %v5051_v13, %v5050_v8  ;;  %v3932_v38 = vadd.f32 %v16682_v22, %v3931_v17  ;;  %v5056_v49 = vmax.f32 %v3940_v16, 0.0  ;;  %v4762_v3 = vmax.f32 %v2764_v45, 0.0  ;;  %v14376_v5 = vpop.f32.mrf.mxu0  ;;  %14474 = vmatprep.mubr.msk.bf16.mxu0 %vm1896_vm0, %v16082_v53 }
 0x16f   :  { %v14665_v25 = vpop.f32.mrf.mxu1  ;;  %v4763_v20 = vmax.f32 %v2767_v4, 0.0 }
 0x170   :  { %22407 = vst [vmem:[#allocation38_spill] sm:$0xff] %v17030_v23  ;;  %v3943_v39 = vadd.f32 %v14665_v25, %v16682_v22  ;;  %v5054_v6 = vmax.f32 %v3932_v38, 0.0  ;;  %v2779_v21 = vpop.f32.mrf.mxu0 }
 0x171   :  { %v3934_v52 = vpop.f32.mrf.mxu1  ;;  %v17069_v38 = vpack.c.bf16 %v4763_v20, %v4762_v3 }
 0x172   :  { %v5057_v57 = vmax.f32 %v3943_v39, 0.0  ;;  %v3935_v59 = vadd.f32 %v16682_v22, %v3934_v52  ;;  %v2788_v39 = vadd.f32 %v14376_v5, %v16682_v22  ;;  %v2780_v52 = vadd.f32 %v16682_v22, %v2779_v21 }
 0x173   :  { %v14668_v2 = vpop.f32.mrf.mxu1  ;;  %14763 = vmatmul.mubr.msk.bf16.gmra.mxu1 %vm1896_vm0, %v16015_v26  ;;  %v17064_v26 = vpack.c.bf16 %v4765_v14, %v4764_v63  ;;  %v16084_v63 = vld [vmem:[%s22374_s0 + $0x1e8] sm:$0xff]  }
 0x174   :  { %v17058_v8 = vpack.c.bf16 %v5057_v57, %v5056_v49  ;;  %v5055_v13 = vmax.f32 %v3935_v59, 0.0  ;;  %14766 = vmatprep.mubr.msk.bf16.mxu1 %vm1896_vm0, %v16017_v44  ;;  %v3956_v16 = vadd.f32 %v14668_v2, %v16682_v22  ;;  %v14377_v44 = vpop.f32.mrf.mxu0  ;;  %v16021_v49 = vld [vmem:[%s22374_s0 + $0x680] sm:$0xff]   ;;  %v4768_v3 = vmax.f32 %v2788_v39, 0.0  ;;  %14475 = vmatmul.mubr.msk.bf16.gmra.mxu0 %vm1896_vm0, %v16084_v63 }
 0x175   :  { %v3947_v17 = vpop.f32.mrf.mxu1  ;;  %v2791_v4 = vadd.f32 %v14377_v44, %v16682_v22 }
 0x176   :  { %22408 = vst [vmem:[#allocation39_spill] sm:$0xff] %v17058_v8  ;;  %v17062_v25 = vpack.c.bf16 %v5055_v13, %v5054_v6  ;;  %v3948_v45 = vadd.f32 %v16682_v22, %v3947_v17  ;;  %v5060_v56 = vmax.f32 %v3956_v16, 0.0  ;;  %v2782_v59 = vpop.f32.mrf.mxu0  ;;  %v4766_v6 = vmax.f32 %v2780_v52, 0.0 }
 0x177   :  { %v14669_v35 = vpop.f32.mrf.mxu1  ;;  %v2783_v13 = vadd.f32 %v16682_v22, %v2782_v59  ;;  %v4769_v21 = vmax.f32 %v2791_v4, 0.0 }
 0x178   :  { %22409 = vst [vmem:[#allocation40_spill] sm:$0xff] %v17062_v25  ;;  %v3959_v47 = vadd.f32 %v14669_v35, %v16682_v22  ;;  %v14380_v14 = vpop.f32.mrf.mxu0  ;;  %v5058_v16 = vmax.f32 %v3948_v45, 0.0  ;;  %v16023_v45 = vld [vmem:[%s22374_s0 + $0x688] sm:$0xff]  }
 0x179   :  { %v3950_v57 = vpop.f32.mrf.mxu1  ;;  %v4767_v44 = vmax.f32 %v2783_v13, 0.0  ;;  %v16088_v13 = vld [vmem:[%s22374_s0 + $0x1f8] sm:$0xff]  }
 0x17a   :  { %v5061_v0 = vmax.f32 %v3959_v47, 0.0  ;;  %v3951_v2 = vadd.f32 %v16682_v22, %v3950_v57  ;;  %v2795_v47 = vpop.f32.mrf.mxu0  ;;  %v2804_v57 = vadd.f32 %v14380_v14, %v16682_v22 }
 0x17b   :  { %v14672_v5 = vpop.f32.mrf.mxu1  ;;  %14767 = vmatmul.mubr.msk.bf16.gmra.mxu1 %vm1896_vm0, %v16019_v37  ;;  %v17096_v37 = vpack.c.bf16 %v4769_v21, %v4768_v3  ;;  %v16086_v3 = vld [vmem:[%s22374_s0 + $0x1f0] sm:$0xff]  }
 0x17c   :  { %v17090_v17 = vpack.c.bf16 %v5061_v0, %v5060_v56  ;;  %v5059_v20 = vmax.f32 %v3951_v2, 0.0  ;;  %14770 = vmatprep.mubr.msk.bf16.mxu1 %vm1896_vm0, %v16021_v49  ;;  %v3972_v35 = vadd.f32 %v14672_v5, %v16682_v22  ;;  %v17101_v56 = vpack.c.bf16 %v4767_v44, %v4766_v6  ;;  %v14381_v49 = vpop.f32.mrf.mxu0  ;;  %v16025_v0 = vld [vmem:[%s22374_s0 + $0x690] sm:$0xff]   ;;  %14478 = vmatprep.mubr.msk.bf16.mxu0 %vm1896_vm0, %v16086_v3 }
 0x17d   :  { %v3963_v39 = vpop.f32.mrf.mxu1  ;;  %v2796_v2 = vadd.f32 %v16682_v22, %v2795_v47  ;;  %v2807_v21 = vadd.f32 %v14381_v49, %v16682_v22  ;;  %14479 = vmatmul.mubr.msk.bf16.gmra.mxu0 %vm1896_vm0, %v16088_v13 }
 0x17e   :  { %22410 = vst [vmem:[#allocation41_spill] sm:$0xff] %v17090_v17  ;;  %v17094_v53 = vpack.c.bf16 %v5059_v20, %v5058_v16  ;;  %v3964_v59 = vadd.f32 %v16682_v22, %v3963_v39  ;;  %v5064_v4 = vmax.f32 %v3972_v35, 0.0  ;;  %v2798_v6 = vpop.f32.mrf.mxu0  ;;  %v4772_v20 = vmax.f32 %v2804_v57, 0.0 }
 0x17f   :  { %v14673_v52 = vpop.f32.mrf.mxu1  ;;  %v4770_v44 = vmax.f32 %v2796_v2, 0.0  ;;  %v2799_v35 = vadd.f32 %v16682_v22, %v2798_v6  ;;  %v4773_v57 = vmax.f32 %v2807_v21, 0.0  ;;  %v17135_v6 = vld [vmem:[#allocation4] ss:$0 sm:$0xff]  ;;  %v16090_v21 = vld [vmem:[%s22374_s0 + $0x200] sm:$0xff]  }
 0x180   :  { %22411 = vst [vmem:[#allocation42_spill] sm:$0xff] %v17094_v53  ;;  %v3975_v63 = vadd.f32 %v14673_v52, %v16682_v22  ;;  %v14384_v47 = vpop.f32.mrf.mxu0  ;;  %v5062_v52 = vmax.f32 %v3964_v59, 0.0  ;;  %v16027_v59 = vld [vmem:[%s22374_s0 + $0x698] sm:$0xff]   ;;  %14482 = vmatprep.mubr.msk.bf16.mxu0 %vm1896_vm0, %v16090_v21 }
 0x181   :  { %v3966_v5 = vpop.f32.mrf.mxu1  ;;  %v4771_v3 = vmax.f32 %v2799_v35, 0.0 }
 0x182   :  { %v5065_v14 = vmax.f32 %v3975_v63, 0.0  ;;  %v3967_v16 = vadd.f32 %v16682_v22, %v3966_v5  ;;  %v2811_v53 = vpop.f32.mrf.mxu0 }
 0x183   :  { %v14676_v39 = vpop.f32.mrf.mxu1  ;;  %14771 = vmatmul.mubr.msk.bf16.gmra.mxu1 %vm1896_vm0, %v16023_v45  ;;  %v17128_v45 = vpack.c.bf16 %v4773_v57, %v4772_v20  ;;  %v2812_v20 = vadd.f32 %v17135_v6, %v2811_v53 }
 0x184   :  { %v17122_v17 = vpack.c.bf16 %v5065_v14, %v5064_v4  ;;  %v5063_v63 = vmax.f32 %v3967_v16, 0.0  ;;  %14774 = vmatprep.mubr.msk.bf16.mxu1 %vm1896_vm0, %v16025_v0  ;;  %v3988_v49 = vadd.f32 %v14676_v39, %v16682_v22  ;;  %v17133_v4 = vpack.c.bf16 %v4771_v3, %v4770_v44  ;;  %v14385_v13 = vpop.f32.mrf.mxu0  ;;  %v16029_v16 = vld [vmem:[%s22374_s0 + $0x6a0] sm:$0xff]  }
 0x185   :  { %v3979_v5 = vpop.f32.mrf.mxu1  ;;  %v2820_v0 = vadd.f32 %v17135_v6, %v14384_v47  ;;  %v16092_v47 = vld [vmem:[%s22374_s0 + $0x208] sm:$0xff]   ;;  %v4774_v3 = vmax.f32 %v2812_v20, 0.0 }
 0x186   :  { %22412 = vst [vmem:[#allocation43_spill] sm:$0xff] %v17122_v17  ;;  %v17126_v8 = vpack.c.bf16 %v5063_v63, %v5062_v52  ;;  %v3980_v22 = vadd.f32 %v17135_v6, %v3979_v5  ;;  %v5068_v39 = vmax.f32 %v3988_v49, 0.0  ;;  %v2814_v35 = vpop.f32.mrf.mxu0  ;;  %v2823_v5 = vadd.f32 %v17135_v6, %v14385_v13  ;;  %14483 = vmatmul.mubr.msk.bf16.gmra.mxu0 %vm1896_vm0, %v16092_v47 }
 0x187   :  { %v14677_v2 = vpop.f32.mrf.mxu1  ;;  %v4776_v57 = vmax.f32 %v2820_v0, 0.0  ;;  %v2815_v49 = vadd.f32 %v17135_v6, %v2814_v35 }
 0x188   :  { %22413 = vst [vmem:[#allocation44_spill] sm:$0xff] %v17126_v8  ;;  %v3991_v14 = vadd.f32 %v17135_v6, %v14677_v2  ;;  %v14388_v2 = vpop.f32.mrf.mxu0  ;;  %v5066_v17 = vmax.f32 %v3980_v22, 0.0  ;;  %v4777_v0 = vmax.f32 %v2823_v5, 0.0  ;;  %v16031_v22 = vld [vmem:[%s22374_s0 + $0x6a8] sm:$0xff]  }
 0x189   :  { %v3982_v44 = vpop.f32.mrf.mxu1  ;;  %v4775_v21 = vmax.f32 %v2815_v49, 0.0  ;;  %v2836_v35 = vadd.f32 %v17135_v6, %v14388_v2  ;;  %v16097_v49 = vld [vmem:[%s22374_s0 + $0x218] sm:$0xff]  }
 0x18a   :  { %v5069_v52 = vmax.f32 %v3991_v14, 0.0  ;;  %v3983_v63 = vadd.f32 %v17135_v6, %v3982_v44  ;;  %v2827_v25 = vpop.f32.mrf.mxu0 }
 0x18b   :  { %v14680_v53 = vpop.f32.mrf.mxu1  ;;  %14775 = vmatmul.mubr.msk.bf16.gmra.mxu1 %vm1896_vm0, %v16027_v59  ;;  %v17162_v59 = vpack.c.bf16 %v4777_v0, %v4776_v57  ;;  %v16095_v57 = vld [vmem:[%s22374_s0 + $0x210] sm:$0xff]   ;;  %v4780_v0 = vmax.f32 %v2836_v35, 0.0 }
 0x18c   :  { %v17156_v8 = vpack.c.bf16 %v5069_v52, %v5068_v39  ;;  %v5067_v14 = vmax.f32 %v3983_v63, 0.0  ;;  %14778 = vmatprep.mubr.msk.bf16.mxu1 %vm1896_vm0, %v16029_v16  ;;  %v4004_v13 = vadd.f32 %v17135_v6, %v14680_v53  ;;  %v17167_v39 = vpack.c.bf16 %v4775_v21, %v4774_v3  ;;  %v14389_v16 = vpop.f32.mrf.mxu0  ;;  %14486 = vmatprep.mubr.msk.bf16.mxu0 %vm1896_vm0, %v16095_v57 }
 0x18d   :  { %v3995_v44 = vpop.f32.mrf.mxu1  ;;  %v2828_v63 = vadd.f32 %v17135_v6, %v2827_v25 }
 0x18e   :  { %22414 = vst [vmem:[#allocation45_spill] sm:$0xff] %v17156_v8  ;;  %v17160_v9 = vpack.c.bf16 %v5067_v14, %v5066_v17  ;;  %v3996_v47 = vadd.f32 %v17135_v6, %v3995_v44  ;;  %v16033_v17 = vld [vmem:[%s22374_s0 + $0x6b0] sm:$0xff]   ;;  %v5072_v5 = vmax.f32 %v4004_v13, 0.0  ;;  %v2830_v3 = vpop.f32.mrf.mxu0  ;;  %v2839_v44 = vadd.f32 %v17135_v6, %v14389_v16  ;;  %14487 = vmatmul.mubr.msk.bf16.gmra.mxu0 %vm1896_vm0, %v16097_v49 }
 0x18f   :  { %v14681_v20 = vpop.f32.mrf.mxu1  ;;  %v4778_v21 = vmax.f32 %v2828_v63, 0.0  ;;  %v2831_v13 = vadd.f32 %v17135_v6, %v2830_v3  ;;  %v16093_v63 = vld [vmem:[%s22379_s5] sm:$0xff]  }
 0x190   :  { %22415 = vst [vmem:[#allocation46_spill] sm:$0xff] %v17160_v9  ;;  %v4007_v52 = vadd.f32 %v17135_v6, %v14681_v20  ;;  %v14392_v20 = vpop.f32.mrf.mxu0  ;;  %v5070_v8 = vmax.f32 %v3996_v47, 0.0  ;;  %v4781_v35 = vmax.f32 %v2839_v44, 0.0  ;;  %15384 = vmatprep.subr.bf16.mxu0 %v16093_v63  ;;  %v16099_v44 = vld [vmem:[%s22374_s0 + $0x220] sm:$0xff]  }
 0x191   :  { %v3998_v53 = vpop.f32.mrf.mxu1  ;;  %v4779_v57 = vmax.f32 %v2831_v13, 0.0  ;;  %v2852_v3 = vadd.f32 %v17135_v6, %v14392_v20  ;;  %15385 = vmatpush3.bf16.msra.mxu0 %v16093_v63  ;;  %v16101_v20 = vld [vmem:[%s22374_s0 + $0x228] sm:$0xff]   ;;  %14490 = vmatprep.mubr.msk.bf16.mxu0 %vm1896_vm0, %v16099_v44 }
 0x192   :  { %v5073_v2 = vmax.f32 %v4007_v52, 0.0  ;;  %v3999_v14 = vadd.f32 %v17135_v6, %v3998_v53  ;;  %v2843_v23 = vpop.f32.mrf.mxu0 }
 0x193   :  { %v14684_v25 = vpop.f32.mrf.mxu1  ;;  %14779 = vmatmul.mubr.msk.bf16.gmra.mxu1 %vm1896_vm0, %v16031_v22  ;;  %v17194_v22 = vpack.c.bf16 %v4781_v35, %v4780_v0  ;;  %v2844_v0 = vadd.f32 %v17135_v6, %v2843_v23 }
 0x194   :  { %v17188_v9 = vpack.c.bf16 %v5073_v2, %v5072_v5  ;;  %v5071_v52 = vmax.f32 %v3999_v14, 0.0  ;;  %14782 = vmatprep.mubr.msk.bf16.mxu1 %vm1896_vm0, %v16033_v17  ;;  %v4020_v16 = vadd.f32 %v17135_v6, %v14684_v25  ;;  %v16035_v5 = vld [vmem:[%s22374_s0 + $0x6b8] sm:$0xff]   ;;  %v17202_v17 = vpack.c.bf16 %v4779_v57, %v4778_v21  ;;  %v14393_v49 = vpop.f32.mrf.mxu0  ;;  %v16037_v14 = vld [vmem:[%s22374_s0 + $0x6c0] sm:$0xff]  }
 0x195   :  { %v4011_v53 = vpop.f32.mrf.mxu1  ;;  %v2855_v57 = vadd.f32 %v17135_v6, %v14393_v49 }
 0x196   :  { %22416 = vst [vmem:[#allocation47_spill] sm:$0xff] %v17188_v9  ;;  %v17192_v19 = vpack.c.bf16 %v5071_v52, %v5070_v8  ;;  %v4012_v2 = vadd.f32 %v17135_v6, %v4011_v53  ;;  %v5076_v25 = vmax.f32 %v4020_v16, 0.0  ;;  %v2846_v13 = vpop.f32.mrf.mxu0  ;;  %v4784_v53 = vmax.f32 %v2852_v3, 0.0  ;;  %14491 = vmatmul.mubr.msk.bf16.gmra.mxu0 %vm1896_vm0, %v16101_v20 }
 0x197   :  { %v14685_v47 = vpop.f32.mrf.mxu1  ;;  %v2847_v16 = vadd.f32 %v17135_v6, %v2846_v13  ;;  %v4785_v3 = vmax.f32 %v2855_v57, 0.0 }
 0x198   :  { %22417 = vst [vmem:[#allocation48_spill] sm:$0xff] %v17192_v19  ;;  %v4023_v8 = vadd.f32 %v17135_v6, %v14685_v47  ;;  %v4782_v47 = vmax.f32 %v2844_v0, 0.0  ;;  %v14396_v63 = vpop.f32.mrf.mxu0  ;;  %v5074_v9 = vmax.f32 %v4012_v2, 0.0  ;;  %v16039_v2 = vld [vmem:[%s22374_s0 + $0x6c8] sm:$0xff]  }
 0x199   :  { %v4014_v21 = vpop.f32.mrf.mxu1  ;;  %v4783_v44 = vmax.f32 %v2847_v16, 0.0  ;;  %v2868_v13 = vadd.f32 %v17135_v6, %v14396_v63  ;;  %v16105_v16 = vld [vmem:[%s22374_s0 + $0x238] sm:$0xff]  }
 0x19a   :  { %v5077_v52 = vmax.f32 %v4023_v8, 0.0  ;;  %v4015_v35 = vadd.f32 %v17135_v6, %v4014_v21  ;;  %v2859_v27 = vpop.f32.mrf.mxu0 }
 0x19b   :  { %v14688_v23 = vpop.f32.mrf.mxu1  ;;  %14783 = vmatmul.mubr.msk.bf16.gmra.mxu1 %vm1896_vm0, %v16035_v5  ;;  %v17229_v5 = vpack.c.bf16 %v4785_v3, %v4784_v53  ;;  %v16103_v53 = vld [vmem:[%s22374_s0 + $0x230] sm:$0xff]   ;;  %v4788_v3 = vmax.f32 %v2868_v13, 0.0 }
 0x19c   :  { %v17223_v19 = vpack.c.bf16 %v5077_v52, %v5076_v25  ;;  %v5075_v8 = vmax.f32 %v4015_v35, 0.0  ;;  %14786 = vmatprep.mubr.msk.bf16.mxu1 %vm1896_vm0, %v16037_v14  ;;  %v4036_v49 = vadd.f32 %v17135_v6, %v14688_v23  ;;  %v17234_v25 = vpack.c.bf16 %v4783_v44, %v4782_v47  ;;  %v14397_v14 = vpop.f32.mrf.mxu0  ;;  %14494 = vmatprep.mubr.msk.bf16.mxu0 %vm1896_vm0, %v16103_v53 }
 0x19d   :  { %v4027_v21 = vpop.f32.mrf.mxu1  ;;  %v2860_v35 = vadd.f32 %v17135_v6, %v2859_v27 }
 0x19e   :  { %22418 = vst [vmem:[#allocation49_spill] sm:$0xff] %v17223_v19  ;;  %v17227_v30 = vpack.c.bf16 %v5075_v8, %v5074_v9  ;;  %v4028_v20 = vadd.f32 %v17135_v6, %v4027_v21  ;;  %v16041_v9 = vld [vmem:[%s22374_s0 + $0x6d0] sm:$0xff]   ;;  %v5080_v57 = vmax.f32 %v4036_v49, 0.0  ;;  %v2862_v47 = vpop.f32.mrf.mxu0  ;;  %v2871_v21 = vadd.f32 %v17135_v6, %v14397_v14  ;;  %14495 = vmatmul.mubr.msk.bf16.gmra.mxu0 %vm1896_vm0, %v16105_v16 }
 0x19f   :  { %v14689_v0 = vpop.f32.mrf.mxu1  ;;  %v4786_v44 = vmax.f32 %v2860_v35, 0.0  ;;  %v2863_v49 = vadd.f32 %v17135_v6, %v2862_v47 }
 0x1a0   :  { %22419 = vst [vmem:[#allocation50_spill] sm:$0xff] %v17227_v30  ;;  %v4039_v52 = vadd.f32 %v17135_v6, %v14689_v0  ;;  %v14400_v0 = vpop.f32.mrf.mxu0  ;;  %v5078_v19 = vmax.f32 %v4028_v20, 0.0  ;;  %v4789_v13 = vmax.f32 %v2871_v21, 0.0  ;;  %v16043_v20 = vld [vmem:[%s22374_s0 + $0x6d8] sm:$0xff]  }
 0x1a1   :  { %v4030_v23 = vpop.f32.mrf.mxu1  ;;  %v4787_v53 = vmax.f32 %v2863_v49, 0.0  ;;  %v2884_v47 = vadd.f32 %v17135_v6, %v14400_v0  ;;  %v16109_v49 = vld [vmem:[%s22374_s0 + $0x248] sm:$0xff]  }
 0x1a2   :  { %v5081_v63 = vmax.f32 %v4039_v52, 0.0  ;;  %v4031_v8 = vadd.f32 %v17135_v6, %v4030_v23  ;;  %v2875_v41 = vpop.f32.mrf.mxu0 }
 0x1a3   :  { %v14692_v27 = vpop.f32.mrf.mxu1  ;;  %14787 = vmatmul.mubr.msk.bf16.gmra.mxu1 %vm1896_vm0, %v16039_v2  ;;  %v17261_v2 = vpack.c.bf16 %v4789_v13, %v4788_v3  ;;  %v16107_v3 = vld [vmem:[%s22374_s0 + $0x240] sm:$0xff]   ;;  %v4792_v13 = vmax.f32 %v2884_v47, 0.0 }
 0x1a4   :  { %v17255_v30 = vpack.c.bf16 %v5081_v63, %v5080_v57  ;;  %v5079_v52 = vmax.f32 %v4031_v8, 0.0  ;;  %14790 = vmatprep.mubr.msk.bf16.mxu1 %vm1896_vm0, %v16041_v9  ;;  %v4052_v14 = vadd.f32 %v17135_v6, %v14692_v27  ;;  %v17266_v57 = vpack.c.bf16 %v4787_v53, %v4786_v44  ;;  %v14401_v9 = vpop.f32.mrf.mxu0  ;;  %14498 = vmatprep.mubr.msk.bf16.mxu0 %vm1896_vm0, %v16107_v3 }
 0x1a5   :  { %v4043_v23 = vpop.f32.mrf.mxu1  ;;  %v2876_v8 = vadd.f32 %v17135_v6, %v2875_v41 }
 0x1a6   :  { %22420 = vst [vmem:[#allocation51_spill] sm:$0xff] %v17255_v30  ;;  %v17259_v48 = vpack.c.bf16 %v5079_v52, %v5078_v19  ;;  %v4044_v16 = vadd.f32 %v17135_v6, %v4043_v23  ;;  %v16045_v19 = vld [vmem:[%s22374_s0 + $0x6e0] sm:$0xff]   ;;  %v5084_v21 = vmax.f32 %v4052_v14, 0.0  ;;  %v2878_v44 = vpop.f32.mrf.mxu0  ;;  %v2887_v23 = vadd.f32 %v17135_v6, %v14401_v9  ;;  %14499 = vmatmul.mubr.msk.bf16.gmra.mxu0 %vm1896_vm0, %v16109_v49 }
 0x1a7   :  { %v14693_v35 = vpop.f32.mrf.mxu1  ;;  %v4790_v53 = vmax.f32 %v2876_v8, 0.0  ;;  %v2879_v14 = vadd.f32 %v17135_v6, %v2878_v44 }
 0x1a8   :  { %22421 = vst [vmem:[#allocation52_spill] sm:$0xff] %v17259_v48  ;;  %v4055_v63 = vadd.f32 %v17135_v6, %v14693_v35  ;;  %v14404_v35 = vpop.f32.mrf.mxu0  ;;  %v5082_v30 = vmax.f32 %v4044_v16, 0.0  ;;  %v4793_v47 = vmax.f32 %v2887_v23, 0.0  ;;  %v16047_v16 = vld [vmem:[%s22374_s0 + $0x6e8] sm:$0xff]  }
 0x1a9   :  { %v4046_v27 = vpop.f32.mrf.mxu1  ;;  %v4791_v3 = vmax.f32 %v2879_v14, 0.0  ;;  %v2900_v44 = vadd.f32 %v17135_v6, %v14404_v35  ;;  %v16113_v14 = vld [vmem:[%s22374_s0 + $0x258] sm:$0xff]  }
 0x1aa   :  { %v5085_v0 = vmax.f32 %v4055_v63, 0.0  ;;  %v4047_v52 = vadd.f32 %v17135_v6, %v4046_v27  ;;  %v2891_v60 = vpop.f32.mrf.mxu0 }
 0x1ab   :  { %v14696_v41 = vpop.f32.mrf.mxu1  ;;  %14791 = vmatmul.mubr.msk.bf16.gmra.mxu1 %vm1896_vm0, %v16043_v20  ;;  %v17293_v20 = vpack.c.bf16 %v4793_v47, %v4792_v13  ;;  %v16111_v13 = vld [vmem:[%s22374_s0 + $0x250] sm:$0xff]   ;;  %v4796_v47 = vmax.f32 %v2900_v44, 0.0 }
 0x1ac   :  { %v17287_v48 = vpack.c.bf16 %v5085_v0, %v5084_v21  ;;  %v5083_v63 = vmax.f32 %v4047_v52, 0.0  ;;  %14794 = vmatprep.mubr.msk.bf16.mxu1 %vm1896_vm0, %v16045_v19  ;;  %v4068_v9 = vadd.f32 %v17135_v6, %v14696_v41  ;;  %v17298_v21 = vpack.c.bf16 %v4791_v3, %v4790_v53  ;;  %v14405_v19 = vpop.f32.mrf.mxu0  ;;  %14502 = vmatprep.mubr.msk.bf16.mxu0 %vm1896_vm0, %v16111_v13 }
 0x1ad   :  { %v4059_v27 = vpop.f32.mrf.mxu1  ;;  %v2892_v52 = vadd.f32 %v17135_v6, %v2891_v60 }
 0x1ae   :  { %22422 = vst [vmem:[#allocation53_spill] sm:$0xff] %v17287_v48  ;;  %v17291_v11 = vpack.c.bf16 %v5083_v63, %v5082_v30  ;;  %v4060_v49 = vadd.f32 %v17135_v6, %v4059_v27  ;;  %v16049_v30 = vld [vmem:[%s22374_s0 + $0x6f0] sm:$0xff]   ;;  %v5088_v23 = vmax.f32 %v4068_v9, 0.0  ;;  %v2894_v53 = vpop.f32.mrf.mxu0  ;;  %v2903_v27 = vadd.f32 %v17135_v6, %v14405_v19  ;;  %14503 = vmatmul.mubr.msk.bf16.gmra.mxu0 %vm1896_vm0, %v16113_v14 }
 0x1af   :  { %v14697_v8 = vpop.f32.mrf.mxu1  ;;  %v4794_v3 = vmax.f32 %v2892_v52, 0.0  ;;  %v2895_v9 = vadd.f32 %v17135_v6, %v2894_v53 }
 0x1b0   :  { %22423 = vst [vmem:[#allocation54_spill] sm:$0xff] %v17291_v11  ;;  %v4071_v0 = vadd.f32 %v17135_v6, %v14697_v8  ;;  %v14408_v8 = vpop.f32.mrf.mxu0  ;;  %v5086_v48 = vmax.f32 %v4060_v49, 0.0  ;;  %v4797_v44 = vmax.f32 %v2903_v27, 0.0  ;;  %v16051_v49 = vld [vmem:[%s22374_s0 + $0x6f8] sm:$0xff]  }
 0x1b1   :  { %v4062_v41 = vpop.f32.mrf.mxu1  ;;  %v4795_v13 = vmax.f32 %v2895_v9, 0.0  ;;  %v2916_v53 = vadd.f32 %v17135_v6, %v14408_v8  ;;  %v16117_v9 = vld [vmem:[%s22374_s0 + $0x268] sm:$0xff]  }
 0x1b2   :  { %v5089_v35 = vmax.f32 %v4071_v0, 0.0  ;;  %v4063_v63 = vadd.f32 %v17135_v6, %v4062_v41  ;;  %v2907_v18 = vpop.f32.mrf.mxu0 }
 0x1b3   :  { %v14700_v60 = vpop.f32.mrf.mxu1  ;;  %14795 = vmatmul.mubr.msk.bf16.gmra.mxu1 %vm1896_vm0, %v16047_v16  ;;  %v17325_v16 = vpack.c.bf16 %v4797_v44, %v4796_v47  ;;  %v16115_v47 = vld [vmem:[%s22374_s0 + $0x260] sm:$0xff]   ;;  %v4800_v44 = vmax.f32 %v2916_v53, 0.0 }
 0x1b4   :  { %v17319_v11 = vpack.c.bf16 %v5089_v35, %v5088_v23  ;;  %v5087_v0 = vmax.f32 %v4063_v63, 0.0  ;;  %14798 = vmatprep.mubr.msk.bf16.mxu1 %vm1896_vm0, %v16049_v30  ;;  %v4084_v19 = vadd.f32 %v17135_v6, %v14700_v60  ;;  %v17330_v23 = vpack.c.bf16 %v4795_v13, %v4794_v3  ;;  %v14409_v30 = vpop.f32.mrf.mxu0  ;;  %14506 = vmatprep.mubr.msk.bf16.mxu0 %vm1896_vm0, %v16115_v47 }
 0x1b5   :  { %v4075_v41 = vpop.f32.mrf.mxu1  ;;  %v2908_v63 = vadd.f32 %v17135_v6, %v2907_v18 }
 0x1b6   :  { %22424 = vst [vmem:[#allocation55_spill] sm:$0xff] %v17319_v11  ;;  %v17323_v50 = vpack.c.bf16 %v5087_v0, %v5086_v48  ;;  %v4076_v14 = vadd.f32 %v17135_v6, %v4075_v41  ;;  %v16053_v48 = vld [vmem:[%s22374_s0 + $0x700] sm:$0xff]   ;;  %v5092_v27 = vmax.f32 %v4084_v19, 0.0  ;;  %v2910_v3 = vpop.f32.mrf.mxu0  ;;  %v2919_v41 = vadd.f32 %v17135_v6, %v14409_v30  ;;  %14507 = vmatmul.mubr.msk.bf16.gmra.mxu0 %vm1896_vm0, %v16117_v9 }
 0x1b7   :  { %v14701_v52 = vpop.f32.mrf.mxu1  ;;  %v4798_v13 = vmax.f32 %v2908_v63, 0.0  ;;  %v2911_v19 = vadd.f32 %v17135_v6, %v2910_v3 }
 0x1b8   :  { %22425 = vst [vmem:[#allocation56_spill] sm:$0xff] %v17323_v50  ;;  %v4087_v35 = vadd.f32 %v17135_v6, %v14701_v52  ;;  %v14412_v52 = vpop.f32.mrf.mxu0  ;;  %v5090_v11 = vmax.f32 %v4076_v14, 0.0  ;;  %v4801_v53 = vmax.f32 %v2919_v41, 0.0  ;;  %v16055_v14 = vld [vmem:[%s22374_s0 + $0x708] sm:$0xff]  }
 0x1b9   :  { %v4078_v60 = vpop.f32.mrf.mxu1  ;;  %v4799_v47 = vmax.f32 %v2911_v19, 0.0  ;;  %v2932_v3 = vadd.f32 %v17135_v6, %v14412_v52  ;;  %v16119_v19 = vld [vmem:[%s22374_s0 + $0x278] sm:$0xff]  }
 0x1ba   :  { %v5093_v8 = vmax.f32 %v4087_v35, 0.0  ;;  %v4079_v0 = vadd.f32 %v17135_v6, %v4078_v60  ;;  %v2923_v55 = vpop.f32.mrf.mxu0 }
 0x1bb   :  { %v14704_v18 = vpop.f32.mrf.mxu1  ;;  %14799 = vmatmul.mubr.msk.bf16.gmra.mxu1 %vm1896_vm0, %v16051_v49  ;;  %v17357_v49 = vpack.c.bf16 %v4801_v53, %v4800_v44  ;;  %v16118_v44 = vld [vmem:[%s22374_s0 + $0x270] sm:$0xff]   ;;  %v4804_v53 = vmax.f32 %v2932_v3, 0.0 }
 0x1bc   :  { %v17351_v50 = vpack.c.bf16 %v5093_v8, %v5092_v27  ;;  %v5091_v35 = vmax.f32 %v4079_v0, 0.0  ;;  %14802 = vmatprep.mubr.msk.bf16.mxu1 %vm1896_vm0, %v16053_v48  ;;  %v4100_v30 = vadd.f32 %v17135_v6, %v14704_v18  ;;  %v17362_v27 = vpack.c.bf16 %v4799_v47, %v4798_v13  ;;  %v14413_v48 = vpop.f32.mrf.mxu0  ;;  %14510 = vmatprep.mubr.msk.bf16.mxu0 %vm1896_vm0, %v16118_v44 }
 0x1bd   :  { %v4091_v60 = vpop.f32.mrf.mxu1  ;;  %v2924_v0 = vadd.f32 %v17135_v6, %v2923_v55 }
 0x1be   :  { %22426 = vst [vmem:[#allocation57_spill] sm:$0xff] %v17351_v50  ;;  %v17355_v28 = vpack.c.bf16 %v5091_v35, %v5090_v11  ;;  %v4092_v9 = vadd.f32 %v17135_v6, %v4091_v60  ;;  %v16057_v11 = vld [vmem:[%s22374_s0 + $0x710] sm:$0xff]   ;;  %v5096_v41 = vmax.f32 %v4100_v30, 0.0  ;;  %v2926_v13 = vpop.f32.mrf.mxu0  ;;  %v2935_v60 = vadd.f32 %v17135_v6, %v14413_v48  ;;  %14511 = vmatmul.mubr.msk.bf16.gmra.mxu0 %vm1896_vm0, %v16119_v19 }
 0x1bf   :  { %v14705_v63 = vpop.f32.mrf.mxu1  ;;  %v4802_v47 = vmax.f32 %v2924_v0, 0.0  ;;  %v2927_v30 = vadd.f32 %v17135_v6, %v2926_v13 }
 0x1c0   :  { %22427 = vst [vmem:[#allocation58_spill] sm:$0xff] %v17355_v28  ;;  %v4103_v8 = vadd.f32 %v17135_v6, %v14705_v63  ;;  %v14416_v63 = vpop.f32.mrf.mxu0  ;;  %v5094_v50 = vmax.f32 %v4092_v9, 0.0  ;;  %v4805_v3 = vmax.f32 %v2935_v60, 0.0  ;;  %v16059_v9 = vld [vmem:[%s22374_s0 + $0x718] sm:$0xff]  }
 0x1c1   :  { %v4094_v18 = vpop.f32.mrf.mxu1  ;;  %v4803_v44 = vmax.f32 %v2927_v30, 0.0  ;;  %v2948_v13 = vadd.f32 %v17135_v6, %v14416_v63  ;;  %v16121_v30 = vld [vmem:[%s22374_s0 + $0x288] sm:$0xff]  }
 0x1c2   :  { %v5097_v52 = vmax.f32 %v4103_v8, 0.0  ;;  %v4095_v35 = vadd.f32 %v17135_v6, %v4094_v18  ;;  %v2939_v32 = vpop.f32.mrf.mxu0 }
 0x1c3   :  { %v14708_v55 = vpop.f32.mrf.mxu1  ;;  %14803 = vmatmul.mubr.msk.bf16.gmra.mxu1 %vm1896_vm0, %v16055_v14  ;;  %v17389_v14 = vpack.c.bf16 %v4805_v3, %v4804_v53  ;;  %v16120_v53 = vld [vmem:[%s22374_s0 + $0x280] sm:$0xff]   ;;  %v4808_v3 = vmax.f32 %v2948_v13, 0.0 }
 0x1c4   :  { %v17383_v28 = vpack.c.bf16 %v5097_v52, %v5096_v41  ;;  %v5095_v8 = vmax.f32 %v4095_v35, 0.0  ;;  %14806 = vmatprep.mubr.msk.bf16.mxu1 %vm1896_vm0, %v16057_v11  ;;  %v4116_v48 = vadd.f32 %v17135_v6, %v14708_v55  ;;  %v17394_v41 = vpack.c.bf16 %v4803_v44, %v4802_v47  ;;  %v14417_v11 = vpop.f32.mrf.mxu0  ;;  %14514 = vmatprep.mubr.msk.bf16.mxu0 %vm1896_vm0, %v16120_v53 }
 0x1c5   :  { %v4107_v18 = vpop.f32.mrf.mxu1  ;;  %v2940_v35 = vadd.f32 %v17135_v6, %v2939_v32 }
 0x1c6   :  { %22428 = vst [vmem:[#allocation59_spill] sm:$0xff] %v17383_v28  ;;  %v17387_v7 = vpack.c.bf16 %v5095_v8, %v5094_v50  ;;  %v4108_v19 = vadd.f32 %v17135_v6, %v4107_v18  ;;  %v16061_v50 = vld [vmem:[%s22374_s0 + $0x720] sm:$0xff]   ;;  %v5100_v60 = vmax.f32 %v4116_v48, 0.0  ;;  %v2942_v47 = vpop.f32.mrf.mxu0  ;;  %v2951_v18 = vadd.f32 %v17135_v6, %v14417_v11  ;;  %14515 = vmatmul.mubr.msk.bf16.gmra.mxu0 %vm1896_vm0, %v16121_v30 }
 0x1c7   :  { %v14709_v0 = vpop.f32.mrf.mxu1  ;;  %v4806_v44 = vmax.f32 %v2940_v35, 0.0  ;;  %v2943_v48 = vadd.f32 %v17135_v6, %v2942_v47 }
 0x1c8   :  { %22429 = vst [vmem:[#allocation60_spill] sm:$0xff] %v17387_v7  ;;  %v4119_v52 = vadd.f32 %v17135_v6, %v14709_v0  ;;  %v14420_v0 = vpop.f32.mrf.mxu0  ;;  %v5098_v28 = vmax.f32 %v4108_v19, 0.0  ;;  %v4809_v13 = vmax.f32 %v2951_v18, 0.0  ;;  %v16063_v19 = vld [vmem:[%s22374_s0 + $0x728] sm:$0xff]  }
 0x1c9   :  { %v4110_v55 = vpop.f32.mrf.mxu1  ;;  %v4807_v53 = vmax.f32 %v2943_v48, 0.0  ;;  %v2964_v47 = vadd.f32 %v17135_v6, %v14420_v0  ;;  %v16123_v48 = vld [vmem:[%s22374_s0 + $0x298] sm:$0xff]  }
 0x1ca   :  { %v5101_v63 = vmax.f32 %v4119_v52, 0.0  ;;  %v4111_v8 = vadd.f32 %v17135_v6, %v4110_v55  ;;  %v2955_v10 = vpop.f32.mrf.mxu0 }
 0x1cb   :  { %v14712_v32 = vpop.f32.mrf.mxu1  ;;  %14807 = vmatmul.mubr.msk.bf16.gmra.mxu1 %vm1896_vm0, %v16059_v9  ;;  %v17421_v9 = vpack.c.bf16 %v4809_v13, %v4808_v3  ;;  %v16122_v3 = vld [vmem:[%s22374_s0 + $0x290] sm:$0xff]   ;;  %v4812_v13 = vmax.f32 %v2964_v47, 0.0 }
 0x1cc   :  { %v17415_v7 = vpack.c.bf16 %v5101_v63, %v5100_v60  ;;  %v5099_v52 = vmax.f32 %v4111_v8, 0.0  ;;  %14810 = vmatprep.mubr.msk.bf16.mxu1 %vm1896_vm0, %v16061_v50  ;;  %v4132_v11 = vadd.f32 %v17135_v6, %v14712_v32  ;;  %v17426_v60 = vpack.c.bf16 %v4807_v53, %v4806_v44  ;;  %v14421_v50 = vpop.f32.mrf.mxu0  ;;  %14518 = vmatprep.mubr.msk.bf16.mxu0 %vm1896_vm0, %v16122_v3 }
 0x1cd   :  { %v4123_v55 = vpop.f32.mrf.mxu1  ;;  %v2956_v8 = vadd.f32 %v17135_v6, %v2955_v10 }
 0x1ce   :  { %22430 = vst [vmem:[#allocation61_spill] sm:$0xff] %v17415_v7  ;;  %v17419_v51 = vpack.c.bf16 %v5099_v52, %v5098_v28  ;;  %v4124_v30 = vadd.f32 %v17135_v6, %v4123_v55  ;;  %v16065_v28 = vld [vmem:[%s22374_s0 + $0x730] sm:$0xff]   ;;  %v5104_v18 = vmax.f32 %v4132_v11, 0.0  ;;  %v2958_v44 = vpop.f32.mrf.mxu0  ;;  %v2967_v55 = vadd.f32 %v17135_v6, %v14421_v50  ;;  %14519 = vmatmul.mubr.msk.bf16.gmra.mxu0 %vm1896_vm0, %v16123_v48 }
 0x1cf   :  { %v14713_v35 = vpop.f32.mrf.mxu1  ;;  %v4810_v53 = vmax.f32 %v2956_v8, 0.0  ;;  %v2959_v11 = vadd.f32 %v17135_v6, %v2958_v44 }
 0x1d0   :  { %22431 = vst [vmem:[#allocation62_spill] sm:$0xff] %v17419_v51  ;;  %v4135_v63 = vadd.f32 %v17135_v6, %v14713_v35  ;;  %v14424_v35 = vpop.f32.mrf.mxu0  ;;  %v5102_v7 = vmax.f32 %v4124_v30, 0.0  ;;  %v4813_v47 = vmax.f32 %v2967_v55, 0.0  ;;  %v16067_v30 = vld [vmem:[%s22374_s0 + $0x738] sm:$0xff]  }
 0x1d1   :  { %v4126_v32 = vpop.f32.mrf.mxu1  ;;  %v4811_v3 = vmax.f32 %v2959_v11, 0.0  ;;  %v2980_v44 = vadd.f32 %v17135_v6, %v14424_v35  ;;  %v16125_v11 = vld [vmem:[%s22374_s0 + $0x2a8] sm:$0xff]  }
 0x1d2   :  { %v5105_v0 = vmax.f32 %v4135_v63, 0.0  ;;  %v4127_v52 = vadd.f32 %v17135_v6, %v4126_v32  ;;  %v2971_v54 = vpop.f32.mrf.mxu0 }
 0x1d3   :  { %v14716_v10 = vpop.f32.mrf.mxu1  ;;  %14811 = vmatmul.mubr.msk.bf16.gmra.mxu1 %vm1896_vm0, %v16063_v19  ;;  %v17453_v19 = vpack.c.bf16 %v4813_v47, %v4812_v13  ;;  %v16124_v13 = vld [vmem:[%s22374_s0 + $0x2a0] sm:$0xff]   ;;  %v4816_v47 = vmax.f32 %v2980_v44, 0.0 }
 0x1d4   :  { %v17447_v51 = vpack.c.bf16 %v5105_v0, %v5104_v18  ;;  %v5103_v63 = vmax.f32 %v4127_v52, 0.0  ;;  %14814 = vmatprep.mubr.msk.bf16.mxu1 %vm1896_vm0, %v16065_v28  ;;  %v4148_v50 = vadd.f32 %v17135_v6, %v14716_v10  ;;  %v17458_v18 = vpack.c.bf16 %v4811_v3, %v4810_v53  ;;  %v14425_v28 = vpop.f32.mrf.mxu0  ;;  %14522 = vmatprep.mubr.msk.bf16.mxu0 %vm1896_vm0, %v16124_v13 }
 0x1d5   :  { %v4139_v32 = vpop.f32.mrf.mxu1  ;;  %v2972_v52 = vadd.f32 %v17135_v6, %v2971_v54 }
 0x1d6   :  { %22432 = vst [vmem:[#allocation63_spill] sm:$0xff] %v17447_v51  ;;  %v17451_v31 = vpack.c.bf16 %v5103_v63, %v5102_v7  ;;  %v4140_v48 = vadd.f32 %v17135_v6, %v4139_v32  ;;  %v16069_v7 = vld [vmem:[%s22374_s0 + $0x740] sm:$0xff]   ;;  %v5108_v55 = vmax.f32 %v4148_v50, 0.0  ;;  %v2974_v53 = vpop.f32.mrf.mxu0  ;;  %v2983_v32 = vadd.f32 %v17135_v6, %v14425_v28  ;;  %14523 = vmatmul.mubr.msk.bf16.gmra.mxu0 %vm1896_vm0, %v16125_v11 }
 0x1d7   :  { %v14717_v8 = vpop.f32.mrf.mxu1  ;;  %v4814_v3 = vmax.f32 %v2972_v52, 0.0  ;;  %v2975_v50 = vadd.f32 %v17135_v6, %v2974_v53 }
 0x1d8   :  { %22433 = vst [vmem:[#allocation64_spill] sm:$0xff] %v17451_v31  ;;  %v4151_v0 = vadd.f32 %v17135_v6, %v14717_v8  ;;  %v14428_v8 = vpop.f32.mrf.mxu0  ;;  %v5106_v51 = vmax.f32 %v4140_v48, 0.0  ;;  %v4817_v44 = vmax.f32 %v2983_v32, 0.0  ;;  %v16071_v48 = vld [vmem:[%s22374_s0 + $0x748] sm:$0xff]  }
 0x1d9   :  { %v4142_v10 = vpop.f32.mrf.mxu1  ;;  %v4815_v13 = vmax.f32 %v2975_v50, 0.0  ;;  %v2996_v53 = vadd.f32 %v17135_v6, %v14428_v8  ;;  %v16127_v50 = vld [vmem:[%s22374_s0 + $0x2b8] sm:$0xff]  }
 0x1da   :  { %v5109_v35 = vmax.f32 %v4151_v0, 0.0  ;;  %v4143_v63 = vadd.f32 %v17135_v6, %v4142_v10  ;;  %v2987_v34 = vpop.f32.mrf.mxu0 }
 0x1db   :  { %v14720_v54 = vpop.f32.mrf.mxu1  ;;  %14815 = vmatmul.mubr.msk.bf16.gmra.mxu1 %vm1896_vm0, %v16067_v30  ;;  %v17485_v30 = vpack.c.bf16 %v4817_v44, %v4816_v47  ;;  %v16126_v47 = vld [vmem:[%s22374_s0 + $0x2b0] sm:$0xff]   ;;  %v4820_v44 = vmax.f32 %v2996_v53, 0.0 }
 0x1dc   :  { %v17479_v31 = vpack.c.bf16 %v5109_v35, %v5108_v55  ;;  %v5107_v0 = vmax.f32 %v4143_v63, 0.0  ;;  %14818 = vmatprep.mubr.msk.bf16.mxu1 %vm1896_vm0, %v16069_v7  ;;  %v4164_v28 = vadd.f32 %v17135_v6, %v14720_v54  ;;  %v17490_v55 = vpack.c.bf16 %v4815_v13, %v4814_v3  ;;  %v14429_v7 = vpop.f32.mrf.mxu0  ;;  %14526 = vmatprep.mubr.msk.bf16.mxu0 %vm1896_vm0, %v16126_v47 }
 0x1dd   :  { %v4155_v10 = vpop.f32.mrf.mxu1  ;;  %v2988_v63 = vadd.f32 %v17135_v6, %v2987_v34 }
 0x1de   :  { %22434 = vst [vmem:[#allocation65_spill] sm:$0xff] %v17479_v31  ;;  %v17483_v12 = vpack.c.bf16 %v5107_v0, %v5106_v51  ;;  %v4156_v11 = vadd.f32 %v17135_v6, %v4155_v10  ;;  %v16073_v51 = vld [vmem:[%s22374_s0 + $0x750] sm:$0xff]   ;;  %v5112_v32 = vmax.f32 %v4164_v28, 0.0  ;;  %v2990_v3 = vpop.f32.mrf.mxu0  ;;  %v2999_v10 = vadd.f32 %v17135_v6, %v14429_v7  ;;  %14527 = vmatmul.mubr.msk.bf16.gmra.mxu0 %vm1896_vm0, %v16127_v50 }
 0x1df   :  { %v14721_v52 = vpop.f32.mrf.mxu1  ;;  %v4818_v13 = vmax.f32 %v2988_v63, 0.0  ;;  %v2991_v28 = vadd.f32 %v17135_v6, %v2990_v3 }
 0x1e0   :  { %22435 = vst [vmem:[#allocation66_spill] sm:$0xff] %v17483_v12  ;;  %v4167_v35 = vadd.f32 %v17135_v6, %v14721_v52  ;;  %v14432_v52 = vpop.f32.mrf.mxu0  ;;  %v5110_v31 = vmax.f32 %v4156_v11, 0.0  ;;  %v4821_v53 = vmax.f32 %v2999_v10, 0.0  ;;  %v16075_v11 = vld [vmem:[%s22374_s0 + $0x758] sm:$0xff]  }
 0x1e1   :  { %v4158_v54 = vpop.f32.mrf.mxu1  ;;  %v4819_v47 = vmax.f32 %v2991_v28, 0.0  ;;  %v3012_v3 = vadd.f32 %v17135_v6, %v14432_v52  ;;  %v16129_v28 = vld [vmem:[%s22374_s0 + $0x2c8] sm:$0xff]  }
 0x1e2   :  { %v5113_v8 = vmax.f32 %v4167_v35, 0.0  ;;  %v4159_v0 = vadd.f32 %v17135_v6, %v4158_v54  ;;  %v3003_v15 = vpop.f32.mrf.mxu0 }
 0x1e3   :  { %v14724_v34 = vpop.f32.mrf.mxu1  ;;  %14819 = vmatmul.mubr.msk.bf16.gmra.mxu1 %vm1896_vm0, %v16071_v48  ;;  %v17517_v48 = vpack.c.bf16 %v4821_v53, %v4820_v44  ;;  %v16128_v44 = vld [vmem:[%s22374_s0 + $0x2c0] sm:$0xff]   ;;  %v4824_v53 = vmax.f32 %v3012_v3, 0.0 }
 0x1e4   :  { %v17511_v12 = vpack.c.bf16 %v5113_v8, %v5112_v32  ;;  %v5111_v35 = vmax.f32 %v4159_v0, 0.0  ;;  %14822 = vmatprep.mubr.msk.bf16.mxu1 %vm1896_vm0, %v16073_v51  ;;  %v4180_v7 = vadd.f32 %v17135_v6, %v14724_v34  ;;  %v17522_v32 = vpack.c.bf16 %v4819_v47, %v4818_v13  ;;  %v14433_v51 = vpop.f32.mrf.mxu0  ;;  %14530 = vmatprep.mubr.msk.bf16.mxu0 %vm1896_vm0, %v16128_v44 }
 0x1e5   :  { %v4171_v54 = vpop.f32.mrf.mxu1  ;;  %v3004_v0 = vadd.f32 %v17135_v6, %v3003_v15 }
 0x1e6   :  { %22436 = vst [vmem:[#allocation67_spill] sm:$0xff] %v17511_v12  ;;  %v17515_v58 = vpack.c.bf16 %v5111_v35, %v5110_v31  ;;  %v4172_v50 = vadd.f32 %v17135_v6, %v4171_v54  ;;  %v16077_v31 = vld [vmem:[%s22374_s0 + $0x760] sm:$0xff]   ;;  %v5116_v10 = vmax.f32 %v4180_v7, 0.0  ;;  %v3006_v13 = vpop.f32.mrf.mxu0  ;;  %v3015_v54 = vadd.f32 %v17135_v6, %v14433_v51  ;;  %14531 = vmatmul.mubr.msk.bf16.gmra.mxu0 %vm1896_vm0, %v16129_v28 }
 0x1e7   :  { %v14725_v63 = vpop.f32.mrf.mxu1  ;;  %v4822_v47 = vmax.f32 %v3004_v0, 0.0  ;;  %v3007_v7 = vadd.f32 %v17135_v6, %v3006_v13 }
 0x1e8   :  { %22437 = vst [vmem:[#allocation68_spill] sm:$0xff] %v17515_v58  ;;  %v4183_v8 = vadd.f32 %v17135_v6, %v14725_v63  ;;  %v14436_v63 = vpop.f32.mrf.mxu0  ;;  %v5114_v12 = vmax.f32 %v4172_v50, 0.0  ;;  %v4825_v3 = vmax.f32 %v3015_v54, 0.0  ;;  %v16079_v50 = vld [vmem:[%s22374_s0 + $0x768] sm:$0xff]  }
 0x1e9   :  { %v4174_v34 = vpop.f32.mrf.mxu1  ;;  %v4823_v44 = vmax.f32 %v3007_v7, 0.0  ;;  %v3028_v13 = vadd.f32 %v17135_v6, %v14436_v63  ;;  %v16131_v7 = vld [vmem:[%s22374_s0 + $0x2d8] sm:$0xff]  }
 0x1ea   :  { %v5117_v52 = vmax.f32 %v4183_v8, 0.0  ;;  %v4175_v35 = vadd.f32 %v17135_v6, %v4174_v34  ;;  %v3019_v61 = vpop.f32.mrf.mxu0 }
 0x1eb   :  { %v14728_v15 = vpop.f32.mrf.mxu1  ;;  %14823 = vmatmul.mubr.msk.bf16.gmra.mxu1 %vm1896_vm0, %v16075_v11  ;;  %v17549_v11 = vpack.c.bf16 %v4825_v3, %v4824_v53  ;;  %v16130_v53 = vld [vmem:[%s22374_s0 + $0x2d0] sm:$0xff]   ;;  %v4828_v3 = vmax.f32 %v3028_v13, 0.0 }
 0x1ec   :  { %v17543_v58 = vpack.c.bf16 %v5117_v52, %v5116_v10  ;;  %v5115_v8 = vmax.f32 %v4175_v35, 0.0  ;;  %14826 = vmatprep.mubr.msk.bf16.mxu1 %vm1896_vm0, %v16077_v31  ;;  %v4196_v51 = vadd.f32 %v17135_v6, %v14728_v15  ;;  %v17554_v10 = vpack.c.bf16 %v4823_v44, %v4822_v47  ;;  %v14437_v31 = vpop.f32.mrf.mxu0  ;;  %14534 = vmatprep.mubr.msk.bf16.mxu0 %vm1896_vm0, %v16130_v53 }
 0x1ed   :  { %v4187_v34 = vpop.f32.mrf.mxu1  ;;  %22440 = vst [vmem:[#allocation71_spill] sm:$0xff] %v17549_v11  ;;  %v3020_v35 = vadd.f32 %v17135_v6, %v3019_v61 }
 0x1ee   :  { %22438 = vst [vmem:[#allocation69_spill] sm:$0xff] %v17543_v58  ;;  %v17547_v40 = vpack.c.bf16 %v5115_v8, %v5114_v12  ;;  %v4188_v28 = vadd.f32 %v17135_v6, %v4187_v34  ;;  %v16081_v12 = vld [vmem:[%s22374_s0 + $0x770] sm:$0xff]   ;;  %v5120_v54 = vmax.f32 %v4196_v51, 0.0  ;;  %v3022_v47 = vpop.f32.mrf.mxu0  ;;  %v3031_v34 = vadd.f32 %v17135_v6, %v14437_v31  ;;  %14535 = vmatmul.mubr.msk.bf16.gmra.mxu0 %vm1896_vm0, %v16131_v7 }
 0x1ef   :  { %v14729_v0 = vpop.f32.mrf.mxu1  ;;  %v4826_v44 = vmax.f32 %v3020_v35, 0.0  ;;  %v3023_v51 = vadd.f32 %v17135_v6, %v3022_v47 }
 0x1f0   :  { %22439 = vst [vmem:[#allocation70_spill] sm:$0xff] %v17547_v40  ;;  %v4199_v52 = vadd.f32 %v17135_v6, %v14729_v0  ;;  %v14440_v0 = vpop.f32.mrf.mxu0  ;;  %v5118_v58 = vmax.f32 %v4188_v28, 0.0  ;;  %v4829_v13 = vmax.f32 %v3031_v34, 0.0  ;;  %v16083_v28 = vld [vmem:[%s22374_s0 + $0x778] sm:$0xff]   ;;  %v16132_v34 = vld [vmem:[%s22374_s0 + $0x2e0] sm:$0xff]  }
 0x1f1   :  { %v4190_v15 = vpop.f32.mrf.mxu1  ;;  %v4827_v53 = vmax.f32 %v3023_v51, 0.0  ;;  %v3044_v47 = vadd.f32 %v17135_v6, %v14440_v0  ;;  %v16133_v0 = vld [vmem:[%s22374_s0 + $0x2e8] sm:$0xff]   ;;  %14538 = vmatprep.mubr.msk.bf16.mxu0 %vm1896_vm0, %v16132_v34 }
 0x1f2   :  { %v5121_v63 = vmax.f32 %v4199_v52, 0.0  ;;  %v4191_v8 = vadd.f32 %v17135_v6, %v4190_v15  ;;  %v3035_v43 = vpop.f32.mrf.mxu0 }
 0x1f3   :  { %v14732_v61 = vpop.f32.mrf.mxu1  ;;  %14827 = vmatmul.mubr.msk.bf16.gmra.mxu1 %vm1896_vm0, %v16079_v50  ;;  %v17581_v50 = vpack.c.bf16 %v4829_v13, %v4828_v3  ;;  %v4832_v13 = vmax.f32 %v3044_v47, 0.0 }
 0x1f4   :  { %v17575_v40 = vpack.c.bf16 %v5121_v63, %v5120_v54  ;;  %v5119_v52 = vmax.f32 %v4191_v8, 0.0  ;;  %14830 = vmatprep.mubr.msk.bf16.mxu1 %vm1896_vm0, %v16081_v12  ;;  %v4212_v31 = vadd.f32 %v17135_v6, %v14732_v61  ;;  %v17586_v54 = vpack.c.bf16 %v4827_v53, %v4826_v44  ;;  %v14441_v12 = vpop.f32.mrf.mxu0  ;;  %v17594_v8 = vld [vmem:[#allocation4] ss:$0 sm:$0xff] }
 0x1f5   :  { %v4203_v15 = vpop.f32.mrf.mxu1  ;;  %22443 = vst [vmem:[#allocation74_spill] sm:$0xff] %v17581_v50  ;;  %v3036_v3 = vadd.f32 %v17594_v8, %v3035_v43 }
 0x1f6   :  { %22441 = vst [vmem:[#allocation72_spill] sm:$0xff] %v17575_v40  ;;  %v17579_v11 = vpack.c.bf16 %v5119_v52, %v5118_v58  ;;  %22444 = vst [vmem:[#allocation75_spill] sm:$0xff] %v17586_v54  ;;  %v4204_v7 = vadd.f32 %v17135_v6, %v4203_v15  ;;  %v16085_v58 = vld [vmem:[%s22374_s0 + $0x780] sm:$0xff]   ;;  %v5124_v61 = vmax.f32 %v4212_v31, 0.0  ;;  %v3038_v51 = vpop.f32.mrf.mxu0  ;;  %v3047_v15 = vadd.f32 %v17594_v8, %v14441_v12 }
 0x1f7   :  { %v14733_v35 = vpop.f32.mrf.mxu1  ;;  %v4830_v53 = vmax.f32 %v3036_v3, 0.0  ;;  %v3039_v31 = vadd.f32 %v17594_v8, %v3038_v51  ;;  %14539 = vmatmul.mubr.msk.bf16.gmra.mxu0 %vm1896_vm0, %v16133_v0 }
 0x1f8   :  { %22442 = vst [vmem:[#allocation73_spill] sm:$0xff] %v17579_v11  ;;  %v4215_v63 = vadd.f32 %v17135_v6, %v14733_v35  ;;  %v14444_v35 = vpop.f32.mrf.mxu0  ;;  %v5122_v40 = vmax.f32 %v4204_v7, 0.0  ;;  %v4833_v47 = vmax.f32 %v3047_v15, 0.0  ;;  %v16087_v7 = vld [vmem:[%s22374_s0 + $0x788] sm:$0xff]  }
 0x1f9   :  { %v4206_v44 = vpop.f32.mrf.mxu1  ;;  %v4831_v34 = vmax.f32 %v3039_v31, 0.0  ;;  %v3060_v51 = vadd.f32 %v17594_v8, %v14444_v35  ;;  %v16135_v31 = vld [vmem:[%s22374_s0 + $0x2f8] sm:$0xff]  }
 0x1fa   :  { %v5125_v6 = vmax.f32 %v4215_v63, 0.0  ;;  %v4207_v52 = vadd.f32 %v17594_v8, %v4206_v44  ;;  %v3051_v50 = vpop.f32.mrf.mxu0 }
 0x1fb   :  { %v14736_v43 = vpop.f32.mrf.mxu1  ;;  %14831 = vmatmul.mubr.msk.bf16.gmra.mxu1 %vm1896_vm0, %v16083_v28  ;;  %v17615_v28 = vpack.c.bf16 %v4833_v47, %v4832_v13  ;;  %v16134_v13 = vld [vmem:[%s22374_s0 + $0x2f0] sm:$0xff]   ;;  %v4836_v47 = vmax.f32 %v3060_v51, 0.0 }
 0x1fc   :  { %v17609_v11 = vpack.c.bf16 %v5125_v6, %v5124_v61  ;;  %v5123_v63 = vmax.f32 %v4207_v52, 0.0  ;;  %14834 = vmatprep.mubr.msk.bf16.mxu1 %vm1896_vm0, %v16085_v58  ;;  %v4228_v12 = vadd.f32 %v17594_v8, %v14736_v43  ;;  %v17620_v61 = vpack.c.bf16 %v4831_v34, %v4830_v53  ;;  %v14445_v58 = vpop.f32.mrf.mxu0  ;;  %14542 = vmatprep.mubr.msk.bf16.mxu0 %vm1896_vm0, %v16134_v13 }
 0x1fd   :  { %v4219_v44 = vpop.f32.mrf.mxu1  ;;  %22447 = vst [vmem:[#allocation78_spill] sm:$0xff] %v17615_v28  ;;  %v3052_v52 = vadd.f32 %v17594_v8, %v3051_v50 }
 0x1fe   :  { %22445 = vst [vmem:[#allocation76_spill] sm:$0xff] %v17609_v11  ;;  %v17613_v54 = vpack.c.bf16 %v5123_v63, %v5122_v40  ;;  %22448 = vst [vmem:[#allocation79_spill] sm:$0xff] %v17620_v61  ;;  %v4220_v0 = vadd.f32 %v17594_v8, %v4219_v44  ;;  %v16089_v40 = vld [vmem:[%s22374_s0 + $0x790] sm:$0xff]   ;;  %v5128_v15 = vmax.f32 %v4228_v12, 0.0  ;;  %v3054_v53 = vpop.f32.mrf.mxu0  ;;  %v3063_v44 = vadd.f32 %v17594_v8, %v14445_v58 }
 0x1ff   :  { %v14737_v3 = vpop.f32.mrf.mxu1  ;;  %v4834_v34 = vmax.f32 %v3052_v52, 0.0  ;;  %v3055_v12 = vadd.f32 %v17594_v8, %v3054_v53  ;;  %14543 = vmatmul.mubr.msk.bf16.gmra.mxu0 %vm1896_vm0, %v16135_v31 }
 0x200   :  { %22446 = vst [vmem:[#allocation77_spill] sm:$0xff] %v17613_v54  ;;  %v4231_v6 = vadd.f32 %v17594_v8, %v14737_v3  ;;  %v14448_v3 = vpop.f32.mrf.mxu0  ;;  %v5126_v11 = vmax.f32 %v4220_v0, 0.0  ;;  %v4837_v51 = vmax.f32 %v3063_v44, 0.0  ;;  %v16091_v0 = vld [vmem:[%s22374_s0 + $0x798] sm:$0xff]  }
 0x201   :  { %v4222_v43 = vpop.f32.mrf.mxu1  ;;  %v4835_v13 = vmax.f32 %v3055_v12, 0.0  ;;  %v3076_v53 = vadd.f32 %v17594_v8, %v14448_v3  ;;  %v16137_v12 = vld [vmem:[%s22374_s0 + $0x308] sm:$0xff]  }
 0x202   :  { %v5129_v35 = vmax.f32 %v4231_v6, 0.0  ;;  %v4223_v63 = vadd.f32 %v17594_v8, %v4222_v43  ;;  %v3067_v28 = vpop.f32.mrf.mxu0 }
 0x203   :  { %v14740_v50 = vpop.f32.mrf.mxu1  ;;  %14835 = vmatmul.mubr.msk.bf16.gmra.mxu1 %vm1896_vm0, %v16087_v7  ;;  %v17647_v7 = vpack.c.bf16 %v4837_v51, %v4836_v47  ;;  %v16136_v47 = vld [vmem:[%s22374_s0 + $0x300] sm:$0xff]   ;;  %v4840_v51 = vmax.f32 %v3076_v53, 0.0 }
 0x204   :  { %v17641_v54 = vpack.c.bf16 %v5129_v35, %v5128_v15  ;;  %v5127_v6 = vmax.f32 %v4223_v63, 0.0  ;;  %14838 = vmatprep.mubr.msk.bf16.mxu1 %vm1896_vm0, %v16089_v40  ;;  %v4244_v58 = vadd.f32 %v17594_v8, %v14740_v50  ;;  %v17652_v15 = vpack.c.bf16 %v4835_v13, %v4834_v34  ;;  %v14449_v40 = vpop.f32.mrf.mxu0  ;;  %14546 = vmatprep.mubr.msk.bf16.mxu0 %vm1896_vm0, %v16136_v47 }
 0x205   :  { %v4235_v43 = vpop.f32.mrf.mxu1  ;;  %22451 = vst [vmem:[#allocation82_spill] sm:$0xff] %v17647_v7  ;;  %v3068_v63 = vadd.f32 %v17594_v8, %v3067_v28 }
 0x206   :  { %22449 = vst [vmem:[#allocation80_spill] sm:$0xff] %v17641_v54  ;;  %v17645_v61 = vpack.c.bf16 %v5127_v6, %v5126_v11  ;;  %22452 = vst [vmem:[#allocation83_spill] sm:$0xff] %v17652_v15  ;;  %v4236_v31 = vadd.f32 %v17594_v8, %v4235_v43  ;;  %v16094_v11 = vld [vmem:[%s22374_s0 + $0x7a0] sm:$0xff]   ;;  %v5132_v44 = vmax.f32 %v4244_v58, 0.0  ;;  %v3070_v34 = vpop.f32.mrf.mxu0  ;;  %v3079_v43 = vadd.f32 %v17594_v8, %v14449_v40 }
 0x207   :  { %v14741_v52 = vpop.f32.mrf.mxu1  ;;  %v4838_v13 = vmax.f32 %v3068_v63, 0.0  ;;  %v3071_v58 = vadd.f32 %v17594_v8, %v3070_v34  ;;  %14547 = vmatmul.mubr.msk.bf16.gmra.mxu0 %vm1896_vm0, %v16137_v12 }
 0x208   :  { %22450 = vst [vmem:[#allocation81_spill] sm:$0xff] %v17645_v61  ;;  %v4247_v35 = vadd.f32 %v17594_v8, %v14741_v52  ;;  %v14452_v52 = vpop.f32.mrf.mxu0  ;;  %v5130_v54 = vmax.f32 %v4236_v31, 0.0  ;;  %v4841_v53 = vmax.f32 %v3079_v43, 0.0  ;;  %v16096_v31 = vld [vmem:[%s22374_s0 + $0x7a8] sm:$0xff]  }
 0x209   :  { %v4238_v50 = vpop.f32.mrf.mxu1  ;;  %v4839_v47 = vmax.f32 %v3071_v58, 0.0  ;;  %v3092_v34 = vadd.f32 %v17594_v8, %v14452_v52  ;;  %v16139_v58 = vld [vmem:[%s22374_s0 + $0x318] sm:$0xff]  }
 0x20a   :  { %v5133_v3 = vmax.f32 %v4247_v35, 0.0  ;;  %v4239_v6 = vadd.f32 %v17594_v8, %v4238_v50  ;;  %v3083_v7 = vpop.f32.mrf.mxu0 }
 0x20b   :  { %v14744_v28 = vpop.f32.mrf.mxu1  ;;  %14839 = vmatmul.mubr.msk.bf16.gmra.mxu1 %vm1896_vm0, %v16091_v0  ;;  %v17679_v0 = vpack.c.bf16 %v4841_v53, %v4840_v51  ;;  %v16138_v51 = vld [vmem:[%s22374_s0 + $0x310] sm:$0xff]   ;;  %v4844_v53 = vmax.f32 %v3092_v34, 0.0 }
 0x20c   :  { %v17673_v61 = vpack.c.bf16 %v5133_v3, %v5132_v44  ;;  %v5131_v35 = vmax.f32 %v4239_v6, 0.0  ;;  %14842 = vmatprep.mubr.msk.bf16.mxu1 %vm1896_vm0, %v16094_v11  ;;  %v4260_v40 = vadd.f32 %v17594_v8, %v14744_v28  ;;  %v17684_v44 = vpack.c.bf16 %v4839_v47, %v4838_v13  ;;  %v14453_v11 = vpop.f32.mrf.mxu0  ;;  %14550 = vmatprep.mubr.msk.bf16.mxu0 %vm1896_vm0, %v16138_v51 }
 0x20d   :  { %v4251_v50 = vpop.f32.mrf.mxu1  ;;  %22455 = vst [vmem:[#allocation86_spill] sm:$0xff] %v17679_v0  ;;  %v3084_v6 = vadd.f32 %v17594_v8, %v3083_v7 }
 0x20e   :  { %22453 = vst [vmem:[#allocation84_spill] sm:$0xff] %v17673_v61  ;;  %v17677_v15 = vpack.c.bf16 %v5131_v35, %v5130_v54  ;;  %22456 = vst [vmem:[#allocation87_spill] sm:$0xff] %v17684_v44  ;;  %v4252_v12 = vadd.f32 %v17594_v8, %v4251_v50  ;;  %v16098_v54 = vld [vmem:[%s22374_s0 + $0x7b0] sm:$0xff]   ;;  %v5136_v43 = vmax.f32 %v4260_v40, 0.0  ;;  %v3086_v13 = vpop.f32.mrf.mxu0  ;;  %v3095_v50 = vadd.f32 %v17594_v8, %v14453_v11 }
 0x20f   :  { %v14745_v63 = vpop.f32.mrf.mxu1  ;;  %v4842_v47 = vmax.f32 %v3084_v6, 0.0  ;;  %v3087_v40 = vadd.f32 %v17594_v8, %v3086_v13  ;;  %14551 = vmatmul.mubr.msk.bf16.gmra.mxu0 %vm1896_vm0, %v16139_v58 }
 0x210   :  { %22454 = vst [vmem:[#allocation85_spill] sm:$0xff] %v17677_v15  ;;  %v4263_v3 = vadd.f32 %v17594_v8, %v14745_v63  ;;  %v14456_v63 = vpop.f32.mrf.mxu0  ;;  %v5134_v61 = vmax.f32 %v4252_v12, 0.0  ;;  %v4845_v34 = vmax.f32 %v3095_v50, 0.0  ;;  %v16100_v12 = vld [vmem:[%s22374_s0 + $0x7b8] sm:$0xff]  }
 0x211   :  { %v4254_v28 = vpop.f32.mrf.mxu1  ;;  %v4843_v51 = vmax.f32 %v3087_v40, 0.0  ;;  %v3108_v13 = vadd.f32 %v17594_v8, %v14456_v63  ;;  %v16141_v40 = vld [vmem:[%s22374_s0 + $0x328] sm:$0xff]  }
 0x212   :  { %v5137_v52 = vmax.f32 %v4263_v3, 0.0  ;;  %v4255_v35 = vadd.f32 %v17594_v8, %v4254_v28  ;;  %v3099_v0 = vpop.f32.mrf.mxu0 }
 0x213   :  { %v14748_v7 = vpop.f32.mrf.mxu1  ;;  %14843 = vmatmul.mubr.msk.bf16.gmra.mxu1 %vm1896_vm0, %v16096_v31  ;;  %v17711_v31 = vpack.c.bf16 %v4845_v34, %v4844_v53  ;;  %v16140_v53 = vld [vmem:[%s22374_s0 + $0x320] sm:$0xff]   ;;  %v4848_v34 = vmax.f32 %v3108_v13, 0.0 }
 0x214   :  { %v17705_v15 = vpack.c.bf16 %v5137_v52, %v5136_v43  ;;  %v5135_v3 = vmax.f32 %v4255_v35, 0.0  ;;  %14846 = vmatprep.mubr.msk.bf16.mxu1 %vm1896_vm0, %v16098_v54  ;;  %v4276_v11 = vadd.f32 %v17594_v8, %v14748_v7  ;;  %v17716_v43 = vpack.c.bf16 %v4843_v51, %v4842_v47  ;;  %v14457_v54 = vpop.f32.mrf.mxu0  ;;  %14554 = vmatprep.mubr.msk.bf16.mxu0 %vm1896_vm0, %v16140_v53 }
 0x215   :  { %v4267_v28 = vpop.f32.mrf.mxu1  ;;  %22459 = vst [vmem:[#allocation90_spill] sm:$0xff] %v17711_v31  ;;  %v3100_v35 = vadd.f32 %v17594_v8, %v3099_v0 }
 0x216   :  { %22457 = vst [vmem:[#allocation88_spill] sm:$0xff] %v17705_v15  ;;  %v17709_v44 = vpack.c.bf16 %v5135_v3, %v5134_v61  ;;  %22460 = vst [vmem:[#allocation91_spill] sm:$0xff] %v17716_v43  ;;  %v4268_v58 = vadd.f32 %v17594_v8, %v4267_v28  ;;  %v16102_v61 = vld [vmem:[%s22374_s0 + $0x7c0] sm:$0xff]   ;;  %v5140_v50 = vmax.f32 %v4276_v11, 0.0  ;;  %v3102_v47 = vpop.f32.mrf.mxu0  ;;  %v3111_v28 = vadd.f32 %v17594_v8, %v14457_v54 }
 0x217   :  { %v14749_v6 = vpop.f32.mrf.mxu1  ;;  %v4846_v51 = vmax.f32 %v3100_v35, 0.0  ;;  %v3103_v11 = vadd.f32 %v17594_v8, %v3102_v47  ;;  %14555 = vmatmul.mubr.msk.bf16.gmra.mxu0 %vm1896_vm0, %v16141_v40 }
 0x218   :  { %22458 = vst [vmem:[#allocation89_spill] sm:$0xff] %v17709_v44  ;;  %v4279_v52 = vadd.f32 %v17594_v8, %v14749_v6  ;;  %v14460_v6 = vpop.f32.mrf.mxu0  ;;  %v5138_v15 = vmax.f32 %v4268_v58, 0.0  ;;  %v4849_v13 = vmax.f32 %v3111_v28, 0.0  ;;  %v16104_v58 = vld [vmem:[%s22374_s0 + $0x7c8] sm:$0xff]  }
 0x219   :  { %v4270_v7 = vpop.f32.mrf.mxu1  ;;  %v4847_v53 = vmax.f32 %v3103_v11, 0.0  ;;  %v3124_v47 = vadd.f32 %v17594_v8, %v14460_v6  ;;  %v16143_v11 = vld [vmem:[%s22374_s0 + $0x338] sm:$0xff]  }
 0x21a   :  { %v5141_v63 = vmax.f32 %v4279_v52, 0.0  ;;  %v4271_v3 = vadd.f32 %v17594_v8, %v4270_v7  ;;  %v3115_v31 = vpop.f32.mrf.mxu0 }
 0x21b   :  { %v14752_v0 = vpop.f32.mrf.mxu1  ;;  %14847 = vmatmul.mubr.msk.bf16.gmra.mxu1 %vm1896_vm0, %v16100_v12  ;;  %v17743_v12 = vpack.c.bf16 %v4849_v13, %v4848_v34  ;;  %v16142_v34 = vld [vmem:[%s22374_s0 + $0x330] sm:$0xff]   ;;  %v4852_v13 = vmax.f32 %v3124_v47, 0.0 }
 0x21c   :  { %v17737_v44 = vpack.c.bf16 %v5141_v63, %v5140_v50  ;;  %v5139_v52 = vmax.f32 %v4271_v3, 0.0  ;;  %14850 = vmatprep.mubr.msk.bf16.mxu1 %vm1896_vm0, %v16102_v61  ;;  %v4292_v54 = vadd.f32 %v17594_v8, %v14752_v0  ;;  %v17748_v50 = vpack.c.bf16 %v4847_v53, %v4846_v51  ;;  %v14461_v61 = vpop.f32.mrf.mxu0  ;;  %14558 = vmatprep.mubr.msk.bf16.mxu0 %vm1896_vm0, %v16142_v34 }
 0x21d   :  { %v4283_v7 = vpop.f32.mrf.mxu1  ;;  %22463 = vst [vmem:[#allocation94_spill] sm:$0xff] %v17743_v12  ;;  %v3116_v3 = vadd.f32 %v17594_v8, %v3115_v31 }
 0x21e   :  { %22461 = vst [vmem:[#allocation92_spill] sm:$0xff] %v17737_v44  ;;  %v17741_v43 = vpack.c.bf16 %v5139_v52, %v5138_v15  ;;  %22464 = vst [vmem:[#allocation95_spill] sm:$0xff] %v17748_v50  ;;  %v4284_v40 = vadd.f32 %v17594_v8, %v4283_v7  ;;  %v16106_v15 = vld [vmem:[%s22374_s0 + $0x7d0] sm:$0xff]   ;;  %v5144_v28 = vmax.f32 %v4292_v54, 0.0  ;;  %v3118_v51 = vpop.f32.mrf.mxu0  ;;  %v3127_v7 = vadd.f32 %v17594_v8, %v14461_v61 }
 0x21f   :  { %v14753_v35 = vpop.f32.mrf.mxu1  ;;  %v4850_v53 = vmax.f32 %v3116_v3, 0.0  ;;  %v3119_v54 = vadd.f32 %v17594_v8, %v3118_v51  ;;  %14559 = vmatmul.mubr.msk.bf16.gmra.mxu0 %vm1896_vm0, %v16143_v11 }
 0x220   :  { %22462 = vst [vmem:[#allocation93_spill] sm:$0xff] %v17741_v43  ;;  %v4295_v63 = vadd.f32 %v17594_v8, %v14753_v35  ;;  %v14464_v35 = vpop.f32.mrf.mxu0  ;;  %v5142_v44 = vmax.f32 %v4284_v40, 0.0  ;;  %v4853_v47 = vmax.f32 %v3127_v7, 0.0  ;;  %v16108_v40 = vld [vmem:[%s22374_s0 + $0x7d8] sm:$0xff]  }
 0x221   :  { %v4286_v0 = vpop.f32.mrf.mxu1  ;;  %v4851_v34 = vmax.f32 %v3119_v54, 0.0  ;;  %v3140_v51 = vadd.f32 %v17594_v8, %v14464_v35  ;;  %v16145_v54 = vld [vmem:[%s22374_s0 + $0x348] sm:$0xff]  }
 0x222   :  { %v5145_v6 = vmax.f32 %v4295_v63, 0.0  ;;  %v4287_v52 = vadd.f32 %v17594_v8, %v4286_v0  ;;  %v3131_v12 = vpop.f32.mrf.mxu0 }
 0x223   :  { %v14756_v31 = vpop.f32.mrf.mxu1  ;;  %14851 = vmatmul.mubr.msk.bf16.gmra.mxu1 %vm1896_vm0, %v16104_v58  ;;  %v17775_v58 = vpack.c.bf16 %v4853_v47, %v4852_v13  ;;  %v16144_v13 = vld [vmem:[%s22374_s0 + $0x340] sm:$0xff]   ;;  %v4856_v47 = vmax.f32 %v3140_v51, 0.0 }
 0x224   :  { %v17769_v43 = vpack.c.bf16 %v5145_v6, %v5144_v28  ;;  %v5143_v63 = vmax.f32 %v4287_v52, 0.0  ;;  %14854 = vmatprep.mubr.msk.bf16.mxu1 %vm1896_vm0, %v16106_v15  ;;  %v4308_v61 = vadd.f32 %v17594_v8, %v14756_v31  ;;  %v17780_v28 = vpack.c.bf16 %v4851_v34, %v4850_v53  ;;  %v14465_v15 = vpop.f32.mrf.mxu0  ;;  %14562 = vmatprep.mubr.msk.bf16.mxu0 %vm1896_vm0, %v16144_v13 }
 0x225   :  { %v4299_v0 = vpop.f32.mrf.mxu1  ;;  %22467 = vst [vmem:[#allocation98_spill] sm:$0xff] %v17775_v58  ;;  %v3132_v52 = vadd.f32 %v17594_v8, %v3131_v12 }
 0x226   :  { %22465 = vst [vmem:[#allocation96_spill] sm:$0xff] %v17769_v43  ;;  %v17773_v50 = vpack.c.bf16 %v5143_v63, %v5142_v44  ;;  %22468 = vst [vmem:[#allocation99_spill] sm:$0xff] %v17780_v28  ;;  %v4300_v11 = vadd.f32 %v17594_v8, %v4299_v0  ;;  %v16110_v44 = vld [vmem:[%s22374_s0 + $0x7e0] sm:$0xff]   ;;  %v5148_v7 = vmax.f32 %v4308_v61, 0.0  ;;  %v3134_v53 = vpop.f32.mrf.mxu0  ;;  %v3143_v0 = vadd.f32 %v17594_v8, %v14465_v15 }
 0x227   :  { %v14757_v3 = vpop.f32.mrf.mxu1  ;;  %v4854_v34 = vmax.f32 %v3132_v52, 0.0  ;;  %v3135_v61 = vadd.f32 %v17594_v8, %v3134_v53  ;;  %14563 = vmatmul.mubr.msk.bf16.gmra.mxu0 %vm1896_vm0, %v16145_v54 }
 0x228   :  { %22466 = vst [vmem:[#allocation97_spill] sm:$0xff] %v17773_v50  ;;  %v4311_v6 = vadd.f32 %v17594_v8, %v14757_v3  ;;  %v14468_v3 = vpop.f32.mrf.mxu0  ;;  %v5146_v43 = vmax.f32 %v4300_v11, 0.0  ;;  %v4857_v51 = vmax.f32 %v3143_v0, 0.0  ;;  %v16112_v11 = vld [vmem:[%s22374_s0 + $0x7e8] sm:$0xff]  }
 0x229   :  { %v4302_v31 = vpop.f32.mrf.mxu1  ;;  %v4855_v13 = vmax.f32 %v3135_v61, 0.0  ;;  %v3156_v53 = vadd.f32 %v17594_v8, %v14468_v3  ;;  %v16147_v61 = vld [vmem:[%s22374_s0 + $0x358] sm:$0xff]  }
 0x22a   :  { %v5149_v35 = vmax.f32 %v4311_v6, 0.0  ;;  %v4303_v63 = vadd.f32 %v17594_v8, %v4302_v31  ;;  %v3147_v58 = vpop.f32.mrf.mxu0 }
 0x22b   :  { %v14760_v12 = vpop.f32.mrf.mxu1  ;;  %14855 = vmatmul.mubr.msk.bf16.gmra.mxu1 %vm1896_vm0, %v16108_v40  ;;  %v17807_v40 = vpack.c.bf16 %v4857_v51, %v4856_v47  ;;  %v16146_v47 = vld [vmem:[%s22374_s0 + $0x350] sm:$0xff]   ;;  %v4860_v51 = vmax.f32 %v3156_v53, 0.0 }
 0x22c   :  { %v17801_v50 = vpack.c.bf16 %v5149_v35, %v5148_v7  ;;  %v5147_v6 = vmax.f32 %v4303_v63, 0.0  ;;  %14858 = vmatprep.mubr.msk.bf16.mxu1 %vm1896_vm0, %v16110_v44  ;;  %v4324_v15 = vadd.f32 %v17594_v8, %v14760_v12  ;;  %v17812_v7 = vpack.c.bf16 %v4855_v13, %v4854_v34  ;;  %v14469_v44 = vpop.f32.mrf.mxu0  ;;  %14566 = vmatprep.mubr.msk.bf16.mxu0 %vm1896_vm0, %v16146_v47 }
 0x22d   :  { %v4315_v31 = vpop.f32.mrf.mxu1  ;;  %22471 = vst [vmem:[#allocation102_spill] sm:$0xff] %v17807_v40  ;;  %v3148_v63 = vadd.f32 %v17594_v8, %v3147_v58 }
 0x22e   :  { %22469 = vst [vmem:[#allocation100_spill] sm:$0xff] %v17801_v50  ;;  %v17805_v28 = vpack.c.bf16 %v5147_v6, %v5146_v43  ;;  %22472 = vst [vmem:[#allocation103_spill] sm:$0xff] %v17812_v7  ;;  %v4316_v54 = vadd.f32 %v17594_v8, %v4315_v31  ;;  %v16114_v43 = vld [vmem:[%s22374_s0 + $0x7f0] sm:$0xff]   ;;  %v5152_v0 = vmax.f32 %v4324_v15, 0.0  ;;  %v3150_v34 = vpop.f32.mrf.mxu0  ;;  %v3159_v31 = vadd.f32 %v17594_v8, %v14469_v44 }
 0x22f   :  { %v14761_v52 = vpop.f32.mrf.mxu1  ;;  %v4858_v13 = vmax.f32 %v3148_v63, 0.0  ;;  %v3151_v15 = vadd.f32 %v17594_v8, %v3150_v34  ;;  %14567 = vmatmul.mubr.msk.bf16.gmra.mxu0 %vm1896_vm0, %v16147_v61 }
 0x230   :  { %22470 = vst [vmem:[#allocation101_spill] sm:$0xff] %v17805_v28  ;;  %v4327_v35 = vadd.f32 %v17594_v8, %v14761_v52  ;;  %v14472_v52 = vpop.f32.mrf.mxu0  ;;  %v5150_v50 = vmax.f32 %v4316_v54, 0.0  ;;  %v4861_v53 = vmax.f32 %v3159_v31, 0.0  ;;  %v16116_v54 = vld [vmem:[%s22374_s0 + $0x7f8] sm:$0xff]  }
 0x231   :  { %v4318_v12 = vpop.f32.mrf.mxu1  ;;  %v4859_v47 = vmax.f32 %v3151_v15, 0.0  ;;  %v3172_v34 = vadd.f32 %v17594_v8, %v14472_v52 }
 0x232   :  { %v5153_v3 = vmax.f32 %v4327_v35, 0.0  ;;  %v4319_v6 = vadd.f32 %v17594_v8, %v4318_v12  ;;  %v3163_v40 = vpop.f32.mrf.mxu0 }
 0x233   :  { %v14764_v58 = vpop.f32.mrf.mxu1  ;;  %14859 = vmatmul.mubr.msk.bf16.gmra.mxu1 %vm1896_vm0, %v16112_v11  ;;  %v17839_v11 = vpack.c.bf16 %v4861_v53, %v4860_v51 }
 0x234   :  { %v17833_v28 = vpack.c.bf16 %v5153_v3, %v5152_v0  ;;  %v5151_v35 = vmax.f32 %v4319_v6, 0.0  ;;  %14862 = vmatprep.mubr.msk.bf16.mxu1 %vm1896_vm0, %v16114_v43  ;;  %v4340_v44 = vadd.f32 %v17594_v8, %v14764_v58  ;;  %v17844_v0 = vpack.c.bf16 %v4859_v47, %v4858_v13  ;;  %v14473_v43 = vpop.f32.mrf.mxu0  ;;  %v16149_v13 = vld [vmem:[%s22374_s0 + $0x368] sm:$0xff]  }
 0x235   :  { %v4331_v12 = vpop.f32.mrf.mxu1  ;;  %22475 = vst [vmem:[#allocation106_spill] sm:$0xff] %v17839_v11  ;;  %v3164_v6 = vadd.f32 %v17594_v8, %v3163_v40  ;;  %v3175_v53 = vadd.f32 %v17594_v8, %v14473_v43 }
 0x236   :  { %22473 = vst [vmem:[#allocation104_spill] sm:$0xff] %v17833_v28  ;;  %v17837_v7 = vpack.c.bf16 %v5151_v35, %v5150_v50  ;;  %v4332_v61 = vadd.f32 %v17594_v8, %v4331_v12  ;;  %v16148_v50 = vld [vmem:[%s22374_s0 + $0x360] sm:$0xff]   ;;  %v5156_v51 = vmax.f32 %v4340_v44, 0.0  ;;  %v3166_v58 = vpop.f32.mrf.mxu0  ;;  %v4864_v35 = vmax.f32 %v3172_v34, 0.0 }
 0x237   :  { %v14765_v63 = vpop.f32.mrf.mxu1  ;;  %14570 = vmatprep.mubr.msk.bf16.mxu0 %vm1896_vm0, %v16148_v50  ;;  %v4862_v12 = vmax.f32 %v3164_v6, 0.0  ;;  %v3167_v44 = vadd.f32 %v17594_v8, %v3166_v58  ;;  %v4865_v34 = vmax.f32 %v3175_v53, 0.0 }
 0x238   :  { %22474 = vst [vmem:[#allocation105_spill] sm:$0xff] %v17837_v7  ;;  %v4343_v3 = vadd.f32 %v17594_v8, %v14765_v63  ;;  %v14476_v47 = vpop.f32.mrf.mxu0  ;;  %14571 = vmatmul.mubr.msk.bf16.gmra.mxu0 %vm1896_vm0, %v16149_v13  ;;  %v5154_v63 = vmax.f32 %v4332_v61, 0.0 }
 0x239   :  { %v4334_v31 = vpop.f32.mrf.mxu1  ;;  %v17869_v6 = vpack.c.bf16 %v4865_v34, %v4864_v35  ;;  %v3188_v61 = vadd.f32 %v17594_v8, %v14476_v47 }
 0x23a   :  { %v5157_v15 = vmax.f32 %v4343_v3, 0.0  ;;  %v4335_v52 = vadd.f32 %v17594_v8, %v4334_v31  ;;  %v4863_v31 = vmax.f32 %v3167_v44, 0.0  ;;  %v3179_v7 = vpop.f32.mrf.mxu0 }
 0x23b   :  { %v14768_v40 = vpop.f32.mrf.mxu1  ;;  %14863 = vmatmul.mubr.msk.bf16.gmra.mxu1 %vm1896_vm0, %v16116_v54 }
 0x23c   :  { %v17862_v28 = vpack.c.bf16 %v5157_v15, %v5156_v51  ;;  %v5155_v3 = vmax.f32 %v4335_v52, 0.0  ;;  %14870 = vmatprep.mubr.msk.bf16.mxu1 %vm5537_vm1, %v16941_v1  ;;  %v4356_v43 = vadd.f32 %v17594_v8, %v14768_v40  ;;  %v17871_v11 = vpack.c.bf16 %v4863_v31, %v4862_v12  ;;  %v14477_v51 = vpop.f32.mrf.mxu0  ;;  %v16150_v52 = vld [vmem:[%s22374_s0 + $0x370] sm:$0xff]   ;;  %v16151_v12 = vld [vmem:[%s22374_s0 + $0x378] sm:$0xff]  }
 0x23d   :  { %v4347_v50 = vpop.f32.mrf.mxu1  ;;  %v3180_v15 = vadd.f32 %v17594_v8, %v3179_v7  ;;  %14574 = vmatprep.mubr.msk.bf16.mxu0 %vm1896_vm0, %v16150_v52 }
 0x23e   :  { %22476 = vst [vmem:[#allocation107_spill] sm:$0xff] %v17862_v28  ;;  %v17867_v54 = vpack.c.bf16 %v5155_v3, %v5154_v63  ;;  %v4348_v13 = vadd.f32 %v17594_v8, %v4347_v50  ;;  %v5160_v53 = vmax.f32 %v4356_v43, 0.0  ;;  %v3182_v35 = vpop.f32.mrf.mxu0  ;;  %v4868_v63 = vmax.f32 %v3188_v61, 0.0 }
 0x23f   :  { %v14769_v58 = vpop.f32.mrf.mxu1  ;;  %v3191_v3 = vadd.f32 %v17594_v8, %v14477_v51  ;;  %v4866_v34 = vmax.f32 %v3180_v15, 0.0  ;;  %v3183_v43 = vadd.f32 %v17594_v8, %v3182_v35 }
 0x240   :  { %22477 = vst [vmem:[#allocation108_spill] sm:$0xff] %v17867_v54  ;;  %v4359_v1 = vadd.f32 %v17594_v8, %v14769_v58  ;;  %v14480_v50 = vpop.f32.mrf.mxu0  ;;  %14575 = vmatmul.mubr.msk.bf16.gmra.mxu0 %vm1896_vm0, %v16151_v12  ;;  %v5158_v31 = vmax.f32 %v4348_v13, 0.0 }
 0x241   :  { %v4350_v40 = vpop.f32.mrf.mxu1  ;;  %v4869_v61 = vmax.f32 %v3191_v3, 0.0  ;;  %v3204_v13 = vadd.f32 %v17594_v8, %v14480_v50 }
 0x242   :  { %v5161_v44 = vmax.f32 %v4359_v1, 0.0  ;;  %v4351_v47 = vadd.f32 %v17594_v8, %v4350_v40  ;;  %v4867_v40 = vmax.f32 %v3183_v43, 0.0  ;;  %v3195_v28 = vpop.f32.mrf.mxu0 }
 0x243   :  { %v14772_v7 = vpop.f32.mrf.mxu1  ;;  %14871 = vmatmul.mubr.msk.bf16.vlgmr.msra.gmra.mxu1 %vm5537_vm1, %v16936_v62  ;;  %v17897_v15 = vpack.c.bf16 %v4869_v61, %v4868_v63 }
 0x244   :  { %v17890_v58 = vpack.c.bf16 %v5161_v44, %v5160_v53  ;;  %v5159_v1 = vmax.f32 %v4351_v47, 0.0  ;;  %14874 = vmatprep.mubr.msk.bf16.mxu1 %vm5537_vm1, %v16973_v46  ;;  %v4372_v51 = vadd.f32 %v17594_v8, %v14772_v7  ;;  %v17899_v54 = vpack.c.bf16 %v4867_v40, %v4866_v34  ;;  %v14481_v53 = vpop.f32.mrf.mxu0  ;;  %v16152_v47 = vld [vmem:[%s22374_s0 + $0x380] sm:$0xff]   ;;  %v16153_v34 = vld [vmem:[%s22374_s0 + $0x388] sm:$0xff]  }
 0x245   :  { %v4363_v52 = vpop.f32.mrf.mxu1  ;;  %v3196_v44 = vadd.f32 %v17594_v8, %v3195_v28  ;;  %14578 = vmatprep.mubr.msk.bf16.mxu0 %vm1896_vm0, %v16152_v47 }
 0x246   :  { %22478 = vst [vmem:[#allocation109_spill] sm:$0xff] %v17890_v58  ;;  %v17895_v62 = vpack.c.bf16 %v5159_v1, %v5158_v31  ;;  %v4364_v12 = vadd.f32 %v17594_v8, %v4363_v52  ;;  %v5164_v3 = vmax.f32 %v4372_v51, 0.0  ;;  %v3198_v63 = vpop.f32.mrf.mxu0  ;;  %v4872_v31 = vmax.f32 %v3204_v13, 0.0 }
 0x247   :  { %v14773_v35 = vpop.f32.mrf.mxu1  ;;  %v3207_v1 = vadd.f32 %v17594_v8, %v14481_v53  ;;  %v4870_v61 = vmax.f32 %v3196_v44, 0.0  ;;  %v3199_v51 = vadd.f32 %v17594_v8, %v3198_v63 }
 0x248   :  { %22479 = vst [vmem:[#allocation110_spill] sm:$0xff] %v17895_v62  ;;  %v4375_v46 = vadd.f32 %v17594_v8, %v14773_v35  ;;  %v14484_v52 = vpop.f32.mrf.mxu0  ;;  %14579 = vmatmul.mubr.msk.bf16.gmra.mxu0 %vm1896_vm0, %v16153_v34  ;;  %v5162_v40 = vmax.f32 %v4364_v12, 0.0 }
 0x249   :  { %v4366_v7 = vpop.f32.mrf.mxu1  ;;  %v4873_v13 = vmax.f32 %v3207_v1, 0.0  ;;  %v3220_v12 = vadd.f32 %v17594_v8, %v14484_v52 }
 0x24a   :  { %v5165_v43 = vmax.f32 %v4375_v46, 0.0  ;;  %v4367_v50 = vadd.f32 %v17594_v8, %v4366_v7  ;;  %v4871_v7 = vmax.f32 %v3199_v51, 0.0  ;;  %v3211_v58 = vpop.f32.mrf.mxu0 }
 0x24b   :  { %v14776_v28 = vpop.f32.mrf.mxu1  ;;  %14875 = vmatmul.mubr.msk.bf16.gmra.mxu1 %vm5537_vm1, %v16968_v42  ;;  %v17925_v44 = vpack.c.bf16 %v4873_v13, %v4872_v31 }
 0x24c   :  { %v17918_v35 = vpack.c.bf16 %v5165_v43, %v5164_v3  ;;  %v5163_v46 = vmax.f32 %v4367_v50, 0.0  ;;  %14878 = vmatprep.mubr.msk.bf16.mxu1 %vm5537_vm1, %v17005_v36  ;;  %v4388_v53 = vadd.f32 %v17594_v8, %v14776_v28  ;;  %v17927_v62 = vpack.c.bf16 %v4871_v7, %v4870_v61  ;;  %v14485_v3 = vpop.f32.mrf.mxu0  ;;  %v16154_v50 = vld [vmem:[%s22374_s0 + $0x390] sm:$0xff]   ;;  %v16155_v61 = vld [vmem:[%s22374_s0 + $0x398] sm:$0xff]  }
 0x24d   :  { %v4379_v47 = vpop.f32.mrf.mxu1  ;;  %v3212_v43 = vadd.f32 %v17594_v8, %v3211_v58  ;;  %14582 = vmatprep.mubr.msk.bf16.mxu0 %vm1896_vm0, %v16154_v50 }
 0x24e   :  { %22480 = vst [vmem:[#allocation111_spill] sm:$0xff] %v17918_v35  ;;  %v17923_v42 = vpack.c.bf16 %v5163_v46, %v5162_v40  ;;  %v4380_v34 = vadd.f32 %v17594_v8, %v4379_v47  ;;  %v5168_v1 = vmax.f32 %v4388_v53, 0.0  ;;  %v3214_v31 = vpop.f32.mrf.mxu0  ;;  %v4876_v40 = vmax.f32 %v3220_v12, 0.0 }
 0x24f   :  { %v14777_v63 = vpop.f32.mrf.mxu1  ;;  %v3223_v46 = vadd.f32 %v17594_v8, %v14485_v3  ;;  %v4874_v13 = vmax.f32 %v3212_v43, 0.0  ;;  %v3215_v53 = vadd.f32 %v17594_v8, %v3214_v31 }
 0x250   :  { %22481 = vst [vmem:[#allocation112_spill] sm:$0xff] %v17923_v42  ;;  %v4391_v36 = vadd.f32 %v17594_v8, %v14777_v63  ;;  %v14488_v47 = vpop.f32.mrf.mxu0  ;;  %14583 = vmatmul.mubr.msk.bf16.gmra.mxu0 %vm1896_vm0, %v16155_v61  ;;  %v5166_v7 = vmax.f32 %v4380_v34, 0.0 }
 0x251   :  { %v4382_v28 = vpop.f32.mrf.mxu1  ;;  %v4877_v12 = vmax.f32 %v3223_v46, 0.0  ;;  %v3236_v34 = vadd.f32 %v17594_v8, %v14488_v47 }
 0x252   :  { %v5169_v51 = vmax.f32 %v4391_v36, 0.0  ;;  %v4383_v52 = vadd.f32 %v17594_v8, %v4382_v28  ;;  %v4875_v28 = vmax.f32 %v3215_v53, 0.0  ;;  %v3227_v35 = vpop.f32.mrf.mxu0 }
 0x253   :  { %v14780_v58 = vpop.f32.mrf.mxu1  ;;  %14879 = vmatmul.mubr.msk.bf16.gmra.mxu1 %vm5537_vm1, %v17000_v29  ;;  %v17953_v43 = vpack.c.bf16 %v4877_v12, %v4876_v40 }
 0x254   :  { %v17946_v63 = vpack.c.bf16 %v5169_v51, %v5168_v1  ;;  %v5167_v36 = vmax.f32 %v4383_v52, 0.0  ;;  %14882 = vmatprep.mubr.msk.bf16.mxu1 %vm5537_vm1, %v17037_v33  ;;  %v4404_v3 = vadd.f32 %v17594_v8, %v14780_v58  ;;  %v17955_v42 = vpack.c.bf16 %v4875_v28, %v4874_v13  ;;  %v14489_v1 = vpop.f32.mrf.mxu0  ;;  %v16156_v52 = vld [vmem:[%s22374_s0 + $0x3a0] sm:$0xff]   ;;  %v16157_v13 = vld [vmem:[%s22374_s0 + $0x3a8] sm:$0xff]  }
 0x255   :  { %v4395_v50 = vpop.f32.mrf.mxu1  ;;  %v3228_v51 = vadd.f32 %v17594_v8, %v3227_v35  ;;  %14586 = vmatprep.mubr.msk.bf16.mxu0 %vm1896_vm0, %v16156_v52 }
 0x256   :  { %22482 = vst [vmem:[#allocation113_spill] sm:$0xff] %v17946_v63  ;;  %v17951_v29 = vpack.c.bf16 %v5167_v36, %v5166_v7  ;;  %v4396_v61 = vadd.f32 %v17594_v8, %v4395_v50  ;;  %v5172_v46 = vmax.f32 %v4404_v3, 0.0  ;;  %v3230_v40 = vpop.f32.mrf.mxu0  ;;  %v4880_v7 = vmax.f32 %v3236_v34, 0.0 }
 0x257   :  { %v14781_v31 = vpop.f32.mrf.mxu1  ;;  %v3239_v36 = vadd.f32 %v17594_v8, %v14489_v1  ;;  %v4878_v12 = vmax.f32 %v3228_v51, 0.0  ;;  %v3231_v3 = vadd.f32 %v17594_v8, %v3230_v40 }
 0x258   :  { %22483 = vst [vmem:[#allocation114_spill] sm:$0xff] %v17951_v29  ;;  %v4407_v33 = vadd.f32 %v17594_v8, %v14781_v31  ;;  %v14492_v50 = vpop.f32.mrf.mxu0  ;;  %14587 = vmatmul.mubr.msk.bf16.gmra.mxu0 %vm1896_vm0, %v16157_v13  ;;  %v5170_v28 = vmax.f32 %v4396_v61, 0.0 }
 0x259   :  { %v4398_v58 = vpop.f32.mrf.mxu1  ;;  %v4881_v34 = vmax.f32 %v3239_v36, 0.0  ;;  %v3252_v61 = vadd.f32 %v17594_v8, %v14492_v50 }
 0x25a   :  { %v5173_v53 = vmax.f32 %v4407_v33, 0.0  ;;  %v4399_v47 = vadd.f32 %v17594_v8, %v4398_v58  ;;  %v4879_v58 = vmax.f32 %v3231_v3, 0.0  ;;  %v3243_v63 = vpop.f32.mrf.mxu0 }
 0x25b   :  { %v14784_v35 = vpop.f32.mrf.mxu1  ;;  %14883 = vmatmul.mubr.msk.bf16.gmra.mxu1 %vm5537_vm1, %v17032_v24  ;;  %v17981_v51 = vpack.c.bf16 %v4881_v34, %v4880_v7 }
 0x25c   :  { %v17974_v31 = vpack.c.bf16 %v5173_v53, %v5172_v46  ;;  %v5171_v33 = vmax.f32 %v4399_v47, 0.0  ;;  %14886 = vmatprep.mubr.msk.bf16.mxu1 %vm5537_vm1, %v17069_v38  ;;  %v4420_v1 = vadd.f32 %v17594_v8, %v14784_v35  ;;  %v17983_v29 = vpack.c.bf16 %v4879_v58, %v4878_v12  ;;  %v14493_v46 = vpop.f32.mrf.mxu0  ;;  %v16158_v47 = vld [vmem:[%s22374_s0 + $0x3b0] sm:$0xff]   ;;  %v16159_v12 = vld [vmem:[%s22374_s0 + $0x3b8] sm:$0xff]  }
 0x25d   :  { %v4411_v52 = vpop.f32.mrf.mxu1  ;;  %v3244_v53 = vadd.f32 %v17594_v8, %v3243_v63  ;;  %14590 = vmatprep.mubr.msk.bf16.mxu0 %vm1896_vm0, %v16158_v47 }
 0x25e   :  { %22484 = vst [vmem:[#allocation115_spill] sm:$0xff] %v17974_v31  ;;  %v17979_v24 = vpack.c.bf16 %v5171_v33, %v5170_v28  ;;  %v4412_v13 = vadd.f32 %v17594_v8, %v4411_v52  ;;  %v5176_v36 = vmax.f32 %v4420_v1, 0.0  ;;  %v3246_v7 = vpop.f32.mrf.mxu0  ;;  %v4884_v28 = vmax.f32 %v3252_v61, 0.0 }
 0x25f   :  { %v14785_v40 = vpop.f32.mrf.mxu1  ;;  %v3255_v33 = vadd.f32 %v17594_v8, %v14493_v46  ;;  %v4882_v34 = vmax.f32 %v3244_v53, 0.0  ;;  %v3247_v1 = vadd.f32 %v17594_v8, %v3246_v7 }
 0x260   :  { %22485 = vst [vmem:[#allocation116_spill] sm:$0xff] %v17979_v24  ;;  %v4423_v38 = vadd.f32 %v17594_v8, %v14785_v40  ;;  %v14496_v52 = vpop.f32.mrf.mxu0  ;;  %14591 = vmatmul.mubr.msk.bf16.gmra.mxu0 %vm1896_vm0, %v16159_v12  ;;  %v5174_v58 = vmax.f32 %v4412_v13, 0.0 }
 0x261   :  { %v4414_v35 = vpop.f32.mrf.mxu1  ;;  %v4885_v61 = vmax.f32 %v3255_v33, 0.0  ;;  %v3268_v13 = vadd.f32 %v17594_v8, %v14496_v52 }
 0x262   :  { %v5177_v3 = vmax.f32 %v4423_v38, 0.0  ;;  %v4415_v50 = vadd.f32 %v17594_v8, %v4414_v35  ;;  %v4883_v35 = vmax.f32 %v3247_v1, 0.0  ;;  %v3259_v31 = vpop.f32.mrf.mxu0 }
 0x263   :  { %v14788_v63 = vpop.f32.mrf.mxu1  ;;  %14887 = vmatmul.mubr.msk.bf16.gmra.mxu1 %vm5537_vm1, %v17064_v26  ;;  %v18009_v53 = vpack.c.bf16 %v4885_v61, %v4884_v28 }
 0x264   :  { %v18002_v40 = vpack.c.bf16 %v5177_v3, %v5176_v36  ;;  %v5175_v38 = vmax.f32 %v4415_v50, 0.0  ;;  %14890 = vmatprep.mubr.msk.bf16.mxu1 %vm5537_vm1, %v17101_v56  ;;  %v4436_v46 = vadd.f32 %v17594_v8, %v14788_v63  ;;  %v18011_v24 = vpack.c.bf16 %v4883_v35, %v4882_v34  ;;  %v14497_v36 = vpop.f32.mrf.mxu0  ;;  %v16160_v50 = vld [vmem:[%s22374_s0 + $0x3c0] sm:$0xff]   ;;  %v16161_v34 = vld [vmem:[%s22374_s0 + $0x3c8] sm:$0xff]  }
 0x265   :  { %v4427_v47 = vpop.f32.mrf.mxu1  ;;  %v3260_v3 = vadd.f32 %v17594_v8, %v3259_v31  ;;  %14594 = vmatprep.mubr.msk.bf16.mxu0 %vm1896_vm0, %v16160_v50 }
 0x266   :  { %22486 = vst [vmem:[#allocation117_spill] sm:$0xff] %v18002_v40  ;;  %v18007_v26 = vpack.c.bf16 %v5175_v38, %v5174_v58  ;;  %v4428_v12 = vadd.f32 %v17594_v8, %v4427_v47  ;;  %v5180_v33 = vmax.f32 %v4436_v46, 0.0  ;;  %v3262_v28 = vpop.f32.mrf.mxu0  ;;  %v4888_v58 = vmax.f32 %v3268_v13, 0.0 }
 0x267   :  { %v14789_v7 = vpop.f32.mrf.mxu1  ;;  %v3271_v38 = vadd.f32 %v17594_v8, %v14497_v36  ;;  %v4886_v61 = vmax.f32 %v3260_v3, 0.0  ;;  %v3263_v46 = vadd.f32 %v17594_v8, %v3262_v28  ;;  %v18034_v36 = vld [vmem:[#allocation4] ss:$0 sm:$0xff] }
 0x268   :  { %22487 = vst [vmem:[#allocation118_spill] sm:$0xff] %v18007_v26  ;;  %v4439_v56 = vadd.f32 %v17594_v8, %v14789_v7  ;;  %v14500_v47 = vpop.f32.mrf.mxu0  ;;  %14595 = vmatmul.mubr.msk.bf16.gmra.mxu0 %vm1896_vm0, %v16161_v34  ;;  %v5178_v35 = vmax.f32 %v4428_v12, 0.0 }
 0x269   :  { %v4430_v63 = vpop.f32.mrf.mxu1  ;;  %v4889_v13 = vmax.f32 %v3271_v38, 0.0  ;;  %v3284_v34 = vadd.f32 %v18034_v36, %v14500_v47  ;;  %v16162_v38 = vld [vmem:[%s22374_s0 + $0x3d0] sm:$0xff]  }
 0x26a   :  { %v5181_v1 = vmax.f32 %v4439_v56, 0.0  ;;  %v4431_v52 = vadd.f32 %v17594_v8, %v4430_v63  ;;  %v18037_v3 = vpop.f32.mrf.mxu0  ;;  %14598 = vmatprep.mubr.msk.bf16.mxu0 %vm1896_vm0, %v16162_v38 }
 0x26b   :  { %v14792_v31 = vpop.f32.mrf.mxu1  ;;  %14891 = vmatmul.mubr.msk.bf16.gmra.mxu1 %vm5537_vm1, %v17096_v37  ;;  %v4887_v37 = vmax.f32 %v3263_v46, 0.0  ;;  %v18041_v28 = vpack.c.bf16 %v4889_v13, %v4888_v58  ;;  %v16163_v58 = vld [vmem:[%s22374_s0 + $0x3d8] sm:$0xff]  }
 0x26c   :  { %v18030_v7 = vpack.c.bf16 %v5181_v1, %v5180_v33  ;;  %v5179_v56 = vmax.f32 %v4431_v52, 0.0  ;;  %14894 = vmatprep.mubr.msk.bf16.mxu1 %vm5537_vm1, %v17133_v4  ;;  %v4452_v50 = vadd.f32 %v18034_v36, %v14792_v31  ;;  %v14501_v1 = vpop.f32.mrf.mxu0 }
 0x26d   :  { %v4443_v63 = vpop.f32.mrf.mxu1  ;;  %v18043_v33 = vpack.c.bf16 %v4887_v37, %v4886_v61  ;;  %v3287_v13 = vadd.f32 %v18034_v36, %v14501_v1 }
 0x26e   :  { %22488 = vst [vmem:[#allocation119_spill] sm:$0xff] %v18030_v7  ;;  %v18039_v8 = vpack.c.bf16 %v5179_v56, %v5178_v35  ;;  %v4444_v4 = vadd.f32 %v18034_v36, %v4443_v63  ;;  %v5184_v31 = vmax.f32 %v4452_v50, 0.0  ;;  %v18051_v35 = vpop.f32.mrf.mxu0  ;;  %v4892_v56 = vmax.f32 %v3284_v34, 0.0 }
 0x26f   :  { %v14793_v12 = vpop.f32.mrf.mxu1 }
 0x270   :  { %22489 = vst [vmem:[#allocation120_spill] sm:$0xff] %v18039_v8  ;;  %v4455_v52 = vadd.f32 %v18034_v36, %v14793_v12  ;;  %v14504_v50 = vpop.f32.mrf.mxu0  ;;  %14599 = vmatmul.mubr.msk.bf16.gmra.mxu0 %vm1896_vm0, %v16163_v58  ;;  %v5182_v37 = vmax.f32 %v4444_v4, 0.0 }
 0x271   :  { %v4446_v46 = vpop.f32.mrf.mxu1  ;;  %v3300_v58 = vadd.f32 %v18034_v36, %v14504_v50 }
 0x272   :  { %v5185_v61 = vmax.f32 %v4455_v52, 0.0  ;;  %v4447_v47 = vadd.f32 %v18034_v36, %v4446_v46  ;;  %v4893_v52 = vmax.f32 %v3287_v13, 0.0  ;;  %v18067_v46 = vpop.f32.mrf.mxu0 }
 0x273   :  { %v14796_v63 = vpop.f32.mrf.mxu1  ;;  %14895 = vmatmul.mubr.msk.bf16.gmra.mxu1 %vm5537_vm1, %v17128_v45 }
 0x274   :  { %v18062_v12 = vpack.c.bf16 %v5185_v61, %v5184_v31  ;;  %v5183_v7 = vmax.f32 %v4447_v47, 0.0  ;;  %14898 = vmatprep.mubr.msk.bf16.mxu1 %vm5537_vm1, %v17167_v39  ;;  %v4468_v34 = vadd.f32 %v18034_v36, %v14796_v63  ;;  %v18071_v8 = vpack.c.bf16 %v4893_v52, %v4892_v56  ;;  %v14505_v4 = vpop.f32.mrf.mxu0  ;;  %v16164_v39 = vld [vmem:[%s22374_s0 + $0x3e0] sm:$0xff]  }
 0x275   :  { %v4459_v1 = vpop.f32.mrf.mxu1  ;;  %v3303_v52 = vadd.f32 %v18034_v36, %v14505_v4  ;;  %14602 = vmatprep.mubr.msk.bf16.mxu0 %vm1896_vm0, %v16164_v39 }
 0x276   :  { %22490 = vst [vmem:[#allocation121_spill] sm:$0xff] %v18062_v12  ;;  %v18069_v38 = vpack.c.bf16 %v5183_v7, %v5182_v37  ;;  %v4460_v31 = vadd.f32 %v18034_v36, %v4459_v1  ;;  %v5188_v47 = vmax.f32 %v4468_v34, 0.0  ;;  %v18079_v63 = vpop.f32.mrf.mxu0  ;;  %v16165_v7 = vld [vmem:[%s22374_s0 + $0x3e8] sm:$0xff]   ;;  %v4896_v37 = vmax.f32 %v3300_v58, 0.0 }
 0x277   :  { %v14797_v45 = vpop.f32.mrf.mxu1 }
 0x278   :  { %22491 = vst [vmem:[#allocation122_spill] sm:$0xff] %v18069_v38  ;;  %v4471_v61 = vadd.f32 %v18034_v36, %v14797_v45  ;;  %v14508_v34 = vpop.f32.mrf.mxu0  ;;  %14603 = vmatmul.mubr.msk.bf16.gmra.mxu0 %vm1896_vm0, %v16165_v7  ;;  %v5186_v45 = vmax.f32 %v4460_v31, 0.0 }
 0x279   :  { %v4462_v13 = vpop.f32.mrf.mxu1  ;;  %v3316_v7 = vadd.f32 %v18034_v36, %v14508_v34 }
 0x27a   :  { %v5189_v56 = vmax.f32 %v4471_v61, 0.0  ;;  %v4463_v50 = vadd.f32 %v18034_v36, %v4462_v13  ;;  %v4897_v61 = vmax.f32 %v3303_v52, 0.0  ;;  %v18095_v13 = vpop.f32.mrf.mxu0 }
 0x27b   :  { %v14800_v1 = vpop.f32.mrf.mxu1  ;;  %14899 = vmatmul.mubr.msk.bf16.gmra.mxu1 %vm5537_vm1, %v17162_v59 }
 0x27c   :  { %v18090_v12 = vpack.c.bf16 %v5189_v56, %v5188_v47  ;;  %v5187_v38 = vmax.f32 %v4463_v50, 0.0  ;;  %14902 = vmatprep.mubr.msk.bf16.mxu1 %vm5537_vm1, %v17202_v17  ;;  %v4484_v58 = vadd.f32 %v18034_v36, %v14800_v1  ;;  %v18099_v40 = vpack.c.bf16 %v4897_v61, %v4896_v37  ;;  %v14509_v31 = vpop.f32.mrf.mxu0  ;;  %v16166_v17 = vld [vmem:[%s22374_s0 + $0x3f0] sm:$0xff]  }
 0x27d   :  { %v4475_v4 = vpop.f32.mrf.mxu1  ;;  %v3319_v61 = vadd.f32 %v18034_v36, %v14509_v31  ;;  %14606 = vmatprep.mubr.msk.bf16.mxu0 %vm1896_vm0, %v16166_v17 }
 0x27e   :  { %22492 = vst [vmem:[#allocation123_spill] sm:$0xff] %v18090_v12  ;;  %v18097_v39 = vpack.c.bf16 %v5187_v38, %v5186_v45  ;;  %22494 = vst [vmem:[#allocation125_spill] sm:$0xff] %v18099_v40  ;;  %v4476_v47 = vadd.f32 %v18034_v36, %v4475_v4  ;;  %v5192_v50 = vmax.f32 %v4484_v58, 0.0  ;;  %v18107_v1 = vpop.f32.mrf.mxu0  ;;  %v16167_v38 = vld [vmem:[%s22374_s0 + $0x3f8] sm:$0xff]   ;;  %v4900_v45 = vmax.f32 %v3316_v7, 0.0 }
 0x27f   :  { %v14801_v59 = vpop.f32.mrf.mxu1 }
 0x280   :  { %22493 = vst [vmem:[#allocation124_spill] sm:$0xff] %v18097_v39  ;;  %v4487_v56 = vadd.f32 %v18034_v36, %v14801_v59  ;;  %v14512_v58 = vpop.f32.mrf.mxu0  ;;  %14607 = vmatmul.mubr.msk.bf16.gmra.mxu0 %vm1896_vm0, %v16167_v38  ;;  %v5190_v59 = vmax.f32 %v4476_v47, 0.0 }
 0x281   :  { %v4478_v52 = vpop.f32.mrf.mxu1  ;;  %v3332_v38 = vadd.f32 %v18034_v36, %v14512_v58 }
 0x282   :  { %v5193_v37 = vmax.f32 %v4487_v56, 0.0  ;;  %v4479_v34 = vadd.f32 %v18034_v36, %v4478_v52  ;;  %v4901_v56 = vmax.f32 %v3319_v61, 0.0  ;;  %v18123_v52 = vpop.f32.mrf.mxu0 }
 0x283   :  { %v14804_v4 = vpop.f32.mrf.mxu1  ;;  %14903 = vmatmul.mubr.msk.bf16.gmra.mxu1 %vm5537_vm1, %v17194_v22  ;;  %v4904_v40 = vmax.f32 %v3332_v38, 0.0 }
 0x284   :  { %v18118_v12 = vpack.c.bf16 %v5193_v37, %v5192_v50  ;;  %v5191_v39 = vmax.f32 %v4479_v34, 0.0  ;;  %14906 = vmatprep.mubr.msk.bf16.mxu1 %vm5537_vm1, %v17234_v25  ;;  %v4500_v7 = vadd.f32 %v18034_v36, %v14804_v4  ;;  %v18127_v26 = vpack.c.bf16 %v4901_v56, %v4900_v45  ;;  %v14513_v47 = vpop.f32.mrf.mxu0 }
 0x285   :  { %v4491_v31 = vpop.f32.mrf.mxu1 }
 0x286   :  { %22495 = vst [vmem:[#allocation126_spill] sm:$0xff] %v18118_v12  ;;  %v18125_v17 = vpack.c.bf16 %v5191_v39, %v5190_v59  ;;  %22497 = vst [vmem:[#allocation128_spill] sm:$0xff] %v18127_v26  ;;  %v4492_v50 = vadd.f32 %v18034_v36, %v4491_v31  ;;  %v5196_v34 = vmax.f32 %v4500_v7, 0.0  ;;  %v18132_v61 = vpop.f32.mrf.mxu0  ;;  %v3335_v39 = vadd.f32 %v18034_v36, %v14513_v47 }
 0x287   :  { %v14805_v22 = vpop.f32.mrf.mxu1 }
 0x288   :  { %22496 = vst [vmem:[#allocation127_spill] sm:$0xff] %v18125_v17  ;;  %v4503_v37 = vadd.f32 %v18034_v36, %v14805_v22  ;;  %v14516_v58 = vpop.f32.mrf.mxu0  ;;  %v5194_v59 = vmax.f32 %v4492_v50, 0.0  ;;  %v4905_v7 = vmax.f32 %v3335_v39, 0.0 }
 0x289   :  { %v4494_v25 = vpop.f32.mrf.mxu1 }
 0x28a   :  { %v5197_v4 = vmax.f32 %v4503_v37, 0.0  ;;  %v4495_v12 = vadd.f32 %v18034_v36, %v4494_v25  ;;  %v18143_v25 = vpop.f32.mrf.mxu0  ;;  %v18147_v47 = vpack.c.bf16 %v4905_v7, %v4904_v40 }
 0x28b   :  { %v14808_v45 = vpop.f32.mrf.mxu1  ;;  %14907 = vmatmul.mubr.msk.bf16.gmra.mxu1 %vm5537_vm1, %v17229_v5  ;;  %v3348_v5 = vadd.f32 %v18034_v36, %v14516_v58 }
 0x28c   :  { %v18138_v56 = vpack.c.bf16 %v5197_v4, %v5196_v34  ;;  %v5195_v31 = vmax.f32 %v4495_v12, 0.0  ;;  %14910 = vmatprep.mubr.msk.bf16.mxu1 %vm5537_vm1, %v17266_v57  ;;  %v4516_v22 = vadd.f32 %v18034_v36, %v14808_v45  ;;  %22500 = vst [vmem:[#allocation131_spill] sm:$0xff] %v18147_v47  ;;  %v14517_v50 = vpop.f32.mrf.mxu0 }
 0x28d   :  { %v4507_v37 = vpop.f32.mrf.mxu1  ;;  %v4908_v26 = vmax.f32 %v3348_v5, 0.0 }
 0x28e   :  { %22498 = vst [vmem:[#allocation129_spill] sm:$0xff] %v18138_v56  ;;  %v18145_v38 = vpack.c.bf16 %v5195_v31, %v5194_v59  ;;  %v4508_v34 = vadd.f32 %v18034_v36, %v4507_v37  ;;  %v5200_v4 = vmax.f32 %v4516_v22, 0.0  ;;  %v18152_v39 = vpop.f32.mrf.mxu0  ;;  %v3351_v59 = vadd.f32 %v18034_v36, %v14517_v50 }
 0x28f   :  { %v14809_v17 = vpop.f32.mrf.mxu1 }
 0x290   :  { %22499 = vst [vmem:[#allocation130_spill] sm:$0xff] %v18145_v38  ;;  %v4519_v12 = vadd.f32 %v18034_v36, %v14809_v17  ;;  %v14520_v58 = vpop.f32.mrf.mxu0  ;;  %v5198_v31 = vmax.f32 %v4508_v34, 0.0  ;;  %v4909_v17 = vmax.f32 %v3351_v59, 0.0 }
 0x291   :  { %v4510_v57 = vpop.f32.mrf.mxu1 }
 0x292   :  { %v5201_v45 = vmax.f32 %v4519_v12, 0.0  ;;  %v4511_v56 = vadd.f32 %v18034_v36, %v4510_v57  ;;  %v18163_v57 = vpop.f32.mrf.mxu0  ;;  %v18167_v50 = vpack.c.bf16 %v4909_v17, %v4908_v26 }
 0x293   :  { %v14812_v40 = vpop.f32.mrf.mxu1  ;;  %14911 = vmatmul.mubr.msk.bf16.gmra.mxu1 %vm5537_vm1, %v17261_v2  ;;  %v3364_v2 = vadd.f32 %v18034_v36, %v14520_v58 }
 0x294   :  { %v18158_v7 = vpack.c.bf16 %v5201_v45, %v5200_v4  ;;  %v5199_v37 = vmax.f32 %v4511_v56, 0.0  ;;  %14914 = vmatprep.mubr.msk.bf16.mxu1 %vm5537_vm1, %v17298_v21  ;;  %v4532_v22 = vadd.f32 %v18034_v36, %v14812_v40  ;;  %22503 = vst [vmem:[#allocation134_spill] sm:$0xff] %v18167_v50  ;;  %v14521_v34 = vpop.f32.mrf.mxu0 }
 0x295   :  { %v4523_v12 = vpop.f32.mrf.mxu1  ;;  %v4912_v47 = vmax.f32 %v3364_v2, 0.0 }
 0x296   :  { %22501 = vst [vmem:[#allocation132_spill] sm:$0xff] %v18158_v7  ;;  %v18165_v5 = vpack.c.bf16 %v5199_v37, %v5198_v31  ;;  %v4524_v4 = vadd.f32 %v18034_v36, %v4523_v12  ;;  %v5204_v45 = vmax.f32 %v4532_v22, 0.0  ;;  %v18172_v59 = vpop.f32.mrf.mxu0  ;;  %v3367_v31 = vadd.f32 %v18034_v36, %v14521_v34 }
 0x297   :  { %v14813_v38 = vpop.f32.mrf.mxu1 }
 0x298   :  { %22502 = vst [vmem:[#allocation133_spill] sm:$0xff] %v18165_v5  ;;  %v4535_v56 = vadd.f32 %v18034_v36, %v14813_v38  ;;  %v14524_v58 = vpop.f32.mrf.mxu0  ;;  %v5202_v37 = vmax.f32 %v4524_v4, 0.0  ;;  %v4913_v38 = vmax.f32 %v3367_v31, 0.0 }
 0x299   :  { %v4526_v21 = vpop.f32.mrf.mxu1 }
 0x29a   :  { %v5205_v40 = vmax.f32 %v4535_v56, 0.0  ;;  %v4527_v7 = vadd.f32 %v18034_v36, %v4526_v21  ;;  %v18183_v21 = vpop.f32.mrf.mxu0  ;;  %v18187_v34 = vpack.c.bf16 %v4913_v38, %v4912_v47 }
 0x29b   :  { %v14816_v26 = vpop.f32.mrf.mxu1  ;;  %14915 = vmatmul.mubr.msk.bf16.gmra.mxu1 %vm5537_vm1, %v17293_v20  ;;  %v3380_v20 = vadd.f32 %v18034_v36, %v14524_v58 }
 0x29c   :  { %v18178_v17 = vpack.c.bf16 %v5205_v40, %v5204_v45  ;;  %v5203_v12 = vmax.f32 %v4527_v7, 0.0  ;;  %14918 = vmatprep.mubr.msk.bf16.mxu1 %vm5537_vm1, %v17330_v23  ;;  %v4548_v22 = vadd.f32 %v18034_v36, %v14816_v26  ;;  %22506 = vst [vmem:[#allocation137_spill] sm:$0xff] %v18187_v34  ;;  %v14525_v4 = vpop.f32.mrf.mxu0 }
 0x29d   :  { %v4539_v56 = vpop.f32.mrf.mxu1  ;;  %v4916_v50 = vmax.f32 %v3380_v20, 0.0 }
 0x29e   :  { %22504 = vst [vmem:[#allocation135_spill] sm:$0xff] %v18178_v17  ;;  %v18185_v2 = vpack.c.bf16 %v5203_v12, %v5202_v37  ;;  %v4540_v45 = vadd.f32 %v18034_v36, %v4539_v56  ;;  %v5208_v40 = vmax.f32 %v4548_v22, 0.0  ;;  %v18192_v31 = vpop.f32.mrf.mxu0  ;;  %v3383_v37 = vadd.f32 %v18034_v36, %v14525_v4 }
 0x29f   :  { %v14817_v5 = vpop.f32.mrf.mxu1 }
 0x2a0   :  { %22505 = vst [vmem:[#allocation136_spill] sm:$0xff] %v18185_v2  ;;  %v4551_v7 = vadd.f32 %v18034_v36, %v14817_v5  ;;  %v14528_v58 = vpop.f32.mrf.mxu0  ;;  %v5206_v12 = vmax.f32 %v4540_v45, 0.0  ;;  %v4917_v5 = vmax.f32 %v3383_v37, 0.0 }
 0x2a1   :  { %v4542_v23 = vpop.f32.mrf.mxu1 }
 0x2a2   :  { %v5209_v26 = vmax.f32 %v4551_v7, 0.0  ;;  %v4543_v17 = vadd.f32 %v18034_v36, %v4542_v23  ;;  %v18203_v23 = vpop.f32.mrf.mxu0  ;;  %v18207_v4 = vpack.c.bf16 %v4917_v5, %v4916_v50 }
 0x2a3   :  { %v14820_v47 = vpop.f32.mrf.mxu1  ;;  %14919 = vmatmul.mubr.msk.bf16.gmra.mxu1 %vm5537_vm1, %v17325_v16  ;;  %v3396_v16 = vadd.f32 %v18034_v36, %v14528_v58 }
 0x2a4   :  { %v18198_v38 = vpack.c.bf16 %v5209_v26, %v5208_v40  ;;  %v5207_v56 = vmax.f32 %v4543_v17, 0.0  ;;  %14922 = vmatprep.mubr.msk.bf16.mxu1 %vm5537_vm1, %v17362_v27  ;;  %v4564_v22 = vadd.f32 %v18034_v36, %v14820_v47  ;;  %22509 = vst [vmem:[#allocation140_spill] sm:$0xff] %v18207_v4  ;;  %v14529_v45 = vpop.f32.mrf.mxu0 }
 0x2a5   :  { %v4555_v7 = vpop.f32.mrf.mxu1  ;;  %v4920_v34 = vmax.f32 %v3396_v16, 0.0 }
 0x2a6   :  { %22507 = vst [vmem:[#allocation138_spill] sm:$0xff] %v18198_v38  ;;  %v18205_v20 = vpack.c.bf16 %v5207_v56, %v5206_v12  ;;  %v4556_v40 = vadd.f32 %v18034_v36, %v4555_v7  ;;  %v5212_v26 = vmax.f32 %v4564_v22, 0.0  ;;  %v18212_v37 = vpop.f32.mrf.mxu0  ;;  %v3399_v12 = vadd.f32 %v18034_v36, %v14529_v45 }
 0x2a7   :  { %v14821_v2 = vpop.f32.mrf.mxu1 }
 0x2a8   :  { %22508 = vst [vmem:[#allocation139_spill] sm:$0xff] %v18205_v20  ;;  %v4567_v17 = vadd.f32 %v18034_v36, %v14821_v2  ;;  %v14532_v58 = vpop.f32.mrf.mxu0  ;;  %v5210_v56 = vmax.f32 %v4556_v40, 0.0  ;;  %v4921_v2 = vmax.f32 %v3399_v12, 0.0 }
 0x2a9   :  { %v4558_v27 = vpop.f32.mrf.mxu1 }
 0x2aa   :  { %v5213_v47 = vmax.f32 %v4567_v17, 0.0  ;;  %v4559_v38 = vadd.f32 %v18034_v36, %v4558_v27  ;;  %v18223_v27 = vpop.f32.mrf.mxu0  ;;  %v18227_v45 = vpack.c.bf16 %v4921_v2, %v4920_v34 }
 0x2ab   :  { %v14824_v50 = vpop.f32.mrf.mxu1  ;;  %14923 = vmatmul.mubr.msk.bf16.gmra.mxu1 %vm5537_vm1, %v17357_v49  ;;  %v3412_v49 = vadd.f32 %v18034_v36, %v14532_v58 }
 0x2ac   :  { %v18218_v5 = vpack.c.bf16 %v5213_v47, %v5212_v26  ;;  %v5211_v7 = vmax.f32 %v4559_v38, 0.0  ;;  %14926 = vmatprep.mubr.msk.bf16.mxu1 %vm5537_vm1, %v17394_v41  ;;  %v4580_v22 = vadd.f32 %v18034_v36, %v14824_v50  ;;  %22512 = vst [vmem:[#allocation143_spill] sm:$0xff] %v18227_v45  ;;  %v14533_v40 = vpop.f32.mrf.mxu0 }
 0x2ad   :  { %v4571_v17 = vpop.f32.mrf.mxu1  ;;  %v4924_v4 = vmax.f32 %v3412_v49, 0.0 }
 0x2ae   :  { %22510 = vst [vmem:[#allocation141_spill] sm:$0xff] %v18218_v5  ;;  %v18225_v16 = vpack.c.bf16 %v5211_v7, %v5210_v56  ;;  %v4572_v26 = vadd.f32 %v18034_v36, %v4571_v17  ;;  %v5216_v47 = vmax.f32 %v4580_v22, 0.0  ;;  %v18232_v12 = vpop.f32.mrf.mxu0  ;;  %v3415_v56 = vadd.f32 %v18034_v36, %v14533_v40 }
 0x2af   :  { %v14825_v20 = vpop.f32.mrf.mxu1 }
 0x2b0   :  { %22511 = vst [vmem:[#allocation142_spill] sm:$0xff] %v18225_v16  ;;  %v4583_v38 = vadd.f32 %v18034_v36, %v14825_v20  ;;  %v14536_v58 = vpop.f32.mrf.mxu0  ;;  %v5214_v7 = vmax.f32 %v4572_v26, 0.0  ;;  %v4925_v20 = vmax.f32 %v3415_v56, 0.0 }
 0x2b1   :  { %v4574_v41 = vpop.f32.mrf.mxu1 }
 0x2b2   :  { %v5217_v50 = vmax.f32 %v4583_v38, 0.0  ;;  %v4575_v5 = vadd.f32 %v18034_v36, %v4574_v41  ;;  %v18243_v41 = vpop.f32.mrf.mxu0  ;;  %v18247_v40 = vpack.c.bf16 %v4925_v20, %v4924_v4 }
 0x2b3   :  { %v14828_v34 = vpop.f32.mrf.mxu1  ;;  %14927 = vmatmul.mubr.msk.bf16.gmra.mxu1 %vm5537_vm1, %v17389_v14  ;;  %v3428_v14 = vadd.f32 %v18034_v36, %v14536_v58 }
 0x2b4   :  { %v18238_v2 = vpack.c.bf16 %v5217_v50, %v5216_v47  ;;  %v5215_v17 = vmax.f32 %v4575_v5, 0.0  ;;  %14930 = vmatprep.mubr.msk.bf16.mxu1 %vm5537_vm1, %v17426_v60  ;;  %v4596_v22 = vadd.f32 %v18034_v36, %v14828_v34  ;;  %22515 = vst [vmem:[#allocation146_spill] sm:$0xff] %v18247_v40  ;;  %v14537_v26 = vpop.f32.mrf.mxu0 }
 0x2b5   :  { %v4587_v38 = vpop.f32.mrf.mxu1  ;;  %v4928_v45 = vmax.f32 %v3428_v14, 0.0 }
 0x2b6   :  { %22513 = vst [vmem:[#allocation144_spill] sm:$0xff] %v18238_v2  ;;  %v18245_v49 = vpack.c.bf16 %v5215_v17, %v5214_v7  ;;  %v4588_v47 = vadd.f32 %v18034_v36, %v4587_v38  ;;  %v5220_v50 = vmax.f32 %v4596_v22, 0.0  ;;  %v18252_v56 = vpop.f32.mrf.mxu0  ;;  %v3431_v7 = vadd.f32 %v18034_v36, %v14537_v26 }
 0x2b7   :  { %v14829_v16 = vpop.f32.mrf.mxu1 }
 0x2b8   :  { %22514 = vst [vmem:[#allocation145_spill] sm:$0xff] %v18245_v49  ;;  %v4599_v5 = vadd.f32 %v18034_v36, %v14829_v16  ;;  %v14540_v58 = vpop.f32.mrf.mxu0  ;;  %v5218_v17 = vmax.f32 %v4588_v47, 0.0  ;;  %v4929_v16 = vmax.f32 %v3431_v7, 0.0 }
 0x2b9   :  { %v4590_v60 = vpop.f32.mrf.mxu1 }
 0x2ba   :  { %v5221_v34 = vmax.f32 %v4599_v5, 0.0  ;;  %v4591_v2 = vadd.f32 %v18034_v36, %v4590_v60  ;;  %v18263_v60 = vpop.f32.mrf.mxu0  ;;  %v18267_v26 = vpack.c.bf16 %v4929_v16, %v4928_v45 }
 0x2bb   :  { %v14832_v4 = vpop.f32.mrf.mxu1  ;;  %14931 = vmatmul.mubr.msk.bf16.gmra.mxu1 %vm5537_vm1, %v17421_v9  ;;  %v3444_v9 = vadd.f32 %v18034_v36, %v14540_v58 }
 0x2bc   :  { %v18258_v20 = vpack.c.bf16 %v5221_v34, %v5220_v50  ;;  %v5219_v38 = vmax.f32 %v4591_v2, 0.0  ;;  %14934 = vmatprep.mubr.msk.bf16.mxu1 %vm5537_vm1, %v17458_v18  ;;  %v4612_v22 = vadd.f32 %v18034_v36, %v14832_v4  ;;  %22518 = vst [vmem:[#allocation149_spill] sm:$0xff] %v18267_v26  ;;  %v14541_v47 = vpop.f32.mrf.mxu0 }
 0x2bd   :  { %v4603_v5 = vpop.f32.mrf.mxu1  ;;  %v4932_v40 = vmax.f32 %v3444_v9, 0.0 }
 0x2be   :  { %22516 = vst [vmem:[#allocation147_spill] sm:$0xff] %v18258_v20  ;;  %v18265_v14 = vpack.c.bf16 %v5219_v38, %v5218_v17  ;;  %v4604_v50 = vadd.f32 %v18034_v36, %v4603_v5  ;;  %v5224_v34 = vmax.f32 %v4612_v22, 0.0  ;;  %v18272_v7 = vpop.f32.mrf.mxu0  ;;  %v3447_v17 = vadd.f32 %v18034_v36, %v14541_v47 }
 0x2bf   :  { %v14833_v49 = vpop.f32.mrf.mxu1 }
 0x2c0   :  { %22517 = vst [vmem:[#allocation148_spill] sm:$0xff] %v18265_v14  ;;  %v4615_v2 = vadd.f32 %v18034_v36, %v14833_v49  ;;  %v14544_v58 = vpop.f32.mrf.mxu0  ;;  %v5222_v38 = vmax.f32 %v4604_v50, 0.0  ;;  %v4933_v49 = vmax.f32 %v3447_v17, 0.0 }
 0x2c1   :  { %v4606_v18 = vpop.f32.mrf.mxu1 }
 0x2c2   :  { %v5225_v4 = vmax.f32 %v4615_v2, 0.0  ;;  %v4607_v20 = vadd.f32 %v18034_v36, %v4606_v18  ;;  %v18283_v18 = vpop.f32.mrf.mxu0  ;;  %v18287_v47 = vpack.c.bf16 %v4933_v49, %v4932_v40 }
 0x2c3   :  { %v14836_v45 = vpop.f32.mrf.mxu1  ;;  %14935 = vmatmul.mubr.msk.bf16.gmra.mxu1 %vm5537_vm1, %v17453_v19  ;;  %v3460_v19 = vadd.f32 %v18034_v36, %v14544_v58 }
 0x2c4   :  { %v18278_v16 = vpack.c.bf16 %v5225_v4, %v5224_v34  ;;  %v5223_v5 = vmax.f32 %v4607_v20, 0.0  ;;  %14938 = vmatprep.mubr.msk.bf16.mxu1 %vm5537_vm1, %v17490_v55  ;;  %v4628_v22 = vadd.f32 %v18034_v36, %v14836_v45  ;;  %22521 = vst [vmem:[#allocation152_spill] sm:$0xff] %v18287_v47  ;;  %v14545_v50 = vpop.f32.mrf.mxu0 }
 0x2c5   :  { %v4619_v2 = vpop.f32.mrf.mxu1  ;;  %v4936_v26 = vmax.f32 %v3460_v19, 0.0 }
 0x2c6   :  { %22519 = vst [vmem:[#allocation150_spill] sm:$0xff] %v18278_v16  ;;  %v18285_v9 = vpack.c.bf16 %v5223_v5, %v5222_v38  ;;  %v4620_v34 = vadd.f32 %v18034_v36, %v4619_v2  ;;  %v5228_v4 = vmax.f32 %v4628_v22, 0.0  ;;  %v18292_v17 = vpop.f32.mrf.mxu0  ;;  %v3463_v38 = vadd.f32 %v18034_v36, %v14545_v50 }
 0x2c7   :  { %v14837_v14 = vpop.f32.mrf.mxu1 }
 0x2c8   :  { %22520 = vst [vmem:[#allocation151_spill] sm:$0xff] %v18285_v9  ;;  %v4631_v20 = vadd.f32 %v18034_v36, %v14837_v14  ;;  %v14548_v58 = vpop.f32.mrf.mxu0  ;;  %v5226_v5 = vmax.f32 %v4620_v34, 0.0  ;;  %v4937_v14 = vmax.f32 %v3463_v38, 0.0 }
 0x2c9   :  { %v4622_v55 = vpop.f32.mrf.mxu1 }
 0x2ca   :  { %v5229_v45 = vmax.f32 %v4631_v20, 0.0  ;;  %v4623_v16 = vadd.f32 %v18034_v36, %v4622_v55  ;;  %v18303_v55 = vpop.f32.mrf.mxu0  ;;  %v18307_v50 = vpack.c.bf16 %v4937_v14, %v4936_v26 }
 0x2cb   :  { %v14840_v40 = vpop.f32.mrf.mxu1  ;;  %14939 = vmatmul.mubr.msk.bf16.gmra.mxu1 %vm5537_vm1, %v17485_v30  ;;  %22523 = vst [vmem:[#allocation154_spill] sm:$0xff] %v18303_v55  ;;  %v3476_v30 = vadd.f32 %v18034_v36, %v14548_v58 }
 0x2cc   :  { %v18298_v49 = vpack.c.bf16 %v5229_v45, %v5228_v4  ;;  %v5227_v2 = vmax.f32 %v4623_v16, 0.0  ;;  %14942 = vmatprep.mubr.msk.bf16.mxu1 %vm5537_vm1, %v17522_v32  ;;  %v4644_v22 = vadd.f32 %v18034_v36, %v14840_v40  ;;  %22525 = vst [vmem:[#allocation156_spill] sm:$0xff] %v18307_v50  ;;  %v14549_v34 = vpop.f32.mrf.mxu0 }
 0x2cd   :  { %v4635_v20 = vpop.f32.mrf.mxu1  ;;  %v4940_v47 = vmax.f32 %v3476_v30, 0.0 }
 0x2ce   :  { %22522 = vst [vmem:[#allocation153_spill] sm:$0xff] %v18298_v49  ;;  %v18305_v19 = vpack.c.bf16 %v5227_v2, %v5226_v5  ;;  %v4636_v4 = vadd.f32 %v18034_v36, %v4635_v20  ;;  %v5232_v45 = vmax.f32 %v4644_v22, 0.0  ;;  %v18312_v38 = vpop.f32.mrf.mxu0  ;;  %v3479_v5 = vadd.f32 %v18034_v36, %v14549_v34 }
 0x2cf   :  { %v14841_v9 = vpop.f32.mrf.mxu1  ;;  %22526 = vst [vmem:[#allocation157_spill] sm:$0xff] %v18312_v38 }
 0x2d0   :  { %22524 = vst [vmem:[#allocation155_spill] sm:$0xff] %v18305_v19  ;;  %v4647_v16 = vadd.f32 %v18034_v36, %v14841_v9  ;;  %v14552_v58 = vpop.f32.mrf.mxu0  ;;  %v5230_v2 = vmax.f32 %v4636_v4, 0.0  ;;  %v4941_v9 = vmax.f32 %v3479_v5, 0.0 }
 0x2d1   :  { %v4638_v32 = vpop.f32.mrf.mxu1 }
 0x2d2   :  { %v5233_v40 = vmax.f32 %v4647_v16, 0.0  ;;  %v4639_v49 = vadd.f32 %v18034_v36, %v4638_v32  ;;  %v18323_v32 = vpop.f32.mrf.mxu0  ;;  %v18327_v34 = vpack.c.bf16 %v4941_v9, %v4940_v47 }
 0x2d3   :  { %v14844_v26 = vpop.f32.mrf.mxu1  ;;  %14943 = vmatmul.mubr.msk.bf16.gmra.mxu1 %vm5537_vm1, %v17517_v48  ;;  %22528 = vst [vmem:[#allocation159_spill] sm:$0xff] %v18323_v32  ;;  %v3492_v48 = vadd.f32 %v18034_v36, %v14552_v58 }
 0x2d4   :  { %v18318_v14 = vpack.c.bf16 %v5233_v40, %v5232_v45  ;;  %v5231_v20 = vmax.f32 %v4639_v49, 0.0  ;;  %14946 = vmatprep.mubr.msk.bf16.mxu1 %vm5537_vm1, %v17554_v10  ;;  %v4660_v22 = vadd.f32 %v18034_v36, %v14844_v26  ;;  %22530 = vst [vmem:[#allocation161_spill] sm:$0xff] %v18327_v34  ;;  %v14553_v4 = vpop.f32.mrf.mxu0 }
 0x2d5   :  { %v4651_v16 = vpop.f32.mrf.mxu1  ;;  %v4944_v50 = vmax.f32 %v3492_v48, 0.0 }
 0x2d6   :  { %22527 = vst [vmem:[#allocation158_spill] sm:$0xff] %v18318_v14  ;;  %v18325_v30 = vpack.c.bf16 %v5231_v20, %v5230_v2  ;;  %v4652_v45 = vadd.f32 %v18034_v36, %v4651_v16  ;;  %v5236_v40 = vmax.f32 %v4660_v22, 0.0  ;;  %v18332_v5 = vpop.f32.mrf.mxu0  ;;  %v3495_v2 = vadd.f32 %v18034_v36, %v14553_v4  ;;  %v22532_v20 = vld [vmem:[#allocation71_spill] sm:$0xff] }
 0x2d7   :  { %v14845_v19 = vpop.f32.mrf.mxu1  ;;  %22531 = vst [vmem:[#allocation162_spill] sm:$0xff] %v18332_v5 }
 0x2d8   :  { %22529 = vst [vmem:[#allocation160_spill] sm:$0xff] %v18325_v30  ;;  %v4663_v49 = vadd.f32 %v18034_v36, %v14845_v19  ;;  %v14556_v58 = vpop.f32.mrf.mxu0  ;;  %v5234_v9 = vmax.f32 %v4652_v45, 0.0  ;;  %v22534_v19 = vld [vmem:[#allocation75_spill] sm:$0xff]  ;;  %v4945_v22 = vmax.f32 %v3495_v2, 0.0 }
 0x2d9   :  { %v4654_v10 = vpop.f32.mrf.mxu1 }
 0x2da   :  { %v5237_v26 = vmax.f32 %v4663_v49, 0.0  ;;  %v4655_v14 = vadd.f32 %v18034_v36, %v4654_v10  ;;  %v18343_v10 = vpop.f32.mrf.mxu0  ;;  %v18347_v4 = vpack.c.bf16 %v4945_v22, %v4944_v50 }
 0x2db   :  { %v14848_v47 = vpop.f32.mrf.mxu1  ;;  %14947 = vmatmul.mubr.msk.bf16.gmra.mxu1 %vm5537_vm1, %v22532_v20  ;;  %22535 = vst [vmem:[#allocation75_spill] sm:$0xff] %v18343_v10  ;;  %v3508_v20 = vadd.f32 %v18034_v36, %v14556_v58 }
 0x2dc   :  { %v18338_v30 = vpack.c.bf16 %v5237_v26, %v5236_v40  ;;  %v5235_v16 = vmax.f32 %v4655_v14, 0.0  ;;  %14950 = vmatprep.mubr.msk.bf16.mxu1 %vm5537_vm1, %v22534_v19  ;;  %v4676_v49 = vadd.f32 %v18034_v36, %v14848_v47  ;;  %22537 = vst [vmem:[#allocation164_spill] sm:$0xff] %v18347_v4  ;;  %v14557_v45 = vpop.f32.mrf.mxu0 }
 0x2dd   :  { %v4667_v34 = vpop.f32.mrf.mxu1  ;;  %v4948_v10 = vmax.f32 %v3508_v20, 0.0 }
 0x2de   :  { %22533 = vst [vmem:[#allocation71_spill] sm:$0xff] %v18338_v30  ;;  %v18345_v48 = vpack.c.bf16 %v5235_v16, %v5234_v9  ;;  %v4668_v40 = vadd.f32 %v18034_v36, %v4667_v34  ;;  %v5240_v26 = vmax.f32 %v4676_v49, 0.0  ;;  %v18352_v2 = vpop.f32.mrf.mxu0  ;;  %v3511_v9 = vadd.f32 %v18034_v36, %v14557_v45  ;;  %v22539_v16 = vld [vmem:[#allocation74_spill] sm:$0xff] }
 0x2df   :  { %v14849_v5 = vpop.f32.mrf.mxu1  ;;  %22538 = vst [vmem:[#allocation165_spill] sm:$0xff] %v18352_v2 }
 0x2e0   :  { %22536 = vst [vmem:[#allocation163_spill] sm:$0xff] %v18345_v48  ;;  %v4679_v14 = vadd.f32 %v18034_v36, %v14849_v5  ;;  %v14560_v58 = vpop.f32.mrf.mxu0  ;;  %v5238_v22 = vmax.f32 %v4668_v40, 0.0  ;;  %v22541_v5 = vld [vmem:[#allocation79_spill] sm:$0xff]  ;;  %v4949_v49 = vmax.f32 %v3511_v9, 0.0 }
 0x2e1   :  { %v4670_v19 = vpop.f32.mrf.mxu1 }
 0x2e2   :  { %v5241_v47 = vmax.f32 %v4679_v14, 0.0  ;;  %v4671_v30 = vadd.f32 %v18034_v36, %v4670_v19  ;;  %v18363_v19 = vpop.f32.mrf.mxu0  ;;  %v18367_v45 = vpack.c.bf16 %v4949_v49, %v4948_v10 }
 0x2e3   :  { %v14852_v50 = vpop.f32.mrf.mxu1  ;;  %14951 = vmatmul.mubr.msk.bf16.gmra.mxu1 %vm5537_vm1, %v22539_v16  ;;  %22542 = vst [vmem:[#allocation79_spill] sm:$0xff] %v18363_v19  ;;  %v3524_v16 = vadd.f32 %v18034_v36, %v14560_v58 }
 0x2e4   :  { %v18358_v48 = vpack.c.bf16 %v5241_v47, %v5240_v26  ;;  %v5239_v34 = vmax.f32 %v4671_v30, 0.0  ;;  %14954 = vmatprep.mubr.msk.bf16.mxu1 %vm5537_vm1, %v22541_v5  ;;  %v4692_v14 = vadd.f32 %v18034_v36, %v14852_v50  ;;  %22544 = vst [vmem:[#allocation167_spill] sm:$0xff] %v18367_v45  ;;  %v14561_v40 = vpop.f32.mrf.mxu0 }
 0x2e5   :  { %v4683_v4 = vpop.f32.mrf.mxu1  ;;  %v4952_v19 = vmax.f32 %v3524_v16, 0.0 }
 0x2e6   :  { %22540 = vst [vmem:[#allocation74_spill] sm:$0xff] %v18358_v48  ;;  %v18365_v20 = vpack.c.bf16 %v5239_v34, %v5238_v22  ;;  %v4684_v26 = vadd.f32 %v18034_v36, %v4683_v4  ;;  %v5244_v47 = vmax.f32 %v4692_v14, 0.0  ;;  %v18372_v9 = vpop.f32.mrf.mxu0  ;;  %v3527_v22 = vadd.f32 %v18034_v36, %v14561_v40  ;;  %v22546_v34 = vld [vmem:[#allocation78_spill] sm:$0xff] }
 0x2e7   :  { %v14853_v2 = vpop.f32.mrf.mxu1  ;;  %22545 = vst [vmem:[#allocation168_spill] sm:$0xff] %v18372_v9 }
 0x2e8   :  { %22543 = vst [vmem:[#allocation166_spill] sm:$0xff] %v18365_v20  ;;  %v4695_v30 = vadd.f32 %v18034_v36, %v14853_v2  ;;  %v14564_v58 = vpop.f32.mrf.mxu0  ;;  %v5242_v49 = vmax.f32 %v4684_v26, 0.0  ;;  %v22548_v2 = vld [vmem:[#allocation83_spill] sm:$0xff]  ;;  %v4953_v14 = vmax.f32 %v3527_v22, 0.0 }
 0x2e9   :  { %v4686_v5 = vpop.f32.mrf.mxu1 }
 0x2ea   :  { %v5245_v50 = vmax.f32 %v4695_v30, 0.0  ;;  %v4687_v48 = vadd.f32 %v18034_v36, %v4686_v5  ;;  %v18383_v5 = vpop.f32.mrf.mxu0  ;;  %v18387_v40 = vpack.c.bf16 %v4953_v14, %v4952_v19 }
 0x2eb   :  { %v14856_v10 = vpop.f32.mrf.mxu1  ;;  %14955 = vmatmul.mubr.msk.bf16.gmra.mxu1 %vm5537_vm1, %v22546_v34  ;;  %22549 = vst [vmem:[#allocation83_spill] sm:$0xff] %v18383_v5  ;;  %v3540_v34 = vadd.f32 %v18034_v36, %v14564_v58 }
 0x2ec   :  { %v18378_v20 = vpack.c.bf16 %v5245_v50, %v5244_v47  ;;  %v5243_v4 = vmax.f32 %v4687_v48, 0.0  ;;  %14958 = vmatprep.mubr.msk.bf16.mxu1 %vm5537_vm1, %v22548_v2  ;;  %v4708_v30 = vadd.f32 %v18034_v36, %v14856_v10  ;;  %22551 = vst [vmem:[#allocation170_spill] sm:$0xff] %v18387_v40  ;;  %v14565_v26 = vpop.f32.mrf.mxu0 }
 0x2ed   :  { %v4699_v45 = vpop.f32.mrf.mxu1  ;;  %v4956_v5 = vmax.f32 %v3540_v34, 0.0 }
 0x2ee   :  { %22547 = vst [vmem:[#allocation78_spill] sm:$0xff] %v18378_v20  ;;  %v18385_v16 = vpack.c.bf16 %v5243_v4, %v5242_v49  ;;  %v4700_v47 = vadd.f32 %v18034_v36, %v4699_v45  ;;  %v5248_v50 = vmax.f32 %v4708_v30, 0.0  ;;  %v18392_v22 = vpop.f32.mrf.mxu0  ;;  %v3543_v49 = vadd.f32 %v18034_v36, %v14565_v26  ;;  %v22553_v4 = vld [vmem:[#allocation82_spill] sm:$0xff] }
 0x2ef   :  { %v14857_v9 = vpop.f32.mrf.mxu1  ;;  %22552 = vst [vmem:[#allocation171_spill] sm:$0xff] %v18392_v22 }
 0x2f0   :  { %22550 = vst [vmem:[#allocation169_spill] sm:$0xff] %v18385_v16  ;;  %v4711_v48 = vadd.f32 %v18034_v36, %v14857_v9  ;;  %v14568_v58 = vpop.f32.mrf.mxu0  ;;  %v5246_v14 = vmax.f32 %v4700_v47, 0.0  ;;  %v22555_v9 = vld [vmem:[#allocation87_spill] sm:$0xff]  ;;  %v4957_v30 = vmax.f32 %v3543_v49, 0.0 }
 0x2f1   :  { %v4702_v2 = vpop.f32.mrf.mxu1 }
 0x2f2   :  { %v5249_v10 = vmax.f32 %v4711_v48, 0.0  ;;  %v4703_v20 = vadd.f32 %v18034_v36, %v4702_v2  ;;  %v18403_v2 = vpop.f32.mrf.mxu0  ;;  %v18407_v26 = vpack.c.bf16 %v4957_v30, %v4956_v5 }
 0x2f3   :  { %v14860_v19 = vpop.f32.mrf.mxu1  ;;  %14959 = vmatmul.mubr.msk.bf16.gmra.mxu1 %vm5537_vm1, %v22553_v4  ;;  %22556 = vst [vmem:[#allocation87_spill] sm:$0xff] %v18403_v2  ;;  %v3556_v4 = vadd.f32 %v18034_v36, %v14568_v58 }
 0x2f4   :  { %v18398_v16 = vpack.c.bf16 %v5249_v10, %v5248_v50  ;;  %v5247_v45 = vmax.f32 %v4703_v20, 0.0  ;;  %14962 = vmatprep.mubr.msk.bf16.mxu1 %vm5537_vm1, %v22555_v9  ;;  %v4724_v48 = vadd.f32 %v18034_v36, %v14860_v19  ;;  %22558 = vst [vmem:[#allocation173_spill] sm:$0xff] %v18407_v26  ;;  %v14569_v47 = vpop.f32.mrf.mxu0 }
 0x2f5   :  { %v4715_v40 = vpop.f32.mrf.mxu1  ;;  %v4960_v2 = vmax.f32 %v3556_v4, 0.0 }
 0x2f6   :  { %22554 = vst [vmem:[#allocation82_spill] sm:$0xff] %v18398_v16  ;;  %v18405_v34 = vpack.c.bf16 %v5247_v45, %v5246_v14  ;;  %v4716_v50 = vadd.f32 %v18034_v36, %v4715_v40  ;;  %v5252_v10 = vmax.f32 %v4724_v48, 0.0  ;;  %v18412_v49 = vpop.f32.mrf.mxu0  ;;  %v3559_v14 = vadd.f32 %v18034_v36, %v14569_v47  ;;  %v22560_v45 = vld [vmem:[#allocation86_spill] sm:$0xff] }
 0x2f7   :  { %v14861_v22 = vpop.f32.mrf.mxu1  ;;  %22559 = vst [vmem:[#allocation174_spill] sm:$0xff] %v18412_v49 }
 0x2f8   :  { %22557 = vst [vmem:[#allocation172_spill] sm:$0xff] %v18405_v34  ;;  %v4727_v20 = vadd.f32 %v18034_v36, %v14861_v22  ;;  %v14572_v58 = vpop.f32.mrf.mxu0  ;;  %v5250_v30 = vmax.f32 %v4716_v50, 0.0  ;;  %v22562_v22 = vld [vmem:[#allocation91_spill] sm:$0xff]  ;;  %v4961_v48 = vmax.f32 %v3559_v14, 0.0 }
 0x2f9   :  { %v4718_v9 = vpop.f32.mrf.mxu1 }
 0x2fa   :  { %v5253_v19 = vmax.f32 %v4727_v20, 0.0  ;;  %v4719_v16 = vadd.f32 %v18034_v36, %v4718_v9  ;;  %v18423_v9 = vpop.f32.mrf.mxu0  ;;  %v18427_v47 = vpack.c.bf16 %v4961_v48, %v4960_v2 }
 0x2fb   :  { %v14864_v5 = vpop.f32.mrf.mxu1  ;;  %14963 = vmatmul.mubr.msk.bf16.gmra.mxu1 %vm5537_vm1, %v22560_v45  ;;  %22563 = vst [vmem:[#allocation91_spill] sm:$0xff] %v18423_v9  ;;  %v3572_v45 = vadd.f32 %v18034_v36, %v14572_v58 }
 0x2fc   :  { %v18418_v34 = vpack.c.bf16 %v5253_v19, %v5252_v10  ;;  %v5251_v40 = vmax.f32 %v4719_v16, 0.0  ;;  %14966 = vmatprep.mubr.msk.bf16.mxu1 %vm5537_vm1, %v22562_v22  ;;  %v4740_v20 = vadd.f32 %v18034_v36, %v14864_v5  ;;  %22565 = vst [vmem:[#allocation176_spill] sm:$0xff] %v18427_v47  ;;  %v14573_v50 = vpop.f32.mrf.mxu0 }
 0x2fd   :  { %v4731_v26 = vpop.f32.mrf.mxu1  ;;  %v4964_v9 = vmax.f32 %v3572_v45, 0.0  ;;  %v18446_v45 = vld [vmem:[#allocation7] ss:$0 sm:$0xff] }
 0x2fe   :  { %22561 = vst [vmem:[#allocation86_spill] sm:$0xff] %v18418_v34  ;;  %v18425_v4 = vpack.c.bf16 %v5251_v40, %v5250_v30  ;;  %v4732_v10 = vadd.f32 %v18034_v36, %v4731_v26  ;;  %v5256_v19 = vmax.f32 %v4740_v20, 0.0  ;;  %v18432_v14 = vpop.f32.mrf.mxu0  ;;  %v3575_v30 = vadd.f32 %v18034_v36, %v14573_v50  ;;  %v22567_v40 = vld [vmem:[#allocation90_spill] sm:$0xff] }
 0x2ff   :  { %v14865_v49 = vpop.f32.mrf.mxu1  ;;  %22566 = vst [vmem:[#allocation177_spill] sm:$0xff] %v18432_v14 }
 0x300   :  { %22564 = vst [vmem:[#allocation175_spill] sm:$0xff] %v18425_v4  ;;  %v4743_v16 = vadd.f32 %v18034_v36, %v14865_v49  ;;  %v14576_v58 = vpop.f32.mrf.mxu0  ;;  %v5254_v48 = vmax.f32 %v4732_v10, 0.0  ;;  %v22569_v49 = vld [vmem:[#allocation95_spill] sm:$0xff]  ;;  %v4965_v20 = vmax.f32 %v3575_v30, 0.0 }
 0x301   :  { %v4734_v22 = vpop.f32.mrf.mxu1 }
 0x302   :  { %v5257_v5 = vmax.f32 %v4743_v16, 0.0  ;;  %v4735_v34 = vadd.f32 %v18034_v36, %v4734_v22  ;;  %v18442_v16 = vpop.f32.mrf.mxu0  ;;  %v18448_v50 = vpack.c.bf16 %v4965_v20, %v4964_v9 }
 0x303   :  { %v14872_v2 = vpop.f32.mrf.mxu1  ;;  %14967 = vmatmul.mubr.msk.bf16.gmra.mxu1 %vm5537_vm1, %v22567_v40  ;;  %22570 = vst [vmem:[#allocation95_spill] sm:$0xff] %v18442_v16  ;;  %v3588_v40 = vadd.f32 %v18034_v36, %v14576_v58  ;;  %v22575_v16 = vld [vmem:[#allocation99_spill] sm:$0xff] }
 0x304   :  { %v18438_v4 = vpack.c.bf16 %v5257_v5, %v5256_v19  ;;  %v5255_v26 = vmax.f32 %v4735_v34, 0.0  ;;  %14970 = vmatprep.mubr.msk.bf16.mxu1 %vm5537_vm1, %v22569_v49  ;;  %22572 = vst [vmem:[#allocation179_spill] sm:$0xff] %v18448_v50  ;;  %v14577_v10 = vpop.f32.mrf.mxu0  ;;  %v6349_v5 = vadd.f32 %v14872_v2, %v18446_v45 }
 0x305   :  { %v6340_v47 = vpop.f32.mrf.mxu1 }
 0x306   :  { %22568 = vst [vmem:[#allocation90_spill] sm:$0xff] %v18438_v4  ;;  %v18444_v22 = vpack.c.bf16 %v5255_v26, %v5254_v48  ;;  %v6341_v19 = vadd.f32 %v18446_v45, %v6340_v47  ;;  %v18454_v49 = vpop.f32.mrf.mxu0  ;;  %v4968_v26 = vmax.f32 %v3588_v40, 0.0  ;;  %v3591_v4 = vadd.f32 %v18034_v36, %v14577_v10 }
 0x307   :  { %v14873_v14 = vpop.f32.mrf.mxu1  ;;  %22573 = vst [vmem:[#allocation180_spill] sm:$0xff] %v18454_v49  ;;  %v8389_v2 = vmax.f32 %v6349_v5, 0.0 }
 0x308   :  { %22571 = vst [vmem:[#allocation178_spill] sm:$0xff] %v18444_v22  ;;  %v6352_v34 = vadd.f32 %v14873_v14, %v18446_v45  ;;  %v22574_v22 = vld [vmem:[#allocation94_spill] sm:$0xff]  ;;  %v14580_v58 = vpop.f32.mrf.mxu0  ;;  %v8387_v50 = vmax.f32 %v6341_v19, 0.0  ;;  %v4969_v14 = vmax.f32 %v3591_v4, 0.0 }
 0x309   :  { %v6343_v30 = vpop.f32.mrf.mxu1 }
 0x30a   :  { %v6344_v48 = vadd.f32 %v18446_v45, %v6343_v30  ;;  %v8390_v9 = vmax.f32 %v6352_v34, 0.0  ;;  %v18462_v49 = vpop.f32.mrf.mxu0  ;;  %v18464_v40 = vpack.c.bf16 %v4969_v14, %v4968_v26  ;;  %v18466_v34 = vld [vmem:[#allocation4] ss:$0 sm:$0xff] }
 0x30b   :  { %v14876_v20 = vpop.f32.mrf.mxu1  ;;  %14971 = vmatmul.mubr.msk.bf16.gmra.mxu1 %vm5537_vm1, %v22574_v22  ;;  %22576 = vst [vmem:[#allocation94_spill] sm:$0xff] %v18462_v49  ;;  %v3604_v22 = vadd.f32 %v18466_v34, %v14580_v58  ;;  %v22579_v14 = vld [vmem:[#allocation98_spill] sm:$0xff] }
 0x30c   :  { %v8388_v47 = vmax.f32 %v6344_v48, 0.0  ;;  %14974 = vmatprep.mubr.msk.bf16.mxu1 %vm5537_vm1, %v22575_v16  ;;  %22577 = vst [vmem:[#allocation99_spill] sm:$0xff] %v18464_v40  ;;  %v8900_v36 = vpack.c.bf16 %v8390_v9, %v8389_v2  ;;  %v14581_v38 = vpop.f32.mrf.mxu0  ;;  %v6365_v4 = vadd.f32 %v14876_v20, %v18446_v45 }
 0x30d   :  { %v6356_v32 = vpop.f32.mrf.mxu1  ;;  %v4972_v26 = vmax.f32 %v3604_v22, 0.0  ;;  %v3607_v9 = vadd.f32 %v18466_v34, %v14581_v38 }
 0x30e   :  { %v8899_v30 = vpack.c.bf16 %v8388_v47, %v8387_v50  ;;  %v6357_v19 = vadd.f32 %v18446_v45, %v6356_v32  ;;  %v18474_v50 = vpop.f32.mrf.mxu0 }
 0x30f   :  { %v14877_v10 = vpop.f32.mrf.mxu1  ;;  %22578 = vst [vmem:[#allocation181_spill] sm:$0xff] %v18474_v50  ;;  %v4973_v20 = vmax.f32 %v3607_v9, 0.0 }
 0x310   :  { %v6368_v48 = vadd.f32 %v14877_v10, %v18446_v45  ;;  %15386 = vmatprep.mubr.msk.bf16.mxu0 %vm5537_vm1, %v8899_v30  ;;  %v14584_v32 = vpop.f32.mrf.mxu0  ;;  %v8391_v2 = vmax.f32 %v6357_v19, 0.0  ;;  %v22580_v10 = vld [vmem:[#allocation103_spill] sm:$0xff] }
 0x311   :  { %v6359_v16 = vpop.f32.mrf.mxu1  ;;  %15387 = vmatmul.mubr.msk.bf16.vlgmr.msra.gmra.mxu0 %vm5537_vm1, %v8900_v36  ;;  %v8393_v36 = vmax.f32 %v6365_v4, 0.0  ;;  %v18484_v22 = vpack.c.bf16 %v4973_v20, %v4972_v26  ;;  %v3620_v49 = vadd.f32 %v18466_v34, %v14584_v32 }
 0x312   :  { %v6360_v5 = vadd.f32 %v18446_v45, %v6359_v16  ;;  %v8394_v58 = vmax.f32 %v6368_v48, 0.0  ;;  %v18482_v50 = vpop.f32.mrf.mxu0 }
 0x313   :  { %v14880_v47 = vpop.f32.mrf.mxu1  ;;  %14975 = vmatmul.mubr.msk.bf16.gmra.mxu1 %vm5537_vm1, %v22579_v14  ;;  %22581 = vst [vmem:[#allocation98_spill] sm:$0xff] %v18484_v22 }
 0x314   :  { %v8392_v30 = vmax.f32 %v6360_v5, 0.0  ;;  %14978 = vmatprep.mubr.msk.bf16.mxu1 %vm5537_vm1, %v22580_v10  ;;  %v8902_v38 = vpack.c.bf16 %v8394_v58, %v8393_v36  ;;  %v14585_v55 = vpop.f32.mrf.mxu0  ;;  %v6381_v5 = vadd.f32 %v14880_v47, %v18446_v45  ;;  %v4976_v58 = vmax.f32 %v3620_v49, 0.0  ;;  %v22583_v10 = vld [vmem:[#allocation102_spill] sm:$0xff] }
 0x315   :  { %v6372_v40 = vpop.f32.mrf.mxu1 }
 0x316   :  { %v8901_v16 = vpack.c.bf16 %v8392_v30, %v8391_v2  ;;  %v6373_v14 = vadd.f32 %v18446_v45, %v6372_v40  ;;  %v18492_v9 = vpop.f32.mrf.mxu0  ;;  %v3623_v2 = vadd.f32 %v18466_v34, %v14585_v55 }
 0x317   :  { %v14881_v48 = vpop.f32.mrf.mxu1  ;;  %22582 = vst [vmem:[#allocation103_spill] sm:$0xff] %v18492_v9 }
 0x318   :  { %v6384_v19 = vadd.f32 %v14881_v48, %v18446_v45  ;;  %15390 = vmatprep.mubr.msk.bf16.mxu0 %vm5537_vm1, %v8901_v16  ;;  %v14588_v40 = vpop.f32.mrf.mxu0  ;;  %v8395_v20 = vmax.f32 %v6373_v14, 0.0  ;;  %v4977_v47 = vmax.f32 %v3623_v2, 0.0  ;;  %v8397_v16 = vmax.f32 %v6381_v5, 0.0 }
 0x319   :  { %v6375_v4 = vpop.f32.mrf.mxu1  ;;  %15391 = vmatmul.mubr.msk.bf16.gmra.mxu0 %vm5537_vm1, %v8902_v38  ;;  %v3636_v22 = vadd.f32 %v18466_v34, %v14588_v40 }
 0x31a   :  { %v6376_v26 = vadd.f32 %v18446_v45, %v6375_v4  ;;  %v8398_v32 = vmax.f32 %v6384_v19, 0.0  ;;  %v18500_v48 = vpop.f32.mrf.mxu0  ;;  %v18502_v49 = vpack.c.bf16 %v4977_v47, %v4976_v58 }
 0x31b   :  { %v14884_v30 = vpop.f32.mrf.mxu1  ;;  %14979 = vmatmul.mubr.msk.bf16.gmra.mxu1 %vm5537_vm1, %v22583_v10  ;;  %v4980_v2 = vmax.f32 %v3636_v22, 0.0 }
 0x31c   :  { %v8396_v36 = vmax.f32 %v6376_v26, 0.0  ;;  %14982 = vmatprep.mubr.msk.bf16.mxu1 %vm5537_vm1, %v17844_v0  ;;  %22584 = vst [vmem:[#allocation102_spill] sm:$0xff] %v18502_v49  ;;  %v8904_v55 = vpack.c.bf16 %v8398_v32, %v8397_v16  ;;  %v14589_v9 = vpop.f32.mrf.mxu0  ;;  %v6397_v0 = vadd.f32 %v14884_v30, %v18446_v45 }
 0x31d   :  { %v6388_v38 = vpop.f32.mrf.mxu1  ;;  %v3639_v32 = vadd.f32 %v18466_v34, %v14589_v9 }
 0x31e   :  { %v8903_v4 = vpack.c.bf16 %v8396_v36, %v8395_v20  ;;  %v6389_v10 = vadd.f32 %v18446_v45, %v6388_v38  ;;  %v18510_v26 = vpop.f32.mrf.mxu0  ;;  %v22586_v36 = vld [vmem:[#allocation106_spill] sm:$0xff] }
 0x31f   :  { %v14885_v19 = vpop.f32.mrf.mxu1  ;;  %22585 = vst [vmem:[#allocation182_spill] sm:$0xff] %v18510_v26  ;;  %v4981_v30 = vmax.f32 %v3639_v32, 0.0 }
 0x320   :  { %v6400_v14 = vadd.f32 %v14885_v19, %v18446_v45  ;;  %15394 = vmatprep.mubr.msk.bf16.mxu0 %vm5537_vm1, %v8903_v4  ;;  %v14592_v47 = vpop.f32.mrf.mxu0  ;;  %v8399_v16 = vmax.f32 %v6389_v10, 0.0  ;;  %v8401_v4 = vmax.f32 %v6397_v0, 0.0 }
 0x321   :  { %v6391_v5 = vpop.f32.mrf.mxu1  ;;  %15395 = vmatmul.mubr.msk.bf16.gmra.mxu0 %vm5537_vm1, %v8904_v55  ;;  %v18520_v22 = vpack.c.bf16 %v4981_v30, %v4980_v2  ;;  %v3652_v49 = vadd.f32 %v18466_v34, %v14592_v47 }
 0x322   :  { %v6392_v58 = vadd.f32 %v18446_v45, %v6391_v5  ;;  %v8402_v40 = vmax.f32 %v6400_v14, 0.0  ;;  %v18518_v19 = vpop.f32.mrf.mxu0 }
 0x323   :  { %v14888_v20 = vpop.f32.mrf.mxu1  ;;  %14983 = vmatmul.mubr.msk.bf16.gmra.mxu1 %vm5537_vm1, %v22586_v36  ;;  %22587 = vst [vmem:[#allocation106_spill] sm:$0xff] %v18520_v22  ;;  %v4984_v32 = vmax.f32 %v3652_v49, 0.0 }
 0x324   :  { %v8400_v38 = vmax.f32 %v6392_v58, 0.0  ;;  %14986 = vmatprep.mubr.msk.bf16.mxu1 %vm5537_vm1, %v17871_v11  ;;  %v8906_v9 = vpack.c.bf16 %v8402_v40, %v8401_v4  ;;  %v14593_v26 = vpop.f32.mrf.mxu0  ;;  %v6413_v11 = vadd.f32 %v14888_v20, %v18446_v45 }
 0x325   :  { %v6404_v55 = vpop.f32.mrf.mxu1  ;;  %v3655_v40 = vadd.f32 %v18466_v34, %v14593_v26 }
 0x326   :  { %v8905_v5 = vpack.c.bf16 %v8400_v38, %v8399_v16  ;;  %v6405_v36 = vadd.f32 %v18446_v45, %v6404_v55  ;;  %v18528_v58 = vpop.f32.mrf.mxu0  ;;  %v8405_v55 = vmax.f32 %v6413_v11, 0.0 }
 0x327   :  { %v14889_v14 = vpop.f32.mrf.mxu1  ;;  %v4985_v20 = vmax.f32 %v3655_v40, 0.0 }
 0x328   :  { %v6416_v10 = vadd.f32 %v14889_v14, %v18446_v45  ;;  %15398 = vmatprep.mubr.msk.bf16.mxu0 %vm5537_vm1, %v8905_v5  ;;  %v14596_v38 = vpop.f32.mrf.mxu0  ;;  %v8403_v30 = vmax.f32 %v6405_v36, 0.0 }
 0x329   :  { %v6407_v0 = vpop.f32.mrf.mxu1  ;;  %15399 = vmatmul.mubr.msk.bf16.gmra.mxu0 %vm5537_vm1, %v8906_v9  ;;  %v18538_v49 = vpack.c.bf16 %v4985_v20, %v4984_v32 }
 0x32a   :  { %v6408_v2 = vadd.f32 %v18446_v45, %v6407_v0  ;;  %v8406_v47 = vmax.f32 %v6416_v10, 0.0  ;;  %v18536_v9 = vpop.f32.mrf.mxu0  ;;  %v3668_v0 = vadd.f32 %v18466_v34, %v14596_v38 }
 0x32b   :  { %v14892_v16 = vpop.f32.mrf.mxu1  ;;  %14987 = vmatmul.mubr.msk.bf16.gmra.mxu1 %vm5537_vm1, %v17869_v6  ;;  %22588 = vst [vmem:[#allocation183_spill] sm:$0xff] %v18538_v49 }
 0x32c   :  { %v8404_v4 = vmax.f32 %v6408_v2, 0.0  ;;  %14990 = vmatprep.mubr.msk.bf16.mxu1 %vm5537_vm1, %v17899_v54  ;;  %v8908_v26 = vpack.c.bf16 %v8406_v47, %v8405_v55  ;;  %v14597_v22 = vpop.f32.mrf.mxu0  ;;  %v6429_v54 = vadd.f32 %v14892_v16, %v18446_v45  ;;  %v4988_v40 = vmax.f32 %v3668_v0, 0.0 }
 0x32d   :  { %v6420_v5 = vpop.f32.mrf.mxu1  ;;  %v3671_v47 = vadd.f32 %v18466_v34, %v14597_v22 }
 0x32e   :  { %v8907_v14 = vpack.c.bf16 %v8404_v4, %v8403_v30  ;;  %v6421_v6 = vadd.f32 %v18446_v45, %v6420_v5  ;;  %v18546_v2 = vpop.f32.mrf.mxu0  ;;  %v8409_v5 = vmax.f32 %v6429_v54, 0.0 }
 0x32f   :  { %v14893_v10 = vpop.f32.mrf.mxu1  ;;  %v4989_v16 = vmax.f32 %v3671_v47, 0.0 }
 0x330   :  { %v6432_v36 = vadd.f32 %v14893_v10, %v18446_v45  ;;  %15402 = vmatprep.mubr.msk.bf16.mxu0 %vm5537_vm1, %v8907_v14  ;;  %v14600_v4 = vpop.f32.mrf.mxu0  ;;  %v8407_v20 = vmax.f32 %v6421_v6, 0.0 }
 0x331   :  { %v6423_v11 = vpop.f32.mrf.mxu1  ;;  %15403 = vmatmul.mubr.msk.bf16.gmra.mxu0 %vm5537_vm1, %v8908_v26  ;;  %v18556_v0 = vpack.c.bf16 %v4989_v16, %v4988_v40 }
 0x332   :  { %v6424_v32 = vadd.f32 %v18446_v45, %v6423_v11  ;;  %v8410_v38 = vmax.f32 %v6432_v36, 0.0  ;;  %v18554_v26 = vpop.f32.mrf.mxu0  ;;  %v3684_v11 = vadd.f32 %v18466_v34, %v14600_v4 }
 0x333   :  { %v14896_v30 = vpop.f32.mrf.mxu1  ;;  %14991 = vmatmul.mubr.msk.bf16.gmra.mxu1 %vm5537_vm1, %v17897_v15  ;;  %22589 = vst [vmem:[#allocation184_spill] sm:$0xff] %v18556_v0 }
 0x334   :  { %v8408_v55 = vmax.f32 %v6424_v32, 0.0  ;;  %14994 = vmatprep.mubr.msk.bf16.mxu1 %vm5537_vm1, %v17927_v62  ;;  %v8910_v22 = vpack.c.bf16 %v8410_v38, %v8409_v5  ;;  %v14601_v49 = vpop.f32.mrf.mxu0  ;;  %v6445_v62 = vadd.f32 %v14896_v30, %v18446_v45  ;;  %v4992_v47 = vmax.f32 %v3684_v11, 0.0 }
 0x335   :  { %v6436_v14 = vpop.f32.mrf.mxu1  ;;  %v3687_v38 = vadd.f32 %v18466_v34, %v14601_v49 }
 0x336   :  { %v8909_v10 = vpack.c.bf16 %v8408_v55, %v8407_v20  ;;  %v6437_v15 = vadd.f32 %v18446_v45, %v6436_v14  ;;  %v18564_v32 = vpop.f32.mrf.mxu0  ;;  %v8413_v14 = vmax.f32 %v6445_v62, 0.0 }
 0x337   :  { %v14897_v36 = vpop.f32.mrf.mxu1  ;;  %v4993_v30 = vmax.f32 %v3687_v38, 0.0 }
 0x338   :  { %v6448_v6 = vadd.f32 %v14897_v36, %v18446_v45  ;;  %15406 = vmatprep.mubr.msk.bf16.mxu0 %vm5537_vm1, %v8909_v10  ;;  %v14604_v55 = vpop.f32.mrf.mxu0  ;;  %v8411_v16 = vmax.f32 %v6437_v15, 0.0 }
 0x339   :  { %v6439_v54 = vpop.f32.mrf.mxu1  ;;  %15407 = vmatmul.mubr.msk.bf16.gmra.mxu0 %vm5537_vm1, %v8910_v22  ;;  %v18574_v11 = vpack.c.bf16 %v4993_v30, %v4992_v47 }
 0x33a   :  { %v6440_v40 = vadd.f32 %v18446_v45, %v6439_v54  ;;  %v8414_v4 = vmax.f32 %v6448_v6, 0.0  ;;  %v18572_v22 = vpop.f32.mrf.mxu0  ;;  %v3700_v54 = vadd.f32 %v18466_v34, %v14604_v55 }
 0x33b   :  { %v14900_v20 = vpop.f32.mrf.mxu1  ;;  %14995 = vmatmul.mubr.msk.bf16.gmra.mxu1 %vm5537_vm1, %v17925_v44 }
 0x33c   :  { %v8412_v5 = vmax.f32 %v6440_v40, 0.0  ;;  %14998 = vmatprep.mubr.msk.bf16.mxu1 %vm5537_vm1, %v17955_v42  ;;  %v8912_v49 = vpack.c.bf16 %v8414_v4, %v8413_v14  ;;  %v14605_v0 = vpop.f32.mrf.mxu0  ;;  %v6461_v42 = vadd.f32 %v14900_v20, %v18446_v45  ;;  %v4996_v38 = vmax.f32 %v3700_v54, 0.0 }
 0x33d   :  { %v6452_v10 = vpop.f32.mrf.mxu1  ;;  %v3703_v4 = vadd.f32 %v18466_v34, %v14605_v0 }
 0x33e   :  { %v8911_v36 = vpack.c.bf16 %v8412_v5, %v8411_v16  ;;  %v6453_v44 = vadd.f32 %v18446_v45, %v6452_v10  ;;  %v18582_v40 = vpop.f32.mrf.mxu0  ;;  %v8417_v10 = vmax.f32 %v6461_v42, 0.0 }
 0x33f   :  { %v14901_v6 = vpop.f32.mrf.mxu1  ;;  %v4997_v20 = vmax.f32 %v3703_v4, 0.0 }
 0x340   :  { %v6464_v15 = vadd.f32 %v14901_v6, %v18446_v45  ;;  %15410 = vmatprep.mubr.msk.bf16.mxu0 %vm5537_vm1, %v8911_v36  ;;  %v14608_v5 = vpop.f32.mrf.mxu0  ;;  %v8415_v30 = vmax.f32 %v6453_v44, 0.0 }
 0x341   :  { %v6455_v62 = vpop.f32.mrf.mxu1  ;;  %15411 = vmatmul.mubr.msk.bf16.gmra.mxu0 %vm5537_vm1, %v8912_v49  ;;  %v18592_v54 = vpack.c.bf16 %v4997_v20, %v4996_v38 }
 0x342   :  { %v6456_v47 = vadd.f32 %v18446_v45, %v6455_v62  ;;  %v8418_v55 = vmax.f32 %v6464_v15, 0.0  ;;  %v18590_v49 = vpop.f32.mrf.mxu0  ;;  %v3716_v62 = vadd.f32 %v18466_v34, %v14608_v5 }
 0x343   :  { %v14904_v16 = vpop.f32.mrf.mxu1  ;;  %14999 = vmatmul.mubr.msk.bf16.gmra.mxu1 %vm5537_vm1, %v17953_v43 }
 0x344   :  { %v8416_v14 = vmax.f32 %v6456_v47, 0.0  ;;  %15002 = vmatprep.mubr.msk.bf16.mxu1 %vm5537_vm1, %v17983_v29  ;;  %v8914_v0 = vpack.c.bf16 %v8418_v55, %v8417_v10  ;;  %v6477_v29 = vadd.f32 %v14904_v16, %v18446_v45  ;;  %v14609_v42 = vpop.f32.mrf.mxu0  ;;  %v5000_v38 = vmax.f32 %v3716_v62, 0.0 }
 0x345   :  { %v6468_v36 = vpop.f32.mrf.mxu1  ;;  %v3719_v55 = vadd.f32 %v18466_v34, %v14609_v42 }
 0x346   :  { %v8913_v6 = vpack.c.bf16 %v8416_v14, %v8415_v30  ;;  %v6469_v43 = vadd.f32 %v18446_v45, %v6468_v36  ;;  %v8421_v10 = vmax.f32 %v6477_v29, 0.0  ;;  %v3279_v29 = vadd.f32 %v18466_v34, %v18051_v35 }
 0x347   :  { %v14905_v15 = vpop.f32.mrf.mxu1  ;;  %v5001_v16 = vmax.f32 %v3719_v55, 0.0 }
 0x348   :  { %v6480_v44 = vadd.f32 %v14905_v15, %v18446_v45  ;;  %15414 = vmatprep.mubr.msk.bf16.mxu0 %vm5537_vm1, %v8913_v6  ;;  %v8419_v5 = vmax.f32 %v6469_v43, 0.0 }
 0x349   :  { %v6471_v47 = vpop.f32.mrf.mxu1  ;;  %15415 = vmatmul.mubr.msk.bf16.gmra.mxu0 %vm5537_vm1, %v8914_v0  ;;  %v18606_v0 = vpack.c.bf16 %v5001_v16, %v5000_v38  ;;  %v4891_v16 = vmax.f32 %v3279_v29, 0.0 }
 0x34a   :  { %v6472_v4 = vadd.f32 %v18446_v45, %v6471_v47  ;;  %v8422_v30 = vmax.f32 %v6480_v44, 0.0 }
 0x34b   :  { %v14908_v14 = vpop.f32.mrf.mxu1  ;;  %15003 = vmatmul.mubr.msk.bf16.gmra.mxu1 %vm5537_vm1, %v17981_v51 }
 0x34c   :  { %v8420_v20 = vmax.f32 %v6472_v4, 0.0  ;;  %15006 = vmatprep.mubr.msk.bf16.mxu1 %vm5537_vm1, %v18011_v24  ;;  %v8916_v15 = vpack.c.bf16 %v8422_v30, %v8421_v10  ;;  %v6493_v51 = vadd.f32 %v14908_v14, %v18446_v45  ;;  %v3276_v24 = vadd.f32 %v18466_v34, %v18037_v3 }
 0x34d   :  { %v6484_v36 = vpop.f32.mrf.mxu1 }
 0x34e   :  { %v8915_v6 = vpack.c.bf16 %v8420_v20, %v8419_v5  ;;  %v6485_v47 = vadd.f32 %v18446_v45, %v6484_v36  ;;  %v8425_v14 = vmax.f32 %v6493_v51, 0.0  ;;  %v4890_v20 = vmax.f32 %v3276_v24, 0.0 }
 0x34f   :  { %v14909_v62 = vpop.f32.mrf.mxu1 }
 0x350   :  { %v6496_v44 = vadd.f32 %v14909_v62, %v18446_v45  ;;  %15418 = vmatprep.mubr.msk.bf16.mxu0 %vm5537_vm1, %v8915_v6  ;;  %v8423_v55 = vmax.f32 %v6485_v47, 0.0  ;;  %v5330_v62 = vpack.c.bf16 %v4891_v16, %v4890_v20  ;;  %v3295_v47 = vadd.f32 %v18466_v34, %v18079_v63 }
 0x351   :  { %v6487_v43 = vpop.f32.mrf.mxu1  ;;  %15419 = vmatmul.mubr.msk.bf16.gmra.mxu0 %vm5537_vm1, %v8916_v15 }
 0x352   :  { %v6488_v42 = vadd.f32 %v18446_v45, %v6487_v43  ;;  %v8426_v4 = vmax.f32 %v6496_v44, 0.0 }
 0x353   :  { %v14912_v38 = vpop.f32.mrf.mxu1  ;;  %15007 = vmatmul.mubr.msk.bf16.gmra.mxu1 %vm5537_vm1, %v18009_v53 }
 0x354   :  { %v8424_v30 = vmax.f32 %v6488_v42, 0.0  ;;  %15010 = vmatprep.mubr.msk.bf16.mxu1 %vm5537_vm1, %v18043_v33  ;;  %v8918_v10 = vpack.c.bf16 %v8426_v4, %v8425_v14  ;;  %v6509_v53 = vadd.f32 %v14912_v38, %v18446_v45  ;;  %v3292_v33 = vadd.f32 %v18466_v34, %v18067_v46 }
 0x355   :  { %v6500_v5 = vpop.f32.mrf.mxu1 }
 0x356   :  { %v8917_v3 = vpack.c.bf16 %v8424_v30, %v8423_v55  ;;  %v6501_v35 = vadd.f32 %v18446_v45, %v6500_v5  ;;  %v8429_v42 = vmax.f32 %v6509_v53, 0.0  ;;  %v4894_v38 = vmax.f32 %v3292_v33, 0.0 }
 0x357   :  { %v14913_v36 = vpop.f32.mrf.mxu1  ;;  %v4895_v55 = vmax.f32 %v3295_v47, 0.0 }
 0x358   :  { %v6512_v6 = vadd.f32 %v14913_v36, %v18446_v45  ;;  %15422 = vmatprep.mubr.msk.bf16.mxu0 %vm5537_vm1, %v8917_v3  ;;  %v8427_v24 = vmax.f32 %v6501_v35, 0.0  ;;  %v3308_v3 = vadd.f32 %v18466_v34, %v18095_v13 }
 0x359   :  { %v6503_v15 = vpop.f32.mrf.mxu1  ;;  %15423 = vmatmul.mubr.msk.bf16.gmra.mxu0 %vm5537_vm1, %v8918_v10  ;;  %v5332_v16 = vpack.c.bf16 %v4895_v55, %v4894_v38  ;;  %v3311_v10 = vadd.f32 %v18466_v34, %v18107_v1  ;;  %v3327_v38 = vadd.f32 %v18466_v34, %v18132_v61 }
 0x35a   :  { %v6504_v44 = vadd.f32 %v18446_v45, %v6503_v15  ;;  %v8430_v51 = vmax.f32 %v6512_v6, 0.0  ;;  %v4898_v47 = vmax.f32 %v3308_v3, 0.0 }
 0x35b   :  { %v14916_v43 = vpop.f32.mrf.mxu1  ;;  %15011 = vmatmul.mubr.msk.bf16.gmra.mxu1 %vm5537_vm1, %v18041_v28  ;;  %v4903_v3 = vmax.f32 %v3327_v38, 0.0 }
 0x35c   :  { %v8428_v29 = vmax.f32 %v6504_v44, 0.0  ;;  %15014 = vmatprep.mubr.msk.bf16.mxu1 %vm5537_vm1, %v5330_v62  ;;  %v8920_v46 = vpack.c.bf16 %v8430_v51, %v8429_v42  ;;  %v6525_v20 = vadd.f32 %v14916_v43, %v18446_v45  ;;  %v4899_v44 = vmax.f32 %v3311_v10, 0.0 }
 0x35d   :  { %v6516_v4 = vpop.f32.mrf.mxu1 }
 0x35e   :  { %v8919_v30 = vpack.c.bf16 %v8428_v29, %v8427_v24  ;;  %v6517_v63 = vadd.f32 %v18446_v45, %v6516_v4  ;;  %v8433_v62 = vmax.f32 %v6525_v20, 0.0  ;;  %v5334_v42 = vpack.c.bf16 %v4899_v44, %v4898_v47 }
 0x35f   :  { %v14917_v14 = vpop.f32.mrf.mxu1  ;;  %v3324_v4 = vadd.f32 %v18466_v34, %v18123_v52 }
 0x360   :  { %v6528_v5 = vadd.f32 %v14917_v14, %v18446_v45  ;;  %15426 = vmatprep.mubr.msk.bf16.mxu0 %vm5537_vm1, %v8919_v30  ;;  %v8431_v53 = vmax.f32 %v6517_v63, 0.0  ;;  %v22590_v14 = vld [vmem:[#allocation125_spill] sm:$0xff] }
 0x361   :  { %v6519_v28 = vpop.f32.mrf.mxu1  ;;  %15427 = vmatmul.mubr.msk.bf16.gmra.mxu0 %vm5537_vm1, %v8920_v46 }
 0x362   :  { %v6520_v36 = vadd.f32 %v18446_v45, %v6519_v28  ;;  %v8434_v35 = vmax.f32 %v6528_v5, 0.0 }
 0x363   :  { %v14920_v6 = vpop.f32.mrf.mxu1  ;;  %15015 = vmatmul.mubr.msk.bf16.gmra.mxu1 %vm5537_vm1, %v18071_v8 }
 0x364   :  { %v8432_v15 = vmax.f32 %v6520_v36, 0.0  ;;  %15018 = vmatprep.mubr.msk.bf16.mxu1 %vm5537_vm1, %v5332_v16  ;;  %v8922_v13 = vpack.c.bf16 %v8434_v35, %v8433_v62  ;;  %v6541_v29 = vadd.f32 %v14920_v6, %v18446_v45  ;;  %v4902_v16 = vmax.f32 %v3324_v4, 0.0 }
 0x365   :  { %v6532_v33 = vpop.f32.mrf.mxu1  ;;  %v3340_v62 = vadd.f32 %v18466_v34, %v18143_v25 }
 0x366   :  { %v8921_v51 = vpack.c.bf16 %v8432_v15, %v8431_v53  ;;  %v6533_v1 = vadd.f32 %v18446_v45, %v6532_v33  ;;  %v8437_v20 = vmax.f32 %v6541_v29, 0.0  ;;  %v5336_v15 = vpack.c.bf16 %v4903_v3, %v4902_v16  ;;  %v22592_v3 = vld [vmem:[#allocation131_spill] sm:$0xff] }
 0x367   :  { %v14921_v43 = vpop.f32.mrf.mxu1  ;;  %v3343_v33 = vadd.f32 %v18466_v34, %v18152_v39 }
 0x368   :  { %v6544_v24 = vadd.f32 %v14921_v43, %v18446_v45  ;;  %15430 = vmatprep.mubr.msk.bf16.mxu0 %vm5537_vm1, %v8921_v51  ;;  %v8435_v63 = vmax.f32 %v6533_v1, 0.0 }
 0x369   :  { %v6535_v8 = vpop.f32.mrf.mxu1  ;;  %15431 = vmatmul.mubr.msk.bf16.gmra.mxu0 %vm5537_vm1, %v8922_v13  ;;  %v22591_v13 = vld [vmem:[#allocation128_spill] sm:$0xff] }
 0x36a   :  { %v6536_v55 = vadd.f32 %v18446_v45, %v6535_v8  ;;  %v8438_v30 = vmax.f32 %v6544_v24, 0.0  ;;  %v4906_v8 = vmax.f32 %v3340_v62, 0.0 }
 0x36b   :  { %v14924_v46 = vpop.f32.mrf.mxu1  ;;  %15019 = vmatmul.mubr.msk.bf16.gmra.mxu1 %vm5537_vm1, %v22590_v14 }
 0x36c   :  { %v8436_v5 = vmax.f32 %v6536_v55, 0.0  ;;  %15022 = vmatprep.mubr.msk.bf16.mxu1 %vm5537_vm1, %v5334_v42  ;;  %v8924_v52 = vpack.c.bf16 %v8438_v30, %v8437_v20  ;;  %v6557_v6 = vadd.f32 %v14924_v46, %v18446_v45  ;;  %v4907_v42 = vmax.f32 %v3343_v33, 0.0 }
 0x36d   :  { %v6548_v28 = vpop.f32.mrf.mxu1 }
 0x36e   :  { %v8923_v10 = vpack.c.bf16 %v8436_v5, %v8435_v63  ;;  %v6549_v61 = vadd.f32 %v18446_v45, %v6548_v28  ;;  %v8441_v24 = vmax.f32 %v6557_v6, 0.0  ;;  %v5338_v14 = vpack.c.bf16 %v4907_v42, %v4906_v8 }
 0x36f   :  { %v14925_v36 = vpop.f32.mrf.mxu1  ;;  %v3356_v63 = vadd.f32 %v18466_v34, %v18163_v57  ;;  %v3359_v5 = vadd.f32 %v18466_v34, %v18172_v59 }
 0x370   :  { %v6560_v35 = vadd.f32 %v14925_v36, %v18446_v45  ;;  %15434 = vmatprep.mubr.msk.bf16.mxu0 %vm5537_vm1, %v8923_v10  ;;  %v8439_v43 = vmax.f32 %v6549_v61, 0.0 }
 0x371   :  { %v6551_v53 = vpop.f32.mrf.mxu1  ;;  %15435 = vmatmul.mubr.msk.bf16.gmra.mxu0 %vm5537_vm1, %v8924_v52  ;;  %v4911_v6 = vmax.f32 %v3359_v5, 0.0 }
 0x372   :  { %v6552_v47 = vadd.f32 %v18446_v45, %v6551_v53  ;;  %v8442_v44 = vmax.f32 %v6560_v35, 0.0  ;;  %v4910_v35 = vmax.f32 %v3356_v63, 0.0 }
 0x373   :  { %v14928_v51 = vpop.f32.mrf.mxu1  ;;  %15023 = vmatmul.mubr.msk.bf16.gmra.mxu1 %vm5537_vm1, %v22591_v13  ;;  %v3375_v13 = vadd.f32 %v18466_v34, %v18192_v31 }
 0x374   :  { %v8440_v1 = vmax.f32 %v6552_v47, 0.0  ;;  %15026 = vmatprep.mubr.msk.bf16.mxu1 %vm5537_vm1, %v5336_v15  ;;  %v8926_v25 = vpack.c.bf16 %v8442_v44, %v8441_v24  ;;  %v6573_v30 = vadd.f32 %v14928_v51, %v18446_v45  ;;  %v5340_v44 = vpack.c.bf16 %v4911_v6, %v4910_v35 }
 0x375   :  { %v6564_v29 = vpop.f32.mrf.mxu1  ;;  %v3372_v51 = vadd.f32 %v18466_v34, %v18183_v21 }
 0x376   :  { %v8925_v4 = vpack.c.bf16 %v8440_v1, %v8439_v43  ;;  %v6565_v39 = vadd.f32 %v18446_v45, %v6564_v29  ;;  %v8445_v36 = vmax.f32 %v6573_v30, 0.0  ;;  %v22593_v29 = vld [vmem:[#allocation134_spill] sm:$0xff] }
 0x377   :  { %v14929_v38 = vpop.f32.mrf.mxu1 }
 0x378   :  { %v6576_v55 = vadd.f32 %v14929_v38, %v18446_v45  ;;  %15438 = vmatprep.mubr.msk.bf16.mxu0 %vm5537_vm1, %v8925_v4  ;;  %v8443_v10 = vmax.f32 %v6565_v39, 0.0  ;;  %v4914_v38 = vmax.f32 %v3372_v51, 0.0  ;;  %v4915_v39 = vmax.f32 %v3375_v13, 0.0 }
 0x379   :  { %v6567_v46 = vpop.f32.mrf.mxu1  ;;  %15439 = vmatmul.mubr.msk.bf16.gmra.mxu0 %vm5537_vm1, %v8926_v25  ;;  %v3404_v51 = vadd.f32 %v18466_v34, %v18223_v27  ;;  %v3407_v13 = vadd.f32 %v18466_v34, %v18232_v12 }
 0x37a   :  { %v6568_v20 = vadd.f32 %v18446_v45, %v6567_v46  ;;  %v8446_v28 = vmax.f32 %v6576_v55, 0.0  ;;  %v5342_v5 = vpack.c.bf16 %v4915_v39, %v4914_v38 }
 0x37b   :  { %v14932_v16 = vpop.f32.mrf.mxu1  ;;  %15027 = vmatmul.mubr.msk.bf16.gmra.mxu1 %vm5537_vm1, %v22592_v3  ;;  %v4922_v38 = vmax.f32 %v3404_v51, 0.0  ;;  %v4923_v39 = vmax.f32 %v3407_v13, 0.0  ;;  %v22597_v13 = vld [vmem:[#allocation146_spill] sm:$0xff] }
 0x37c   :  { %v8444_v52 = vmax.f32 %v6568_v20, 0.0  ;;  %15030 = vmatprep.mubr.msk.bf16.mxu1 %vm5537_vm1, %v5338_v14  ;;  %v8928_v57 = vpack.c.bf16 %v8446_v28, %v8445_v36  ;;  %v6589_v33 = vadd.f32 %v14932_v16, %v18446_v45  ;;  %v3388_v20 = vadd.f32 %v18466_v34, %v18203_v23 }
 0x37d   :  { %v6580_v61 = vpop.f32.mrf.mxu1  ;;  %v3391_v28 = vadd.f32 %v18466_v34, %v18212_v37 }
 0x37e   :  { %v8927_v53 = vpack.c.bf16 %v8444_v52, %v8443_v10  ;;  %v6581_v59 = vadd.f32 %v18446_v45, %v6580_v61  ;;  %v8449_v4 = vmax.f32 %v6589_v33, 0.0  ;;  %v22594_v52 = vld [vmem:[#allocation137_spill] sm:$0xff] }
 0x37f   :  { %v14933_v15 = vpop.f32.mrf.mxu1 }
 0x380   :  { %v6592_v62 = vadd.f32 %v14933_v15, %v18446_v45  ;;  %15442 = vmatprep.mubr.msk.bf16.mxu0 %vm5537_vm1, %v8927_v53  ;;  %v8447_v8 = vmax.f32 %v6581_v59, 0.0  ;;  %v4918_v53 = vmax.f32 %v3388_v20, 0.0 }
 0x381   :  { %v6583_v47 = vpop.f32.mrf.mxu1  ;;  %15443 = vmatmul.mubr.msk.bf16.gmra.mxu0 %vm5537_vm1, %v8928_v57  ;;  %v4919_v57 = vmax.f32 %v3391_v28, 0.0 }
 0x382   :  { %v6584_v43 = vadd.f32 %v18446_v45, %v6583_v47  ;;  %v8450_v1 = vmax.f32 %v6592_v62, 0.0 }
 0x383   :  { %v14936_v24 = vpop.f32.mrf.mxu1  ;;  %15031 = vmatmul.mubr.msk.bf16.gmra.mxu1 %vm5537_vm1, %v22593_v29  ;;  %v22595_v29 = vld [vmem:[#allocation140_spill] sm:$0xff] }
 0x384   :  { %v8448_v42 = vmax.f32 %v6584_v43, 0.0  ;;  %15034 = vmatprep.mubr.msk.bf16.mxu1 %vm5537_vm1, %v5340_v44  ;;  %v8930_v21 = vpack.c.bf16 %v8450_v1, %v8449_v4  ;;  %v6605_v14 = vadd.f32 %v14936_v24, %v18446_v45  ;;  %v5344_v44 = vpack.c.bf16 %v4919_v57, %v4918_v53 }
 0x385   :  { %v6596_v25 = vpop.f32.mrf.mxu1 }
 0x386   :  { %v8929_v55 = vpack.c.bf16 %v8448_v42, %v8447_v8  ;;  %v6597_v31 = vadd.f32 %v18446_v45, %v6596_v25  ;;  %v8453_v35 = vmax.f32 %v6605_v14, 0.0  ;;  %v5346_v14 = vpack.c.bf16 %v4923_v39, %v4922_v38 }
 0x387   :  { %v14937_v30 = vpop.f32.mrf.mxu1 }
 0x388   :  { %v6608_v46 = vadd.f32 %v14937_v30, %v18446_v45  ;;  %15446 = vmatprep.mubr.msk.bf16.mxu0 %vm5537_vm1, %v8929_v55  ;;  %v8451_v36 = vmax.f32 %v6597_v31, 0.0 }
 0x389   :  { %v6599_v63 = vpop.f32.mrf.mxu1  ;;  %15447 = vmatmul.mubr.msk.bf16.gmra.mxu0 %vm5537_vm1, %v8930_v21 }
 0x38a   :  { %v6600_v16 = vadd.f32 %v18446_v45, %v6599_v63  ;;  %v8454_v3 = vmax.f32 %v6608_v46, 0.0  ;;  %v3420_v63 = vadd.f32 %v18466_v34, %v18243_v41 }
 0x38b   :  { %v14940_v10 = vpop.f32.mrf.mxu1  ;;  %15035 = vmatmul.mubr.msk.bf16.gmra.mxu1 %vm5537_vm1, %v22594_v52 }
 0x38c   :  { %v8452_v61 = vmax.f32 %v6600_v16, 0.0  ;;  %15038 = vmatprep.mubr.msk.bf16.mxu1 %vm5537_vm1, %v5342_v5  ;;  %v8932_v23 = vpack.c.bf16 %v8454_v3, %v8453_v35  ;;  %v6621_v33 = vadd.f32 %v14940_v10, %v18446_v45  ;;  %v3423_v5 = vadd.f32 %v18466_v34, %v18252_v56  ;;  %v22596_v3 = vld [vmem:[#allocation143_spill] sm:$0xff] }
 0x38d   :  { %v6612_v6 = vpop.f32.mrf.mxu1  ;;  %v4926_v35 = vmax.f32 %v3420_v63, 0.0 }
 0x38e   :  { %v8931_v15 = vpack.c.bf16 %v8452_v61, %v8451_v36  ;;  %v6613_v37 = vadd.f32 %v18446_v45, %v6612_v6  ;;  %v8457_v4 = vmax.f32 %v6621_v33, 0.0  ;;  %v4927_v6 = vmax.f32 %v3423_v5, 0.0 }
 0x38f   :  { %v14941_v59 = vpop.f32.mrf.mxu1  ;;  %v3439_v33 = vadd.f32 %v18466_v34, %v18272_v7 }
 0x390   :  { %v6624_v62 = vadd.f32 %v14941_v59, %v18446_v45  ;;  %15450 = vmatprep.mubr.msk.bf16.mxu0 %vm5537_vm1, %v8931_v15  ;;  %v8455_v8 = vmax.f32 %v6613_v37, 0.0  ;;  %v5348_v37 = vpack.c.bf16 %v4927_v6, %v4926_v35 }
 0x391   :  { %v6615_v47 = vpop.f32.mrf.mxu1  ;;  %15451 = vmatmul.mubr.msk.bf16.gmra.mxu0 %vm5537_vm1, %v8932_v23 }
 0x392   :  { %v6616_v43 = vadd.f32 %v18446_v45, %v6615_v47  ;;  %v8458_v1 = vmax.f32 %v6624_v62, 0.0  ;;  %v3436_v62 = vadd.f32 %v18466_v34, %v18263_v60 }
 0x393   :  { %v14944_v24 = vpop.f32.mrf.mxu1  ;;  %15039 = vmatmul.mubr.msk.bf16.gmra.mxu1 %vm5537_vm1, %v22595_v29 }
 0x394   :  { %v8456_v42 = vmax.f32 %v6616_v43, 0.0  ;;  %15042 = vmatprep.mubr.msk.bf16.mxu1 %vm5537_vm1, %v5344_v44  ;;  %v8934_v27 = vpack.c.bf16 %v8458_v1, %v8457_v4  ;;  %v6637_v31 = vadd.f32 %v14944_v24, %v18446_v45 }
 0x395   :  { %v6628_v25 = vpop.f32.mrf.mxu1 }
 0x396   :  { %v8933_v55 = vpack.c.bf16 %v8456_v42, %v8455_v8  ;;  %v6629_v12 = vadd.f32 %v18446_v45, %v6628_v25  ;;  %v8461_v36 = vmax.f32 %v6637_v31, 0.0  ;;  %v4930_v8 = vmax.f32 %v3436_v62, 0.0 }
 0x397   :  { %v14945_v21 = vpop.f32.mrf.mxu1  ;;  %v4931_v42 = vmax.f32 %v3439_v33, 0.0 }
 0x398   :  { %v6640_v30 = vadd.f32 %v14945_v21, %v18446_v45  ;;  %15454 = vmatprep.mubr.msk.bf16.mxu0 %vm5537_vm1, %v8933_v55  ;;  %v8459_v10 = vmax.f32 %v6629_v12, 0.0  ;;  %v3452_v21 = vadd.f32 %v18466_v34, %v18283_v18  ;;  %v3455_v12 = vadd.f32 %v18466_v34, %v18292_v17 }
 0x399   :  { %v6631_v46 = vpop.f32.mrf.mxu1  ;;  %15455 = vmatmul.mubr.msk.bf16.gmra.mxu0 %vm5537_vm1, %v8934_v27  ;;  %v5350_v27 = vpack.c.bf16 %v4931_v42, %v4930_v8 }
 0x39a   :  { %v6632_v20 = vadd.f32 %v18446_v45, %v6631_v46  ;;  %v8462_v28 = vmax.f32 %v6640_v30, 0.0 }
 0x39b   :  { %v14948_v16 = vpop.f32.mrf.mxu1  ;;  %15043 = vmatmul.mubr.msk.bf16.gmra.mxu1 %vm5537_vm1, %v22596_v3  ;;  %v4935_v3 = vmax.f32 %v3455_v12, 0.0  ;;  %v22604_v12 = vld [vmem:[#allocation156_spill] sm:$0xff] }
 0x39c   :  { %v8460_v52 = vmax.f32 %v6632_v20, 0.0  ;;  %15046 = vmatprep.mubr.msk.bf16.mxu1 %vm5537_vm1, %v5346_v14  ;;  %v8936_v41 = vpack.c.bf16 %v8462_v28, %v8461_v36  ;;  %v6653_v23 = vadd.f32 %v14948_v16, %v18446_v45  ;;  %v22598_v14 = vld [vmem:[#allocation149_spill] sm:$0xff]  ;;  %v4934_v16 = vmax.f32 %v3452_v21, 0.0  ;;  %v18765_v36 = vld [vmem:[#allocation7] ss:$0 sm:$0xff] }
 0x39d   :  { %v6644_v61 = vpop.f32.mrf.mxu1 }
 0x39e   :  { %v8935_v53 = vpack.c.bf16 %v8460_v52, %v8459_v10  ;;  %v6645_v56 = vadd.f32 %v18446_v45, %v6644_v61  ;;  %v8465_v24 = vmax.f32 %v6653_v23, 0.0  ;;  %v5352_v6 = vpack.c.bf16 %v4935_v3, %v4934_v16 }
 0x39f   :  { %v14949_v57 = vpop.f32.mrf.mxu1 }
 0x3a0   :  { %v6656_v15 = vadd.f32 %v14949_v57, %v18446_v45  ;;  %15458 = vmatprep.mubr.msk.bf16.mxu0 %vm5537_vm1, %v8935_v53  ;;  %v8463_v43 = vmax.f32 %v6645_v56, 0.0  ;;  %v22599_v53 = vld [vmem:[#allocation154_spill] sm:$0xff]  ;;  %v22600_v57 = vld [vmem:[#allocation157_spill] sm:$0xff] }
 0x3a1   :  { %v6647_v59 = vpop.f32.mrf.mxu1  ;;  %15459 = vmatmul.mubr.msk.bf16.gmra.mxu0 %vm5537_vm1, %v8936_v41  ;;  %v3468_v41 = vadd.f32 %v18466_v34, %v22599_v53  ;;  %v3471_v56 = vadd.f32 %v18466_v34, %v22600_v57 }
 0x3a2   :  { %v6648_v47 = vadd.f32 %v18446_v45, %v6647_v59  ;;  %v8466_v44 = vmax.f32 %v6656_v15, 0.0 }
 0x3a3   :  { %v14952_v51 = vpop.f32.mrf.mxu1  ;;  %15047 = vmatmul.mubr.msk.bf16.gmra.mxu1 %vm5537_vm1, %v22597_v13  ;;  %v4939_v13 = vmax.f32 %v3471_v56, 0.0  ;;  %v22607_v56 = vld [vmem:[#allocation161_spill] sm:$0xff] }
 0x3a4   :  { %v8464_v1 = vmax.f32 %v6648_v47, 0.0  ;;  %15050 = vmatprep.mubr.msk.bf16.mxu1 %vm5537_vm1, %v5348_v37  ;;  %v8938_v60 = vpack.c.bf16 %v8466_v44, %v8465_v24  ;;  %v6669_v39 = vadd.f32 %v14952_v51, %v18446_v45  ;;  %v22601_v37 = vld [vmem:[#allocation152_spill] sm:$0xff]  ;;  %v4938_v51 = vmax.f32 %v3468_v41, 0.0 }
 0x3a5   :  { %v6660_v29 = vpop.f32.mrf.mxu1 }
 0x3a6   :  { %v8937_v4 = vpack.c.bf16 %v8464_v1, %v8463_v43  ;;  %v6661_v7 = vadd.f32 %v18446_v45, %v6660_v29  ;;  %v8469_v20 = vmax.f32 %v6669_v39, 0.0 }
 0x3a7   :  { %v14953_v25 = vpop.f32.mrf.mxu1 }
 0x3a8   :  { %v6672_v38 = vadd.f32 %v14953_v25, %v18446_v45  ;;  %15462 = vmatprep.mubr.msk.bf16.mxu0 %vm5537_vm1, %v8937_v4  ;;  %v8467_v63 = vmax.f32 %v6661_v7, 0.0  ;;  %v5354_v4 = vpack.c.bf16 %v4939_v13, %v4938_v51  ;;  %v22602_v25 = vld [vmem:[#allocation159_spill] sm:$0xff] }
 0x3a9   :  { %v6663_v55 = vpop.f32.mrf.mxu1  ;;  %15463 = vmatmul.mubr.msk.bf16.gmra.mxu0 %vm5537_vm1, %v8938_v60  ;;  %v18785_v60 = vld [vmem:[#allocation4] ss:$0 sm:$0xff] }
 0x3aa   :  { %v6664_v30 = vadd.f32 %v18446_v45, %v6663_v55  ;;  %v8470_v31 = vmax.f32 %v6672_v38, 0.0  ;;  %v3484_v7 = vadd.f32 %v18785_v60, %v22602_v25  ;;  %v22603_v38 = vld [vmem:[#allocation162_spill] sm:$0xff] }
 0x3ab   :  { %v14956_v46 = vpop.f32.mrf.mxu1  ;;  %15051 = vmatmul.mubr.msk.bf16.gmra.mxu1 %vm5537_vm1, %v22598_v14  ;;  %v3487_v39 = vadd.f32 %v18785_v60, %v22603_v38 }
 0x3ac   :  { %v8468_v5 = vmax.f32 %v6664_v30, 0.0  ;;  %15054 = vmatprep.mubr.msk.bf16.mxu1 %vm5537_vm1, %v5350_v27  ;;  %v8940_v18 = vpack.c.bf16 %v8470_v31, %v8469_v20  ;;  %v6685_v61 = vadd.f32 %v18765_v36, %v14956_v46 }
 0x3ad   :  { %v6676_v28 = vpop.f32.mrf.mxu1 }
 0x3ae   :  { %v8939_v10 = vpack.c.bf16 %v8468_v5, %v8467_v63  ;;  %v6677_v17 = vadd.f32 %v18765_v36, %v6676_v28  ;;  %v8473_v47 = vmax.f32 %v6685_v61, 0.0  ;;  %v4942_v63 = vmax.f32 %v3484_v7, 0.0 }
 0x3af   :  { %v14957_v52 = vpop.f32.mrf.mxu1  ;;  %v4943_v5 = vmax.f32 %v3487_v39, 0.0  ;;  %v22610_v39 = vld [vmem:[#allocation164_spill] sm:$0xff] }
 0x3b0   :  { %v6688_v45 = vadd.f32 %v18765_v36, %v14957_v52  ;;  %15466 = vmatprep.mubr.msk.bf16.mxu0 %vm5537_vm1, %v8939_v10  ;;  %v8471_v62 = vmax.f32 %v6677_v17, 0.0 }
 0x3b1   :  { %v6679_v35 = vpop.f32.mrf.mxu1  ;;  %15467 = vmatmul.mubr.msk.bf16.gmra.mxu0 %vm5537_vm1, %v8940_v18  ;;  %v5356_v17 = vpack.c.bf16 %v4943_v5, %v4942_v63  ;;  %v18821_v63 = vpop.f32.mrf.mxu0 }
 0x3b2   :  { %v6680_v15 = vadd.f32 %v18765_v36, %v6679_v35  ;;  %v8474_v23 = vmax.f32 %v6688_v45, 0.0  ;;  %v22605_v45 = vld [vmem:[#allocation75_spill] sm:$0xff]  ;;  %v22606_v35 = vld [vmem:[#allocation165_spill] sm:$0xff] }
 0x3b3   :  { %v14960_v59 = vpop.f32.mrf.mxu1  ;;  %15055 = vmatmul.mubr.msk.bf16.gmra.mxu1 %vm5537_vm1, %v22601_v37  ;;  %v3500_v61 = vadd.f32 %v18785_v60, %v22605_v45 }
 0x3b4   :  { %v8472_v33 = vmax.f32 %v6680_v15, 0.0  ;;  %15058 = vmatprep.mubr.msk.bf16.mxu1 %vm5537_vm1, %v5352_v6  ;;  %v8942_v1 = vpack.c.bf16 %v8474_v23, %v8473_v47  ;;  %v6701_v8 = vadd.f32 %v18765_v36, %v14960_v59  ;;  %v3503_v6 = vadd.f32 %v18785_v60, %v22606_v35 }
 0x3b5   :  { %v6692_v44 = vpop.f32.mrf.mxu1 }
 0x3b6   :  { %v8941_v43 = vpack.c.bf16 %v8472_v33, %v8471_v62  ;;  %v6693_v34 = vadd.f32 %v18765_v36, %v6692_v44  ;;  %v8477_v46 = vmax.f32 %v6701_v8, 0.0  ;;  %v4946_v62 = vmax.f32 %v3500_v61, 0.0 }
 0x3b7   :  { %v14961_v24 = vpop.f32.mrf.mxu1  ;;  %v4947_v33 = vmax.f32 %v3503_v6, 0.0 }
 0x3b8   :  { %v6704_v29 = vadd.f32 %v18765_v36, %v14961_v24  ;;  %15470 = vmatprep.mubr.msk.bf16.mxu0 %vm5537_vm1, %v8941_v43  ;;  %v8475_v30 = vmax.f32 %v6693_v34, 0.0 }
 0x3b9   :  { %v6695_v42 = vpop.f32.mrf.mxu1  ;;  %15471 = vmatmul.mubr.msk.bf16.gmra.mxu0 %vm5537_vm1, %v8942_v1  ;;  %v5358_v34 = vpack.c.bf16 %v4947_v33, %v4946_v62 }
 0x3ba   :  { %v6696_v55 = vadd.f32 %v18765_v36, %v6695_v42  ;;  %v8478_v27 = vmax.f32 %v6704_v29, 0.0  ;;  %v22608_v29 = vld [vmem:[#allocation79_spill] sm:$0xff]  ;;  %v22609_v42 = vld [vmem:[#allocation168_spill] sm:$0xff] }
 0x3bb   :  { %v14964_v21 = vpop.f32.mrf.mxu1  ;;  %15059 = vmatmul.mubr.msk.bf16.gmra.mxu1 %vm5537_vm1, %v22604_v12  ;;  %v3516_v8 = vadd.f32 %v18785_v60, %v22608_v29 }
 0x3bc   :  { %v8476_v31 = vmax.f32 %v6696_v55, 0.0  ;;  %15062 = vmatprep.mubr.msk.bf16.mxu1 %vm5537_vm1, %v5354_v4  ;;  %v8944_v28 = vpack.c.bf16 %v8478_v27, %v8477_v46  ;;  %v6717_v18 = vadd.f32 %v18765_v36, %v14964_v21  ;;  %v3519_v4 = vadd.f32 %v18785_v60, %v22609_v42 }
 0x3bd   :  { %v6708_v14 = vpop.f32.mrf.mxu1 }
 0x3be   :  { %v8943_v20 = vpack.c.bf16 %v8476_v31, %v8475_v30  ;;  %v6709_v3 = vadd.f32 %v18765_v36, %v6708_v14  ;;  %v8481_v59 = vmax.f32 %v6717_v18, 0.0  ;;  %v4950_v30 = vmax.f32 %v3516_v8, 0.0  ;;  %v22612_v18 = vld [vmem:[#allocation171_spill] sm:$0xff] }
 0x3bf   :  { %v14965_v16 = vpop.f32.mrf.mxu1  ;;  %v4951_v31 = vmax.f32 %v3519_v4, 0.0 }
 0x3c0   :  { %v6720_v10 = vadd.f32 %v18765_v36, %v14965_v16  ;;  %15474 = vmatprep.mubr.msk.bf16.mxu0 %vm5537_vm1, %v8943_v20  ;;  %v8479_v15 = vmax.f32 %v6709_v3, 0.0  ;;  %v18823_v20 = vld [vmem:[#allocation9] ss:$0 sm:$0xff]  ;;  %v22611_v3 = vld [vmem:[#allocation83_spill] sm:$0xff] }
 0x3c1   :  { %v6711_v52 = vpop.f32.mrf.mxu1  ;;  %15475 = vmatmul.mubr.msk.bf16.gmra.mxu0 %vm5537_vm1, %v8944_v28  ;;  %v5360_v35 = vpack.c.bf16 %v4951_v31, %v4950_v30 }
 0x3c2   :  { %v6712_v53 = vadd.f32 %v18765_v36, %v6711_v52  ;;  %v8482_v41 = vmax.f32 %v6720_v10, 0.0  ;;  %v3532_v10 = vadd.f32 %v18785_v60, %v22611_v3  ;;  %v3535_v52 = vadd.f32 %v18785_v60, %v22612_v18 }
 0x3c3   :  { %v14968_v57 = vpop.f32.mrf.mxu1  ;;  %15063 = vmatmul.mubr.msk.bf16.gmra.mxu1 %vm5537_vm1, %v22607_v56  ;;  %v22613_v56 = vld [vmem:[#allocation167_spill] sm:$0xff] }
 0x3c4   :  { %v8480_v23 = vmax.f32 %v6712_v53, 0.0  ;;  %15066 = vmatprep.mubr.msk.bf16.mxu1 %vm5537_vm1, %v5356_v17  ;;  %v8946_v44 = vpack.c.bf16 %v8482_v41, %v8481_v59  ;;  %v6733_v1 = vadd.f32 %v18765_v36, %v14968_v57  ;;  %v4954_v62 = vmax.f32 %v3532_v10, 0.0 }
 0x3c5   :  { %v6724_v37 = vpop.f32.mrf.mxu1  ;;  %v4955_v33 = vmax.f32 %v3535_v52, 0.0 }
 0x3c6   :  { %v8945_v47 = vpack.c.bf16 %v8480_v23, %v8479_v15  ;;  %v6725_v13 = vadd.f32 %v18765_v36, %v6724_v37  ;;  %v8485_v21 = vmax.f32 %v6733_v1, 0.0 }
 0x3c7   :  { %v14969_v51 = vpop.f32.mrf.mxu1  ;;  %v5362_v4 = vpack.c.bf16 %v4955_v33, %v4954_v62 }
 0x3c8   :  { %v6736_v43 = vadd.f32 %v18765_v36, %v14969_v51  ;;  %15478 = vmatprep.mubr.msk.bf16.mxu0 %vm5537_vm1, %v8945_v47  ;;  %v8483_v55 = vmax.f32 %v6725_v13, 0.0 }
 0x3c9   :  { %v6727_v24 = vpop.f32.mrf.mxu1  ;;  %15479 = vmatmul.mubr.msk.bf16.gmra.mxu0 %vm5537_vm1, %v8946_v44 }
 0x3ca   :  { %v6728_v25 = vadd.f32 %v18765_v36, %v6727_v24  ;;  %v8486_v7 = vmax.f32 %v6736_v43, 0.0 }
 0x3cb   :  { %v14972_v38 = vpop.f32.mrf.mxu1  ;;  %15067 = vmatmul.mubr.msk.bf16.gmra.mxu1 %vm5537_vm1, %v22610_v39  ;;  %v22614_v39 = vld [vmem:[#allocation87_spill] sm:$0xff] }
 0x3cc   :  { %v8484_v27 = vmax.f32 %v6728_v25, 0.0  ;;  %15070 = vmatprep.mubr.msk.bf16.mxu1 %vm5537_vm1, %v5358_v34  ;;  %v8948_v14 = vpack.c.bf16 %v8486_v7, %v8485_v21  ;;  %v6749_v17 = vadd.f32 %v18765_v36, %v14972_v38 }
 0x3cd   :  { %v6740_v12 = vpop.f32.mrf.mxu1 }
 0x3ce   :  { %v8947_v46 = vpack.c.bf16 %v8484_v27, %v8483_v55  ;;  %v6741_v28 = vadd.f32 %v18765_v36, %v6740_v12  ;;  %v8489_v47 = vmax.f32 %v6749_v17, 0.0  ;;  %v3548_v55 = vadd.f32 %v18785_v60, %v22614_v39  ;;  %v22615_v27 = vld [vmem:[#allocation174_spill] sm:$0xff] }
 0x3cf   :  { %v14973_v5 = vpop.f32.mrf.mxu1  ;;  %v3551_v21 = vadd.f32 %v18785_v60, %v22615_v27 }
 0x3d0   :  { %v6752_v16 = vadd.f32 %v18765_v36, %v14973_v5  ;;  %15482 = vmatprep.mubr.msk.bf16.mxu0 %vm5537_vm1, %v8947_v46  ;;  %v8487_v23 = vmax.f32 %v6741_v28, 0.0  ;;  %v4958_v17 = vmax.f32 %v3548_v55, 0.0 }
 0x3d1   :  { %v6743_v45 = vpop.f32.mrf.mxu1  ;;  %v15388_v61 = vpop.f32.mrf.mxu0  ;;  %15483 = vmatmul.mubr.msk.bf16.gmra.mxu0 %vm5537_vm1, %v8948_v14  ;;  %v22616_v14 = vld [vmem:[#allocation170_spill] sm:$0xff] }
 0x3d2   :  { %v6744_v6 = vadd.f32 %v18765_v36, %v6743_v45  ;;  %v9989_v53 = vadd.f32 %v15388_v61, %v18823_v20  ;;  %v8490_v41 = vmax.f32 %v6752_v16, 0.0  ;;  %v4959_v45 = vmax.f32 %v3551_v21, 0.0 }
 0x3d3   :  { %v14976_v57 = vpop.f32.mrf.mxu1  ;;  %15071 = vmatmul.mubr.msk.bf16.gmra.mxu1 %vm5537_vm1, %v22613_v56  ;;  %v9980_v15 = vpop.f32.mrf.mxu0 }
 0x3d4   :  { %v8488_v59 = vmax.f32 %v6744_v6, 0.0  ;;  %12030 = vst.msk [vmem:[%s22381_s7 + $0x10] sm:$0xff] %vm12027_vm2, %v9989_v53  ;;  %v9981_v37 = vadd.f32 %v18823_v20, %v9980_v15  ;;  %15074 = vmatprep.mubr.msk.bf16.mxu1 %vm5537_vm1, %v5360_v35  ;;  %v8950_v1 = vpack.c.bf16 %v8490_v41, %v8489_v47  ;;  %v6765_v25 = vadd.f32 %v18765_v36, %v14976_v57 }
 0x3d5   :  { %v6756_v44 = vpop.f32.mrf.mxu1  ;;  %v15389_v51 = vpop.f32.mrf.mxu0 }
 0x3d6   :  { %v8949_v13 = vpack.c.bf16 %v8488_v59, %v8487_v23  ;;  %12028 = vst.msk [vmem:[%s22381_s7] sm:$0xff] %vm12027_vm2, %v9981_v37  ;;  %v9992_v43 = vadd.f32 %v15389_v51, %v18823_v20  ;;  %v6757_v29 = vadd.f32 %v18765_v36, %v6756_v44  ;;  %v8493_v10 = vmax.f32 %v6765_v25, 0.0  ;;  %v22617_v23 = vld [vmem:[#allocation91_spill] sm:$0xff]  ;;  %v22618_v37 = vld [vmem:[#allocation177_spill] sm:$0xff] }
 0x3d7   :  { %v14977_v24 = vpop.f32.mrf.mxu1  ;;  %v9983_v34 = vpop.f32.mrf.mxu0  ;;  %v3564_v59 = vadd.f32 %v18785_v60, %v22617_v23  ;;  %v3567_v62 = vadd.f32 %v18785_v60, %v22618_v37  ;;  %v5364_v51 = vpack.c.bf16 %v4959_v45, %v4958_v17  ;;  %v22621_v17 = vld [vmem:[#allocation180_spill] sm:$0xff] }
 0x3d8   :  { %12031 = vst.msk [vmem:[%s22381_s7 + $0x18] sm:$0xff] %vm12027_vm2, %v9992_v43  ;;  %v6768_v8 = vadd.f32 %v18765_v36, %v14977_v24  ;;  %v9984_v42 = vadd.f32 %v18823_v20, %v9983_v34  ;;  %15486 = vmatprep.mubr.msk.bf16.mxu0 %vm5537_vm1, %v8949_v13  ;;  %v8491_v28 = vmax.f32 %v6757_v29, 0.0  ;;  %v22619_v34 = vld [vmem:[#allocation173_spill] sm:$0xff]  ;;  %v3583_v45 = vadd.f32 %v18785_v60, %v22621_v17 }
 0x3d9   :  { %v6759_v7 = vpop.f32.mrf.mxu1  ;;  %v15392_v38 = vpop.f32.mrf.mxu0  ;;  %15487 = vmatmul.mubr.msk.bf16.gmra.mxu0 %vm5537_vm1, %v8950_v1  ;;  %v4962_v25 = vmax.f32 %v3564_v59, 0.0 }
 0x3da   :  { %12029 = vst.msk [vmem:[%s22381_s7 + $0x8] sm:$0xff] %vm12027_vm2, %v9984_v42  ;;  %v6760_v12 = vadd.f32 %v18765_v36, %v6759_v7  ;;  %v10005_v30 = vadd.f32 %v15392_v38, %v18823_v20  ;;  %v8494_v31 = vmax.f32 %v6768_v8, 0.0  ;;  %v4963_v7 = vmax.f32 %v3567_v62, 0.0 }
 0x3db   :  { %v14980_v46 = vpop.f32.mrf.mxu1  ;;  %15075 = vmatmul.mubr.msk.bf16.gmra.mxu1 %vm5537_vm1, %v22616_v14  ;;  %v9996_v5 = vpop.f32.mrf.mxu0 }
 0x3dc   :  { %v8492_v16 = vmax.f32 %v6760_v12, 0.0  ;;  %12034 = vst.msk [vmem:[%s22381_s7 + $0x30] sm:$0xff] %vm12027_vm2, %v10005_v30  ;;  %v9997_v3 = vadd.f32 %v18823_v20, %v9996_v5  ;;  %15078 = vmatprep.mubr.msk.bf16.mxu1 %vm5537_vm1, %v5362_v4  ;;  %v8952_v6 = vpack.c.bf16 %v8494_v31, %v8493_v10  ;;  %v6781_v33 = vadd.f32 %v18765_v36, %v14980_v46 }
 0x3dd   :  { %v6772_v18 = vpop.f32.mrf.mxu1  ;;  %v15393_v52 = vpop.f32.mrf.mxu0 }
 0x3de   :  { %v8951_v61 = vpack.c.bf16 %v8492_v16, %v8491_v28  ;;  %12032 = vst.msk [vmem:[%s22381_s7 + $0x20] sm:$0xff] %vm12027_vm2, %v9997_v3  ;;  %v10008_v35 = vadd.f32 %v15393_v52, %v18823_v20  ;;  %v6773_v57 = vadd.f32 %v18765_v36, %v6772_v18  ;;  %v8497_v38 = vmax.f32 %v6781_v33, 0.0  ;;  %v22620_v18 = vld [vmem:[#allocation95_spill] sm:$0xff] }
 0x3df   :  { %v14981_v53 = vpop.f32.mrf.mxu1  ;;  %v9999_v41 = vpop.f32.mrf.mxu0  ;;  %v5366_v28 = vpack.c.bf16 %v4963_v7, %v4962_v25  ;;  %v3580_v52 = vadd.f32 %v18785_v60, %v22620_v18 }
 0x3e0   :  { %12035 = vst.msk [vmem:[%s22381_s7 + $0x38] sm:$0xff] %vm12027_vm2, %v10008_v35  ;;  %v6784_v56 = vadd.f32 %v18765_v36, %v14981_v53  ;;  %v10000_v15 = vadd.f32 %v18823_v20, %v9999_v41  ;;  %15490 = vmatprep.mubr.msk.bf16.mxu0 %vm5537_vm1, %v8951_v61  ;;  %v8495_v8 = vmax.f32 %v6773_v57, 0.0  ;;  %v22622_v41 = vld [vmem:[#allocation176_spill] sm:$0xff] }
 0x3e1   :  { %v6775_v47 = vpop.f32.mrf.mxu1  ;;  %v15396_v44 = vpop.f32.mrf.mxu0  ;;  %15491 = vmatmul.mubr.msk.bf16.gmra.mxu0 %vm5537_vm1, %v8952_v6  ;;  %v4966_v33 = vmax.f32 %v3580_v52, 0.0 }
 0x3e2   :  { %12033 = vst.msk [vmem:[%s22381_s7 + $0x28] sm:$0xff] %vm12027_vm2, %v10000_v15  ;;  %v6776_v13 = vadd.f32 %v18765_v36, %v6775_v47  ;;  %v10021_v43 = vadd.f32 %v15396_v44, %v18823_v20  ;;  %v8498_v1 = vmax.f32 %v6784_v56, 0.0  ;;  %v4967_v47 = vmax.f32 %v3583_v45, 0.0 }
 0x3e3   :  { %v14984_v24 = vpop.f32.mrf.mxu1  ;;  %15079 = vmatmul.mubr.msk.bf16.gmra.mxu1 %vm5537_vm1, %v22619_v34  ;;  %v10012_v29 = vpop.f32.mrf.mxu0 }
 0x3e4   :  { %v8496_v42 = vmax.f32 %v6776_v13, 0.0  ;;  %12038 = vst.msk [vmem:[%s22381_s7 + $0x50] sm:$0xff] %vm12027_vm2, %v10021_v43  ;;  %v10013_v4 = vadd.f32 %v18823_v20, %v10012_v29  ;;  %15082 = vmatprep.mubr.msk.bf16.mxu1 %vm5537_vm1, %v5364_v51  ;;  %v8954_v12 = vpack.c.bf16 %v8498_v1, %v8497_v38  ;;  %v6797_v16 = vadd.f32 %v18765_v36, %v14984_v24 }
 0x3e5   :  { %v6788_v39 = vpop.f32.mrf.mxu1  ;;  %v15397_v55 = vpop.f32.mrf.mxu0 }
 0x3e6   :  { %v8953_v27 = vpack.c.bf16 %v8496_v42, %v8495_v8  ;;  %12036 = vst.msk [vmem:[%s22381_s7 + $0x40] sm:$0xff] %vm12027_vm2, %v10013_v4  ;;  %v10024_v21 = vadd.f32 %v15397_v55, %v18823_v20  ;;  %v6789_v46 = vadd.f32 %v18765_v36, %v6788_v39  ;;  %v8501_v59 = vmax.f32 %v6797_v16, 0.0  ;;  %v22623_v8 = vld [vmem:[#allocation94_spill] sm:$0xff]  ;;  %v22624_v4 = vld [vmem:[#allocation181_spill] sm:$0xff] }
 0x3e7   :  { %v14985_v30 = vpop.f32.mrf.mxu1  ;;  %v10015_v31 = vpop.f32.mrf.mxu0  ;;  %v3596_v42 = vadd.f32 %v18785_v60, %v22623_v8  ;;  %v3599_v25 = vadd.f32 %v18785_v60, %v22624_v4  ;;  %v5368_v55 = vpack.c.bf16 %v4967_v47, %v4966_v33 }
 0x3e8   :  { %12039 = vst.msk [vmem:[%s22381_s7 + $0x58] sm:$0xff] %vm12027_vm2, %v10024_v21  ;;  %v6800_v14 = vadd.f32 %v18765_v36, %v14985_v30  ;;  %v10016_v5 = vadd.f32 %v18823_v20, %v10015_v31  ;;  %15494 = vmatprep.mubr.msk.bf16.mxu0 %vm5537_vm1, %v8953_v27  ;;  %v8499_v56 = vmax.f32 %v6789_v46, 0.0  ;;  %v22625_v31 = vld [vmem:[#allocation179_spill] sm:$0xff] }
 0x3e9   :  { %v6791_v3 = vpop.f32.mrf.mxu1  ;;  %v15400_v10 = vpop.f32.mrf.mxu0  ;;  %15495 = vmatmul.mubr.msk.bf16.gmra.mxu0 %vm5537_vm1, %v8954_v12  ;;  %v4970_v16 = vmax.f32 %v3596_v42, 0.0 }
 0x3ea   :  { %12037 = vst.msk [vmem:[%s22381_s7 + $0x48] sm:$0xff] %vm12027_vm2, %v10016_v5  ;;  %v6792_v61 = vadd.f32 %v18765_v36, %v6791_v3  ;;  %v10037_v35 = vadd.f32 %v15400_v10, %v18823_v20  ;;  %v8502_v6 = vmax.f32 %v6800_v14, 0.0  ;;  %v4971_v3 = vmax.f32 %v3599_v25, 0.0 }
 0x3eb   :  { %v14988_v53 = vpop.f32.mrf.mxu1  ;;  %15083 = vmatmul.mubr.msk.bf16.gmra.mxu1 %vm5537_vm1, %v22622_v41  ;;  %v10028_v57 = vpop.f32.mrf.mxu0 }
 0x3ec   :  { %v8500_v15 = vmax.f32 %v6792_v61, 0.0  ;;  %12042 = vst.msk [vmem:[%s22381_s7 + $0x70] sm:$0xff] %vm12027_vm2, %v10037_v35  ;;  %v10029_v23 = vadd.f32 %v18823_v20, %v10028_v57  ;;  %15086 = vmatprep.mubr.msk.bf16.mxu1 %vm5537_vm1, %v5366_v28  ;;  %v8956_v13 = vpack.c.bf16 %v8502_v6, %v8501_v59  ;;  %v6813_v7 = vadd.f32 %v18765_v36, %v14988_v53 }
 0x3ed   :  { %v6804_v37 = vpop.f32.mrf.mxu1  ;;  %v15401_v62 = vpop.f32.mrf.mxu0 }
 0x3ee   :  { %v8955_v44 = vpack.c.bf16 %v8500_v15, %v8499_v56  ;;  %12040 = vst.msk [vmem:[%s22381_s7 + $0x60] sm:$0xff] %vm12027_vm2, %v10029_v23  ;;  %v10040_v51 = vadd.f32 %v15401_v62, %v18823_v20  ;;  %v6805_v24 = vadd.f32 %v18765_v36, %v6804_v37  ;;  %v8505_v10 = vmax.f32 %v6813_v7, 0.0  ;;  %v22626_v62 = vld [vmem:[#allocation103_spill] sm:$0xff] }
 0x3ef   :  { %v14989_v43 = vpop.f32.mrf.mxu1  ;;  %v10031_v1 = vpop.f32.mrf.mxu0  ;;  %v5370_v56 = vpack.c.bf16 %v4971_v3, %v4970_v16  ;;  %v3612_v37 = vadd.f32 %v18785_v60, %v18482_v50  ;;  %v3615_v33 = vadd.f32 %v18785_v60, %v22626_v62 }
 0x3f0   :  { %12043 = vst.msk [vmem:[%s22381_s7 + $0x78] sm:$0xff] %vm12027_vm2, %v10040_v51  ;;  %v6816_v34 = vadd.f32 %v18765_v36, %v14989_v43  ;;  %v10032_v29 = vadd.f32 %v18823_v20, %v10031_v1  ;;  %15498 = vmatprep.mubr.msk.bf16.mxu0 %vm5537_vm1, %v8955_v44  ;;  %v8503_v14 = vmax.f32 %v6805_v24, 0.0  ;;  %v22627_v43 = vld [vmem:[#allocation99_spill] sm:$0xff] }
 0x3f1   :  { %v6807_v38 = vpop.f32.mrf.mxu1  ;;  %v15404_v39 = vpop.f32.mrf.mxu0  ;;  %15499 = vmatmul.mubr.msk.bf16.gmra.mxu0 %vm5537_vm1, %v8956_v13  ;;  %v4974_v4 = vmax.f32 %v3612_v37, 0.0  ;;  %v4975_v25 = vmax.f32 %v3615_v33, 0.0 }
 0x3f2   :  { %12041 = vst.msk [vmem:[%s22381_s7 + $0x68] sm:$0xff] %vm12027_vm2, %v10032_v29  ;;  %v6808_v27 = vadd.f32 %v18765_v36, %v6807_v38  ;;  %v10053_v21 = vadd.f32 %v15404_v39, %v18823_v20  ;;  %v8506_v12 = vmax.f32 %v6816_v34, 0.0 }
 0x3f3   :  { %v14992_v30 = vpop.f32.mrf.mxu1  ;;  %15087 = vmatmul.mubr.msk.bf16.gmra.mxu1 %vm5537_vm1, %v22625_v31  ;;  %v10044_v46 = vpop.f32.mrf.mxu0  ;;  %v3628_v31 = vadd.f32 %v18785_v60, %v18500_v48  ;;  %v5372_v3 = vpack.c.bf16 %v4975_v25, %v4974_v4  ;;  %v22630_v25 = vld [vmem:[#allocation102_spill] sm:$0xff] }
 0x3f4   :  { %v8504_v5 = vmax.f32 %v6808_v27, 0.0  ;;  %12046 = vst.msk [vmem:[%s22381_s7 + $0x90] sm:$0xff] %vm12027_vm2, %v10053_v21  ;;  %v10045_v28 = vadd.f32 %v18823_v20, %v10044_v46  ;;  %15090 = vmatprep.mubr.msk.bf16.mxu1 %vm5537_vm1, %v5368_v55  ;;  %v8958_v61 = vpack.c.bf16 %v8506_v12, %v8505_v10  ;;  %v6829_v15 = vadd.f32 %v18765_v36, %v14992_v30  ;;  %v22628_v46 = vld [vmem:[#allocation182_spill] sm:$0xff] }
 0x3f5   :  { %v6820_v18 = vpop.f32.mrf.mxu1  ;;  %v15405_v52 = vpop.f32.mrf.mxu0 }
 0x3f6   :  { %v8957_v17 = vpack.c.bf16 %v8504_v5, %v8503_v14  ;;  %12044 = vst.msk [vmem:[%s22381_s7 + $0x80] sm:$0xff] %vm12027_vm2, %v10045_v28  ;;  %v10056_v45 = vadd.f32 %v15405_v52, %v18823_v20  ;;  %v6821_v53 = vadd.f32 %v18765_v36, %v6820_v18  ;;  %v8509_v29 = vmax.f32 %v6829_v15, 0.0 }
 0x3f7   :  { %v14993_v35 = vpop.f32.mrf.mxu1  ;;  %v10047_v6 = vpop.f32.mrf.mxu0  ;;  %v3631_v14 = vadd.f32 %v18785_v60, %v22628_v46 }
 0x3f8   :  { %12047 = vst.msk [vmem:[%s22381_s7 + $0x98] sm:$0xff] %vm12027_vm2, %v10056_v45  ;;  %v6832_v41 = vadd.f32 %v18765_v36, %v14993_v35  ;;  %v10048_v57 = vadd.f32 %v18823_v20, %v10047_v6  ;;  %15502 = vmatprep.mubr.msk.bf16.mxu0 %vm5537_vm1, %v8957_v17  ;;  %v8507_v24 = vmax.f32 %v6821_v53, 0.0  ;;  %v22629_v17 = vld [vmem:[#allocation98_spill] sm:$0xff]  ;;  %v4978_v53 = vmax.f32 %v3628_v31, 0.0 }
 0x3f9   :  { %v6823_v23 = vpop.f32.mrf.mxu1  ;;  %v15408_v59 = vpop.f32.mrf.mxu0  ;;  %15503 = vmatmul.mubr.msk.bf16.gmra.mxu0 %vm5537_vm1, %v8958_v61 }
 0x3fa   :  { %12045 = vst.msk [vmem:[%s22381_s7 + $0x88] sm:$0xff] %vm12027_vm2, %v10048_v57  ;;  %v6824_v47 = vadd.f32 %v18765_v36, %v6823_v23  ;;  %v10069_v44 = vadd.f32 %v15408_v59, %v18823_v20  ;;  %v8510_v51 = vmax.f32 %v6832_v41, 0.0  ;;  %v4979_v41 = vmax.f32 %v3631_v14, 0.0 }
 0x3fb   :  { %v14996_v13 = vpop.f32.mrf.mxu1  ;;  %15091 = vmatmul.mubr.msk.bf16.gmra.mxu1 %vm5537_vm1, %v22627_v43  ;;  %v10060_v1 = vpop.f32.mrf.mxu0 }
 0x3fc   :  { %v8508_v50 = vmax.f32 %v6824_v47, 0.0  ;;  %12050 = vst.msk [vmem:[%s22381_s7 + $0xb0] sm:$0xff] %vm12027_vm2, %v10069_v44  ;;  %v10061_v34 = vadd.f32 %v18823_v20, %v10060_v1  ;;  %15094 = vmatprep.mubr.msk.bf16.mxu1 %vm5537_vm1, %v5370_v56  ;;  %v8960_v39 = vpack.c.bf16 %v8510_v51, %v8509_v29  ;;  %v6845_v5 = vadd.f32 %v18765_v36, %v14996_v13 }
 0x3fd   :  { %v6836_v8 = vpop.f32.mrf.mxu1  ;;  %v15409_v42 = vpop.f32.mrf.mxu0  ;;  %v5374_v13 = vpack.c.bf16 %v4979_v41, %v4978_v53  ;;  %v22631_v53 = vld [vmem:[#allocation106_spill] sm:$0xff] }
 0x3fe   :  { %v8959_v7 = vpack.c.bf16 %v8508_v50, %v8507_v24  ;;  %12048 = vst.msk [vmem:[%s22381_s7 + $0xa0] sm:$0xff] %vm12027_vm2, %v10061_v34  ;;  %v10072_v38 = vadd.f32 %v15409_v42, %v18823_v20  ;;  %v6837_v21 = vadd.f32 %v18765_v36, %v6836_v8  ;;  %v8513_v57 = vmax.f32 %v6845_v5, 0.0 }
 0x3ff   :  { %v14997_v55 = vpop.f32.mrf.mxu1  ;;  %v10063_v27 = vpop.f32.mrf.mxu0  ;;  %v3644_v50 = vadd.f32 %v18785_v60, %v18518_v19  ;;  %v3647_v34 = vadd.f32 %v18785_v60, %v18528_v58 }
 0x400   :  { %12051 = vst.msk [vmem:[%s22381_s7 + $0xb8] sm:$0xff] %vm12027_vm2, %v10072_v38  ;;  %v6848_v12 = vadd.f32 %v18765_v36, %v14997_v55  ;;  %v10064_v30 = vadd.f32 %v18823_v20, %v10063_v27  ;;  %15506 = vmatprep.mubr.msk.bf16.mxu0 %vm5537_vm1, %v8959_v7  ;;  %v8511_v61 = vmax.f32 %v6837_v21, 0.0 }
 0x401   :  { %v6839_v28 = vpop.f32.mrf.mxu1  ;;  %v15412_v16 = vpop.f32.mrf.mxu0  ;;  %15507 = vmatmul.mubr.msk.bf16.gmra.mxu0 %vm5537_vm1, %v8960_v39  ;;  %v4982_v21 = vmax.f32 %v3644_v50, 0.0 }
 0x402   :  { %12049 = vst.msk [vmem:[%s22381_s7 + $0xa8] sm:$0xff] %vm12027_vm2, %v10064_v30  ;;  %v6840_v10 = vadd.f32 %v18765_v36, %v6839_v28  ;;  %v10085_v18 = vadd.f32 %v15412_v16, %v18823_v20  ;;  %v8514_v48 = vmax.f32 %v6848_v12, 0.0  ;;  %v4983_v12 = vmax.f32 %v3647_v34, 0.0 }
 0x403   :  { %v15000_v52 = vpop.f32.mrf.mxu1  ;;  %15095 = vmatmul.mubr.msk.bf16.gmra.mxu1 %vm5537_vm1, %v22629_v17  ;;  %v10076_v45 = vpop.f32.mrf.mxu0 }
 0x404   :  { %v8512_v35 = vmax.f32 %v6840_v10, 0.0  ;;  %12054 = vst.msk [vmem:[%s22381_s7 + $0xd0] sm:$0xff] %vm12027_vm2, %v10085_v18  ;;  %v10077_v6 = vadd.f32 %v18823_v20, %v10076_v45  ;;  %15098 = vmatprep.mubr.msk.bf16.mxu1 %vm5537_vm1, %v5372_v3  ;;  %v8962_v37 = vpack.c.bf16 %v8514_v48, %v8513_v57  ;;  %v6861_v43 = vadd.f32 %v18765_v36, %v15000_v52 }
 0x405   :  { %v6852_v56 = vpop.f32.mrf.mxu1  ;;  %v15413_v15 = vpop.f32.mrf.mxu0  ;;  %v3660_v10 = vadd.f32 %v18785_v60, %v18536_v9  ;;  %v3663_v18 = vadd.f32 %v18785_v60, %v18546_v2  ;;  %v5376_v45 = vpack.c.bf16 %v4983_v12, %v4982_v21 }
 0x406   :  { %v8961_v23 = vpack.c.bf16 %v8512_v35, %v8511_v61  ;;  %12052 = vst.msk [vmem:[%s22381_s7 + $0xc0] sm:$0xff] %vm12027_vm2, %v10077_v6  ;;  %v10088_v59 = vadd.f32 %v15413_v15, %v18823_v20  ;;  %v6853_v47 = vadd.f32 %v18765_v36, %v6852_v56  ;;  %v8517_v39 = vmax.f32 %v6861_v43, 0.0 }
 0x407   :  { %v15001_v62 = vpop.f32.mrf.mxu1  ;;  %v10079_v33 = vpop.f32.mrf.mxu0  ;;  %v4986_v15 = vmax.f32 %v3660_v10, 0.0 }
 0x408   :  { %12055 = vst.msk [vmem:[%s22381_s7 + $0xd8] sm:$0xff] %vm12027_vm2, %v10088_v59  ;;  %v6864_v44 = vadd.f32 %v18765_v36, %v15001_v62  ;;  %v10080_v51 = vadd.f32 %v18823_v20, %v10079_v33  ;;  %15510 = vmatprep.mubr.msk.bf16.mxu0 %vm5537_vm1, %v8961_v23  ;;  %v8515_v38 = vmax.f32 %v6853_v47, 0.0  ;;  %v4987_v23 = vmax.f32 %v3663_v18, 0.0 }
 0x409   :  { %v6855_v1 = vpop.f32.mrf.mxu1  ;;  %v15416_v24 = vpop.f32.mrf.mxu0  ;;  %15511 = vmatmul.mubr.msk.bf16.gmra.mxu0 %vm5537_vm1, %v8962_v37 }
 0x40a   :  { %12053 = vst.msk [vmem:[%s22381_s7 + $0xc8] sm:$0xff] %vm12027_vm2, %v10080_v51  ;;  %v6856_v29 = vadd.f32 %v18765_v36, %v6855_v1  ;;  %v10101_v8 = vadd.f32 %v15416_v24, %v18823_v20  ;;  %v8518_v42 = vmax.f32 %v6864_v44, 0.0  ;;  %v5378_v50 = vpack.c.bf16 %v4987_v23, %v4986_v15 }
 0x40b   :  { %v15004_v4 = vpop.f32.mrf.mxu1  ;;  %15099 = vmatmul.mubr.msk.bf16.gmra.mxu1 %vm5537_vm1, %v22630_v25  ;;  %v10092_v7 = vpop.f32.mrf.mxu0 }
 0x40c   :  { %v8516_v19 = vmax.f32 %v6856_v29, 0.0  ;;  %12058 = vst.msk [vmem:[%s22381_s7 + $0xf0] sm:$0xff] %vm12027_vm2, %v10101_v8  ;;  %v10093_v58 = vadd.f32 %v18823_v20, %v10092_v7  ;;  %15102 = vmatprep.mubr.msk.bf16.mxu1 %vm5537_vm1, %v5374_v13  ;;  %v8964_v46 = vpack.c.bf16 %v8518_v42, %v8517_v39  ;;  %v6877_v48 = vadd.f32 %v18765_v36, %v15004_v4 }
 0x40d   :  { %v6868_v55 = vpop.f32.mrf.mxu1  ;;  %v15417_v27 = vpop.f32.mrf.mxu0  ;;  %v3676_v42 = vadd.f32 %v18785_v60, %v18554_v26  ;;  %v3679_v4 = vadd.f32 %v18785_v60, %v18564_v32 }
 0x40e   :  { %v8963_v30 = vpack.c.bf16 %v8516_v19, %v8515_v38  ;;  %12056 = vst.msk [vmem:[%s22381_s7 + $0xe0] sm:$0xff] %vm12027_vm2, %v10093_v58  ;;  %v10104_v31 = vadd.f32 %v15417_v27, %v18823_v20  ;;  %v6869_v28 = vadd.f32 %v18765_v36, %v6868_v55  ;;  %v8521_v59 = vmax.f32 %v6877_v48, 0.0  ;;  %v22632_v58 = vld [vmem:[#allocation183_spill] sm:$0xff] }
 0x40f   :  { %v15005_v14 = vpop.f32.mrf.mxu1  ;;  %v10095_v5 = vpop.f32.mrf.mxu0  ;;  %v3692_v48 = vadd.f32 %v18785_v60, %v18572_v22 }
 0x410   :  { %12059 = vst.msk [vmem:[%s22381_s7 + $0xf8] sm:$0xff] %vm12027_vm2, %v10104_v31  ;;  %v6880_v16 = vadd.f32 %v18765_v36, %v15005_v14  ;;  %v10096_v3 = vadd.f32 %v18823_v20, %v10095_v5  ;;  %15514 = vmatprep.mubr.msk.bf16.mxu0 %vm5537_vm1, %v8963_v30  ;;  %v8519_v41 = vmax.f32 %v6869_v28, 0.0  ;;  %v4990_v30 = vmax.f32 %v3676_v42, 0.0 }
 0x411   :  { %v6871_v52 = vpop.f32.mrf.mxu1  ;;  %v15420_v17 = vpop.f32.mrf.mxu0  ;;  %15515 = vmatmul.mubr.msk.bf16.gmra.mxu0 %vm5537_vm1, %v8964_v46  ;;  %v4991_v31 = vmax.f32 %v3679_v4, 0.0  ;;  %v4994_v15 = vmax.f32 %v3692_v48, 0.0  ;;  %v3708_v42 = vadd.f32 %v18785_v60, %v18590_v49  ;;  %v3711_v4 = vadd.f32 %v18785_v60, %v18821_v63 }
 0x412   :  { %12057 = vst.msk [vmem:[%s22381_s7 + $0xe8] sm:$0xff] %vm12027_vm2, %v10096_v3  ;;  %v6872_v61 = vadd.f32 %v18765_v36, %v6871_v52  ;;  %v10117_v35 = vadd.f32 %v15420_v17, %v18823_v20  ;;  %v8522_v9 = vmax.f32 %v6880_v16, 0.0  ;;  %v3695_v52 = vadd.f32 %v18785_v60, %v18582_v40 }
 0x413   :  { %v15008_v6 = vpop.f32.mrf.mxu1  ;;  %15103 = vmatmul.mubr.msk.bf16.gmra.mxu1 %vm5537_vm1, %v22631_v53  ;;  %v10108_v2 = vpop.f32.mrf.mxu0 }
 0x414   :  { %v8520_v57 = vmax.f32 %v6872_v61, 0.0  ;;  %12062 = vst.msk [vmem:[%s22381_s7 + $0x110] sm:$0xff] %vm12027_vm2, %v10117_v35  ;;  %v10109_v56 = vadd.f32 %v18823_v20, %v10108_v2  ;;  %15106 = vmatprep.mubr.msk.bf16.mxu1 %vm5537_vm1, %v5376_v45  ;;  %v8966_v44 = vpack.c.bf16 %v8522_v9, %v8521_v59  ;;  %v6893_v34 = vadd.f32 %v18765_v36, %v15008_v6  ;;  %v22633_v2 = vld [vmem:[#allocation184_spill] sm:$0xff] }
 0x415   :  { %v6884_v37 = vpop.f32.mrf.mxu1  ;;  %v15421_v62 = vpop.f32.mrf.mxu0  ;;  %v5380_v35 = vpack.c.bf16 %v4991_v31, %v4990_v30  ;;  %v4995_v23 = vmax.f32 %v3695_v52, 0.0  ;;  %v19212_v31 = vld [vmem:[#allocation7] ss:$0 sm:$0xff] }
 0x416   :  { %v8965_v33 = vpack.c.bf16 %v8520_v57, %v8519_v41  ;;  %12060 = vst.msk [vmem:[%s22381_s7 + $0x100] sm:$0xff] %vm12027_vm2, %v10109_v56  ;;  %v10120_v47 = vadd.f32 %v15421_v62, %v18823_v20  ;;  %v6885_v43 = vadd.f32 %v18765_v36, %v6884_v37  ;;  %v8525_v27 = vmax.f32 %v6893_v34, 0.0 }
 0x417   :  { %v15009_v51 = vpop.f32.mrf.mxu1  ;;  %v10111_v13 = vpop.f32.mrf.mxu0 }
 0x418   :  { %12063 = vst.msk [vmem:[%s22381_s7 + $0x118] sm:$0xff] %vm12027_vm2, %v10120_v47  ;;  %v6896_v1 = vadd.f32 %v18765_v36, %v15009_v51  ;;  %v10112_v24 = vadd.f32 %v18823_v20, %v10111_v13  ;;  %15518 = vmatprep.mubr.msk.bf16.mxu0 %vm5537_vm1, %v8965_v33  ;;  %v8523_v55 = vmax.f32 %v6885_v43, 0.0 }
 0x419   :  { %v6887_v29 = vpop.f32.mrf.mxu1  ;;  %v15424_v8 = vpop.f32.mrf.mxu0  ;;  %15519 = vmatmul.mubr.msk.bf16.gmra.mxu0 %vm5537_vm1, %v8966_v44 }
 0x41a   :  { %12061 = vst.msk [vmem:[%s22381_s7 + $0x108] sm:$0xff] %vm12027_vm2, %v10112_v24  ;;  %v6888_v25 = vadd.f32 %v18765_v36, %v6887_v29  ;;  %v10133_v7 = vadd.f32 %v15424_v8, %v18823_v20  ;;  %v8526_v38 = vmax.f32 %v6896_v1, 0.0 }
 0x41b   :  { %v15012_v19 = vpop.f32.mrf.mxu1  ;;  %15107 = vmatmul.mubr.msk.bf16.gmra.mxu1 %vm5537_vm1, %v22632_v58  ;;  %v10124_v39 = vpop.f32.mrf.mxu0 }
 0x41c   :  { %v8524_v26 = vmax.f32 %v6888_v25, 0.0  ;;  %12066 = vst.msk [vmem:[%s22381_s7 + $0x130] sm:$0xff] %vm12027_vm2, %v10133_v7  ;;  %v10125_v32 = vadd.f32 %v18823_v20, %v10124_v39  ;;  %15110 = vmatprep.mubr.msk.bf16.mxu1 %vm5537_vm1, %v5378_v50  ;;  %v8968_v5 = vpack.c.bf16 %v8526_v38, %v8525_v27  ;;  %v6909_v17 = vadd.f32 %v18765_v36, %v15012_v19 }
 0x41d   :  { %v6900_v21 = vpop.f32.mrf.mxu1  ;;  %v15425_v12 = vpop.f32.mrf.mxu0  ;;  %v5382_v50 = vpack.c.bf16 %v4995_v23, %v4994_v15 }
 0x41e   :  { %v8967_v46 = vpack.c.bf16 %v8524_v26, %v8523_v55  ;;  %12064 = vst.msk [vmem:[%s22381_s7 + $0x120] sm:$0xff] %vm12027_vm2, %v10125_v32  ;;  %v10136_v14 = vadd.f32 %v15425_v12, %v18823_v20  ;;  %v6901_v3 = vadd.f32 %v18765_v36, %v6900_v21  ;;  %v8529_v59 = vmax.f32 %v6909_v17, 0.0 }
 0x41f   :  { %v15013_v28 = vpop.f32.mrf.mxu1  ;;  %v10127_v16 = vpop.f32.mrf.mxu0  ;;  %v4998_v26 = vmax.f32 %v3708_v42, 0.0  ;;  %v4999_v32 = vmax.f32 %v3711_v4, 0.0 }
 0x420   :  { %12067 = vst.msk [vmem:[%s22381_s7 + $0x138] sm:$0xff] %vm12027_vm2, %v10136_v14  ;;  %v6912_v10 = vadd.f32 %v18765_v36, %v15013_v28  ;;  %v10128_v18 = vadd.f32 %v18823_v20, %v10127_v16  ;;  %15522 = vmatprep.mubr.msk.bf16.mxu0 %vm5537_vm1, %v8967_v46  ;;  %v8527_v41 = vmax.f32 %v6901_v3, 0.0 }
 0x421   :  { %v6903_v45 = vpop.f32.mrf.mxu1  ;;  %v15428_v61 = vpop.f32.mrf.mxu0  ;;  %15523 = vmatmul.mubr.msk.bf16.gmra.mxu0 %vm5537_vm1, %v8968_v5 }
 0x422   :  { %12065 = vst.msk [vmem:[%s22381_s7 + $0x128] sm:$0xff] %vm12027_vm2, %v10128_v18  ;;  %v6904_v9 = vadd.f32 %v18765_v36, %v6903_v45  ;;  %v10149_v6 = vadd.f32 %v15428_v61, %v18823_v20  ;;  %v8530_v22 = vmax.f32 %v6912_v10, 0.0  ;;  %v5384_v10 = vpack.c.bf16 %v4999_v32, %v4998_v26  ;;  %v22635_v32 = vld [vmem:[#allocation13_spill] sm:$0xff] }
 0x423   :  { %v15016_v53 = vpop.f32.mrf.mxu1  ;;  %15111 = vmatmul.mubr.msk.bf16.gmra.mxu1 %vm5537_vm1, %v22633_v2  ;;  %v10140_v40 = vpop.f32.mrf.mxu0 }
 0x424   :  { %v8528_v57 = vmax.f32 %v6904_v9, 0.0  ;;  %12070 = vst.msk [vmem:[%s22381_s7 + $0x150] sm:$0xff] %vm12027_vm2, %v10149_v6  ;;  %v10141_v56 = vadd.f32 %v18823_v20, %v10140_v40  ;;  %15114 = vmatprep.mubr.msk.bf16.mxu1 %vm5537_vm1, %v5380_v35  ;;  %v8970_v44 = vpack.c.bf16 %v8530_v22, %v8529_v59  ;;  %v6925_v34 = vadd.f32 %v18765_v36, %v15016_v53 }
 0x425   :  { %v6916_v37 = vpop.f32.mrf.mxu1  ;;  %v15429_v62 = vpop.f32.mrf.mxu0 }
 0x426   :  { %v8969_v33 = vpack.c.bf16 %v8528_v57, %v8527_v41  ;;  %12068 = vst.msk [vmem:[%s22381_s7 + $0x140] sm:$0xff] %vm12027_vm2, %v10141_v56  ;;  %v10152_v47 = vadd.f32 %v15429_v62, %v18823_v20  ;;  %v6917_v43 = vadd.f32 %v18765_v36, %v6916_v37 }
 0x427   :  { %v15017_v51 = vpop.f32.mrf.mxu1  ;;  %v10143_v13 = vpop.f32.mrf.mxu0 }
 0x428   :  { %12071 = vst.msk [vmem:[%s22381_s7 + $0x158] sm:$0xff] %vm12027_vm2, %v10152_v47  ;;  %v6928_v1 = vadd.f32 %v18765_v36, %v15017_v51  ;;  %v10144_v24 = vadd.f32 %v18823_v20, %v10143_v13  ;;  %15526 = vmatprep.mubr.msk.bf16.mxu0 %vm5537_vm1, %v8969_v33  ;;  %v8531_v39 = vmax.f32 %v6917_v43, 0.0 }
 0x429   :  { %v6919_v29 = vpop.f32.mrf.mxu1  ;;  %v15432_v8 = vpop.f32.mrf.mxu0  ;;  %15527 = vmatmul.mubr.msk.bf16.gmra.mxu0 %vm5537_vm1, %v8970_v44 }
 0x42a   :  { %12069 = vst.msk [vmem:[%s22381_s7 + $0x148] sm:$0xff] %vm12027_vm2, %v10144_v24  ;;  %v6920_v25 = vadd.f32 %v18765_v36, %v6919_v29  ;;  %v10165_v7 = vadd.f32 %v15432_v8, %v18823_v20  ;;  %v8534_v38 = vmax.f32 %v6928_v1, 0.0  ;;  %v8533_v36 = vmax.f32 %v6925_v34, 0.0 }
 0x42b   :  { %v15020_v19 = vpop.f32.mrf.mxu1  ;;  %15115 = vmatmul.mubr.msk.bf16.gmra.mxu1 %vm5537_vm1, %v18574_v11  ;;  %v10156_v58 = vpop.f32.mrf.mxu0 }
 0x42c   :  { %v8532_v49 = vmax.f32 %v6920_v25, 0.0  ;;  %12074 = vst.msk [vmem:[%s22381_s7 + $0x170] sm:$0xff] %vm12027_vm2, %v10165_v7  ;;  %v10157_v60 = vadd.f32 %v18823_v20, %v10156_v58  ;;  %15118 = vmatprep.mubr.msk.bf16.mxu1 %vm5537_vm1, %v5382_v50  ;;  %v8972_v21 = vpack.c.bf16 %v8534_v38, %v8533_v36  ;;  %v6941_v28 = vadd.f32 %v19212_v31, %v15020_v19  ;;  %v22634_v50 = vld [vmem:[#allocation14_spill] sm:$0xff] }
 0x42d   :  { %v6932_v63 = vpop.f32.mrf.mxu1  ;;  %v15433_v55 = vpop.f32.mrf.mxu0 }
 0x42e   :  { %v8971_v27 = vpack.c.bf16 %v8532_v49, %v8531_v39  ;;  %12072 = vst.msk [vmem:[%s22381_s7 + $0x160] sm:$0xff] %vm12027_vm2, %v10157_v60  ;;  %v10168_v11 = vadd.f32 %v15433_v55, %v18823_v20  ;;  %v6933_v46 = vadd.f32 %v19212_v31, %v6932_v63  ;;  %v8537_v6 = vmax.f32 %v6941_v28, 0.0 }
 0x42f   :  { %v15021_v12 = vpop.f32.mrf.mxu1  ;;  %v10159_v30 = vpop.f32.mrf.mxu0 }
 0x430   :  { %12075 = vst.msk [vmem:[%s22381_s7 + $0x178] sm:$0xff] %vm12027_vm2, %v10168_v11  ;;  %v6944_v14 = vadd.f32 %v19212_v31, %v15021_v12  ;;  %v10160_v5 = vadd.f32 %v18823_v20, %v10159_v30  ;;  %15530 = vmatprep.mubr.msk.bf16.mxu0 %vm5537_vm1, %v8971_v27  ;;  %v8535_v61 = vmax.f32 %v6933_v46, 0.0  ;;  %v22636_v30 = vld [vmem:[#allocation16_spill] sm:$0xff] }
 0x431   :  { %v6935_v16 = vpop.f32.mrf.mxu1  ;;  %v15436_v3 = vpop.f32.mrf.mxu0  ;;  %15531 = vmatmul.mubr.msk.bf16.gmra.mxu0 %vm5537_vm1, %v8972_v21 }
 0x432   :  { %12073 = vst.msk [vmem:[%s22381_s7 + $0x168] sm:$0xff] %vm12027_vm2, %v10160_v5  ;;  %v6936_v18 = vadd.f32 %v19212_v31, %v6935_v16  ;;  %v10181_v48 = vadd.f32 %v15436_v3, %v18823_v20  ;;  %v8538_v52 = vmax.f32 %v6944_v14, 0.0 }
 0x433   :  { %v15024_v17 = vpop.f32.mrf.mxu1  ;;  %15119 = vmatmul.mubr.msk.bf16.gmra.mxu1 %vm5537_vm1, %v18592_v54  ;;  %v10172_v45 = vpop.f32.mrf.mxu0 }
 0x434   :  { %v8536_v35 = vmax.f32 %v6936_v18, 0.0  ;;  %12078 = vst.msk [vmem:[%s22381_s7 + $0x190] sm:$0xff] %vm12027_vm2, %v10181_v48  ;;  %v10173_v9 = vadd.f32 %v18823_v20, %v10172_v45  ;;  %15122 = vmatprep.mubr.msk.bf16.mxu1 %vm5537_vm1, %v5384_v10  ;;  %v8974_v40 = vpack.c.bf16 %v8538_v52, %v8537_v6  ;;  %v6957_v59 = vadd.f32 %v19212_v31, %v15024_v17  ;;  %v19309_v17 = vld [vmem:[#allocation9] ss:$0 sm:$0xff] }
 0x435   :  { %v6948_v22 = vpop.f32.mrf.mxu1  ;;  %v15437_v53 = vpop.f32.mrf.mxu0 }
 0x436   :  { %v8973_v2 = vpack.c.bf16 %v8536_v35, %v8535_v61  ;;  %12076 = vst.msk [vmem:[%s22381_s7 + $0x180] sm:$0xff] %vm12027_vm2, %v10173_v9  ;;  %v10184_v54 = vadd.f32 %v15437_v53, %v18823_v20  ;;  %v6949_v56 = vadd.f32 %v19212_v31, %v6948_v22  ;;  %v8541_v34 = vmax.f32 %v6957_v59, 0.0 }
 0x437   :  { %v15025_v41 = vpop.f32.mrf.mxu1  ;;  %v10175_v57 = vpop.f32.mrf.mxu0 }
 0x438   :  { %12079 = vst.msk [vmem:[%s22381_s7 + $0x198] sm:$0xff] %vm12027_vm2, %v10184_v54  ;;  %v6960_v15 = vadd.f32 %v19212_v31, %v15025_v41  ;;  %v10176_v23 = vadd.f32 %v18823_v20, %v10175_v57  ;;  %15534 = vmatprep.mubr.msk.bf16.mxu0 %vm5537_vm1, %v8973_v2  ;;  %v8539_v43 = vmax.f32 %v6949_v56, 0.0  ;;  %v22637_v2 = vld [vmem:[#allocation15_spill] sm:$0xff]  ;;  %v22638_v56 = vld [vmem:[#allocation18_spill] sm:$0xff] }
 0x439   :  { %v6951_v37 = vpop.f32.mrf.mxu1  ;;  %v15440_v62 = vpop.f32.mrf.mxu0  ;;  %15535 = vmatmul.mubr.msk.bf16.gmra.mxu0 %vm5537_vm1, %v8974_v40 }
 0x43a   :  { %12077 = vst.msk [vmem:[%s22381_s7 + $0x188] sm:$0xff] %vm12027_vm2, %v10176_v23  ;;  %v6952_v33 = vadd.f32 %v19212_v31, %v6951_v37  ;;  %v10197_v47 = vadd.f32 %v15440_v62, %v18823_v20  ;;  %v8542_v44 = vmax.f32 %v6960_v15, 0.0 }
 0x43b   :  { %v15028_v51 = vpop.f32.mrf.mxu1  ;;  %15123 = vmatmul.mubr.msk.bf16.gmra.mxu1 %vm5537_vm1, %v18606_v0  ;;  %v10188_v13 = vpop.f32.mrf.mxu0 }
 0x43c   :  { %v8540_v1 = vmax.f32 %v6952_v33, 0.0  ;;  %12082 = vst.msk [vmem:[%s22381_s7 + $0x1b0] sm:$0xff] %vm12027_vm2, %v10197_v47  ;;  %v10189_v24 = vadd.f32 %v18823_v20, %v10188_v13  ;;  %15126 = vmatprep.mubr.msk.bf16.mxu1 %vm5537_vm1, %v22634_v50  ;;  %v8976_v4 = vpack.c.bf16 %v8542_v44, %v8541_v34  ;;  %v6973_v39 = vadd.f32 %v19212_v31, %v15028_v51 }
 0x43d   :  { %v6964_v29 = vpop.f32.mrf.mxu1  ;;  %v15441_v8 = vpop.f32.mrf.mxu0 }
 0x43e   :  { %v8975_v42 = vpack.c.bf16 %v8540_v1, %v8539_v43  ;;  %12080 = vst.msk [vmem:[%s22381_s7 + $0x1a0] sm:$0xff] %vm12027_vm2, %v10189_v24  ;;  %v10200_v0 = vadd.f32 %v15441_v8, %v18823_v20  ;;  %v6965_v38 = vadd.f32 %v19212_v31, %v6964_v29  ;;  %v8545_v46 = vmax.f32 %v6973_v39, 0.0 }
 0x43f   :  { %v15029_v25 = vpop.f32.mrf.mxu1  ;;  %v10191_v7 = vpop.f32.mrf.mxu0 }
 0x440   :  { %12083 = vst.msk [vmem:[%s22381_s7 + $0x1b8] sm:$0xff] %vm12027_vm2, %v10200_v0  ;;  %v6976_v19 = vadd.f32 %v19212_v31, %v15029_v25  ;;  %v10192_v58 = vadd.f32 %v18823_v20, %v10191_v7  ;;  %15538 = vmatprep.mubr.msk.bf16.mxu0 %vm5537_vm1, %v8975_v42  ;;  %v8543_v11 = vmax.f32 %v6965_v38, 0.0  ;;  %v22639_v0 = vld [vmem:[#allocation17_spill] sm:$0xff] }
 0x441   :  { %v6967_v49 = vpop.f32.mrf.mxu1  ;;  %v15444_v60 = vpop.f32.mrf.mxu0  ;;  %15539 = vmatmul.mubr.msk.bf16.gmra.mxu0 %vm5537_vm1, %v8976_v4 }
 0x442   :  { %12081 = vst.msk [vmem:[%s22381_s7 + $0x1a8] sm:$0xff] %vm12027_vm2, %v10192_v58  ;;  %v6968_v36 = vadd.f32 %v19212_v31, %v6967_v49  ;;  %v10213_v63 = vadd.f32 %v15444_v60, %v18823_v20  ;;  %v8546_v55 = vmax.f32 %v6976_v19, 0.0  ;;  %v22640_v19 = vld [vmem:[#allocation20_spill] sm:$0xff] }
 0x443   :  { %v15032_v26 = vpop.f32.mrf.mxu1  ;;  %15127 = vmatmul.mubr.msk.bf16.gmra.mxu1 %vm5537_vm1, %v22635_v32  ;;  %v10204_v27 = vpop.f32.mrf.mxu0 }
 0x444   :  { %v8544_v21 = vmax.f32 %v6968_v36, 0.0  ;;  %12086 = vst.msk [vmem:[%s22381_s7 + $0x1d0] sm:$0xff] %vm12027_vm2, %v10213_v63  ;;  %v10205_v12 = vadd.f32 %v18823_v20, %v10204_v27  ;;  %15130 = vmatprep.mubr.msk.bf16.mxu1 %vm5537_vm1, %v22636_v30  ;;  %v8978_v3 = vpack.c.bf16 %v8546_v55, %v8545_v46 }
 0x445   :  { %v6980_v14 = vpop.f32.mrf.mxu1  ;;  %v15445_v5 = vpop.f32.mrf.mxu0 }
 0x446   :  { %v8977_v28 = vpack.c.bf16 %v8544_v21, %v8543_v11  ;;  %12084 = vst.msk [vmem:[%s22381_s7 + $0x1c0] sm:$0xff] %vm12027_vm2, %v10205_v12  ;;  %v10216_v16 = vadd.f32 %v15445_v5, %v18823_v20  ;;  %v6981_v48 = vadd.f32 %v19212_v31, %v6980_v14  ;;  %v6989_v20 = vadd.f32 %v19212_v31, %v15032_v26 }
 0x447   :  { %v15033_v10 = vpop.f32.mrf.mxu1  ;;  %v10207_v18 = vpop.f32.mrf.mxu0 }
 0x448   :  { %12087 = vst.msk [vmem:[%s22381_s7 + $0x1d8] sm:$0xff] %vm12027_vm2, %v10216_v16  ;;  %v6992_v52 = vadd.f32 %v19212_v31, %v15033_v10  ;;  %v10208_v45 = vadd.f32 %v19309_v17, %v10207_v18  ;;  %15542 = vmatprep.mubr.msk.bf16.mxu0 %vm5537_vm1, %v8977_v28  ;;  %v8547_v40 = vmax.f32 %v6981_v48, 0.0  ;;  %v8549_v15 = vmax.f32 %v6989_v20, 0.0  ;;  %v22641_v16 = vld [vmem:[#allocation19_spill] sm:$0xff] }
 0x449   :  { %v6983_v61 = vpop.f32.mrf.mxu1  ;;  %v15448_v35 = vpop.f32.mrf.mxu0  ;;  %15543 = vmatmul.mubr.msk.bf16.gmra.mxu0 %vm5537_vm1, %v8978_v3 }
 0x44a   :  { %12085 = vst.msk [vmem:[%s22381_s7 + $0x1c8] sm:$0xff] %vm12027_vm2, %v10208_v45  ;;  %v6984_v9 = vadd.f32 %v19212_v31, %v6983_v61  ;;  %v10229_v6 = vadd.f32 %v19309_v17, %v15448_v35  ;;  %v8550_v22 = vmax.f32 %v6992_v52, 0.0  ;;  %v22642_v52 = vld [vmem:[#allocation22_spill] sm:$0xff] }
 0x44b   :  { %v15036_v53 = vpop.f32.mrf.mxu1  ;;  %15131 = vmatmul.mubr.msk.bf16.gmra.mxu1 %vm5537_vm1, %v22637_v2  ;;  %v10220_v54 = vpop.f32.mrf.mxu0 }
 0x44c   :  { %v8548_v41 = vmax.f32 %v6984_v9, 0.0  ;;  %12090 = vst.msk [vmem:[%s22381_s7 + $0x1f0] sm:$0xff] %vm12027_vm2, %v10229_v6  ;;  %v10221_v57 = vadd.f32 %v19309_v17, %v10220_v54  ;;  %15134 = vmatprep.mubr.msk.bf16.mxu1 %vm5537_vm1, %v22638_v56  ;;  %v8980_v33 = vpack.c.bf16 %v8550_v22, %v8549_v15  ;;  %v7005_v1 = vadd.f32 %v19212_v31, %v15036_v53 }
 0x44d   :  { %v6996_v23 = vpop.f32.mrf.mxu1  ;;  %v15449_v59 = vpop.f32.mrf.mxu0 }
 0x44e   :  { %v8979_v37 = vpack.c.bf16 %v8548_v41, %v8547_v40  ;;  %12088 = vst.msk [vmem:[%s22381_s7 + $0x1e0] sm:$0xff] %vm12027_vm2, %v10221_v57  ;;  %v10232_v62 = vadd.f32 %v19309_v17, %v15449_v59  ;;  %v6997_v51 = vadd.f32 %v19212_v31, %v6996_v23  ;;  %v8553_v58 = vmax.f32 %v7005_v1, 0.0 }
 0x44f   :  { %v15037_v47 = vpop.f32.mrf.mxu1  ;;  %v10223_v44 = vpop.f32.mrf.mxu0 }
 0x450   :  { %12091 = vst.msk [vmem:[%s22381_s7 + $0x1f8] sm:$0xff] %vm12027_vm2, %v10232_v62  ;;  %v7008_v13 = vadd.f32 %v19212_v31, %v15037_v47  ;;  %v10224_v43 = vadd.f32 %v19309_v17, %v10223_v44  ;;  %15546 = vmatprep.mubr.msk.bf16.mxu0 %vm5537_vm1, %v8979_v37  ;;  %v8551_v25 = vmax.f32 %v6997_v51, 0.0  ;;  %v22643_v62 = vld [vmem:[#allocation21_spill] sm:$0xff] }
 0x451   :  { %v6999_v24 = vpop.f32.mrf.mxu1  ;;  %v15452_v50 = vpop.f32.mrf.mxu0  ;;  %15547 = vmatmul.mubr.msk.bf16.gmra.mxu0 %vm5537_vm1, %v8980_v33 }
 0x452   :  { %12089 = vst.msk [vmem:[%s22381_s7 + $0x1e8] sm:$0xff] %vm12027_vm2, %v10224_v43  ;;  %v7000_v34 = vadd.f32 %v19212_v31, %v6999_v24  ;;  %v10245_v29 = vadd.f32 %v19309_v17, %v15452_v50  ;;  %v8554_v8 = vmax.f32 %v7008_v13, 0.0  ;;  %v22644_v13 = vld [vmem:[#allocation24_spill] sm:$0xff] }
 0x453   :  { %v15040_v42 = vpop.f32.mrf.mxu1  ;;  %15135 = vmatmul.mubr.msk.bf16.gmra.mxu1 %vm5537_vm1, %v22639_v0  ;;  %v10236_v4 = vpop.f32.mrf.mxu0 }
 0x454   :  { %v8552_v7 = vmax.f32 %v7000_v34, 0.0  ;;  %12094 = vst.msk [vmem:[%s22381_s7 + $0x210] sm:$0xff] %vm12027_vm2, %v10245_v29  ;;  %v10237_v38 = vadd.f32 %v19309_v17, %v10236_v4  ;;  %15138 = vmatprep.mubr.msk.bf16.mxu1 %vm5537_vm1, %v22640_v19  ;;  %v8982_v63 = vpack.c.bf16 %v8554_v8, %v8553_v58  ;;  %v7021_v21 = vadd.f32 %v19212_v31, %v15040_v42 }
 0x455   :  { %v7012_v39 = vpop.f32.mrf.mxu1  ;;  %v15453_v49 = vpop.f32.mrf.mxu0 }
 0x456   :  { %v8981_v60 = vpack.c.bf16 %v8552_v7, %v8551_v25  ;;  %12092 = vst.msk [vmem:[%s22381_s7 + $0x200] sm:$0xff] %vm12027_vm2, %v10237_v38  ;;  %v10248_v36 = vadd.f32 %v19309_v17, %v15453_v49  ;;  %v7013_v32 = vadd.f32 %v19212_v31, %v7012_v39  ;;  %v8557_v45 = vmax.f32 %v7021_v21, 0.0 }
 0x457   :  { %v15041_v55 = vpop.f32.mrf.mxu1  ;;  %v10239_v26 = vpop.f32.mrf.mxu0 }
 0x458   :  { %12095 = vst.msk [vmem:[%s22381_s7 + $0x218] sm:$0xff] %vm12027_vm2, %v10248_v36  ;;  %v7024_v27 = vadd.f32 %v19212_v31, %v15041_v55  ;;  %v10240_v11 = vadd.f32 %v19309_v17, %v10239_v26  ;;  %15550 = vmatprep.mubr.msk.bf16.mxu0 %vm5537_vm1, %v8981_v60  ;;  %v8555_v10 = vmax.f32 %v7013_v32, 0.0  ;;  %v22645_v36 = vld [vmem:[#allocation23_spill] sm:$0xff] }
 0x459   :  { %v7015_v12 = vpop.f32.mrf.mxu1  ;;  %v15456_v30 = vpop.f32.mrf.mxu0  ;;  %15551 = vmatmul.mubr.msk.bf16.gmra.mxu0 %vm5537_vm1, %v8982_v63 }
 0x45a   :  { %12093 = vst.msk [vmem:[%s22381_s7 + $0x208] sm:$0xff] %vm12027_vm2, %v10240_v11  ;;  %v7016_v46 = vadd.f32 %v19212_v31, %v7015_v12  ;;  %v10261_v14 = vadd.f32 %v19309_v17, %v15456_v30  ;;  %v8558_v5 = vmax.f32 %v7024_v27, 0.0  ;;  %v22646_v27 = vld [vmem:[#allocation26_spill] sm:$0xff] }
 0x45b   :  { %v15044_v28 = vpop.f32.mrf.mxu1  ;;  %15139 = vmatmul.mubr.msk.bf16.gmra.mxu1 %vm5537_vm1, %v22641_v16  ;;  %v10252_v3 = vpop.f32.mrf.mxu0 }
 0x45c   :  { %v8556_v18 = vmax.f32 %v7016_v46, 0.0  ;;  %12098 = vst.msk [vmem:[%s22381_s7 + $0x230] sm:$0xff] %vm12027_vm2, %v10261_v14  ;;  %v10253_v48 = vadd.f32 %v19309_v17, %v10252_v3  ;;  %15142 = vmatprep.mubr.msk.bf16.mxu1 %vm5537_vm1, %v22642_v52  ;;  %v8984_v6 = vpack.c.bf16 %v8558_v5, %v8557_v45  ;;  %v7037_v41 = vadd.f32 %v19212_v31, %v15044_v28 }
 0x45d   :  { %v7028_v20 = vpop.f32.mrf.mxu1  ;;  %v15457_v61 = vpop.f32.mrf.mxu0 }
 0x45e   :  { %v8983_v35 = vpack.c.bf16 %v8556_v18, %v8555_v10  ;;  %12096 = vst.msk [vmem:[%s22381_s7 + $0x220] sm:$0xff] %vm12027_vm2, %v10253_v48  ;;  %v10264_v9 = vadd.f32 %v19309_v17, %v15457_v61  ;;  %v7029_v2 = vadd.f32 %v19212_v31, %v7028_v20  ;;  %v8561_v43 = vmax.f32 %v7037_v41, 0.0 }
 0x45f   :  { %v15045_v22 = vpop.f32.mrf.mxu1  ;;  %v10255_v53 = vpop.f32.mrf.mxu0 }
 0x460   :  { %12099 = vst.msk [vmem:[%s22381_s7 + $0x238] sm:$0xff] %vm12027_vm2, %v10264_v9  ;;  %v7040_v54 = vadd.f32 %v19212_v31, %v15045_v22  ;;  %v10256_v40 = vadd.f32 %v19309_v17, %v10255_v53  ;;  %15554 = vmatprep.mubr.msk.bf16.mxu0 %vm5537_vm1, %v8983_v35  ;;  %v8559_v47 = vmax.f32 %v7029_v2, 0.0  ;;  %v22647_v9 = vld [vmem:[#allocation25_spill] sm:$0xff] }
 0x461   :  { %v7031_v57 = vpop.f32.mrf.mxu1  ;;  %v15460_v56 = vpop.f32.mrf.mxu0  ;;  %15555 = vmatmul.mubr.msk.bf16.gmra.mxu0 %vm5537_vm1, %v8984_v6 }
 0x462   :  { %12097 = vst.msk [vmem:[%s22381_s7 + $0x228] sm:$0xff] %vm12027_vm2, %v10256_v40  ;;  %v7032_v15 = vadd.f32 %v19212_v31, %v7031_v57  ;;  %v10277_v23 = vadd.f32 %v19309_v17, %v15460_v56  ;;  %v8562_v59 = vmax.f32 %v7040_v54, 0.0  ;;  %v22648_v54 = vld [vmem:[#allocation28_spill] sm:$0xff] }
 0x463   :  { %v15048_v37 = vpop.f32.mrf.mxu1  ;;  %15143 = vmatmul.mubr.msk.bf16.gmra.mxu1 %vm5537_vm1, %v22643_v62  ;;  %v10268_v33 = vpop.f32.mrf.mxu0 }
 0x464   :  { %v8560_v44 = vmax.f32 %v7032_v15, 0.0  ;;  %12102 = vst.msk [vmem:[%s22381_s7 + $0x250] sm:$0xff] %vm12027_vm2, %v10277_v23  ;;  %v10269_v51 = vadd.f32 %v19309_v17, %v10268_v33  ;;  %15146 = vmatprep.mubr.msk.bf16.mxu1 %vm5537_vm1, %v22644_v13  ;;  %v8986_v29 = vpack.c.bf16 %v8562_v59, %v8561_v43  ;;  %v7053_v7 = vadd.f32 %v19212_v31, %v15048_v37 }
 0x465   :  { %v7044_v1 = vpop.f32.mrf.mxu1  ;;  %v15461_v24 = vpop.f32.mrf.mxu0 }
 0x466   :  { %v8985_v50 = vpack.c.bf16 %v8560_v44, %v8559_v47  ;;  %12100 = vst.msk [vmem:[%s22381_s7 + $0x240] sm:$0xff] %vm12027_vm2, %v10269_v51  ;;  %v10280_v34 = vadd.f32 %v19309_v17, %v15461_v24  ;;  %v7045_v0 = vadd.f32 %v19212_v31, %v7044_v1  ;;  %v8565_v11 = vmax.f32 %v7053_v7, 0.0 }
 0x467   :  { %v15049_v8 = vpop.f32.mrf.mxu1  ;;  %v10271_v42 = vpop.f32.mrf.mxu0 }
 0x468   :  { %12103 = vst.msk [vmem:[%s22381_s7 + $0x258] sm:$0xff] %vm12027_vm2, %v10280_v34  ;;  %v7056_v4 = vadd.f32 %v19212_v31, %v15049_v8  ;;  %v10272_v25 = vadd.f32 %v19309_v17, %v10271_v42  ;;  %15558 = vmatprep.mubr.msk.bf16.mxu0 %vm5537_vm1, %v8985_v50  ;;  %v8563_v55 = vmax.f32 %v7045_v0, 0.0  ;;  %v22649_v34 = vld [vmem:[#allocation27_spill] sm:$0xff] }
 0x469   :  { %v7047_v38 = vpop.f32.mrf.mxu1  ;;  %v15464_v19 = vpop.f32.mrf.mxu0  ;;  %15559 = vmatmul.mubr.msk.bf16.gmra.mxu0 %vm5537_vm1, %v8986_v29 }
 0x46a   :  { %12101 = vst.msk [vmem:[%s22381_s7 + $0x248] sm:$0xff] %vm12027_vm2, %v10272_v25  ;;  %v7048_v58 = vadd.f32 %v19212_v31, %v7047_v38  ;;  %v10293_v39 = vadd.f32 %v19309_v17, %v15464_v19  ;;  %v8566_v49 = vmax.f32 %v7056_v4, 0.0  ;;  %v22650_v4 = vld [vmem:[#allocation30_spill] sm:$0xff] }
 0x46b   :  { %v15052_v60 = vpop.f32.mrf.mxu1  ;;  %15147 = vmatmul.mubr.msk.bf16.gmra.mxu1 %vm5537_vm1, %v22645_v36  ;;  %v10284_v63 = vpop.f32.mrf.mxu0 }
 0x46c   :  { %v8564_v26 = vmax.f32 %v7048_v58, 0.0  ;;  %12106 = vst.msk [vmem:[%s22381_s7 + $0x270] sm:$0xff] %vm12027_vm2, %v10293_v39  ;;  %v10285_v32 = vadd.f32 %v19309_v17, %v10284_v63  ;;  %15150 = vmatprep.mubr.msk.bf16.mxu1 %vm5537_vm1, %v22646_v27  ;;  %v8988_v14 = vpack.c.bf16 %v8566_v49, %v8565_v11  ;;  %v7069_v18 = vadd.f32 %v19212_v31, %v15052_v60 }
 0x46d   :  { %v7060_v21 = vpop.f32.mrf.mxu1  ;;  %v15465_v12 = vpop.f32.mrf.mxu0 }
 0x46e   :  { %v8987_v30 = vpack.c.bf16 %v8564_v26, %v8563_v55  ;;  %12104 = vst.msk [vmem:[%s22381_s7 + $0x260] sm:$0xff] %vm12027_vm2, %v10285_v32  ;;  %v10296_v46 = vadd.f32 %v19309_v17, %v15465_v12  ;;  %v7061_v16 = vadd.f32 %v19212_v31, %v7060_v21  ;;  %v8569_v40 = vmax.f32 %v7069_v18, 0.0 }
 0x46f   :  { %v15053_v5 = vpop.f32.mrf.mxu1  ;;  %v10287_v28 = vpop.f32.mrf.mxu0 }
 0x470   :  { %12107 = vst.msk [vmem:[%s22381_s7 + $0x278] sm:$0xff] %vm12027_vm2, %v10296_v46  ;;  %v7072_v3 = vadd.f32 %v19212_v31, %v15053_v5  ;;  %v10288_v10 = vadd.f32 %v19309_v17, %v10287_v28  ;;  %15562 = vmatprep.mubr.msk.bf16.mxu0 %vm5537_vm1, %v8987_v30  ;;  %v8567_v22 = vmax.f32 %v7061_v16, 0.0  ;;  %v22651_v46 = vld [vmem:[#allocation29_spill] sm:$0xff] }
 0x471   :  { %v7063_v48 = vpop.f32.mrf.mxu1  ;;  %v15468_v52 = vpop.f32.mrf.mxu0  ;;  %15563 = vmatmul.mubr.msk.bf16.gmra.mxu0 %vm5537_vm1, %v8988_v14 }
 0x472   :  { %12105 = vst.msk [vmem:[%s22381_s7 + $0x268] sm:$0xff] %vm12027_vm2, %v10288_v10  ;;  %v7064_v45 = vadd.f32 %v19212_v31, %v7063_v48  ;;  %v10309_v20 = vadd.f32 %v19309_v17, %v15468_v52  ;;  %v8570_v61 = vmax.f32 %v7072_v3, 0.0  ;;  %v22652_v3 = vld [vmem:[#allocation32_spill] sm:$0xff] }
 0x473   :  { %v15056_v35 = vpop.f32.mrf.mxu1  ;;  %15151 = vmatmul.mubr.msk.bf16.gmra.mxu1 %vm5537_vm1, %v22647_v9  ;;  %v10300_v6 = vpop.f32.mrf.mxu0 }
 0x474   :  { %v8568_v53 = vmax.f32 %v7064_v45, 0.0  ;;  %12110 = vst.msk [vmem:[%s22381_s7 + $0x290] sm:$0xff] %vm12027_vm2, %v10309_v20  ;;  %v10301_v2 = vadd.f32 %v19309_v17, %v10300_v6  ;;  %15154 = vmatprep.mubr.msk.bf16.mxu1 %vm5537_vm1, %v22648_v54  ;;  %v8990_v23 = vpack.c.bf16 %v8570_v61, %v8569_v40  ;;  %v7085_v44 = vadd.f32 %v19212_v31, %v15056_v35 }
 0x475   :  { %v7076_v41 = vpop.f32.mrf.mxu1  ;;  %v15469_v57 = vpop.f32.mrf.mxu0 }
 0x476   :  { %v8989_v56 = vpack.c.bf16 %v8568_v53, %v8567_v22  ;;  %12108 = vst.msk [vmem:[%s22381_s7 + $0x280] sm:$0xff] %vm12027_vm2, %v10301_v2  ;;  %v10312_v15 = vadd.f32 %v19309_v17, %v15469_v57  ;;  %v7077_v62 = vadd.f32 %v19212_v31, %v7076_v41  ;;  %v8573_v25 = vmax.f32 %v7085_v44, 0.0 }
 0x477   :  { %v15057_v59 = vpop.f32.mrf.mxu1  ;;  %v10303_v37 = vpop.f32.mrf.mxu0 }
 0x478   :  { %12111 = vst.msk [vmem:[%s22381_s7 + $0x298] sm:$0xff] %vm12027_vm2, %v10312_v15  ;;  %v7088_v33 = vadd.f32 %v19212_v31, %v15057_v59  ;;  %v10304_v47 = vadd.f32 %v19309_v17, %v10303_v37  ;;  %15566 = vmatprep.mubr.msk.bf16.mxu0 %vm5537_vm1, %v8989_v56  ;;  %v8571_v8 = vmax.f32 %v7077_v62, 0.0  ;;  %v22653_v15 = vld [vmem:[#allocation31_spill] sm:$0xff] }
 0x479   :  { %v7079_v51 = vpop.f32.mrf.mxu1  ;;  %v15472_v13 = vpop.f32.mrf.mxu0  ;;  %15567 = vmatmul.mubr.msk.bf16.gmra.mxu0 %vm5537_vm1, %v8990_v23 }
 0x47a   :  { %12109 = vst.msk [vmem:[%s22381_s7 + $0x288] sm:$0xff] %vm12027_vm2, %v10304_v47  ;;  %v7080_v43 = vadd.f32 %v19212_v31, %v7079_v51  ;;  %v10325_v1 = vadd.f32 %v19309_v17, %v15472_v13  ;;  %v8574_v24 = vmax.f32 %v7088_v33, 0.0  ;;  %v22654_v33 = vld [vmem:[#allocation34_spill] sm:$0xff] }
 0x47b   :  { %v15060_v50 = vpop.f32.mrf.mxu1  ;;  %15155 = vmatmul.mubr.msk.bf16.gmra.mxu1 %vm5537_vm1, %v22649_v34  ;;  %v10316_v29 = vpop.f32.mrf.mxu0 }
 0x47c   :  { %v8572_v42 = vmax.f32 %v7080_v43, 0.0  ;;  %12114 = vst.msk [vmem:[%s22381_s7 + $0x2b0] sm:$0xff] %vm12027_vm2, %v10325_v1  ;;  %v10317_v0 = vadd.f32 %v19309_v17, %v10316_v29  ;;  %15158 = vmatprep.mubr.msk.bf16.mxu1 %vm5537_vm1, %v22650_v4  ;;  %v8992_v39 = vpack.c.bf16 %v8574_v24, %v8573_v25  ;;  %v7101_v26 = vadd.f32 %v19212_v31, %v15060_v50 }
 0x47d   :  { %v7092_v7 = vpop.f32.mrf.mxu1  ;;  %v15473_v38 = vpop.f32.mrf.mxu0 }
 0x47e   :  { %v8991_v19 = vpack.c.bf16 %v8572_v42, %v8571_v8  ;;  %12112 = vst.msk [vmem:[%s22381_s7 + $0x2a0] sm:$0xff] %vm12027_vm2, %v10317_v0  ;;  %v10328_v58 = vadd.f32 %v19309_v17, %v15473_v38  ;;  %v7093_v36 = vadd.f32 %v19212_v31, %v7092_v7  ;;  %v8577_v10 = vmax.f32 %v7101_v26, 0.0 }
 0x47f   :  { %v15061_v49 = vpop.f32.mrf.mxu1  ;;  %v10319_v60 = vpop.f32.mrf.mxu0 }
 0x480   :  { %12115 = vst.msk [vmem:[%s22381_s7 + $0x2b8] sm:$0xff] %vm12027_vm2, %v10328_v58  ;;  %v7104_v63 = vadd.f32 %v19212_v31, %v15061_v49  ;;  %v10320_v55 = vadd.f32 %v19309_v17, %v10319_v60  ;;  %15570 = vmatprep.mubr.msk.bf16.mxu0 %vm5537_vm1, %v8991_v19  ;;  %v8575_v5 = vmax.f32 %v7093_v36, 0.0  ;;  %v22655_v58 = vld [vmem:[#allocation33_spill] sm:$0xff] }
 0x481   :  { %v7095_v32 = vpop.f32.mrf.mxu1  ;;  %v15476_v27 = vpop.f32.mrf.mxu0  ;;  %15571 = vmatmul.mubr.msk.bf16.gmra.mxu0 %vm5537_vm1, %v8992_v39 }
 0x482   :  { %12113 = vst.msk [vmem:[%s22381_s7 + $0x2a8] sm:$0xff] %vm12027_vm2, %v10320_v55  ;;  %v7096_v11 = vadd.f32 %v19212_v31, %v7095_v32  ;;  %v10341_v21 = vadd.f32 %v19309_v17, %v15476_v27  ;;  %v8578_v12 = vmax.f32 %v7104_v63, 0.0  ;;  %v22656_v63 = vld [vmem:[#allocation36_spill] sm:$0xff] }
 0x483   :  { %v15064_v30 = vpop.f32.mrf.mxu1  ;;  %15159 = vmatmul.mubr.msk.bf16.gmra.mxu1 %vm5537_vm1, %v22651_v46  ;;  %v10332_v14 = vpop.f32.mrf.mxu0 }
 0x484   :  { %v8576_v28 = vmax.f32 %v7096_v11, 0.0  ;;  %12118 = vst.msk [vmem:[%s22381_s7 + $0x2d0] sm:$0xff] %vm12027_vm2, %v10341_v21  ;;  %v10333_v16 = vadd.f32 %v19309_v17, %v10332_v14  ;;  %15162 = vmatprep.mubr.msk.bf16.mxu1 %vm5537_vm1, %v22652_v3  ;;  %v8994_v20 = vpack.c.bf16 %v8578_v12, %v8577_v10  ;;  %v7117_v53 = vadd.f32 %v19212_v31, %v15064_v30 }
 0x485   :  { %v7108_v18 = vpop.f32.mrf.mxu1  ;;  %v15477_v48 = vpop.f32.mrf.mxu0 }
 0x486   :  { %v8993_v52 = vpack.c.bf16 %v8576_v28, %v8575_v5  ;;  %12116 = vst.msk [vmem:[%s22381_s7 + $0x2c0] sm:$0xff] %vm12027_vm2, %v10333_v16  ;;  %v10344_v45 = vadd.f32 %v19309_v17, %v15477_v48  ;;  %v7109_v9 = vadd.f32 %v19212_v31, %v7108_v18  ;;  %v8581_v47 = vmax.f32 %v7117_v53, 0.0 }
 0x487   :  { %v15065_v61 = vpop.f32.mrf.mxu1  ;;  %v10335_v35 = vpop.f32.mrf.mxu0 }
 0x488   :  { %12119 = vst.msk [vmem:[%s22381_s7 + $0x2d8] sm:$0xff] %vm12027_vm2, %v10344_v45  ;;  %v7120_v6 = vadd.f32 %v19212_v31, %v15065_v61  ;;  %v10336_v22 = vadd.f32 %v19309_v17, %v10335_v35  ;;  %15574 = vmatprep.mubr.msk.bf16.mxu0 %vm5537_vm1, %v8993_v52  ;;  %v8579_v59 = vmax.f32 %v7109_v9, 0.0  ;;  %v22657_v45 = vld [vmem:[#allocation35_spill] sm:$0xff] }
 0x489   :  { %v7111_v2 = vpop.f32.mrf.mxu1  ;;  %v15480_v54 = vpop.f32.mrf.mxu0  ;;  %15575 = vmatmul.mubr.msk.bf16.gmra.mxu0 %vm5537_vm1, %v8994_v20 }
 0x48a   :  { %12117 = vst.msk [vmem:[%s22381_s7 + $0x2c8] sm:$0xff] %vm12027_vm2, %v10336_v22  ;;  %v7112_v40 = vadd.f32 %v19212_v31, %v7111_v2  ;;  %v10357_v41 = vadd.f32 %v19309_v17, %v15480_v54  ;;  %v8582_v57 = vmax.f32 %v7120_v6, 0.0  ;;  %v22658_v6 = vld [vmem:[#allocation38_spill] sm:$0xff] }
 0x48b   :  { %v15068_v56 = vpop.f32.mrf.mxu1  ;;  %15163 = vmatmul.mubr.msk.bf16.gmra.mxu1 %vm5537_vm1, %v22653_v15  ;;  %v10348_v23 = vpop.f32.mrf.mxu0 }
 0x48c   :  { %v8580_v37 = vmax.f32 %v7112_v40, 0.0  ;;  %12122 = vst.msk [vmem:[%s22381_s7 + $0x2f0] sm:$0xff] %vm12027_vm2, %v10357_v41  ;;  %v10349_v62 = vadd.f32 %v19309_v17, %v10348_v23  ;;  %15166 = vmatprep.mubr.msk.bf16.mxu1 %vm5537_vm1, %v22654_v33  ;;  %v8996_v1 = vpack.c.bf16 %v8582_v57, %v8581_v47  ;;  %v7133_v42 = vadd.f32 %v19212_v31, %v15068_v56 }
 0x48d   :  { %v7124_v44 = vpop.f32.mrf.mxu1  ;;  %v15481_v51 = vpop.f32.mrf.mxu0 }
 0x48e   :  { %v8995_v13 = vpack.c.bf16 %v8580_v37, %v8579_v59  ;;  %12120 = vst.msk [vmem:[%s22381_s7 + $0x2e0] sm:$0xff] %vm12027_vm2, %v10349_v62  ;;  %v10360_v43 = vadd.f32 %v19309_v17, %v15481_v51  ;;  %v7125_v34 = vadd.f32 %v19212_v31, %v7124_v44  ;;  %v8585_v55 = vmax.f32 %v7133_v42, 0.0 }
 0x48f   :  { %v15069_v24 = vpop.f32.mrf.mxu1  ;;  %v10351_v50 = vpop.f32.mrf.mxu0 }
 0x490   :  { %12123 = vst.msk [vmem:[%s22381_s7 + $0x2f8] sm:$0xff] %vm12027_vm2, %v10360_v43  ;;  %v7136_v29 = vadd.f32 %v19212_v31, %v15069_v24  ;;  %v10352_v8 = vadd.f32 %v19309_v17, %v10351_v50  ;;  %15578 = vmatprep.mubr.msk.bf16.mxu0 %vm5537_vm1, %v8995_v13  ;;  %v8583_v49 = vmax.f32 %v7125_v34, 0.0  ;;  %v22659_v43 = vld [vmem:[#allocation37_spill] sm:$0xff] }
 0x491   :  { %v7127_v0 = vpop.f32.mrf.mxu1  ;;  %v15484_v4 = vpop.f32.mrf.mxu0  ;;  %15579 = vmatmul.mubr.msk.bf16.gmra.mxu0 %vm5537_vm1, %v8996_v1 }
 0x492   :  { %12121 = vst.msk [vmem:[%s22381_s7 + $0x2e8] sm:$0xff] %vm12027_vm2, %v10352_v8  ;;  %v7128_v25 = vadd.f32 %v19212_v31, %v7127_v0  ;;  %v10373_v7 = vadd.f32 %v19309_v17, %v15484_v4  ;;  %v8586_v38 = vmax.f32 %v7136_v29, 0.0  ;;  %v22660_v29 = vld [vmem:[#allocation40_spill] sm:$0xff] }
 0x493   :  { %v15072_v19 = vpop.f32.mrf.mxu1  ;;  %15167 = vmatmul.mubr.msk.bf16.gmra.mxu1 %vm5537_vm1, %v22655_v58  ;;  %v10364_v39 = vpop.f32.mrf.mxu0 }
 0x494   :  { %v8584_v60 = vmax.f32 %v7128_v25, 0.0  ;;  %12126 = vst.msk [vmem:[%s22381_s7 + $0x310] sm:$0xff] %vm12027_vm2, %v10373_v7  ;;  %v10365_v36 = vadd.f32 %v19309_v17, %v10364_v39  ;;  %15170 = vmatprep.mubr.msk.bf16.mxu1 %vm5537_vm1, %v22656_v63  ;;  %v8998_v21 = vpack.c.bf16 %v8586_v38, %v8585_v55  ;;  %v7149_v28 = vadd.f32 %v19212_v31, %v15072_v19 }
 0x495   :  { %v7140_v26 = vpop.f32.mrf.mxu1  ;;  %v15485_v32 = vpop.f32.mrf.mxu0 }
 0x496   :  { %v8997_v27 = vpack.c.bf16 %v8584_v60, %v8583_v49  ;;  %12124 = vst.msk [vmem:[%s22381_s7 + $0x300] sm:$0xff] %vm12027_vm2, %v10365_v36  ;;  %v10376_v11 = vadd.f32 %v19309_v17, %v15485_v32  ;;  %v7141_v46 = vadd.f32 %v19212_v31, %v7140_v26  ;;  %v8589_v22 = vmax.f32 %v7149_v28, 0.0 }
 0x497   :  { %v15073_v12 = vpop.f32.mrf.mxu1  ;;  %v10367_v30 = vpop.f32.mrf.mxu0 }
 0x498   :  { %12127 = vst.msk [vmem:[%s22381_s7 + $0x318] sm:$0xff] %vm12027_vm2, %v10376_v11  ;;  %v7152_v14 = vadd.f32 %v19212_v31, %v15073_v12  ;;  %v10368_v5 = vadd.f32 %v19309_v17, %v10367_v30  ;;  %15582 = vmatprep.mubr.msk.bf16.mxu0 %vm5537_vm1, %v8997_v27  ;;  %v8587_v61 = vmax.f32 %v7141_v46, 0.0  ;;  %v22661_v11 = vld [vmem:[#allocation39_spill] sm:$0xff] }
 0x499   :  { %v7143_v16 = vpop.f32.mrf.mxu1  ;;  %v15488_v3 = vpop.f32.mrf.mxu0  ;;  %15583 = vmatmul.mubr.msk.bf16.gmra.mxu0 %vm5537_vm1, %v8998_v21 }
 0x49a   :  { %12125 = vst.msk [vmem:[%s22381_s7 + $0x308] sm:$0xff] %vm12027_vm2, %v10368_v5  ;;  %v7144_v10 = vadd.f32 %v19212_v31, %v7143_v16  ;;  %v10389_v18 = vadd.f32 %v19309_v17, %v15488_v3  ;;  %v8590_v48 = vmax.f32 %v7152_v14, 0.0  ;;  %v22662_v14 = vld [vmem:[#allocation42_spill] sm:$0xff] }
 0x49b   :  { %v15076_v52 = vpop.f32.mrf.mxu1  ;;  %15171 = vmatmul.mubr.msk.bf16.gmra.mxu1 %vm5537_vm1, %v22657_v45  ;;  %v10380_v20 = vpop.f32.mrf.mxu0 }
 0x49c   :  { %v8588_v35 = vmax.f32 %v7144_v10, 0.0  ;;  %12130 = vst.msk [vmem:[%s22381_s7 + $0x330] sm:$0xff] %vm12027_vm2, %v10389_v18  ;;  %v10381_v9 = vadd.f32 %v19309_v17, %v10380_v20  ;;  %15174 = vmatprep.mubr.msk.bf16.mxu1 %vm5537_vm1, %v22658_v6  ;;  %v9000_v41 = vpack.c.bf16 %v8590_v48, %v8589_v22  ;;  %v7165_v37 = vadd.f32 %v19212_v31, %v15076_v52 }
 0x49d   :  { %v7156_v53 = vpop.f32.mrf.mxu1  ;;  %v15489_v2 = vpop.f32.mrf.mxu0 }
 0x49e   :  { %v8999_v54 = vpack.c.bf16 %v8588_v35, %v8587_v61  ;;  %12128 = vst.msk [vmem:[%s22381_s7 + $0x320] sm:$0xff] %vm12027_vm2, %v10381_v9  ;;  %v10392_v40 = vadd.f32 %v19309_v17, %v15489_v2  ;;  %v7157_v15 = vadd.f32 %v19212_v31, %v7156_v53  ;;  %v8593_v8 = vmax.f32 %v7165_v37, 0.0 }
 0x49f   :  { %v15077_v57 = vpop.f32.mrf.mxu1  ;;  %v10383_v56 = vpop.f32.mrf.mxu0 }
 0x4a0   :  { %12131 = vst.msk [vmem:[%s22381_s7 + $0x338] sm:$0xff] %vm12027_vm2, %v10392_v40  ;;  %v7168_v23 = vadd.f32 %v19212_v31, %v15077_v57  ;;  %v10384_v59 = vadd.f32 %v19309_v17, %v10383_v56  ;;  %15586 = vmatprep.mubr.msk.bf16.mxu0 %vm5537_vm1, %v8999_v54  ;;  %v8591_v24 = vmax.f32 %v7157_v15, 0.0  ;;  %v22663_v40 = vld [vmem:[#allocation41_spill] sm:$0xff] }
 0x4a1   :  { %v7159_v62 = vpop.f32.mrf.mxu1  ;;  %v15492_v33 = vpop.f32.mrf.mxu0  ;;  %15587 = vmatmul.mubr.msk.bf16.gmra.mxu0 %vm5537_vm1, %v9000_v41 }
 0x4a2   :  { %12129 = vst.msk [vmem:[%s22381_s7 + $0x328] sm:$0xff] %vm12027_vm2, %v10384_v59  ;;  %v7160_v47 = vadd.f32 %v19212_v31, %v7159_v62  ;;  %v10405_v44 = vadd.f32 %v19309_v17, %v15492_v33  ;;  %v8594_v51 = vmax.f32 %v7168_v23, 0.0  ;;  %v22664_v23 = vld [vmem:[#allocation44_spill] sm:$0xff] }
 0x4a3   :  { %v15080_v13 = vpop.f32.mrf.mxu1  ;;  %15175 = vmatmul.mubr.msk.bf16.gmra.mxu1 %vm5537_vm1, %v22659_v43  ;;  %v10396_v1 = vpop.f32.mrf.mxu0 }
 0x4a4   :  { %v8592_v50 = vmax.f32 %v7160_v47, 0.0  ;;  %12134 = vst.msk [vmem:[%s22381_s7 + $0x350] sm:$0xff] %vm12027_vm2, %v10405_v44  ;;  %v10397_v34 = vadd.f32 %v19309_v17, %v10396_v1  ;;  %15178 = vmatprep.mubr.msk.bf16.mxu1 %vm5537_vm1, %v22660_v29  ;;  %v9002_v7 = vpack.c.bf16 %v8594_v51, %v8593_v8  ;;  %v7181_v60 = vadd.f32 %v19212_v31, %v15080_v13  ;;  %v19730_v1 = vld [vmem:[#allocation7] ss:$0 sm:$0xff] }
 0x4a5   :  { %v7172_v42 = vpop.f32.mrf.mxu1  ;;  %v15493_v0 = vpop.f32.mrf.mxu0 }
 0x4a6   :  { %v9001_v4 = vpack.c.bf16 %v8592_v50, %v8591_v24  ;;  %12132 = vst.msk [vmem:[%s22381_s7 + $0x340] sm:$0xff] %vm12027_vm2, %v10397_v34  ;;  %v10408_v25 = vadd.f32 %v19309_v17, %v15493_v0  ;;  %v7173_v58 = vadd.f32 %v19212_v31, %v7172_v42  ;;  %v8597_v5 = vmax.f32 %v7181_v60, 0.0 }
 0x4a7   :  { %v15081_v38 = vpop.f32.mrf.mxu1  ;;  %v10399_v19 = vpop.f32.mrf.mxu0 }
 0x4a8   :  { %12135 = vst.msk [vmem:[%s22381_s7 + $0x358] sm:$0xff] %vm12027_vm2, %v10408_v25  ;;  %v7184_v39 = vadd.f32 %v19212_v31, %v15081_v38  ;;  %v10400_v49 = vadd.f32 %v19309_v17, %v10399_v19  ;;  %15590 = vmatprep.mubr.msk.bf16.mxu0 %vm5537_vm1, %v9001_v4  ;;  %v8595_v12 = vmax.f32 %v7173_v58, 0.0  ;;  %v22665_v25 = vld [vmem:[#allocation43_spill] sm:$0xff] }
 0x4a9   :  { %v7175_v36 = vpop.f32.mrf.mxu1  ;;  %v15496_v63 = vpop.f32.mrf.mxu0  ;;  %15591 = vmatmul.mubr.msk.bf16.gmra.mxu0 %vm5537_vm1, %v9002_v7 }
 0x4aa   :  { %12133 = vst.msk [vmem:[%s22381_s7 + $0x348] sm:$0xff] %vm12027_vm2, %v10400_v49  ;;  %v7176_v55 = vadd.f32 %v19212_v31, %v7175_v36  ;;  %v10421_v26 = vadd.f32 %v19309_v17, %v15496_v63  ;;  %v8598_v32 = vmax.f32 %v7184_v39, 0.0  ;;  %v22666_v39 = vld [vmem:[#allocation46_spill] sm:$0xff] }
 0x4ab   :  { %v15084_v27 = vpop.f32.mrf.mxu1  ;;  %15179 = vmatmul.mubr.msk.bf16.gmra.mxu1 %vm5537_vm1, %v22661_v11  ;;  %v10412_v21 = vpop.f32.mrf.mxu0 }
 0x4ac   :  { %v8596_v30 = vmax.f32 %v7176_v55, 0.0  ;;  %12138 = vst.msk [vmem:[%s22381_s7 + $0x370] sm:$0xff] %vm12027_vm2, %v10421_v26  ;;  %v10413_v46 = vadd.f32 %v19309_v17, %v10412_v21  ;;  %15182 = vmatprep.mubr.msk.bf16.mxu1 %vm5537_vm1, %v22662_v14  ;;  %v9004_v18 = vpack.c.bf16 %v8598_v32, %v8597_v5  ;;  %v7197_v35 = vadd.f32 %v19212_v31, %v15084_v27 }
 0x4ad   :  { %v7188_v28 = vpop.f32.mrf.mxu1  ;;  %v15497_v16 = vpop.f32.mrf.mxu0 }
 0x4ae   :  { %v9003_v3 = vpack.c.bf16 %v8596_v30, %v8595_v12  ;;  %12136 = vst.msk [vmem:[%s22381_s7 + $0x360] sm:$0xff] %vm12027_vm2, %v10413_v46  ;;  %v10424_v10 = vadd.f32 %v19309_v17, %v15497_v16  ;;  %v7189_v45 = vadd.f32 %v19212_v31, %v7188_v28  ;;  %v8601_v59 = vmax.f32 %v7197_v35, 0.0 }
 0x4af   :  { %v15085_v48 = vpop.f32.mrf.mxu1  ;;  %v10415_v52 = vpop.f32.mrf.mxu0 }
 0x4b0   :  { %12139 = vst.msk [vmem:[%s22381_s7 + $0x378] sm:$0xff] %vm12027_vm2, %v10424_v10  ;;  %v7200_v20 = vadd.f32 %v19212_v31, %v15085_v48  ;;  %v10416_v61 = vadd.f32 %v19309_v17, %v10415_v52  ;;  %15594 = vmatprep.mubr.msk.bf16.mxu0 %vm5537_vm1, %v9003_v3  ;;  %v8599_v57 = vmax.f32 %v7189_v45, 0.0  ;;  %v22667_v10 = vld [vmem:[#allocation45_spill] sm:$0xff] }
 0x4b1   :  { %v7191_v9 = vpop.f32.mrf.mxu1  ;;  %v15500_v6 = vpop.f32.mrf.mxu0  ;;  %15595 = vmatmul.mubr.msk.bf16.gmra.mxu0 %vm5537_vm1, %v9004_v18 }
 0x4b2   :  { %12137 = vst.msk [vmem:[%s22381_s7 + $0x368] sm:$0xff] %vm12027_vm2, %v10416_v61  ;;  %v7192_v22 = vadd.f32 %v19212_v31, %v7191_v9  ;;  %v10437_v53 = vadd.f32 %v19309_v17, %v15500_v6  ;;  %v8602_v2 = vmax.f32 %v7200_v20, 0.0  ;;  %v22668_v20 = vld [vmem:[#allocation48_spill] sm:$0xff] }
 0x4b3   :  { %v15088_v54 = vpop.f32.mrf.mxu1  ;;  %15183 = vmatmul.mubr.msk.bf16.gmra.mxu1 %vm5537_vm1, %v22663_v40  ;;  %v10428_v41 = vpop.f32.mrf.mxu0 }
 0x4b4   :  { %v8600_v56 = vmax.f32 %v7192_v22, 0.0  ;;  %12142 = vst.msk [vmem:[%s22381_s7 + $0x390] sm:$0xff] %vm12027_vm2, %v10437_v53  ;;  %v10429_v15 = vadd.f32 %v19309_v17, %v10428_v41  ;;  %15186 = vmatprep.mubr.msk.bf16.mxu1 %vm5537_vm1, %v22664_v23  ;;  %v9006_v44 = vpack.c.bf16 %v8602_v2, %v8601_v59  ;;  %v7213_v34 = vadd.f32 %v19730_v1, %v15088_v54 }
 0x4b5   :  { %v7204_v37 = vpop.f32.mrf.mxu1  ;;  %v15501_v62 = vpop.f32.mrf.mxu0 }
 0x4b6   :  { %v9005_v33 = vpack.c.bf16 %v8600_v56, %v8599_v57  ;;  %12140 = vst.msk [vmem:[%s22381_s7 + $0x380] sm:$0xff] %vm12027_vm2, %v10429_v15  ;;  %v10440_v47 = vadd.f32 %v19309_v17, %v15501_v62  ;;  %v7205_v43 = vadd.f32 %v19212_v31, %v7204_v37  ;;  %v8605_v49 = vmax.f32 %v7213_v34, 0.0 }
 0x4b7   :  { %v15089_v51 = vpop.f32.mrf.mxu1  ;;  %v10431_v13 = vpop.f32.mrf.mxu0 }
 0x4b8   :  { %12143 = vst.msk [vmem:[%s22381_s7 + $0x398] sm:$0xff] %vm12027_vm2, %v10440_v47  ;;  %v7216_v24 = vadd.f32 %v19730_v1, %v15089_v51  ;;  %v10432_v50 = vadd.f32 %v19309_v17, %v10431_v13  ;;  %15598 = vmatprep.mubr.msk.bf16.mxu0 %vm5537_vm1, %v9005_v33  ;;  %v8603_v38 = vmax.f32 %v7205_v43, 0.0  ;;  %v22669_v47 = vld [vmem:[#allocation47_spill] sm:$0xff] }
 0x4b9   :  { %v7207_v29 = vpop.f32.mrf.mxu1  ;;  %v15504_v8 = vpop.f32.mrf.mxu0  ;;  %15599 = vmatmul.mubr.msk.bf16.gmra.mxu0 %vm5537_vm1, %v9006_v44 }
 0x4ba   :  { %12141 = vst.msk [vmem:[%s22381_s7 + $0x388] sm:$0xff] %vm12027_vm2, %v10432_v50  ;;  %v7208_v31 = vadd.f32 %v19730_v1, %v7207_v29  ;;  %v10453_v42 = vadd.f32 %v19309_v17, %v15504_v8  ;;  %v8606_v0 = vmax.f32 %v7216_v24, 0.0  ;;  %v22670_v24 = vld [vmem:[#allocation50_spill] sm:$0xff] }
 0x4bb   :  { %v15092_v4 = vpop.f32.mrf.mxu1  ;;  %15187 = vmatmul.mubr.msk.bf16.gmra.mxu1 %vm5537_vm1, %v22665_v25  ;;  %v10444_v7 = vpop.f32.mrf.mxu0 }
 0x4bc   :  { %v8604_v19 = vmax.f32 %v7208_v31, 0.0  ;;  %12146 = vst.msk [vmem:[%s22381_s7 + $0x3b0] sm:$0xff] %vm12027_vm2, %v10453_v42  ;;  %v10445_v58 = vadd.f32 %v19309_v17, %v10444_v7  ;;  %15190 = vmatprep.mubr.msk.bf16.mxu1 %vm5537_vm1, %v22666_v39  ;;  %v9008_v26 = vpack.c.bf16 %v8606_v0, %v8605_v49  ;;  %v7229_v30 = vadd.f32 %v19730_v1, %v15092_v4 }
 0x4bd   :  { %v7220_v60 = vpop.f32.mrf.mxu1  ;;  %v15505_v36 = vpop.f32.mrf.mxu0 }
 0x4be   :  { %v9007_v63 = vpack.c.bf16 %v8604_v19, %v8603_v38  ;;  %12144 = vst.msk [vmem:[%s22381_s7 + $0x3a0] sm:$0xff] %vm12027_vm2, %v10445_v58  ;;  %v10456_v55 = vadd.f32 %v19309_v17, %v15505_v36  ;;  %v7221_v11 = vadd.f32 %v19730_v1, %v7220_v60  ;;  %v8609_v61 = vmax.f32 %v7229_v30, 0.0  ;;  %v19832_v60 = vld [vmem:[#allocation9] ss:$0 sm:$0xff] }
 0x4bf   :  { %v15093_v32 = vpop.f32.mrf.mxu1  ;;  %v10447_v27 = vpop.f32.mrf.mxu0 }
 0x4c0   :  { %12147 = vst.msk [vmem:[%s22381_s7 + $0x3b8] sm:$0xff] %vm12027_vm2, %v10456_v55  ;;  %v7232_v21 = vadd.f32 %v19730_v1, %v15093_v32  ;;  %v10448_v12 = vadd.f32 %v19309_v17, %v10447_v27  ;;  %15602 = vmatprep.mubr.msk.bf16.mxu0 %vm5537_vm1, %v9007_v63  ;;  %v8607_v48 = vmax.f32 %v7221_v11, 0.0  ;;  %v22671_v55 = vld [vmem:[#allocation49_spill] sm:$0xff] }
 0x4c1   :  { %v7223_v46 = vpop.f32.mrf.mxu1  ;;  %v15508_v14 = vpop.f32.mrf.mxu0  ;;  %15603 = vmatmul.mubr.msk.bf16.gmra.mxu0 %vm5537_vm1, %v9008_v26 }
 0x4c2   :  { %12145 = vst.msk [vmem:[%s22381_s7 + $0x3a8] sm:$0xff] %vm12027_vm2, %v10448_v12  ;;  %v7224_v5 = vadd.f32 %v19730_v1, %v7223_v46  ;;  %v10469_v28 = vadd.f32 %v19309_v17, %v15508_v14  ;;  %v8610_v16 = vmax.f32 %v7232_v21, 0.0  ;;  %v22672_v21 = vld [vmem:[#allocation52_spill] sm:$0xff] }
 0x4c3   :  { %v15096_v3 = vpop.f32.mrf.mxu1  ;;  %15191 = vmatmul.mubr.msk.bf16.gmra.mxu1 %vm5537_vm1, %v22667_v10  ;;  %v10460_v18 = vpop.f32.mrf.mxu0 }
 0x4c4   :  { %v8608_v52 = vmax.f32 %v7224_v5, 0.0  ;;  %12150 = vst.msk [vmem:[%s22381_s7 + $0x3d0] sm:$0xff] %vm12027_vm2, %v10469_v28  ;;  %v10461_v45 = vadd.f32 %v19309_v17, %v10460_v18  ;;  %15194 = vmatprep.mubr.msk.bf16.mxu1 %vm5537_vm1, %v22668_v20  ;;  %v9010_v53 = vpack.c.bf16 %v8610_v16, %v8609_v61  ;;  %v7245_v56 = vadd.f32 %v19730_v1, %v15096_v3 }
 0x4c5   :  { %v7236_v35 = vpop.f32.mrf.mxu1  ;;  %v15509_v9 = vpop.f32.mrf.mxu0 }
 0x4c6   :  { %v9009_v6 = vpack.c.bf16 %v8608_v52, %v8607_v48  ;;  %12148 = vst.msk [vmem:[%s22381_s7 + $0x3c0] sm:$0xff] %vm12027_vm2, %v10461_v45  ;;  %v10472_v22 = vadd.f32 %v19309_v17, %v15509_v9  ;;  %v7237_v40 = vadd.f32 %v19730_v1, %v7236_v35  ;;  %v8613_v50 = vmax.f32 %v7245_v56, 0.0 }
 0x4c7   :  { %v15097_v2 = vpop.f32.mrf.mxu1  ;;  %v10463_v54 = vpop.f32.mrf.mxu0 }
 0x4c8   :  { %12151 = vst.msk [vmem:[%s22381_s7 + $0x3d8] sm:$0xff] %vm12027_vm2, %v10472_v22  ;;  %v7248_v41 = vadd.f32 %v19730_v1, %v15097_v2  ;;  %v10464_v57 = vadd.f32 %v19309_v17, %v10463_v54  ;;  %15606 = vmatprep.mubr.msk.bf16.mxu0 %vm5537_vm1, %v9009_v6  ;;  %v8611_v51 = vmax.f32 %v7237_v40, 0.0  ;;  %v22673_v22 = vld [vmem:[#allocation51_spill] sm:$0xff] }
 0x4c9   :  { %v7239_v15 = vpop.f32.mrf.mxu1  ;;  %v15512_v23 = vpop.f32.mrf.mxu0  ;;  %15607 = vmatmul.mubr.msk.bf16.gmra.mxu0 %vm5537_vm1, %v9010_v53 }
 0x4ca   :  { %12149 = vst.msk [vmem:[%s22381_s7 + $0x3c8] sm:$0xff] %vm12027_vm2, %v10464_v57  ;;  %v7240_v59 = vadd.f32 %v19730_v1, %v7239_v15  ;;  %v10485_v37 = vadd.f32 %v19309_v17, %v15512_v23  ;;  %v8614_v62 = vmax.f32 %v7248_v41, 0.0  ;;  %v22674_v41 = vld [vmem:[#allocation54_spill] sm:$0xff] }
 0x4cb   :  { %v15100_v33 = vpop.f32.mrf.mxu1  ;;  %15195 = vmatmul.mubr.msk.bf16.gmra.mxu1 %vm5537_vm1, %v22669_v47  ;;  %v10476_v44 = vpop.f32.mrf.mxu0 }
 0x4cc   :  { %v8612_v13 = vmax.f32 %v7240_v59, 0.0  ;;  %12154 = vst.msk [vmem:[%s22381_s7 + $0x3f0] sm:$0xff] %vm12027_vm2, %v10485_v37  ;;  %v10477_v43 = vadd.f32 %v19309_v17, %v10476_v44  ;;  %15198 = vmatprep.mubr.msk.bf16.mxu1 %vm5537_vm1, %v22670_v24  ;;  %v9012_v42 = vpack.c.bf16 %v8614_v62, %v8613_v50  ;;  %v7261_v19 = vadd.f32 %v19730_v1, %v15100_v33 }
 0x4cd   :  { %v7252_v34 = vpop.f32.mrf.mxu1  ;;  %v15513_v29 = vpop.f32.mrf.mxu0 }
 0x4ce   :  { %v9011_v8 = vpack.c.bf16 %v8612_v13, %v8611_v51  ;;  %12152 = vst.msk [vmem:[%s22381_s7 + $0x3e0] sm:$0xff] %vm12027_vm2, %v10477_v43  ;;  %v10488_v31 = vadd.f32 %v19309_v17, %v15513_v29  ;;  %v7253_v25 = vadd.f32 %v19730_v1, %v7252_v34  ;;  %v8617_v12 = vmax.f32 %v7261_v19, 0.0 }
 0x4cf   :  { %v15101_v0 = vpop.f32.mrf.mxu1  ;;  %v10479_v4 = vpop.f32.mrf.mxu0 }
 0x4d0   :  { %12155 = vst.msk [vmem:[%s22381_s7 + $0x3f8] sm:$0xff] %vm12027_vm2, %v10488_v31  ;;  %v7264_v7 = vadd.f32 %v19730_v1, %v15101_v0  ;;  %v10480_v38 = vadd.f32 %v19309_v17, %v10479_v4  ;;  %15610 = vmatprep.mubr.msk.bf16.mxu0 %vm5537_vm1, %v9011_v8  ;;  %v8615_v32 = vmax.f32 %v7253_v25, 0.0  ;;  %v22675_v31 = vld [vmem:[#allocation53_spill] sm:$0xff] }
 0x4d1   :  { %v7255_v58 = vpop.f32.mrf.mxu1  ;;  %v15516_v39 = vpop.f32.mrf.mxu0  ;;  %15611 = vmatmul.mubr.msk.bf16.gmra.mxu0 %vm5537_vm1, %v9012_v42 }
 0x4d2   :  { %12153 = vst.msk [vmem:[%s22381_s7 + $0x3e8] sm:$0xff] %vm12027_vm2, %v10480_v38  ;;  %v7256_v49 = vadd.f32 %v19730_v1, %v7255_v58  ;;  %v10501_v36 = vadd.f32 %v19832_v60, %v15516_v39  ;;  %v8618_v17 = vmax.f32 %v7264_v7, 0.0  ;;  %v22676_v7 = vld [vmem:[#allocation56_spill] sm:$0xff] }
 0x4d3   :  { %v15104_v63 = vpop.f32.mrf.mxu1  ;;  %15199 = vmatmul.mubr.msk.bf16.gmra.mxu1 %vm5537_vm1, %v22671_v55  ;;  %v10492_v26 = vpop.f32.mrf.mxu0 }
 0x4d4   :  { %v8616_v27 = vmax.f32 %v7256_v49, 0.0  ;;  %12158 = vst.msk [vmem:[%s22381_s7 + $0x410] sm:$0xff] %vm12027_vm2, %v10501_v36  ;;  %v10493_v11 = vadd.f32 %v19832_v60, %v10492_v26  ;;  %15202 = vmatprep.mubr.msk.bf16.mxu1 %vm5537_vm1, %v22672_v21  ;;  %v9014_v28 = vpack.c.bf16 %v8618_v17, %v8617_v12  ;;  %v7277_v52 = vadd.f32 %v19730_v1, %v15104_v63 }
 0x4d5   :  { %v7268_v30 = vpop.f32.mrf.mxu1  ;;  %v15517_v46 = vpop.f32.mrf.mxu0 }
 0x4d6   :  { %v9013_v14 = vpack.c.bf16 %v8616_v27, %v8615_v32  ;;  %12156 = vst.msk [vmem:[%s22381_s7 + $0x400] sm:$0xff] %vm12027_vm2, %v10493_v11  ;;  %v10504_v5 = vadd.f32 %v19832_v60, %v15517_v46  ;;  %v7269_v10 = vadd.f32 %v19730_v1, %v7268_v30  ;;  %v8621_v57 = vmax.f32 %v7277_v52, 0.0 }
 0x4d7   :  { %v15105_v16 = vpop.f32.mrf.mxu1  ;;  %v10495_v3 = vpop.f32.mrf.mxu0 }
 0x4d8   :  { %12159 = vst.msk [vmem:[%s22381_s7 + $0x418] sm:$0xff] %vm12027_vm2, %v10504_v5  ;;  %v7280_v18 = vadd.f32 %v19730_v1, %v15105_v16  ;;  %v10496_v48 = vadd.f32 %v19832_v60, %v10495_v3  ;;  %15614 = vmatprep.mubr.msk.bf16.mxu0 %vm5537_vm1, %v9013_v14  ;;  %v8619_v2 = vmax.f32 %v7269_v10, 0.0  ;;  %v22677_v5 = vld [vmem:[#allocation55_spill] sm:$0xff] }
 0x4d9   :  { %v7271_v45 = vpop.f32.mrf.mxu1  ;;  %v15520_v20 = vpop.f32.mrf.mxu0  ;;  %15615 = vmatmul.mubr.msk.bf16.gmra.mxu0 %vm5537_vm1, %v9014_v28 }
 0x4da   :  { %12157 = vst.msk [vmem:[%s22381_s7 + $0x408] sm:$0xff] %vm12027_vm2, %v10496_v48  ;;  %v7272_v61 = vadd.f32 %v19730_v1, %v7271_v45  ;;  %v10517_v35 = vadd.f32 %v19832_v60, %v15520_v20  ;;  %v8622_v9 = vmax.f32 %v7280_v18, 0.0  ;;  %v22678_v18 = vld [vmem:[#allocation58_spill] sm:$0xff] }
 0x4db   :  { %v15108_v6 = vpop.f32.mrf.mxu1  ;;  %15203 = vmatmul.mubr.msk.bf16.gmra.mxu1 %vm5537_vm1, %v22673_v22  ;;  %v10508_v53 = vpop.f32.mrf.mxu0 }
 0x4dc   :  { %v8620_v54 = vmax.f32 %v7272_v61, 0.0  ;;  %12162 = vst.msk [vmem:[%s22381_s7 + $0x430] sm:$0xff] %vm12027_vm2, %v10517_v35  ;;  %v10509_v40 = vadd.f32 %v19832_v60, %v10508_v53  ;;  %15206 = vmatprep.mubr.msk.bf16.mxu1 %vm5537_vm1, %v22674_v41  ;;  %v9016_v37 = vpack.c.bf16 %v8622_v9, %v8621_v57  ;;  %v7293_v13 = vadd.f32 %v19730_v1, %v15108_v6 }
 0x4dd   :  { %v7284_v56 = vpop.f32.mrf.mxu1  ;;  %v15521_v15 = vpop.f32.mrf.mxu0 }
 0x4de   :  { %v9015_v23 = vpack.c.bf16 %v8620_v54, %v8619_v2  ;;  %12160 = vst.msk [vmem:[%s22381_s7 + $0x420] sm:$0xff] %vm12027_vm2, %v10509_v40  ;;  %v10520_v59 = vadd.f32 %v19832_v60, %v15521_v15  ;;  %v7285_v47 = vadd.f32 %v19730_v1, %v7284_v56  ;;  %v8625_v38 = vmax.f32 %v7293_v13, 0.0 }
 0x4df   :  { %v15109_v62 = vpop.f32.mrf.mxu1  ;;  %v10511_v33 = vpop.f32.mrf.mxu0 }
 0x4e0   :  { %12163 = vst.msk [vmem:[%s22381_s7 + $0x438] sm:$0xff] %vm12027_vm2, %v10520_v59  ;;  %v7296_v44 = vadd.f32 %v19730_v1, %v15109_v62  ;;  %v10512_v51 = vadd.f32 %v19832_v60, %v10511_v33  ;;  %15618 = vmatprep.mubr.msk.bf16.mxu0 %vm5537_vm1, %v9015_v23  ;;  %v8623_v0 = vmax.f32 %v7285_v47, 0.0  ;;  %v22679_v59 = vld [vmem:[#allocation57_spill] sm:$0xff] }
 0x4e1   :  { %v7287_v43 = vpop.f32.mrf.mxu1  ;;  %v15524_v24 = vpop.f32.mrf.mxu0  ;;  %15619 = vmatmul.mubr.msk.bf16.gmra.mxu0 %vm5537_vm1, %v9016_v37 }
 0x4e2   :  { %12161 = vst.msk [vmem:[%s22381_s7 + $0x428] sm:$0xff] %vm12027_vm2, %v10512_v51  ;;  %v7288_v50 = vadd.f32 %v19730_v1, %v7287_v43  ;;  %v10533_v34 = vadd.f32 %v19832_v60, %v15524_v24  ;;  %v8626_v29 = vmax.f32 %v7296_v44, 0.0  ;;  %v22680_v44 = vld [vmem:[#allocation60_spill] sm:$0xff] }
 0x4e3   :  { %v15112_v8 = vpop.f32.mrf.mxu1  ;;  %15207 = vmatmul.mubr.msk.bf16.gmra.mxu1 %vm5537_vm1, %v22675_v31  ;;  %v10524_v42 = vpop.f32.mrf.mxu0 }
 0x4e4   :  { %v8624_v4 = vmax.f32 %v7288_v50, 0.0  ;;  %12166 = vst.msk [vmem:[%s22381_s7 + $0x450] sm:$0xff] %vm12027_vm2, %v10533_v34  ;;  %v10525_v25 = vadd.f32 %v19832_v60, %v10524_v42  ;;  %15210 = vmatprep.mubr.msk.bf16.mxu1 %vm5537_vm1, %v22676_v7  ;;  %v9018_v36 = vpack.c.bf16 %v8626_v29, %v8625_v38  ;;  %v7309_v27 = vadd.f32 %v19730_v1, %v15112_v8 }
 0x4e5   :  { %v7300_v19 = vpop.f32.mrf.mxu1  ;;  %v15525_v58 = vpop.f32.mrf.mxu0 }
 0x4e6   :  { %v9017_v39 = vpack.c.bf16 %v8624_v4, %v8623_v0  ;;  %12164 = vst.msk [vmem:[%s22381_s7 + $0x440] sm:$0xff] %vm12027_vm2, %v10525_v25  ;;  %v10536_v49 = vadd.f32 %v19832_v60, %v15525_v58  ;;  %v7301_v55 = vadd.f32 %v19730_v1, %v7300_v19  ;;  %v8629_v48 = vmax.f32 %v7309_v27, 0.0 }
 0x4e7   :  { %v15113_v17 = vpop.f32.mrf.mxu1  ;;  %v10527_v63 = vpop.f32.mrf.mxu0 }
 0x4e8   :  { %12167 = vst.msk [vmem:[%s22381_s7 + $0x458] sm:$0xff] %vm12027_vm2, %v10536_v49  ;;  %v7312_v26 = vadd.f32 %v19730_v1, %v15113_v17  ;;  %v10528_v32 = vadd.f32 %v19832_v60, %v10527_v63  ;;  %15622 = vmatprep.mubr.msk.bf16.mxu0 %vm5537_vm1, %v9017_v39  ;;  %v8627_v16 = vmax.f32 %v7301_v55, 0.0  ;;  %v22681_v49 = vld [vmem:[#allocation59_spill] sm:$0xff] }
 0x4e9   :  { %v7303_v11 = vpop.f32.mrf.mxu1  ;;  %v15528_v21 = vpop.f32.mrf.mxu0  ;;  %15623 = vmatmul.mubr.msk.bf16.gmra.mxu0 %vm5537_vm1, %v9018_v36 }
 0x4ea   :  { %12165 = vst.msk [vmem:[%s22381_s7 + $0x448] sm:$0xff] %vm12027_vm2, %v10528_v32  ;;  %v7304_v12 = vadd.f32 %v19730_v1, %v7303_v11  ;;  %v10549_v30 = vadd.f32 %v19832_v60, %v15528_v21  ;;  %v8630_v46 = vmax.f32 %v7312_v26, 0.0  ;;  %v22682_v26 = vld [vmem:[#allocation62_spill] sm:$0xff] }
 0x4eb   :  { %v15116_v14 = vpop.f32.mrf.mxu1  ;;  %15211 = vmatmul.mubr.msk.bf16.gmra.mxu1 %vm5537_vm1, %v22677_v5  ;;  %v10540_v28 = vpop.f32.mrf.mxu0 }
 0x4ec   :  { %v8628_v3 = vmax.f32 %v7304_v12, 0.0  ;;  %12170 = vst.msk [vmem:[%s22381_s7 + $0x470] sm:$0xff] %vm12027_vm2, %v10549_v30  ;;  %v10541_v10 = vadd.f32 %v19832_v60, %v10540_v28  ;;  %15214 = vmatprep.mubr.msk.bf16.mxu1 %vm5537_vm1, %v22678_v18  ;;  %v9020_v35 = vpack.c.bf16 %v8630_v46, %v8629_v48  ;;  %v7325_v54 = vadd.f32 %v19730_v1, %v15116_v14 }
 0x4ed   :  { %v7316_v52 = vpop.f32.mrf.mxu1  ;;  %v15529_v45 = vpop.f32.mrf.mxu0 }
 0x4ee   :  { %v9019_v20 = vpack.c.bf16 %v8628_v3, %v8627_v16  ;;  %12168 = vst.msk [vmem:[%s22381_s7 + $0x460] sm:$0xff] %vm12027_vm2, %v10541_v10  ;;  %v10552_v61 = vadd.f32 %v19832_v60, %v15529_v45  ;;  %v7317_v22 = vadd.f32 %v19730_v1, %v7316_v52  ;;  %v8633_v51 = vmax.f32 %v7325_v54, 0.0 }
 0x4ef   :  { %v15117_v9 = vpop.f32.mrf.mxu1  ;;  %v10543_v6 = vpop.f32.mrf.mxu0 }
 0x4f0   :  { %12171 = vst.msk [vmem:[%s22381_s7 + $0x478] sm:$0xff] %vm12027_vm2, %v10552_v61  ;;  %v7328_v53 = vadd.f32 %v19730_v1, %v15117_v9  ;;  %v10544_v2 = vadd.f32 %v19832_v60, %v10543_v6  ;;  %15626 = vmatprep.mubr.msk.bf16.mxu0 %vm5537_vm1, %v9019_v20  ;;  %v8631_v62 = vmax.f32 %v7317_v22, 0.0  ;;  %v22683_v61 = vld [vmem:[#allocation61_spill] sm:$0xff] }
 0x4f1   :  { %v7319_v40 = vpop.f32.mrf.mxu1  ;;  %v15532_v41 = vpop.f32.mrf.mxu0  ;;  %15627 = vmatmul.mubr.msk.bf16.gmra.mxu0 %vm5537_vm1, %v9020_v35 }
 0x4f2   :  { %12169 = vst.msk [vmem:[%s22381_s7 + $0x468] sm:$0xff] %vm12027_vm2, %v10544_v2  ;;  %v7320_v57 = vadd.f32 %v19730_v1, %v7319_v40  ;;  %v10565_v56 = vadd.f32 %v19832_v60, %v15532_v41  ;;  %v8634_v15 = vmax.f32 %v7328_v53, 0.0  ;;  %v22684_v53 = vld [vmem:[#allocation64_spill] sm:$0xff] }
 0x4f3   :  { %v15120_v23 = vpop.f32.mrf.mxu1  ;;  %15215 = vmatmul.mubr.msk.bf16.gmra.mxu1 %vm5537_vm1, %v22679_v59  ;;  %v10556_v37 = vpop.f32.mrf.mxu0 }
 0x4f4   :  { %v8632_v33 = vmax.f32 %v7320_v57, 0.0  ;;  %12174 = vst.msk [vmem:[%s22381_s7 + $0x490] sm:$0xff] %vm12027_vm2, %v10565_v56  ;;  %v10557_v47 = vadd.f32 %v19832_v60, %v10556_v37  ;;  %15218 = vmatprep.mubr.msk.bf16.mxu1 %vm5537_vm1, %v22680_v44  ;;  %v9022_v34 = vpack.c.bf16 %v8634_v15, %v8633_v51  ;;  %v7341_v4 = vadd.f32 %v19730_v1, %v15120_v23 }
 0x4f5   :  { %v7332_v13 = vpop.f32.mrf.mxu1  ;;  %v15533_v43 = vpop.f32.mrf.mxu0 }
 0x4f6   :  { %v9021_v24 = vpack.c.bf16 %v8632_v33, %v8631_v62  ;;  %12172 = vst.msk [vmem:[%s22381_s7 + $0x480] sm:$0xff] %vm12027_vm2, %v10557_v47  ;;  %v10568_v50 = vadd.f32 %v19832_v60, %v15533_v43  ;;  %v7333_v31 = vadd.f32 %v19730_v1, %v7332_v13  ;;  %v8637_v32 = vmax.f32 %v7341_v4, 0.0 }
 0x4f7   :  { %v15121_v29 = vpop.f32.mrf.mxu1  ;;  %v10559_v8 = vpop.f32.mrf.mxu0 }
 0x4f8   :  { %12175 = vst.msk [vmem:[%s22381_s7 + $0x498] sm:$0xff] %vm12027_vm2, %v10568_v50  ;;  %v7344_v42 = vadd.f32 %v19730_v1, %v15121_v29  ;;  %v10560_v0 = vadd.f32 %v19832_v60, %v10559_v8  ;;  %15630 = vmatprep.mubr.msk.bf16.mxu0 %vm5537_vm1, %v9021_v24  ;;  %v8635_v17 = vmax.f32 %v7333_v31, 0.0  ;;  %v22685_v50 = vld [vmem:[#allocation63_spill] sm:$0xff] }
 0x4f9   :  { %v7335_v25 = vpop.f32.mrf.mxu1  ;;  %v15536_v7 = vpop.f32.mrf.mxu0  ;;  %15631 = vmatmul.mubr.msk.bf16.gmra.mxu0 %vm5537_vm1, %v9022_v34 }
 0x4fa   :  { %12173 = vst.msk [vmem:[%s22381_s7 + $0x488] sm:$0xff] %vm12027_vm2, %v10560_v0  ;;  %v7336_v38 = vadd.f32 %v19730_v1, %v7335_v25  ;;  %v10581_v19 = vadd.f32 %v19832_v60, %v15536_v7  ;;  %v8638_v58 = vmax.f32 %v7344_v42, 0.0  ;;  %v22686_v42 = vld [vmem:[#allocation66_spill] sm:$0xff] }
 0x4fb   :  { %v15124_v39 = vpop.f32.mrf.mxu1  ;;  %15219 = vmatmul.mubr.msk.bf16.gmra.mxu1 %vm5537_vm1, %v22681_v49  ;;  %v10572_v36 = vpop.f32.mrf.mxu0 }
 0x4fc   :  { %v8636_v63 = vmax.f32 %v7336_v38, 0.0  ;;  %12178 = vst.msk [vmem:[%s22381_s7 + $0x4b0] sm:$0xff] %vm12027_vm2, %v10581_v19  ;;  %v10573_v55 = vadd.f32 %v19832_v60, %v10572_v36  ;;  %15222 = vmatprep.mubr.msk.bf16.mxu1 %vm5537_vm1, %v22682_v26  ;;  %v9024_v30 = vpack.c.bf16 %v8638_v58, %v8637_v32  ;;  %v7357_v3 = vadd.f32 %v19730_v1, %v15124_v39 }
 0x4fd   :  { %v7348_v27 = vpop.f32.mrf.mxu1  ;;  %v15537_v11 = vpop.f32.mrf.mxu0 }
 0x4fe   :  { %v9023_v21 = vpack.c.bf16 %v8636_v63, %v8635_v17  ;;  %12176 = vst.msk [vmem:[%s22381_s7 + $0x4a0] sm:$0xff] %vm12027_vm2, %v10573_v55  ;;  %v10584_v12 = vadd.f32 %v19832_v60, %v15537_v11  ;;  %v7349_v5 = vadd.f32 %v19730_v1, %v7348_v27  ;;  %v8641_v2 = vmax.f32 %v7357_v3, 0.0 }
 0x4ff   :  { %v15125_v46 = vpop.f32.mrf.mxu1  ;;  %v10575_v14 = vpop.f32.mrf.mxu0 }
 0x500   :  { %12179 = vst.msk [vmem:[%s22381_s7 + $0x4b8] sm:$0xff] %vm12027_vm2, %v10584_v12  ;;  %v7360_v28 = vadd.f32 %v19730_v1, %v15125_v46  ;;  %v10576_v16 = vadd.f32 %v19832_v60, %v10575_v14  ;;  %15634 = vmatprep.mubr.msk.bf16.mxu0 %vm5537_vm1, %v9023_v21  ;;  %v8639_v9 = vmax.f32 %v7349_v5, 0.0  ;;  %v22687_v12 = vld [vmem:[#allocation65_spill] sm:$0xff] }
 0x501   :  { %v7351_v10 = vpop.f32.mrf.mxu1  ;;  %v15540_v18 = vpop.f32.mrf.mxu0  ;;  %15635 = vmatmul.mubr.msk.bf16.gmra.mxu0 %vm5537_vm1, %v9024_v30 }
 0x502   :  { %12177 = vst.msk [vmem:[%s22381_s7 + $0x4a8] sm:$0xff] %vm12027_vm2, %v10576_v16  ;;  %v7352_v48 = vadd.f32 %v19730_v1, %v7351_v10  ;;  %v10597_v52 = vadd.f32 %v19832_v60, %v15540_v18  ;;  %v8642_v45 = vmax.f32 %v7360_v28, 0.0  ;;  %v22688_v28 = vld [vmem:[#allocation68_spill] sm:$0xff] }
 0x503   :  { %v15128_v20 = vpop.f32.mrf.mxu1  ;;  %15223 = vmatmul.mubr.msk.bf16.gmra.mxu1 %vm5537_vm1, %v22683_v61  ;;  %v10588_v35 = vpop.f32.mrf.mxu0 }
 0x504   :  { %v8640_v6 = vmax.f32 %v7352_v48, 0.0  ;;  %12182 = vst.msk [vmem:[%s22381_s7 + $0x4d0] sm:$0xff] %vm12027_vm2, %v10597_v52  ;;  %v10589_v22 = vadd.f32 %v19832_v60, %v10588_v35  ;;  %15226 = vmatprep.mubr.msk.bf16.mxu1 %vm5537_vm1, %v22684_v53  ;;  %v9026_v56 = vpack.c.bf16 %v8642_v45, %v8641_v2  ;;  %v7373_v33 = vadd.f32 %v19730_v1, %v15128_v20 }
 0x505   :  { %v7364_v54 = vpop.f32.mrf.mxu1  ;;  %v15541_v40 = vpop.f32.mrf.mxu0 }
 0x506   :  { %v9025_v41 = vpack.c.bf16 %v8640_v6, %v8639_v9  ;;  %12180 = vst.msk [vmem:[%s22381_s7 + $0x4c0] sm:$0xff] %vm12027_vm2, %v10589_v22  ;;  %v10600_v57 = vadd.f32 %v19832_v60, %v15541_v40  ;;  %v7365_v59 = vadd.f32 %v19730_v1, %v7364_v54  ;;  %v8645_v0 = vmax.f32 %v7373_v33, 0.0 }
 0x507   :  { %v15129_v15 = vpop.f32.mrf.mxu1  ;;  %v10591_v23 = vpop.f32.mrf.mxu0 }
 0x508   :  { %12183 = vst.msk [vmem:[%s22381_s7 + $0x4d8] sm:$0xff] %vm12027_vm2, %v10600_v57  ;;  %v7376_v37 = vadd.f32 %v19730_v1, %v15129_v15  ;;  %v10592_v62 = vadd.f32 %v19832_v60, %v10591_v23  ;;  %15638 = vmatprep.mubr.msk.bf16.mxu0 %vm5537_vm1, %v9025_v41  ;;  %v8643_v29 = vmax.f32 %v7365_v59, 0.0  ;;  %v22689_v57 = vld [vmem:[#allocation67_spill] sm:$0xff] }
 0x509   :  { %v7367_v47 = vpop.f32.mrf.mxu1  ;;  %v15544_v44 = vpop.f32.mrf.mxu0  ;;  %15639 = vmatmul.mubr.msk.bf16.gmra.mxu0 %vm5537_vm1, %v9026_v56 }
 0x50a   :  { %12181 = vst.msk [vmem:[%s22381_s7 + $0x4c8] sm:$0xff] %vm12027_vm2, %v10592_v62  ;;  %v7368_v51 = vadd.f32 %v19730_v1, %v7367_v47  ;;  %v10613_v13 = vadd.f32 %v19832_v60, %v15544_v44  ;;  %v8646_v43 = vmax.f32 %v7376_v37, 0.0  ;;  %v22690_v37 = vld [vmem:[#allocation70_spill] sm:$0xff] }
 0x50b   :  { %v15132_v24 = vpop.f32.mrf.mxu1  ;;  %15227 = vmatmul.mubr.msk.bf16.gmra.mxu1 %vm5537_vm1, %v22685_v50  ;;  %v10604_v34 = vpop.f32.mrf.mxu0 }
 0x50c   :  { %v8644_v8 = vmax.f32 %v7368_v51, 0.0  ;;  %12186 = vst.msk [vmem:[%s22381_s7 + $0x4f0] sm:$0xff] %vm12027_vm2, %v10613_v13  ;;  %v10605_v31 = vadd.f32 %v19832_v60, %v10604_v34  ;;  %15230 = vmatprep.mubr.msk.bf16.mxu1 %vm5537_vm1, %v22686_v42  ;;  %v9028_v19 = vpack.c.bf16 %v8646_v43, %v8645_v0  ;;  %v7389_v63 = vadd.f32 %v19730_v1, %v15132_v24 }
 0x50d   :  { %v7380_v4 = vpop.f32.mrf.mxu1  ;;  %v15545_v25 = vpop.f32.mrf.mxu0 }
 0x50e   :  { %v9027_v7 = vpack.c.bf16 %v8644_v8, %v8643_v29  ;;  %12184 = vst.msk [vmem:[%s22381_s7 + $0x4e0] sm:$0xff] %vm12027_vm2, %v10605_v31  ;;  %v10616_v38 = vadd.f32 %v19832_v60, %v15545_v25  ;;  %v7381_v49 = vadd.f32 %v19730_v1, %v7380_v4  ;;  %v8649_v16 = vmax.f32 %v7389_v63, 0.0 }
 0x50f   :  { %v15133_v58 = vpop.f32.mrf.mxu1  ;;  %v10607_v39 = vpop.f32.mrf.mxu0 }
 0x510   :  { %12187 = vst.msk [vmem:[%s22381_s7 + $0x4f8] sm:$0xff] %vm12027_vm2, %v10616_v38  ;;  %v7392_v36 = vadd.f32 %v19730_v1, %v15133_v58  ;;  %v10608_v17 = vadd.f32 %v19832_v60, %v10607_v39  ;;  %15642 = vmatprep.mubr.msk.bf16.mxu0 %vm5537_vm1, %v9027_v7  ;;  %v8647_v46 = vmax.f32 %v7381_v49, 0.0  ;;  %v22691_v38 = vld [vmem:[#allocation69_spill] sm:$0xff] }
 0x511   :  { %v7383_v55 = vpop.f32.mrf.mxu1  ;;  %v15548_v26 = vpop.f32.mrf.mxu0  ;;  %15643 = vmatmul.mubr.msk.bf16.gmra.mxu0 %vm5537_vm1, %v9028_v19 }
 0x512   :  { %12185 = vst.msk [vmem:[%s22381_s7 + $0x4e8] sm:$0xff] %vm12027_vm2, %v10608_v17  ;;  %v7384_v32 = vadd.f32 %v19730_v1, %v7383_v55  ;;  %v10629_v27 = vadd.f32 %v19832_v60, %v15548_v26  ;;  %v8650_v11 = vmax.f32 %v7392_v36, 0.0  ;;  %v22692_v36 = vld [vmem:[#allocation73_spill] sm:$0xff] }
 0x513   :  { %v15136_v21 = vpop.f32.mrf.mxu1  ;;  %15231 = vmatmul.mubr.msk.bf16.gmra.mxu1 %vm5537_vm1, %v22687_v12  ;;  %v10620_v30 = vpop.f32.mrf.mxu0 }
 0x514   :  { %v8648_v14 = vmax.f32 %v7384_v32, 0.0  ;;  %12190 = vst.msk [vmem:[%s22381_s7 + $0x510] sm:$0xff] %vm12027_vm2, %v10629_v27  ;;  %v10621_v5 = vadd.f32 %v19832_v60, %v10620_v30  ;;  %15234 = vmatprep.mubr.msk.bf16.mxu1 %vm5537_vm1, %v22688_v28  ;;  %v9030_v52 = vpack.c.bf16 %v8650_v11, %v8649_v16  ;;  %v7405_v6 = vadd.f32 %v19730_v1, %v15136_v21 }
 0x515   :  { %v7396_v3 = vpop.f32.mrf.mxu1  ;;  %v15549_v10 = vpop.f32.mrf.mxu0 }
 0x516   :  { %v9029_v18 = vpack.c.bf16 %v8648_v14, %v8647_v46  ;;  %12188 = vst.msk [vmem:[%s22381_s7 + $0x500] sm:$0xff] %vm12027_vm2, %v10621_v5  ;;  %v10632_v48 = vadd.f32 %v19832_v60, %v15549_v10  ;;  %v7397_v61 = vadd.f32 %v19730_v1, %v7396_v3  ;;  %v8653_v62 = vmax.f32 %v7405_v6, 0.0 }
 0x517   :  { %v15137_v45 = vpop.f32.mrf.mxu1  ;;  %v10623_v20 = vpop.f32.mrf.mxu0 }
 0x518   :  { %12191 = vst.msk [vmem:[%s22381_s7 + $0x518] sm:$0xff] %vm12027_vm2, %v10632_v48  ;;  %v7408_v35 = vadd.f32 %v19730_v1, %v15137_v45  ;;  %v10624_v9 = vadd.f32 %v19832_v60, %v10623_v20  ;;  %15646 = vmatprep.mubr.msk.bf16.mxu0 %vm5537_vm1, %v9029_v18  ;;  %v8651_v15 = vmax.f32 %v7397_v61, 0.0  ;;  %v22693_v48 = vld [vmem:[#allocation72_spill] sm:$0xff] }
 0x519   :  { %v7399_v22 = vpop.f32.mrf.mxu1  ;;  %v15552_v53 = vpop.f32.mrf.mxu0  ;;  %15647 = vmatmul.mubr.msk.bf16.gmra.mxu0 %vm5537_vm1, %v9030_v52 }
 0x51a   :  { %12189 = vst.msk [vmem:[%s22381_s7 + $0x508] sm:$0xff] %vm12027_vm2, %v10624_v9  ;;  %v7400_v2 = vadd.f32 %v19730_v1, %v7399_v22  ;;  %v10645_v54 = vadd.f32 %v19832_v60, %v15552_v53  ;;  %v8654_v40 = vmax.f32 %v7408_v35, 0.0  ;;  %v22694_v35 = vld [vmem:[#allocation77_spill] sm:$0xff] }
 0x51b   :  { %v15140_v41 = vpop.f32.mrf.mxu1  ;;  %15235 = vmatmul.mubr.msk.bf16.gmra.mxu1 %vm5537_vm1, %v22689_v57  ;;  %v10636_v56 = vpop.f32.mrf.mxu0 }
 0x51c   :  { %v8652_v23 = vmax.f32 %v7400_v2, 0.0  ;;  %12194 = vst.msk [vmem:[%s22381_s7 + $0x530] sm:$0xff] %vm12027_vm2, %v10645_v54  ;;  %v10637_v59 = vadd.f32 %v19832_v60, %v10636_v56  ;;  %15238 = vmatprep.mubr.msk.bf16.mxu1 %vm5537_vm1, %v22690_v37  ;;  %v9032_v13 = vpack.c.bf16 %v8654_v40, %v8653_v62  ;;  %v7421_v8 = vadd.f32 %v19730_v1, %v15140_v41 }
 0x51d   :  { %v7412_v33 = vpop.f32.mrf.mxu1  ;;  %v15553_v47 = vpop.f32.mrf.mxu0 }
 0x51e   :  { %v9031_v44 = vpack.c.bf16 %v8652_v23, %v8651_v15  ;;  %12192 = vst.msk [vmem:[%s22381_s7 + $0x520] sm:$0xff] %vm12027_vm2, %v10637_v59  ;;  %v10648_v51 = vadd.f32 %v19832_v60, %v15553_v47  ;;  %v7413_v50 = vadd.f32 %v19730_v1, %v7412_v33  ;;  %v8657_v17 = vmax.f32 %v7421_v8, 0.0 }
 0x51f   :  { %v15141_v43 = vpop.f32.mrf.mxu1  ;;  %v10639_v24 = vpop.f32.mrf.mxu0 }
 0x520   :  { %12195 = vst.msk [vmem:[%s22381_s7 + $0x538] sm:$0xff] %vm12027_vm2, %v10648_v51  ;;  %v7424_v34 = vadd.f32 %v19730_v1, %v15141_v43  ;;  %v10640_v29 = vadd.f32 %v19832_v60, %v10639_v24  ;;  %15650 = vmatprep.mubr.msk.bf16.mxu0 %vm5537_vm1, %v9031_v44  ;;  %v8655_v58 = vmax.f32 %v7413_v50, 0.0  ;;  %v22695_v51 = vld [vmem:[#allocation76_spill] sm:$0xff] }
 0x521   :  { %v7415_v31 = vpop.f32.mrf.mxu1  ;;  %v15556_v42 = vpop.f32.mrf.mxu0  ;;  %15651 = vmatmul.mubr.msk.bf16.gmra.mxu0 %vm5537_vm1, %v9032_v13 }
 0x522   :  { %12193 = vst.msk [vmem:[%s22381_s7 + $0x528] sm:$0xff] %vm12027_vm2, %v10640_v29  ;;  %v7416_v0 = vadd.f32 %v19730_v1, %v7415_v31  ;;  %v10661_v4 = vadd.f32 %v19832_v60, %v15556_v42  ;;  %v8658_v25 = vmax.f32 %v7424_v34, 0.0  ;;  %v22696_v34 = vld [vmem:[#allocation81_spill] sm:$0xff] }
 0x523   :  { %v15144_v7 = vpop.f32.mrf.mxu1  ;;  %15239 = vmatmul.mubr.msk.bf16.gmra.mxu1 %vm5537_vm1, %v22691_v38  ;;  %v10652_v19 = vpop.f32.mrf.mxu0 }
 0x524   :  { %v8656_v39 = vmax.f32 %v7416_v0, 0.0  ;;  %12198 = vst.msk [vmem:[%s22381_s7 + $0x550] sm:$0xff] %vm12027_vm2, %v10661_v4  ;;  %v10653_v49 = vadd.f32 %v19832_v60, %v10652_v19  ;;  %15242 = vmatprep.mubr.msk.bf16.mxu1 %vm5537_vm1, %v22692_v36  ;;  %v9034_v27 = vpack.c.bf16 %v8658_v25, %v8657_v17  ;;  %v7437_v14 = vadd.f32 %v19730_v1, %v15144_v7 }
 0x525   :  { %v7428_v63 = vpop.f32.mrf.mxu1  ;;  %v15557_v55 = vpop.f32.mrf.mxu0 }
 0x526   :  { %v9033_v26 = vpack.c.bf16 %v8656_v39, %v8655_v58  ;;  %12196 = vst.msk [vmem:[%s22381_s7 + $0x540] sm:$0xff] %vm12027_vm2, %v10653_v49  ;;  %v10664_v32 = vadd.f32 %v19832_v60, %v15557_v55  ;;  %v7429_v12 = vadd.f32 %v19730_v1, %v7428_v63  ;;  %v8661_v9 = vmax.f32 %v7437_v14, 0.0 }
 0x527   :  { %v15145_v11 = vpop.f32.mrf.mxu1  ;;  %v10655_v21 = vpop.f32.mrf.mxu0 }
 0x528   :  { %12199 = vst.msk [vmem:[%s22381_s7 + $0x558] sm:$0xff] %vm12027_vm2, %v10664_v32  ;;  %v7440_v30 = vadd.f32 %v19730_v1, %v15145_v11  ;;  %v10656_v46 = vadd.f32 %v19832_v60, %v10655_v21  ;;  %15654 = vmatprep.mubr.msk.bf16.mxu0 %vm5537_vm1, %v9033_v26  ;;  %v8659_v45 = vmax.f32 %v7429_v12, 0.0  ;;  %v22697_v32 = vld [vmem:[#allocation80_spill] sm:$0xff] }
 0x529   :  { %v7431_v5 = vpop.f32.mrf.mxu1  ;;  %v15560_v28 = vpop.f32.mrf.mxu0  ;;  %15655 = vmatmul.mubr.msk.bf16.gmra.mxu0 %vm5537_vm1, %v9034_v27 }
 0x52a   :  { %12197 = vst.msk [vmem:[%s22381_s7 + $0x548] sm:$0xff] %vm12027_vm2, %v10656_v46  ;;  %v7432_v16 = vadd.f32 %v19730_v1, %v7431_v5  ;;  %v10677_v3 = vadd.f32 %v19832_v60, %v15560_v28  ;;  %v8662_v10 = vmax.f32 %v7440_v30, 0.0  ;;  %v22698_v30 = vld [vmem:[#allocation85_spill] sm:$0xff] }
 0x52b   :  { %v15148_v18 = vpop.f32.mrf.mxu1  ;;  %15243 = vmatmul.mubr.msk.bf16.gmra.mxu1 %vm5537_vm1, %v22693_v48  ;;  %v10668_v52 = vpop.f32.mrf.mxu0 }
 0x52c   :  { %v8660_v20 = vmax.f32 %v7432_v16, 0.0  ;;  %12202 = vst.msk [vmem:[%s22381_s7 + $0x570] sm:$0xff] %vm12027_vm2, %v10677_v3  ;;  %v10669_v61 = vadd.f32 %v19832_v60, %v10668_v52  ;;  %15246 = vmatprep.mubr.msk.bf16.mxu1 %vm5537_vm1, %v22694_v35  ;;  %v9036_v54 = vpack.c.bf16 %v8662_v10, %v8661_v9  ;;  %v7453_v23 = vadd.f32 %v19730_v1, %v15148_v18 }
 0x52d   :  { %v7444_v6 = vpop.f32.mrf.mxu1  ;;  %v15561_v22 = vpop.f32.mrf.mxu0 }
 0x52e   :  { %v9035_v53 = vpack.c.bf16 %v8660_v20, %v8659_v45  ;;  %12200 = vst.msk [vmem:[%s22381_s7 + $0x560] sm:$0xff] %vm12027_vm2, %v10669_v61  ;;  %v10680_v2 = vadd.f32 %v19832_v60, %v15561_v22  ;;  %v7445_v57 = vadd.f32 %v19730_v1, %v7444_v6  ;;  %v8665_v29 = vmax.f32 %v7453_v23, 0.0  ;;  %v20247_v20 = vld [vmem:[#allocation7] ss:$0 sm:$0xff] }
 0x52f   :  { %v15149_v40 = vpop.f32.mrf.mxu1  ;;  %v10671_v41 = vpop.f32.mrf.mxu0 }
 0x530   :  { %12203 = vst.msk [vmem:[%s22381_s7 + $0x578] sm:$0xff] %vm12027_vm2, %v10680_v2  ;;  %v7456_v56 = vadd.f32 %v19730_v1, %v15149_v40  ;;  %v10672_v15 = vadd.f32 %v19832_v60, %v10671_v41  ;;  %15658 = vmatprep.mubr.msk.bf16.mxu0 %vm5537_vm1, %v9035_v53  ;;  %v8663_v43 = vmax.f32 %v7445_v57, 0.0  ;;  %v22699_v2 = vld [vmem:[#allocation84_spill] sm:$0xff] }
 0x531   :  { %v7447_v59 = vpop.f32.mrf.mxu1  ;;  %v15564_v37 = vpop.f32.mrf.mxu0  ;;  %15659 = vmatmul.mubr.msk.bf16.gmra.mxu0 %vm5537_vm1, %v9036_v54 }
 0x532   :  { %12201 = vst.msk [vmem:[%s22381_s7 + $0x568] sm:$0xff] %vm12027_vm2, %v10672_v15  ;;  %v7448_v62 = vadd.f32 %v19730_v1, %v7447_v59  ;;  %v10693_v33 = vadd.f32 %v19832_v60, %v15564_v37  ;;  %v8666_v47 = vmax.f32 %v7456_v56, 0.0  ;;  %v22700_v56 = vld [vmem:[#allocation89_spill] sm:$0xff] }
 0x533   :  { %v15152_v44 = vpop.f32.mrf.mxu1  ;;  %15247 = vmatmul.mubr.msk.bf16.gmra.mxu1 %vm5537_vm1, %v22695_v51  ;;  %v10684_v13 = vpop.f32.mrf.mxu0 }
 0x534   :  { %v8664_v24 = vmax.f32 %v7448_v62, 0.0  ;;  %12206 = vst.msk [vmem:[%s22381_s7 + $0x590] sm:$0xff] %vm12027_vm2, %v10693_v33  ;;  %v10685_v50 = vadd.f32 %v19832_v60, %v10684_v13  ;;  %15250 = vmatprep.mubr.msk.bf16.mxu1 %vm5537_vm1, %v22696_v34  ;;  %v9038_v4 = vpack.c.bf16 %v8666_v47, %v8665_v29  ;;  %v7469_v39 = vadd.f32 %v19730_v1, %v15152_v44 }
 0x535   :  { %v7460_v8 = vpop.f32.mrf.mxu1  ;;  %v15565_v31 = vpop.f32.mrf.mxu0 }
 0x536   :  { %v9037_v42 = vpack.c.bf16 %v8664_v24, %v8663_v43  ;;  %12204 = vst.msk [vmem:[%s22381_s7 + $0x580] sm:$0xff] %vm12027_vm2, %v10685_v50  ;;  %v10696_v0 = vadd.f32 %v19832_v60, %v15565_v31  ;;  %v7461_v38 = vadd.f32 %v19730_v1, %v7460_v8  ;;  %v8669_v46 = vmax.f32 %v7469_v39, 0.0 }
 0x537   :  { %v15153_v25 = vpop.f32.mrf.mxu1  ;;  %v10687_v7 = vpop.f32.mrf.mxu0 }
 0x538   :  { %12207 = vst.msk [vmem:[%s22381_s7 + $0x598] sm:$0xff] %vm12027_vm2, %v10696_v0  ;;  %v7472_v19 = vadd.f32 %v19730_v1, %v15153_v25  ;;  %v10688_v58 = vadd.f32 %v19832_v60, %v10687_v7  ;;  %15662 = vmatprep.mubr.msk.bf16.mxu0 %vm5537_vm1, %v9037_v42  ;;  %v8667_v11 = vmax.f32 %v7461_v38, 0.0  ;;  %v22701_v0 = vld [vmem:[#allocation88_spill] sm:$0xff] }
 0x539   :  { %v7463_v49 = vpop.f32.mrf.mxu1  ;;  %v15568_v36 = vpop.f32.mrf.mxu0  ;;  %15663 = vmatmul.mubr.msk.bf16.gmra.mxu0 %vm5537_vm1, %v9038_v4 }
 0x53a   :  { %12205 = vst.msk [vmem:[%s22381_s7 + $0x588] sm:$0xff] %vm12027_vm2, %v10688_v58  ;;  %v7464_v17 = vadd.f32 %v19730_v1, %v7463_v49  ;;  %v10709_v63 = vadd.f32 %v19832_v60, %v15568_v36  ;;  %v8670_v55 = vmax.f32 %v7472_v19, 0.0  ;;  %v22702_v19 = vld [vmem:[#allocation93_spill] sm:$0xff] }
 0x53b   :  { %v15156_v26 = vpop.f32.mrf.mxu1  ;;  %15251 = vmatmul.mubr.msk.bf16.gmra.mxu1 %vm5537_vm1, %v22697_v32  ;;  %v10700_v27 = vpop.f32.mrf.mxu0 }
 0x53c   :  { %v8668_v21 = vmax.f32 %v7464_v17, 0.0  ;;  %12210 = vst.msk [vmem:[%s22381_s7 + $0x5b0] sm:$0xff] %vm12027_vm2, %v10709_v63  ;;  %v10701_v12 = vadd.f32 %v19832_v60, %v10700_v27  ;;  %15254 = vmatprep.mubr.msk.bf16.mxu1 %vm5537_vm1, %v22698_v30  ;;  %v9040_v3 = vpack.c.bf16 %v8670_v55, %v8669_v46  ;;  %v7485_v61 = vadd.f32 %v20247_v20, %v15156_v26 }
 0x53d   :  { %v7476_v14 = vpop.f32.mrf.mxu1  ;;  %v15569_v5 = vpop.f32.mrf.mxu0 }
 0x53e   :  { %v9039_v28 = vpack.c.bf16 %v8668_v21, %v8667_v11  ;;  %12208 = vst.msk [vmem:[%s22381_s7 + $0x5a0] sm:$0xff] %vm12027_vm2, %v10701_v12  ;;  %v10712_v16 = vadd.f32 %v19832_v60, %v15569_v5  ;;  %v7477_v48 = vadd.f32 %v19730_v1, %v7476_v14  ;;  %v8673_v15 = vmax.f32 %v7485_v61, 0.0 }
 0x53f   :  { %v15157_v10 = vpop.f32.mrf.mxu1  ;;  %v10703_v18 = vpop.f32.mrf.mxu0 }
 0x540   :  { %12211 = vst.msk [vmem:[%s22381_s7 + $0x5b8] sm:$0xff] %vm12027_vm2, %v10712_v16  ;;  %v7488_v52 = vadd.f32 %v19730_v1, %v15157_v10  ;;  %v10704_v45 = vadd.f32 %v19832_v60, %v10703_v18  ;;  %15666 = vmatprep.mubr.msk.bf16.mxu0 %vm5537_vm1, %v9039_v28  ;;  %v8671_v40 = vmax.f32 %v7477_v48, 0.0  ;;  %v22703_v16 = vld [vmem:[#allocation92_spill] sm:$0xff] }
 0x541   :  { %v7479_v35 = vpop.f32.mrf.mxu1  ;;  %v15572_v9 = vpop.f32.mrf.mxu0  ;;  %15667 = vmatmul.mubr.msk.bf16.gmra.mxu0 %vm5537_vm1, %v9040_v3 }
 0x542   :  { %12209 = vst.msk [vmem:[%s22381_s7 + $0x5a8] sm:$0xff] %vm12027_vm2, %v10704_v45  ;;  %v7480_v6 = vadd.f32 %v20247_v20, %v7479_v35  ;;  %v10725_v1 = vadd.f32 %v19832_v60, %v15572_v9  ;;  %v8674_v22 = vmax.f32 %v7488_v52, 0.0  ;;  %v22704_v52 = vld [vmem:[#allocation97_spill] sm:$0xff] }
 0x543   :  { %v15160_v53 = vpop.f32.mrf.mxu1  ;;  %15255 = vmatmul.mubr.msk.bf16.gmra.mxu1 %vm5537_vm1, %v22699_v2  ;;  %v10716_v54 = vpop.f32.mrf.mxu0 }
 0x544   :  { %v8672_v41 = vmax.f32 %v7480_v6, 0.0  ;;  %12214 = vst.msk [vmem:[%s22381_s7 + $0x5d0] sm:$0xff] %vm12027_vm2, %v10725_v1  ;;  %v10717_v57 = vadd.f32 %v19832_v60, %v10716_v54  ;;  %15258 = vmatprep.mubr.msk.bf16.mxu1 %vm5537_vm1, %v22700_v56  ;;  %v9042_v33 = vpack.c.bf16 %v8674_v22, %v8673_v15  ;;  %v7501_v24 = vadd.f32 %v20247_v20, %v15160_v53 }
 0x545   :  { %v7492_v23 = vpop.f32.mrf.mxu1  ;;  %v15573_v59 = vpop.f32.mrf.mxu0 }
 0x546   :  { %v9041_v37 = vpack.c.bf16 %v8672_v41, %v8671_v40  ;;  %12212 = vst.msk [vmem:[%s22381_s7 + $0x5c0] sm:$0xff] %vm12027_vm2, %v10717_v57  ;;  %v10728_v62 = vadd.f32 %v19832_v60, %v15573_v59  ;;  %v7493_v51 = vadd.f32 %v20247_v20, %v7492_v23  ;;  %v8677_v58 = vmax.f32 %v7501_v24, 0.0 }
 0x547   :  { %v15161_v47 = vpop.f32.mrf.mxu1  ;;  %v10719_v44 = vpop.f32.mrf.mxu0 }
 0x548   :  { %12215 = vst.msk [vmem:[%s22381_s7 + $0x5d8] sm:$0xff] %vm12027_vm2, %v10728_v62  ;;  %v7504_v13 = vadd.f32 %v20247_v20, %v15161_v47  ;;  %v10720_v43 = vadd.f32 %v19832_v60, %v10719_v44  ;;  %15670 = vmatprep.mubr.msk.bf16.mxu0 %vm5537_vm1, %v9041_v37  ;;  %v8675_v25 = vmax.f32 %v7493_v51, 0.0  ;;  %v22705_v62 = vld [vmem:[#allocation96_spill] sm:$0xff] }
 0x549   :  { %v7495_v50 = vpop.f32.mrf.mxu1  ;;  %v15576_v34 = vpop.f32.mrf.mxu0  ;;  %15671 = vmatmul.mubr.msk.bf16.gmra.mxu0 %vm5537_vm1, %v9042_v33  ;;  %v20353_v51 = vld [vmem:[#allocation9] ss:$0 sm:$0xff] }
 0x54a   :  { %12213 = vst.msk [vmem:[%s22381_s7 + $0x5c8] sm:$0xff] %vm12027_vm2, %v10720_v43  ;;  %v7496_v29 = vadd.f32 %v20247_v20, %v7495_v50  ;;  %v10741_v8 = vadd.f32 %v19832_v60, %v15576_v34  ;;  %v8678_v31 = vmax.f32 %v7504_v13, 0.0  ;;  %v22706_v43 = vld [vmem:[#allocation101_spill] sm:$0xff] }
 0x54b   :  { %v15164_v42 = vpop.f32.mrf.mxu1  ;;  %15259 = vmatmul.mubr.msk.bf16.gmra.mxu1 %vm5537_vm1, %v22701_v0  ;;  %v10732_v4 = vpop.f32.mrf.mxu0 }
 0x54c   :  { %v8676_v7 = vmax.f32 %v7496_v29, 0.0  ;;  %12218 = vst.msk [vmem:[%s22381_s7 + $0x5f0] sm:$0xff] %vm12027_vm2, %v10741_v8  ;;  %v10733_v38 = vadd.f32 %v19832_v60, %v10732_v4  ;;  %15262 = vmatprep.mubr.msk.bf16.mxu1 %vm5537_vm1, %v22702_v19  ;;  %v9044_v63 = vpack.c.bf16 %v8678_v31, %v8677_v58  ;;  %v7517_v21 = vadd.f32 %v20247_v20, %v15164_v42 }
 0x54d   :  { %v7508_v39 = vpop.f32.mrf.mxu1  ;;  %v15577_v49 = vpop.f32.mrf.mxu0 }
 0x54e   :  { %v9043_v36 = vpack.c.bf16 %v8676_v7, %v8675_v25  ;;  %12216 = vst.msk [vmem:[%s22381_s7 + $0x5e0] sm:$0xff] %vm12027_vm2, %v10733_v38  ;;  %v10744_v17 = vadd.f32 %v19832_v60, %v15577_v49  ;;  %v7509_v32 = vadd.f32 %v20247_v20, %v7508_v39  ;;  %v8681_v45 = vmax.f32 %v7517_v21, 0.0 }
 0x54f   :  { %v15165_v55 = vpop.f32.mrf.mxu1  ;;  %v10735_v26 = vpop.f32.mrf.mxu0 }
 0x550   :  { %12219 = vst.msk [vmem:[%s22381_s7 + $0x5f8] sm:$0xff] %vm12027_vm2, %v10744_v17  ;;  %v7520_v27 = vadd.f32 %v20247_v20, %v15165_v55  ;;  %v10736_v11 = vadd.f32 %v19832_v60, %v10735_v26  ;;  %15674 = vmatprep.mubr.msk.bf16.mxu0 %vm5537_vm1, %v9043_v36  ;;  %v8679_v10 = vmax.f32 %v7509_v32, 0.0  ;;  %v22707_v17 = vld [vmem:[#allocation100_spill] sm:$0xff] }
 0x551   :  { %v7511_v12 = vpop.f32.mrf.mxu1  ;;  %v15580_v30 = vpop.f32.mrf.mxu0  ;;  %15675 = vmatmul.mubr.msk.bf16.gmra.mxu0 %vm5537_vm1, %v9044_v63 }
 0x552   :  { %12217 = vst.msk [vmem:[%s22381_s7 + $0x5e8] sm:$0xff] %vm12027_vm2, %v10736_v11  ;;  %v7512_v46 = vadd.f32 %v20247_v20, %v7511_v12  ;;  %v10757_v14 = vadd.f32 %v19832_v60, %v15580_v30  ;;  %v8682_v5 = vmax.f32 %v7520_v27, 0.0  ;;  %v22708_v27 = vld [vmem:[#allocation105_spill] sm:$0xff] }
 0x553   :  { %v15168_v28 = vpop.f32.mrf.mxu1  ;;  %15263 = vmatmul.mubr.msk.bf16.gmra.mxu1 %vm5537_vm1, %v22703_v16  ;;  %v10748_v3 = vpop.f32.mrf.mxu0 }
 0x554   :  { %v8680_v18 = vmax.f32 %v7512_v46, 0.0  ;;  %12222 = vst.msk [vmem:[%s22381_s7 + $0x610] sm:$0xff] %vm12027_vm2, %v10757_v14  ;;  %v10749_v48 = vadd.f32 %v19832_v60, %v10748_v3  ;;  %15266 = vmatprep.mubr.msk.bf16.mxu1 %vm5537_vm1, %v22704_v52  ;;  %v9046_v1 = vpack.c.bf16 %v8682_v5, %v8681_v45  ;;  %v7533_v41 = vadd.f32 %v20247_v20, %v15168_v28 }
 0x555   :  { %v7524_v61 = vpop.f32.mrf.mxu1  ;;  %v15581_v35 = vpop.f32.mrf.mxu0 }
 0x556   :  { %v9045_v9 = vpack.c.bf16 %v8680_v18, %v8679_v10  ;;  %12220 = vst.msk [vmem:[%s22381_s7 + $0x600] sm:$0xff] %vm12027_vm2, %v10749_v48  ;;  %v10760_v6 = vadd.f32 %v19832_v60, %v15581_v35  ;;  %v7525_v2 = vadd.f32 %v20247_v20, %v7524_v61 }
 0x557   :  { %v15169_v22 = vpop.f32.mrf.mxu1  ;;  %v10751_v53 = vpop.f32.mrf.mxu0 }
 0x558   :  { %12223 = vst.msk [vmem:[%s22381_s7 + $0x618] sm:$0xff] %vm12027_vm2, %v10760_v6  ;;  %v7536_v54 = vadd.f32 %v20247_v20, %v15169_v22  ;;  %v10752_v40 = vadd.f32 %v19832_v60, %v10751_v53  ;;  %15678 = vmatprep.mubr.msk.bf16.mxu0 %vm5537_vm1, %v9045_v9  ;;  %v8683_v47 = vmax.f32 %v7525_v2, 0.0  ;;  %v22709_v6 = vld [vmem:[#allocation104_spill] sm:$0xff] }
 0x559   :  { %v7527_v57 = vpop.f32.mrf.mxu1  ;;  %v15584_v56 = vpop.f32.mrf.mxu0  ;;  %15679 = vmatmul.mubr.msk.bf16.gmra.mxu0 %vm5537_vm1, %v9046_v1 }
 0x55a   :  { %12221 = vst.msk [vmem:[%s22381_s7 + $0x608] sm:$0xff] %vm12027_vm2, %v10752_v40  ;;  %v7528_v15 = vadd.f32 %v20247_v20, %v7527_v57  ;;  %v10773_v23 = vadd.f32 %v19832_v60, %v15584_v56  ;;  %v8686_v59 = vmax.f32 %v7536_v54, 0.0  ;;  %v8685_v60 = vmax.f32 %v7533_v41, 0.0  ;;  %v22710_v54 = vld [vmem:[#allocation108_spill] sm:$0xff] }
 0x55b   :  { %v15172_v37 = vpop.f32.mrf.mxu1  ;;  %15267 = vmatmul.mubr.msk.bf16.gmra.mxu1 %vm5537_vm1, %v22705_v62  ;;  %v10764_v33 = vpop.f32.mrf.mxu0 }
 0x55c   :  { %v8684_v44 = vmax.f32 %v7528_v15, 0.0  ;;  %12226 = vst.msk [vmem:[%s22381_s7 + $0x630] sm:$0xff] %vm12027_vm2, %v10773_v23  ;;  %v10765_v13 = vadd.f32 %v20353_v51, %v10764_v33  ;;  %15270 = vmatprep.mubr.msk.bf16.mxu1 %vm5537_vm1, %v22706_v43  ;;  %v9048_v8 = vpack.c.bf16 %v8686_v59, %v8685_v60  ;;  %v7549_v7 = vadd.f32 %v20247_v20, %v15172_v37 }
 0x55d   :  { %v7540_v24 = vpop.f32.mrf.mxu1  ;;  %v15585_v50 = vpop.f32.mrf.mxu0 }
 0x55e   :  { %v9047_v34 = vpack.c.bf16 %v8684_v44, %v8683_v47  ;;  %12224 = vst.msk [vmem:[%s22381_s7 + $0x620] sm:$0xff] %vm12027_vm2, %v10765_v13  ;;  %v10776_v29 = vadd.f32 %v20353_v51, %v15585_v50  ;;  %v7541_v0 = vadd.f32 %v20247_v20, %v7540_v24  ;;  %v8689_v11 = vmax.f32 %v7549_v7, 0.0 }
 0x55f   :  { %v15173_v31 = vpop.f32.mrf.mxu1  ;;  %v10767_v42 = vpop.f32.mrf.mxu0 }
 0x560   :  { %12227 = vst.msk [vmem:[%s22381_s7 + $0x638] sm:$0xff] %vm12027_vm2, %v10776_v29  ;;  %v7552_v4 = vadd.f32 %v20247_v20, %v15173_v31  ;;  %v10768_v25 = vadd.f32 %v20353_v51, %v10767_v42  ;;  %15682 = vmatprep.mubr.msk.bf16.mxu0 %vm5537_vm1, %v9047_v34  ;;  %v8687_v55 = vmax.f32 %v7541_v0, 0.0  ;;  %v22711_v29 = vld [vmem:[#allocation107_spill] sm:$0xff] }
 0x561   :  { %v7543_v38 = vpop.f32.mrf.mxu1  ;;  %v15588_v19 = vpop.f32.mrf.mxu0  ;;  %15683 = vmatmul.mubr.msk.bf16.gmra.mxu0 %vm5537_vm1, %v9048_v8 }
 0x562   :  { %12225 = vst.msk [vmem:[%s22381_s7 + $0x628] sm:$0xff] %vm12027_vm2, %v10768_v25  ;;  %v7544_v58 = vadd.f32 %v20247_v20, %v7543_v38  ;;  %v10789_v39 = vadd.f32 %v20353_v51, %v15588_v19  ;;  %v8690_v49 = vmax.f32 %v7552_v4, 0.0  ;;  %v22712_v4 = vld [vmem:[#allocation110_spill] sm:$0xff] }
 0x563   :  { %v15176_v36 = vpop.f32.mrf.mxu1  ;;  %15271 = vmatmul.mubr.msk.bf16.gmra.mxu1 %vm5537_vm1, %v22707_v17  ;;  %v10780_v63 = vpop.f32.mrf.mxu0 }
 0x564   :  { %v8688_v26 = vmax.f32 %v7544_v58, 0.0  ;;  %12230 = vst.msk [vmem:[%s22381_s7 + $0x650] sm:$0xff] %vm12027_vm2, %v10789_v39  ;;  %v10781_v32 = vadd.f32 %v20353_v51, %v10780_v63  ;;  %15274 = vmatprep.mubr.msk.bf16.mxu1 %vm5537_vm1, %v22708_v27  ;;  %v9050_v14 = vpack.c.bf16 %v8690_v49, %v8689_v11  ;;  %v7565_v18 = vadd.f32 %v20247_v20, %v15176_v36 }
 0x565   :  { %v7556_v21 = vpop.f32.mrf.mxu1  ;;  %v15589_v12 = vpop.f32.mrf.mxu0 }
 0x566   :  { %v9049_v30 = vpack.c.bf16 %v8688_v26, %v8687_v55  ;;  %12228 = vst.msk [vmem:[%s22381_s7 + $0x640] sm:$0xff] %vm12027_vm2, %v10781_v32  ;;  %v10792_v46 = vadd.f32 %v20353_v51, %v15589_v12  ;;  %v7557_v16 = vadd.f32 %v20247_v20, %v7556_v21  ;;  %v8693_v40 = vmax.f32 %v7565_v18, 0.0 }
 0x567   :  { %v15177_v5 = vpop.f32.mrf.mxu1  ;;  %v10783_v28 = vpop.f32.mrf.mxu0 }
 0x568   :  { %12231 = vst.msk [vmem:[%s22381_s7 + $0x658] sm:$0xff] %vm12027_vm2, %v10792_v46  ;;  %v7568_v3 = vadd.f32 %v20247_v20, %v15177_v5  ;;  %v10784_v10 = vadd.f32 %v20353_v51, %v10783_v28  ;;  %15686 = vmatprep.mubr.msk.bf16.mxu0 %vm5537_vm1, %v9049_v30  ;;  %v8691_v22 = vmax.f32 %v7557_v16, 0.0  ;;  %v22713_v46 = vld [vmem:[#allocation109_spill] sm:$0xff] }
 0x569   :  { %v7559_v48 = vpop.f32.mrf.mxu1  ;;  %v15592_v52 = vpop.f32.mrf.mxu0  ;;  %15687 = vmatmul.mubr.msk.bf16.gmra.mxu0 %vm5537_vm1, %v9050_v14 }
 0x56a   :  { %12229 = vst.msk [vmem:[%s22381_s7 + $0x648] sm:$0xff] %vm12027_vm2, %v10784_v10  ;;  %v7560_v45 = vadd.f32 %v20247_v20, %v7559_v48  ;;  %v10805_v61 = vadd.f32 %v20353_v51, %v15592_v52  ;;  %v8694_v35 = vmax.f32 %v7568_v3, 0.0  ;;  %v22714_v3 = vld [vmem:[#allocation112_spill] sm:$0xff] }
 0x56b   :  { %v15180_v9 = vpop.f32.mrf.mxu1  ;;  %15275 = vmatmul.mubr.msk.bf16.gmra.mxu1 %vm5537_vm1, %v22709_v6  ;;  %v10796_v1 = vpop.f32.mrf.mxu0 }
 0x56c   :  { %v8692_v53 = vmax.f32 %v7560_v45, 0.0  ;;  %12234 = vst.msk [vmem:[%s22381_s7 + $0x670] sm:$0xff] %vm12027_vm2, %v10805_v61  ;;  %v10797_v2 = vadd.f32 %v20353_v51, %v10796_v1  ;;  %15278 = vmatprep.mubr.msk.bf16.mxu1 %vm5537_vm1, %v22710_v54  ;;  %v9052_v23 = vpack.c.bf16 %v8694_v35, %v8693_v40  ;;  %v7581_v44 = vadd.f32 %v20247_v20, %v15180_v9 }
 0x56d   :  { %v7572_v41 = vpop.f32.mrf.mxu1  ;;  %v15593_v57 = vpop.f32.mrf.mxu0 }
 0x56e   :  { %v9051_v56 = vpack.c.bf16 %v8692_v53, %v8691_v22  ;;  %12232 = vst.msk [vmem:[%s22381_s7 + $0x660] sm:$0xff] %vm12027_vm2, %v10797_v2  ;;  %v10808_v15 = vadd.f32 %v20353_v51, %v15593_v57  ;;  %v7573_v62 = vadd.f32 %v20247_v20, %v7572_v41  ;;  %v8697_v25 = vmax.f32 %v7581_v44, 0.0 }
 0x56f   :  { %v15181_v59 = vpop.f32.mrf.mxu1  ;;  %v10799_v37 = vpop.f32.mrf.mxu0 }
 0x570   :  { %12235 = vst.msk [vmem:[%s22381_s7 + $0x678] sm:$0xff] %vm12027_vm2, %v10808_v15  ;;  %v7584_v33 = vadd.f32 %v20247_v20, %v15181_v59  ;;  %v10800_v47 = vadd.f32 %v20353_v51, %v10799_v37  ;;  %15690 = vmatprep.mubr.msk.bf16.mxu0 %vm5537_vm1, %v9051_v56  ;;  %v8695_v31 = vmax.f32 %v7573_v62, 0.0  ;;  %v22715_v15 = vld [vmem:[#allocation111_spill] sm:$0xff] }
 0x571   :  { %v7575_v13 = vpop.f32.mrf.mxu1  ;;  %v15596_v43 = vpop.f32.mrf.mxu0  ;;  %15691 = vmatmul.mubr.msk.bf16.gmra.mxu0 %vm5537_vm1, %v9052_v23 }
 0x572   :  { %12233 = vst.msk [vmem:[%s22381_s7 + $0x668] sm:$0xff] %vm12027_vm2, %v10800_v47  ;;  %v7576_v60 = vadd.f32 %v20247_v20, %v7575_v13  ;;  %v10821_v24 = vadd.f32 %v20353_v51, %v15596_v43  ;;  %v8698_v50 = vmax.f32 %v7584_v33, 0.0  ;;  %v22716_v33 = vld [vmem:[#allocation114_spill] sm:$0xff] }
 0x573   :  { %v15184_v34 = vpop.f32.mrf.mxu1  ;;  %15279 = vmatmul.mubr.msk.bf16.gmra.mxu1 %vm5537_vm1, %v22711_v29  ;;  %v10812_v8 = vpop.f32.mrf.mxu0 }
 0x574   :  { %v8696_v42 = vmax.f32 %v7576_v60, 0.0  ;;  %12238 = vst.msk [vmem:[%s22381_s7 + $0x690] sm:$0xff] %vm12027_vm2, %v10821_v24  ;;  %v10813_v0 = vadd.f32 %v20353_v51, %v10812_v8  ;;  %15282 = vmatprep.mubr.msk.bf16.mxu1 %vm5537_vm1, %v22712_v4  ;;  %v9054_v39 = vpack.c.bf16 %v8698_v50, %v8697_v25  ;;  %v7597_v26 = vadd.f32 %v20247_v20, %v15184_v34 }
 0x575   :  { %v7588_v7 = vpop.f32.mrf.mxu1  ;;  %v15597_v38 = vpop.f32.mrf.mxu0 }
 0x576   :  { %v9053_v19 = vpack.c.bf16 %v8696_v42, %v8695_v31  ;;  %12236 = vst.msk [vmem:[%s22381_s7 + $0x680] sm:$0xff] %vm12027_vm2, %v10813_v0  ;;  %v10824_v58 = vadd.f32 %v20353_v51, %v15597_v38  ;;  %v7589_v17 = vadd.f32 %v20247_v20, %v7588_v7  ;;  %v8701_v10 = vmax.f32 %v7597_v26, 0.0 }
 0x577   :  { %v15185_v49 = vpop.f32.mrf.mxu1  ;;  %v10815_v36 = vpop.f32.mrf.mxu0 }
 0x578   :  { %12239 = vst.msk [vmem:[%s22381_s7 + $0x698] sm:$0xff] %vm12027_vm2, %v10824_v58  ;;  %v7600_v63 = vadd.f32 %v20247_v20, %v15185_v49  ;;  %v10816_v55 = vadd.f32 %v20353_v51, %v10815_v36  ;;  %15694 = vmatprep.mubr.msk.bf16.mxu0 %vm5537_vm1, %v9053_v19  ;;  %v8699_v5 = vmax.f32 %v7589_v17, 0.0  ;;  %v22717_v58 = vld [vmem:[#allocation113_spill] sm:$0xff] }
 0x579   :  { %v7591_v32 = vpop.f32.mrf.mxu1  ;;  %v15600_v27 = vpop.f32.mrf.mxu0  ;;  %15695 = vmatmul.mubr.msk.bf16.gmra.mxu0 %vm5537_vm1, %v9054_v39 }
 0x57a   :  { %12237 = vst.msk [vmem:[%s22381_s7 + $0x688] sm:$0xff] %vm12027_vm2, %v10816_v55  ;;  %v7592_v11 = vadd.f32 %v20247_v20, %v7591_v32  ;;  %v10837_v21 = vadd.f32 %v20353_v51, %v15600_v27  ;;  %v8702_v12 = vmax.f32 %v7600_v63, 0.0  ;;  %v22718_v63 = vld [vmem:[#allocation116_spill] sm:$0xff] }
 0x57b   :  { %v15188_v30 = vpop.f32.mrf.mxu1  ;;  %15283 = vmatmul.mubr.msk.bf16.gmra.mxu1 %vm5537_vm1, %v22713_v46  ;;  %v10828_v14 = vpop.f32.mrf.mxu0 }
 0x57c   :  { %v8700_v28 = vmax.f32 %v7592_v11, 0.0  ;;  %12242 = vst.msk [vmem:[%s22381_s7 + $0x6b0] sm:$0xff] %vm12027_vm2, %v10837_v21  ;;  %v10829_v16 = vadd.f32 %v20353_v51, %v10828_v14  ;;  %15286 = vmatprep.mubr.msk.bf16.mxu1 %vm5537_vm1, %v22714_v3  ;;  %v9056_v61 = vpack.c.bf16 %v8702_v12, %v8701_v10  ;;  %v7613_v53 = vadd.f32 %v20247_v20, %v15188_v30 }
 0x57d   :  { %v7604_v18 = vpop.f32.mrf.mxu1  ;;  %v15601_v48 = vpop.f32.mrf.mxu0 }
 0x57e   :  { %v9055_v52 = vpack.c.bf16 %v8700_v28, %v8699_v5  ;;  %12240 = vst.msk [vmem:[%s22381_s7 + $0x6a0] sm:$0xff] %vm12027_vm2, %v10829_v16  ;;  %v10840_v45 = vadd.f32 %v20353_v51, %v15601_v48  ;;  %v7605_v6 = vadd.f32 %v20247_v20, %v7604_v18  ;;  %v8705_v47 = vmax.f32 %v7613_v53, 0.0 }
 0x57f   :  { %v15189_v35 = vpop.f32.mrf.mxu1  ;;  %v10831_v9 = vpop.f32.mrf.mxu0 }
 0x580   :  { %12243 = vst.msk [vmem:[%s22381_s7 + $0x6b8] sm:$0xff] %vm12027_vm2, %v10840_v45  ;;  %v7616_v1 = vadd.f32 %v20247_v20, %v15189_v35  ;;  %v10832_v22 = vadd.f32 %v20353_v51, %v10831_v9  ;;  %15698 = vmatprep.mubr.msk.bf16.mxu0 %vm5537_vm1, %v9055_v52  ;;  %v8703_v59 = vmax.f32 %v7605_v6, 0.0  ;;  %v22719_v45 = vld [vmem:[#allocation115_spill] sm:$0xff] }
 0x581   :  { %v7607_v2 = vpop.f32.mrf.mxu1  ;;  %v15604_v54 = vpop.f32.mrf.mxu0  ;;  %15699 = vmatmul.mubr.msk.bf16.gmra.mxu0 %vm5537_vm1, %v9056_v61 }
 0x582   :  { %12241 = vst.msk [vmem:[%s22381_s7 + $0x6a8] sm:$0xff] %vm12027_vm2, %v10832_v22  ;;  %v7608_v40 = vadd.f32 %v20247_v20, %v7607_v2  ;;  %v10853_v41 = vadd.f32 %v20353_v51, %v15604_v54  ;;  %v8706_v57 = vmax.f32 %v7616_v1, 0.0  ;;  %v22720_v1 = vld [vmem:[#allocation118_spill] sm:$0xff] }
 0x583   :  { %v15192_v56 = vpop.f32.mrf.mxu1  ;;  %15287 = vmatmul.mubr.msk.bf16.gmra.mxu1 %vm5537_vm1, %v22715_v15  ;;  %v10844_v23 = vpop.f32.mrf.mxu0 }
 0x584   :  { %v8704_v37 = vmax.f32 %v7608_v40, 0.0  ;;  %12246 = vst.msk [vmem:[%s22381_s7 + $0x6d0] sm:$0xff] %vm12027_vm2, %v10853_v41  ;;  %v10845_v62 = vadd.f32 %v20353_v51, %v10844_v23  ;;  %15290 = vmatprep.mubr.msk.bf16.mxu1 %vm5537_vm1, %v22716_v33  ;;  %v9058_v24 = vpack.c.bf16 %v8706_v57, %v8705_v47  ;;  %v7629_v42 = vadd.f32 %v20247_v20, %v15192_v56 }
 0x585   :  { %v7620_v44 = vpop.f32.mrf.mxu1  ;;  %v15605_v13 = vpop.f32.mrf.mxu0 }
 0x586   :  { %v9057_v43 = vpack.c.bf16 %v8704_v37, %v8703_v59  ;;  %12244 = vst.msk [vmem:[%s22381_s7 + $0x6c0] sm:$0xff] %vm12027_vm2, %v10845_v62  ;;  %v10856_v60 = vadd.f32 %v20353_v51, %v15605_v13  ;;  %v7621_v29 = vadd.f32 %v20247_v20, %v7620_v44  ;;  %v8709_v55 = vmax.f32 %v7629_v42, 0.0 }
 0x587   :  { %v15193_v50 = vpop.f32.mrf.mxu1  ;;  %v10847_v34 = vpop.f32.mrf.mxu0 }
 0x588   :  { %12247 = vst.msk [vmem:[%s22381_s7 + $0x6d8] sm:$0xff] %vm12027_vm2, %v10856_v60  ;;  %v7632_v8 = vadd.f32 %v20247_v20, %v15193_v50  ;;  %v10848_v31 = vadd.f32 %v20353_v51, %v10847_v34  ;;  %15702 = vmatprep.mubr.msk.bf16.mxu0 %vm5537_vm1, %v9057_v43  ;;  %v8707_v49 = vmax.f32 %v7621_v29, 0.0  ;;  %v22721_v60 = vld [vmem:[#allocation117_spill] sm:$0xff] }
 0x589   :  { %v7623_v0 = vpop.f32.mrf.mxu1  ;;  %v15608_v4 = vpop.f32.mrf.mxu0  ;;  %15703 = vmatmul.mubr.msk.bf16.gmra.mxu0 %vm5537_vm1, %v9058_v24 }
 0x58a   :  { %12245 = vst.msk [vmem:[%s22381_s7 + $0x6c8] sm:$0xff] %vm12027_vm2, %v10848_v31  ;;  %v7624_v25 = vadd.f32 %v20247_v20, %v7623_v0  ;;  %v10869_v7 = vadd.f32 %v20353_v51, %v15608_v4  ;;  %v8710_v38 = vmax.f32 %v7632_v8, 0.0  ;;  %v22722_v8 = vld [vmem:[#allocation120_spill] sm:$0xff] }
 0x58b   :  { %v15196_v19 = vpop.f32.mrf.mxu1  ;;  %15291 = vmatmul.mubr.msk.bf16.gmra.mxu1 %vm5537_vm1, %v22717_v58  ;;  %v10860_v39 = vpop.f32.mrf.mxu0 }
 0x58c   :  { %v8708_v36 = vmax.f32 %v7624_v25, 0.0  ;;  %12250 = vst.msk [vmem:[%s22381_s7 + $0x6f0] sm:$0xff] %vm12027_vm2, %v10869_v7  ;;  %v10861_v17 = vadd.f32 %v20353_v51, %v10860_v39  ;;  %15294 = vmatprep.mubr.msk.bf16.mxu1 %vm5537_vm1, %v22718_v63  ;;  %v9060_v21 = vpack.c.bf16 %v8710_v38, %v8709_v55  ;;  %v7645_v28 = vadd.f32 %v20247_v20, %v15196_v19 }
 0x58d   :  { %v7636_v26 = vpop.f32.mrf.mxu1  ;;  %v15609_v32 = vpop.f32.mrf.mxu0 }
 0x58e   :  { %v9059_v27 = vpack.c.bf16 %v8708_v36, %v8707_v49  ;;  %12248 = vst.msk [vmem:[%s22381_s7 + $0x6e0] sm:$0xff] %vm12027_vm2, %v10861_v17  ;;  %v10872_v11 = vadd.f32 %v20353_v51, %v15609_v32  ;;  %v7637_v46 = vadd.f32 %v20247_v20, %v7636_v26  ;;  %v8713_v22 = vmax.f32 %v7645_v28, 0.0 }
 0x58f   :  { %v15197_v12 = vpop.f32.mrf.mxu1  ;;  %v10863_v30 = vpop.f32.mrf.mxu0 }
 0x590   :  { %12251 = vst.msk [vmem:[%s22381_s7 + $0x6f8] sm:$0xff] %vm12027_vm2, %v10872_v11  ;;  %v7648_v14 = vadd.f32 %v20247_v20, %v15197_v12  ;;  %v10864_v5 = vadd.f32 %v20353_v51, %v10863_v30  ;;  %15706 = vmatprep.mubr.msk.bf16.mxu0 %vm5537_vm1, %v9059_v27  ;;  %v8711_v35 = vmax.f32 %v7637_v46, 0.0  ;;  %v22723_v11 = vld [vmem:[#allocation119_spill] sm:$0xff] }
 0x591   :  { %v7639_v16 = vpop.f32.mrf.mxu1  ;;  %v15612_v3 = vpop.f32.mrf.mxu0  ;;  %15707 = vmatmul.mubr.msk.bf16.gmra.mxu0 %vm5537_vm1, %v9060_v21 }
 0x592   :  { %12249 = vst.msk [vmem:[%s22381_s7 + $0x6e8] sm:$0xff] %vm12027_vm2, %v10864_v5  ;;  %v7640_v10 = vadd.f32 %v20247_v20, %v7639_v16  ;;  %v10885_v18 = vadd.f32 %v20353_v51, %v15612_v3  ;;  %v8714_v48 = vmax.f32 %v7648_v14, 0.0  ;;  %v22724_v14 = vld [vmem:[#allocation122_spill] sm:$0xff] }
 0x593   :  { %v15200_v52 = vpop.f32.mrf.mxu1  ;;  %15295 = vmatmul.mubr.msk.bf16.gmra.mxu1 %vm5537_vm1, %v22719_v45  ;;  %v10876_v61 = vpop.f32.mrf.mxu0 }
 0x594   :  { %v8712_v9 = vmax.f32 %v7640_v10, 0.0  ;;  %12254 = vst.msk [vmem:[%s22381_s7 + $0x710] sm:$0xff] %vm12027_vm2, %v10885_v18  ;;  %v10877_v6 = vadd.f32 %v20353_v51, %v10876_v61  ;;  %15298 = vmatprep.mubr.msk.bf16.mxu1 %vm5537_vm1, %v22720_v1  ;;  %v9062_v41 = vpack.c.bf16 %v8714_v48, %v8713_v22  ;;  %v7661_v37 = vadd.f32 %v20247_v20, %v15200_v52 }
 0x595   :  { %v7652_v53 = vpop.f32.mrf.mxu1  ;;  %v15613_v2 = vpop.f32.mrf.mxu0 }
 0x596   :  { %v9061_v54 = vpack.c.bf16 %v8712_v9, %v8711_v35  ;;  %12252 = vst.msk [vmem:[%s22381_s7 + $0x700] sm:$0xff] %vm12027_vm2, %v10877_v6  ;;  %v10888_v40 = vadd.f32 %v20353_v51, %v15613_v2  ;;  %v7653_v15 = vadd.f32 %v20247_v20, %v7652_v53  ;;  %v8717_v31 = vmax.f32 %v7661_v37, 0.0 }
 0x597   :  { %v15201_v57 = vpop.f32.mrf.mxu1  ;;  %v10879_v56 = vpop.f32.mrf.mxu0 }
 0x598   :  { %12255 = vst.msk [vmem:[%s22381_s7 + $0x718] sm:$0xff] %vm12027_vm2, %v10888_v40  ;;  %v7664_v23 = vadd.f32 %v20247_v20, %v15201_v57  ;;  %v10880_v59 = vadd.f32 %v20353_v51, %v10879_v56  ;;  %15710 = vmatprep.mubr.msk.bf16.mxu0 %vm5537_vm1, %v9061_v54  ;;  %v8715_v50 = vmax.f32 %v7653_v15, 0.0  ;;  %v22725_v40 = vld [vmem:[#allocation121_spill] sm:$0xff] }
 0x599   :  { %v7655_v62 = vpop.f32.mrf.mxu1  ;;  %v15616_v33 = vpop.f32.mrf.mxu0  ;;  %15711 = vmatmul.mubr.msk.bf16.gmra.mxu0 %vm5537_vm1, %v9062_v41 }
 0x59a   :  { %12253 = vst.msk [vmem:[%s22381_s7 + $0x708] sm:$0xff] %vm12027_vm2, %v10880_v59  ;;  %v7656_v47 = vadd.f32 %v20247_v20, %v7655_v62  ;;  %v10901_v44 = vadd.f32 %v20353_v51, %v15616_v33  ;;  %v8718_v13 = vmax.f32 %v7664_v23, 0.0  ;;  %v22726_v23 = vld [vmem:[#allocation124_spill] sm:$0xff] }
 0x59b   :  { %v15204_v43 = vpop.f32.mrf.mxu1  ;;  %15299 = vmatmul.mubr.msk.bf16.gmra.mxu1 %vm5537_vm1, %v22721_v60  ;;  %v10892_v24 = vpop.f32.mrf.mxu0 }
 0x59c   :  { %v8716_v34 = vmax.f32 %v7656_v47, 0.0  ;;  %12258 = vst.msk [vmem:[%s22381_s7 + $0x730] sm:$0xff] %vm12027_vm2, %v10901_v44  ;;  %v10893_v29 = vadd.f32 %v20353_v51, %v10892_v24  ;;  %15302 = vmatprep.mubr.msk.bf16.mxu1 %vm5537_vm1, %v22722_v8  ;;  %v9064_v7 = vpack.c.bf16 %v8718_v13, %v8717_v31  ;;  %v7677_v36 = vadd.f32 %v20247_v20, %v15204_v43 }
 0x59d   :  { %v7668_v42 = vpop.f32.mrf.mxu1  ;;  %v15617_v0 = vpop.f32.mrf.mxu0 }
 0x59e   :  { %v9063_v4 = vpack.c.bf16 %v8716_v34, %v8715_v50  ;;  %12256 = vst.msk [vmem:[%s22381_s7 + $0x720] sm:$0xff] %vm12027_vm2, %v10893_v29  ;;  %v10904_v25 = vadd.f32 %v20353_v51, %v15617_v0  ;;  %v7669_v58 = vadd.f32 %v20247_v20, %v7668_v42  ;;  %v8721_v5 = vmax.f32 %v7677_v36, 0.0 }
 0x59f   :  { %v15205_v38 = vpop.f32.mrf.mxu1  ;;  %v10895_v19 = vpop.f32.mrf.mxu0 }
 0x5a0   :  { %12259 = vst.msk [vmem:[%s22381_s7 + $0x738] sm:$0xff] %vm12027_vm2, %v10904_v25  ;;  %v7680_v39 = vadd.f32 %v20247_v20, %v15205_v38  ;;  %v10896_v49 = vadd.f32 %v20353_v51, %v10895_v19  ;;  %15714 = vmatprep.mubr.msk.bf16.mxu0 %vm5537_vm1, %v9063_v4  ;;  %v8719_v12 = vmax.f32 %v7669_v58, 0.0  ;;  %v22727_v25 = vld [vmem:[#allocation123_spill] sm:$0xff] }
 0x5a1   :  { %v7671_v17 = vpop.f32.mrf.mxu1  ;;  %v15620_v63 = vpop.f32.mrf.mxu0  ;;  %15715 = vmatmul.mubr.msk.bf16.gmra.mxu0 %vm5537_vm1, %v9064_v7 }
 0x5a2   :  { %12257 = vst.msk [vmem:[%s22381_s7 + $0x728] sm:$0xff] %vm12027_vm2, %v10896_v49  ;;  %v7672_v55 = vadd.f32 %v20247_v20, %v7671_v17  ;;  %v10917_v26 = vadd.f32 %v20353_v51, %v15620_v63  ;;  %v8722_v32 = vmax.f32 %v7680_v39, 0.0  ;;  %v22728_v39 = vld [vmem:[#allocation127_spill] sm:$0xff] }
 0x5a3   :  { %v15208_v27 = vpop.f32.mrf.mxu1  ;;  %15303 = vmatmul.mubr.msk.bf16.gmra.mxu1 %vm5537_vm1, %v22723_v11  ;;  %v10908_v21 = vpop.f32.mrf.mxu0 }
 0x5a4   :  { %v8720_v30 = vmax.f32 %v7672_v55, 0.0  ;;  %12262 = vst.msk [vmem:[%s22381_s7 + $0x750] sm:$0xff] %vm12027_vm2, %v10917_v26  ;;  %v10909_v46 = vadd.f32 %v20353_v51, %v10908_v21  ;;  %15306 = vmatprep.mubr.msk.bf16.mxu1 %vm5537_vm1, %v22724_v14  ;;  %v9066_v18 = vpack.c.bf16 %v8722_v32, %v8721_v5  ;;  %v7693_v9 = vadd.f32 %v20247_v20, %v15208_v27 }
 0x5a5   :  { %v7684_v28 = vpop.f32.mrf.mxu1  ;;  %v15621_v16 = vpop.f32.mrf.mxu0 }
 0x5a6   :  { %v9065_v3 = vpack.c.bf16 %v8720_v30, %v8719_v12  ;;  %12260 = vst.msk [vmem:[%s22381_s7 + $0x740] sm:$0xff] %vm12027_vm2, %v10909_v46  ;;  %v10920_v10 = vadd.f32 %v20353_v51, %v15621_v16  ;;  %v7685_v45 = vadd.f32 %v20247_v20, %v7684_v28  ;;  %v8725_v59 = vmax.f32 %v7693_v9, 0.0 }
 0x5a7   :  { %v15209_v48 = vpop.f32.mrf.mxu1  ;;  %v10911_v52 = vpop.f32.mrf.mxu0 }
 0x5a8   :  { %12263 = vst.msk [vmem:[%s22381_s7 + $0x758] sm:$0xff] %vm12027_vm2, %v10920_v10  ;;  %v7696_v61 = vadd.f32 %v20247_v20, %v15209_v48  ;;  %v10912_v35 = vadd.f32 %v20353_v51, %v10911_v52  ;;  %15718 = vmatprep.mubr.msk.bf16.mxu0 %vm5537_vm1, %v9065_v3  ;;  %v8723_v57 = vmax.f32 %v7685_v45, 0.0  ;;  %v22729_v10 = vld [vmem:[#allocation126_spill] sm:$0xff] }
 0x5a9   :  { %v7687_v6 = vpop.f32.mrf.mxu1  ;;  %v15624_v1 = vpop.f32.mrf.mxu0  ;;  %15719 = vmatmul.mubr.msk.bf16.gmra.mxu0 %vm5537_vm1, %v9066_v18 }
 0x5aa   :  { %12261 = vst.msk [vmem:[%s22381_s7 + $0x748] sm:$0xff] %vm12027_vm2, %v10912_v35  ;;  %v7688_v22 = vadd.f32 %v20247_v20, %v7687_v6  ;;  %v10933_v53 = vadd.f32 %v20353_v51, %v15624_v1  ;;  %v8726_v2 = vmax.f32 %v7696_v61, 0.0  ;;  %v22730_v61 = vld [vmem:[#allocation130_spill] sm:$0xff] }
 0x5ab   :  { %v15212_v54 = vpop.f32.mrf.mxu1  ;;  %15307 = vmatmul.mubr.msk.bf16.gmra.mxu1 %vm5537_vm1, %v22725_v40  ;;  %v10924_v41 = vpop.f32.mrf.mxu0 }
 0x5ac   :  { %v8724_v56 = vmax.f32 %v7688_v22, 0.0  ;;  %12266 = vst.msk [vmem:[%s22381_s7 + $0x770] sm:$0xff] %vm12027_vm2, %v10933_v53  ;;  %v10925_v15 = vadd.f32 %v20353_v51, %v10924_v41  ;;  %15310 = vmatprep.mubr.msk.bf16.mxu1 %vm5537_vm1, %v22726_v23  ;;  %v9068_v44 = vpack.c.bf16 %v8726_v2, %v8725_v59  ;;  %v7709_v34 = vadd.f32 %v20247_v20, %v15212_v54 }
 0x5ad   :  { %v7700_v37 = vpop.f32.mrf.mxu1  ;;  %v15625_v62 = vpop.f32.mrf.mxu0 }
 0x5ae   :  { %v9067_v33 = vpack.c.bf16 %v8724_v56, %v8723_v57  ;;  %12264 = vst.msk [vmem:[%s22381_s7 + $0x760] sm:$0xff] %vm12027_vm2, %v10925_v15  ;;  %v10936_v47 = vadd.f32 %v20353_v51, %v15625_v62  ;;  %v7701_v60 = vadd.f32 %v20247_v20, %v7700_v37  ;;  %v8729_v49 = vmax.f32 %v7709_v34, 0.0 }
 0x5af   :  { %v15213_v13 = vpop.f32.mrf.mxu1  ;;  %v10927_v43 = vpop.f32.mrf.mxu0 }
 0x5b0   :  { %12267 = vst.msk [vmem:[%s22381_s7 + $0x778] sm:$0xff] %vm12027_vm2, %v10936_v47  ;;  %v7712_v24 = vadd.f32 %v20247_v20, %v15213_v13  ;;  %v10928_v50 = vadd.f32 %v20353_v51, %v10927_v43  ;;  %15722 = vmatprep.mubr.msk.bf16.mxu0 %vm5537_vm1, %v9067_v33  ;;  %v8727_v38 = vmax.f32 %v7701_v60, 0.0  ;;  %v22731_v47 = vld [vmem:[#allocation129_spill] sm:$0xff] }
 0x5b1   :  { %v7703_v29 = vpop.f32.mrf.mxu1  ;;  %v15628_v8 = vpop.f32.mrf.mxu0  ;;  %15723 = vmatmul.mubr.msk.bf16.gmra.mxu0 %vm5537_vm1, %v9068_v44 }
 0x5b2   :  { %12265 = vst.msk [vmem:[%s22381_s7 + $0x768] sm:$0xff] %vm12027_vm2, %v10928_v50  ;;  %v7704_v31 = vadd.f32 %v20247_v20, %v7703_v29  ;;  %v10949_v42 = vadd.f32 %v20353_v51, %v15628_v8  ;;  %v8730_v0 = vmax.f32 %v7712_v24, 0.0  ;;  %v22732_v24 = vld [vmem:[#allocation133_spill] sm:$0xff] }
 0x5b3   :  { %v15216_v4 = vpop.f32.mrf.mxu1  ;;  %15311 = vmatmul.mubr.msk.bf16.gmra.mxu1 %vm5537_vm1, %v22727_v25  ;;  %v10940_v7 = vpop.f32.mrf.mxu0 }
 0x5b4   :  { %v8728_v19 = vmax.f32 %v7704_v31, 0.0  ;;  %12270 = vst.msk [vmem:[%s22381_s7 + $0x790] sm:$0xff] %vm12027_vm2, %v10949_v42  ;;  %v10941_v58 = vadd.f32 %v20353_v51, %v10940_v7  ;;  %15314 = vmatprep.mubr.msk.bf16.mxu1 %vm5537_vm1, %v22728_v39  ;;  %v9070_v26 = vpack.c.bf16 %v8730_v0, %v8729_v49  ;;  %v7725_v30 = vadd.f32 %v20247_v20, %v15216_v4  ;;  %v20767_v49 = vld [vmem:[#allocation7] ss:$0 sm:$0xff] }
 0x5b5   :  { %v7716_v36 = vpop.f32.mrf.mxu1  ;;  %v15629_v17 = vpop.f32.mrf.mxu0 }
 0x5b6   :  { %v9069_v63 = vpack.c.bf16 %v8728_v19, %v8727_v38  ;;  %12268 = vst.msk [vmem:[%s22381_s7 + $0x780] sm:$0xff] %vm12027_vm2, %v10941_v58  ;;  %v10952_v55 = vadd.f32 %v20353_v51, %v15629_v17  ;;  %v7717_v11 = vadd.f32 %v20247_v20, %v7716_v36  ;;  %v8733_v35 = vmax.f32 %v7725_v30, 0.0 }
 0x5b7   :  { %v15217_v32 = vpop.f32.mrf.mxu1  ;;  %v10943_v27 = vpop.f32.mrf.mxu0 }
 0x5b8   :  { %12271 = vst.msk [vmem:[%s22381_s7 + $0x798] sm:$0xff] %vm12027_vm2, %v10952_v55  ;;  %v7728_v21 = vadd.f32 %v20247_v20, %v15217_v32  ;;  %v10944_v12 = vadd.f32 %v20353_v51, %v10943_v27  ;;  %15726 = vmatprep.mubr.msk.bf16.mxu0 %vm5537_vm1, %v9069_v63  ;;  %v8731_v48 = vmax.f32 %v7717_v11, 0.0 }
 0x5b9   :  { %v7719_v46 = vpop.f32.mrf.mxu1  ;;  %v15632_v14 = vpop.f32.mrf.mxu0  ;;  %15727 = vmatmul.mubr.msk.bf16.gmra.mxu0 %vm5537_vm1, %v9070_v26  ;;  %v22733_v26 = vld [vmem:[#allocation132_spill] sm:$0xff] }
 0x5ba   :  { %12269 = vst.msk [vmem:[%s22381_s7 + $0x788] sm:$0xff] %vm12027_vm2, %v10944_v12  ;;  %v7720_v5 = vadd.f32 %v20247_v20, %v7719_v46  ;;  %v10965_v28 = vadd.f32 %v20353_v51, %v15632_v14  ;;  %v8734_v16 = vmax.f32 %v7728_v21, 0.0  ;;  %v22734_v21 = vld [vmem:[#allocation136_spill] sm:$0xff] }
 0x5bb   :  { %v15220_v3 = vpop.f32.mrf.mxu1  ;;  %15315 = vmatmul.mubr.msk.bf16.gmra.mxu1 %vm5537_vm1, %v22729_v10  ;;  %v10956_v18 = vpop.f32.mrf.mxu0 }
 0x5bc   :  { %v8732_v52 = vmax.f32 %v7720_v5, 0.0  ;;  %12274 = vst.msk [vmem:[%s22381_s7 + $0x7b0] sm:$0xff] %vm12027_vm2, %v10965_v28  ;;  %v10957_v45 = vadd.f32 %v20353_v51, %v10956_v18  ;;  %15318 = vmatprep.mubr.msk.bf16.mxu1 %vm5537_vm1, %v22730_v61  ;;  %v9072_v53 = vpack.c.bf16 %v8734_v16, %v8733_v35  ;;  %v7741_v56 = vadd.f32 %v20247_v20, %v15220_v3 }
 0x5bd   :  { %v7732_v9 = vpop.f32.mrf.mxu1  ;;  %v15633_v6 = vpop.f32.mrf.mxu0 }
 0x5be   :  { %v9071_v1 = vpack.c.bf16 %v8732_v52, %v8731_v48  ;;  %12272 = vst.msk [vmem:[%s22381_s7 + $0x7a0] sm:$0xff] %vm12027_vm2, %v10957_v45  ;;  %v10968_v22 = vadd.f32 %v20353_v51, %v15633_v6  ;;  %v7733_v40 = vadd.f32 %v20247_v20, %v7732_v9  ;;  %v8737_v50 = vmax.f32 %v7741_v56, 0.0 }
 0x5bf   :  { %v15221_v2 = vpop.f32.mrf.mxu1  ;;  %v10959_v54 = vpop.f32.mrf.mxu0 }
 0x5c0   :  { %12275 = vst.msk [vmem:[%s22381_s7 + $0x7b8] sm:$0xff] %vm12027_vm2, %v10968_v22  ;;  %v7744_v41 = vadd.f32 %v20247_v20, %v15221_v2  ;;  %v10960_v57 = vadd.f32 %v20353_v51, %v10959_v54  ;;  %15730 = vmatprep.mubr.msk.bf16.mxu0 %vm5537_vm1, %v9071_v1  ;;  %v8735_v13 = vmax.f32 %v7733_v40, 0.0  ;;  %v22735_v22 = vld [vmem:[#allocation135_spill] sm:$0xff] }
 0x5c1   :  { %v7735_v15 = vpop.f32.mrf.mxu1  ;;  %v15636_v23 = vpop.f32.mrf.mxu0  ;;  %15731 = vmatmul.mubr.msk.bf16.gmra.mxu0 %vm5537_vm1, %v9072_v53 }
 0x5c2   :  { %12273 = vst.msk [vmem:[%s22381_s7 + $0x7a8] sm:$0xff] %vm12027_vm2, %v10960_v57  ;;  %v7736_v59 = vadd.f32 %v20247_v20, %v7735_v15  ;;  %v10981_v37 = vadd.f32 %v20353_v51, %v15636_v23  ;;  %v8738_v62 = vmax.f32 %v7744_v41, 0.0  ;;  %v22736_v41 = vld [vmem:[#allocation139_spill] sm:$0xff] }
 0x5c3   :  { %v15224_v33 = vpop.f32.mrf.mxu1  ;;  %15319 = vmatmul.mubr.msk.bf16.gmra.mxu1 %vm5537_vm1, %v22731_v47  ;;  %v10972_v44 = vpop.f32.mrf.mxu0 }
 0x5c4   :  { %v8736_v43 = vmax.f32 %v7736_v59, 0.0  ;;  %12278 = vst.msk [vmem:[%s22381_s7 + $0x7d0] sm:$0xff] %vm12027_vm2, %v10981_v37  ;;  %v10973_v60 = vadd.f32 %v20353_v51, %v10972_v44  ;;  %15322 = vmatprep.mubr.msk.bf16.mxu1 %vm5537_vm1, %v22732_v24  ;;  %v9074_v42 = vpack.c.bf16 %v8738_v62, %v8737_v50  ;;  %v7757_v19 = vadd.f32 %v20247_v20, %v15224_v33 }
 0x5c5   :  { %v7748_v34 = vpop.f32.mrf.mxu1  ;;  %v15637_v29 = vpop.f32.mrf.mxu0 }
 0x5c6   :  { %v9073_v8 = vpack.c.bf16 %v8736_v43, %v8735_v13  ;;  %12276 = vst.msk [vmem:[%s22381_s7 + $0x7c0] sm:$0xff] %vm12027_vm2, %v10973_v60  ;;  %v10984_v31 = vadd.f32 %v20353_v51, %v15637_v29  ;;  %v7749_v25 = vadd.f32 %v20247_v20, %v7748_v34  ;;  %v8741_v12 = vmax.f32 %v7757_v19, 0.0 }
 0x5c7   :  { %v15225_v0 = vpop.f32.mrf.mxu1  ;;  %v10975_v4 = vpop.f32.mrf.mxu0 }
 0x5c8   :  { %12279 = vst.msk [vmem:[%s22381_s7 + $0x7d8] sm:$0xff] %vm12027_vm2, %v10984_v31  ;;  %v7760_v7 = vadd.f32 %v20247_v20, %v15225_v0  ;;  %v10976_v38 = vadd.f32 %v20353_v51, %v10975_v4  ;;  %15734 = vmatprep.mubr.msk.bf16.mxu0 %vm5537_vm1, %v9073_v8  ;;  %v8739_v32 = vmax.f32 %v7749_v25, 0.0  ;;  %v22737_v31 = vld [vmem:[#allocation138_spill] sm:$0xff] }
 0x5c9   :  { %v7751_v58 = vpop.f32.mrf.mxu1  ;;  %v15640_v39 = vpop.f32.mrf.mxu0  ;;  %15735 = vmatmul.mubr.msk.bf16.gmra.mxu0 %vm5537_vm1, %v9074_v42 }
 0x5ca   :  { %12277 = vst.msk [vmem:[%s22381_s7 + $0x7c8] sm:$0xff] %vm12027_vm2, %v10976_v38  ;;  %v7752_v36 = vadd.f32 %v20767_v49, %v7751_v58  ;;  %v10997_v17 = vadd.f32 %v20353_v51, %v15640_v39  ;;  %v8742_v63 = vmax.f32 %v7760_v7, 0.0  ;;  %v22738_v7 = vld [vmem:[#allocation142_spill] sm:$0xff] }
 0x5cb   :  { %v15228_v55 = vpop.f32.mrf.mxu1  ;;  %15323 = vmatmul.mubr.msk.bf16.gmra.mxu1 %vm5537_vm1, %v22733_v26  ;;  %v10988_v20 = vpop.f32.mrf.mxu0 }
 0x5cc   :  { %v8740_v27 = vmax.f32 %v7752_v36, 0.0  ;;  %12282 = vst.msk [vmem:[%s22381_s7 + $0x7f0] sm:$0xff] %vm12027_vm2, %v10997_v17  ;;  %v10989_v11 = vadd.f32 %v20353_v51, %v10988_v20  ;;  %15326 = vmatprep.mubr.msk.bf16.mxu1 %vm5537_vm1, %v22734_v21  ;;  %v9076_v28 = vpack.c.bf16 %v8742_v63, %v8741_v12  ;;  %v7773_v52 = vadd.f32 %v20767_v49, %v15228_v55 }
 0x5cd   :  { %v7764_v30 = vpop.f32.mrf.mxu1  ;;  %v15641_v46 = vpop.f32.mrf.mxu0 }
 0x5ce   :  { %v9075_v14 = vpack.c.bf16 %v8740_v27, %v8739_v32  ;;  %12280 = vst.msk [vmem:[%s22381_s7 + $0x7e0] sm:$0xff] %vm12027_vm2, %v10989_v11  ;;  %v11000_v5 = vadd.f32 %v20353_v51, %v15641_v46  ;;  %v7765_v10 = vadd.f32 %v20767_v49, %v7764_v30  ;;  %v8745_v57 = vmax.f32 %v7773_v52, 0.0 }
 0x5cf   :  { %v15229_v16 = vpop.f32.mrf.mxu1  ;;  %v10991_v3 = vpop.f32.mrf.mxu0 }
 0x5d0   :  { %12283 = vst.msk [vmem:[%s22381_s7 + $0x7f8] sm:$0xff] %vm12027_vm2, %v11000_v5  ;;  %v7776_v18 = vadd.f32 %v20767_v49, %v15229_v16  ;;  %v10992_v48 = vadd.f32 %v20353_v51, %v10991_v3  ;;  %15738 = vmatprep.mubr.msk.bf16.mxu0 %vm5537_vm1, %v9075_v14  ;;  %v8743_v2 = vmax.f32 %v7765_v10, 0.0  ;;  %v22739_v5 = vld [vmem:[#allocation141_spill] sm:$0xff] }
 0x5d1   :  { %v7767_v45 = vpop.f32.mrf.mxu1  ;;  %v15644_v61 = vpop.f32.mrf.mxu0  ;;  %15739 = vmatmul.mubr.msk.bf16.gmra.mxu0 %vm5537_vm1, %v9076_v28 }
 0x5d2   :  { %12281 = vst.msk [vmem:[%s22381_s7 + $0x7e8] sm:$0xff] %vm12027_vm2, %v10992_v48  ;;  %v7768_v35 = vadd.f32 %v20767_v49, %v7767_v45  ;;  %v11013_v9 = vadd.f32 %v20353_v51, %v15644_v61  ;;  %v8746_v6 = vmax.f32 %v7776_v18, 0.0  ;;  %v22740_v18 = vld [vmem:[#allocation145_spill] sm:$0xff] }
 0x5d3   :  { %v15232_v1 = vpop.f32.mrf.mxu1  ;;  %15327 = vmatmul.mubr.msk.bf16.gmra.mxu1 %vm5537_vm1, %v22735_v22  ;;  %v11004_v53 = vpop.f32.mrf.mxu0 }
 0x5d4   :  { %v8744_v54 = vmax.f32 %v7768_v35, 0.0  ;;  %12286 = vst.msk [vmem:[%s22381_s7 + $0x810] sm:$0xff] %vm12027_vm2, %v11013_v9  ;;  %v11005_v40 = vadd.f32 %v20353_v51, %v11004_v53  ;;  %15330 = vmatprep.mubr.msk.bf16.mxu1 %vm5537_vm1, %v22736_v41  ;;  %v9078_v37 = vpack.c.bf16 %v8746_v6, %v8745_v57  ;;  %v7789_v43 = vadd.f32 %v20767_v49, %v15232_v1  ;;  %v20874_v35 = vld [vmem:[#allocation9] ss:$0 sm:$0xff] }
 0x5d5   :  { %v7780_v56 = vpop.f32.mrf.mxu1  ;;  %v15645_v15 = vpop.f32.mrf.mxu0 }
 0x5d6   :  { %v9077_v23 = vpack.c.bf16 %v8744_v54, %v8743_v2  ;;  %12284 = vst.msk [vmem:[%s22381_s7 + $0x800] sm:$0xff] %vm12027_vm2, %v11005_v40  ;;  %v11016_v59 = vadd.f32 %v20353_v51, %v15645_v15  ;;  %v7781_v47 = vadd.f32 %v20767_v49, %v7780_v56  ;;  %v8749_v38 = vmax.f32 %v7789_v43, 0.0 }
 0x5d7   :  { %v15233_v62 = vpop.f32.mrf.mxu1  ;;  %v11007_v33 = vpop.f32.mrf.mxu0 }
 0x5d8   :  { %12287 = vst.msk [vmem:[%s22381_s7 + $0x818] sm:$0xff] %vm12027_vm2, %v11016_v59  ;;  %v7792_v44 = vadd.f32 %v20767_v49, %v15233_v62  ;;  %v11008_v13 = vadd.f32 %v20353_v51, %v11007_v33  ;;  %15742 = vmatprep.mubr.msk.bf16.mxu0 %vm5537_vm1, %v9077_v23  ;;  %v8747_v0 = vmax.f32 %v7781_v47, 0.0  ;;  %v22741_v59 = vld [vmem:[#allocation144_spill] sm:$0xff] }
 0x5d9   :  { %v7783_v60 = vpop.f32.mrf.mxu1  ;;  %v15648_v24 = vpop.f32.mrf.mxu0  ;;  %15743 = vmatmul.mubr.msk.bf16.gmra.mxu0 %vm5537_vm1, %v9078_v37 }
 0x5da   :  { %12285 = vst.msk [vmem:[%s22381_s7 + $0x808] sm:$0xff] %vm12027_vm2, %v11008_v13  ;;  %v7784_v50 = vadd.f32 %v20767_v49, %v7783_v60  ;;  %v11029_v34 = vadd.f32 %v20353_v51, %v15648_v24  ;;  %v8750_v29 = vmax.f32 %v7792_v44, 0.0  ;;  %v22742_v44 = vld [vmem:[#allocation148_spill] sm:$0xff] }
 0x5db   :  { %v15236_v8 = vpop.f32.mrf.mxu1  ;;  %15331 = vmatmul.mubr.msk.bf16.gmra.mxu1 %vm5537_vm1, %v22737_v31  ;;  %v11020_v42 = vpop.f32.mrf.mxu0 }
 0x5dc   :  { %v8748_v4 = vmax.f32 %v7784_v50, 0.0  ;;  %12290 = vst.msk [vmem:[%s22381_s7 + $0x830] sm:$0xff] %vm12027_vm2, %v11029_v34  ;;  %v11021_v25 = vadd.f32 %v20353_v51, %v11020_v42  ;;  %15334 = vmatprep.mubr.msk.bf16.mxu1 %vm5537_vm1, %v22738_v7  ;;  %v9080_v17 = vpack.c.bf16 %v8750_v29, %v8749_v38  ;;  %v7805_v27 = vadd.f32 %v20767_v49, %v15236_v8 }
 0x5dd   :  { %v7796_v19 = vpop.f32.mrf.mxu1  ;;  %v15649_v58 = vpop.f32.mrf.mxu0 }
 0x5de   :  { %v9079_v39 = vpack.c.bf16 %v8748_v4, %v8747_v0  ;;  %12288 = vst.msk [vmem:[%s22381_s7 + $0x820] sm:$0xff] %vm12027_vm2, %v11021_v25  ;;  %v11032_v36 = vadd.f32 %v20353_v51, %v15649_v58  ;;  %v7797_v26 = vadd.f32 %v20767_v49, %v7796_v19  ;;  %v8753_v48 = vmax.f32 %v7805_v27, 0.0 }
 0x5df   :  { %v15237_v63 = vpop.f32.mrf.mxu1  ;;  %v11023_v55 = vpop.f32.mrf.mxu0 }
 0x5e0   :  { %12291 = vst.msk [vmem:[%s22381_s7 + $0x838] sm:$0xff] %vm12027_vm2, %v11032_v36  ;;  %v7808_v20 = vadd.f32 %v20767_v49, %v15237_v63  ;;  %v11024_v32 = vadd.f32 %v20353_v51, %v11023_v55  ;;  %15746 = vmatprep.mubr.msk.bf16.mxu0 %vm5537_vm1, %v9079_v39  ;;  %v8751_v16 = vmax.f32 %v7797_v26, 0.0  ;;  %v22743_v36 = vld [vmem:[#allocation147_spill] sm:$0xff] }
 0x5e1   :  { %v7799_v11 = vpop.f32.mrf.mxu1  ;;  %v15652_v21 = vpop.f32.mrf.mxu0  ;;  %15747 = vmatmul.mubr.msk.bf16.gmra.mxu0 %vm5537_vm1, %v9080_v17 }
 0x5e2   :  { %12289 = vst.msk [vmem:[%s22381_s7 + $0x828] sm:$0xff] %vm12027_vm2, %v11024_v32  ;;  %v7800_v12 = vadd.f32 %v20767_v49, %v7799_v11  ;;  %v11045_v30 = vadd.f32 %v20353_v51, %v15652_v21  ;;  %v8754_v46 = vmax.f32 %v7808_v20, 0.0  ;;  %v22744_v20 = vld [vmem:[#allocation151_spill] sm:$0xff] }
 0x5e3   :  { %v15240_v14 = vpop.f32.mrf.mxu1  ;;  %15335 = vmatmul.mubr.msk.bf16.gmra.mxu1 %vm5537_vm1, %v22739_v5  ;;  %v11036_v28 = vpop.f32.mrf.mxu0 }
 0x5e4   :  { %v8752_v3 = vmax.f32 %v7800_v12, 0.0  ;;  %12294 = vst.msk [vmem:[%s22381_s7 + $0x850] sm:$0xff] %vm12027_vm2, %v11045_v30  ;;  %v11037_v10 = vadd.f32 %v20353_v51, %v11036_v28  ;;  %15338 = vmatprep.mubr.msk.bf16.mxu1 %vm5537_vm1, %v22740_v18  ;;  %v9082_v6 = vpack.c.bf16 %v8754_v46, %v8753_v48  ;;  %v7821_v54 = vadd.f32 %v20767_v49, %v15240_v14 }
 0x5e5   :  { %v7812_v52 = vpop.f32.mrf.mxu1  ;;  %v15653_v45 = vpop.f32.mrf.mxu0 }
 0x5e6   :  { %v9081_v61 = vpack.c.bf16 %v8752_v3, %v8751_v16  ;;  %12292 = vst.msk [vmem:[%s22381_s7 + $0x840] sm:$0xff] %vm12027_vm2, %v11037_v10  ;;  %v11048_v9 = vadd.f32 %v20874_v35, %v15653_v45  ;;  %v7813_v51 = vadd.f32 %v20767_v49, %v7812_v52  ;;  %v8757_v13 = vmax.f32 %v7821_v54, 0.0 }
 0x5e7   :  { %v15241_v1 = vpop.f32.mrf.mxu1  ;;  %v11039_v22 = vpop.f32.mrf.mxu0 }
 0x5e8   :  { %12295 = vst.msk [vmem:[%s22381_s7 + $0x858] sm:$0xff] %vm12027_vm2, %v11048_v9  ;;  %v7824_v53 = vadd.f32 %v20767_v49, %v15241_v1  ;;  %v11040_v2 = vadd.f32 %v20874_v35, %v11039_v22  ;;  %15750 = vmatprep.mubr.msk.bf16.mxu0 %vm5537_vm1, %v9081_v61  ;;  %v8755_v62 = vmax.f32 %v7813_v51, 0.0  ;;  %v22745_v9 = vld [vmem:[#allocation150_spill] sm:$0xff] }
 0x5e9   :  { %v7815_v40 = vpop.f32.mrf.mxu1  ;;  %v15656_v41 = vpop.f32.mrf.mxu0  ;;  %15751 = vmatmul.mubr.msk.bf16.gmra.mxu0 %vm5537_vm1, %v9082_v6 }
 0x5ea   :  { %12293 = vst.msk [vmem:[%s22381_s7 + $0x848] sm:$0xff] %vm12027_vm2, %v11040_v2  ;;  %v7816_v57 = vadd.f32 %v20767_v49, %v7815_v40  ;;  %v11061_v56 = vadd.f32 %v20874_v35, %v15656_v41  ;;  %v8758_v15 = vmax.f32 %v7824_v53, 0.0  ;;  %v22746_v53 = vld [vmem:[#allocation155_spill] sm:$0xff] }
 0x5eb   :  { %v15244_v23 = vpop.f32.mrf.mxu1  ;;  %15339 = vmatmul.mubr.msk.bf16.gmra.mxu1 %vm5537_vm1, %v22741_v59  ;;  %v11052_v37 = vpop.f32.mrf.mxu0 }
 0x5ec   :  { %v8756_v33 = vmax.f32 %v7816_v57, 0.0  ;;  %12298 = vst.msk [vmem:[%s22381_s7 + $0x870] sm:$0xff] %vm12027_vm2, %v11061_v56  ;;  %v11053_v47 = vadd.f32 %v20874_v35, %v11052_v37  ;;  %15342 = vmatprep.mubr.msk.bf16.mxu1 %vm5537_vm1, %v22742_v44  ;;  %v9084_v34 = vpack.c.bf16 %v8758_v15, %v8757_v13  ;;  %v7837_v4 = vadd.f32 %v20767_v49, %v15244_v23 }
 0x5ed   :  { %v7828_v43 = vpop.f32.mrf.mxu1  ;;  %v15657_v60 = vpop.f32.mrf.mxu0 }
 0x5ee   :  { %v9083_v24 = vpack.c.bf16 %v8756_v33, %v8755_v62  ;;  %12296 = vst.msk [vmem:[%s22381_s7 + $0x860] sm:$0xff] %vm12027_vm2, %v11053_v47  ;;  %v11064_v50 = vadd.f32 %v20874_v35, %v15657_v60  ;;  %v7829_v31 = vadd.f32 %v20767_v49, %v7828_v43  ;;  %v8761_v32 = vmax.f32 %v7837_v4, 0.0 }
 0x5ef   :  { %v15245_v29 = vpop.f32.mrf.mxu1  ;;  %v11055_v8 = vpop.f32.mrf.mxu0 }
 0x5f0   :  { %12299 = vst.msk [vmem:[%s22381_s7 + $0x878] sm:$0xff] %vm12027_vm2, %v11064_v50  ;;  %v7840_v42 = vadd.f32 %v20767_v49, %v15245_v29  ;;  %v11056_v0 = vadd.f32 %v20874_v35, %v11055_v8  ;;  %15754 = vmatprep.mubr.msk.bf16.mxu0 %vm5537_vm1, %v9083_v24  ;;  %v8759_v63 = vmax.f32 %v7829_v31, 0.0  ;;  %v22747_v50 = vld [vmem:[#allocation153_spill] sm:$0xff] }
 0x5f1   :  { %v7831_v25 = vpop.f32.mrf.mxu1  ;;  %v15660_v7 = vpop.f32.mrf.mxu0  ;;  %15755 = vmatmul.mubr.msk.bf16.gmra.mxu0 %vm5537_vm1, %v9084_v34 }
 0x5f2   :  { %12297 = vst.msk [vmem:[%s22381_s7 + $0x868] sm:$0xff] %vm12027_vm2, %v11056_v0  ;;  %v7832_v38 = vadd.f32 %v20767_v49, %v7831_v25  ;;  %v11077_v19 = vadd.f32 %v20874_v35, %v15660_v7  ;;  %v8762_v58 = vmax.f32 %v7840_v42, 0.0  ;;  %v22748_v42 = vld [vmem:[#allocation160_spill] sm:$0xff] }
 0x5f3   :  { %v15248_v39 = vpop.f32.mrf.mxu1  ;;  %15343 = vmatmul.mubr.msk.bf16.gmra.mxu1 %vm5537_vm1, %v22743_v36  ;;  %v11068_v17 = vpop.f32.mrf.mxu0 }
 0x5f4   :  { %v8760_v55 = vmax.f32 %v7832_v38, 0.0  ;;  %12302 = vst.msk [vmem:[%s22381_s7 + $0x890] sm:$0xff] %vm12027_vm2, %v11077_v19  ;;  %v11069_v26 = vadd.f32 %v20874_v35, %v11068_v17  ;;  %15346 = vmatprep.mubr.msk.bf16.mxu1 %vm5537_vm1, %v22744_v20  ;;  %v9086_v30 = vpack.c.bf16 %v8762_v58, %v8761_v32  ;;  %v7853_v3 = vadd.f32 %v20767_v49, %v15248_v39 }
 0x5f5   :  { %v7844_v27 = vpop.f32.mrf.mxu1  ;;  %v15661_v11 = vpop.f32.mrf.mxu0 }
 0x5f6   :  { %v9085_v21 = vpack.c.bf16 %v8760_v55, %v8759_v63  ;;  %12300 = vst.msk [vmem:[%s22381_s7 + $0x880] sm:$0xff] %vm12027_vm2, %v11069_v26  ;;  %v11080_v12 = vadd.f32 %v20874_v35, %v15661_v11  ;;  %v7845_v5 = vadd.f32 %v20767_v49, %v7844_v27  ;;  %v8765_v2 = vmax.f32 %v7853_v3, 0.0 }
 0x5f7   :  { %v15249_v46 = vpop.f32.mrf.mxu1  ;;  %v11071_v14 = vpop.f32.mrf.mxu0 }
 0x5f8   :  { %12303 = vst.msk [vmem:[%s22381_s7 + $0x898] sm:$0xff] %vm12027_vm2, %v11080_v12  ;;  %v7856_v28 = vadd.f32 %v20767_v49, %v15249_v46  ;;  %v11072_v16 = vadd.f32 %v20874_v35, %v11071_v14  ;;  %15758 = vmatprep.mubr.msk.bf16.mxu0 %vm5537_vm1, %v9085_v21  ;;  %v8763_v1 = vmax.f32 %v7845_v5, 0.0  ;;  %v22749_v12 = vld [vmem:[#allocation158_spill] sm:$0xff] }
 0x5f9   :  { %v7847_v10 = vpop.f32.mrf.mxu1  ;;  %v15664_v18 = vpop.f32.mrf.mxu0  ;;  %15759 = vmatmul.mubr.msk.bf16.gmra.mxu0 %vm5537_vm1, %v9086_v30 }
 0x5fa   :  { %12301 = vst.msk [vmem:[%s22381_s7 + $0x888] sm:$0xff] %vm12027_vm2, %v11072_v16  ;;  %v7848_v48 = vadd.f32 %v20767_v49, %v7847_v10  ;;  %v11093_v52 = vadd.f32 %v20874_v35, %v15664_v18  ;;  %v8766_v45 = vmax.f32 %v7856_v28, 0.0  ;;  %v22750_v28 = vld [vmem:[#allocation163_spill] sm:$0xff] }
 0x5fb   :  { %v15252_v61 = vpop.f32.mrf.mxu1  ;;  %15347 = vmatmul.mubr.msk.bf16.gmra.mxu1 %vm5537_vm1, %v22745_v9  ;;  %v11084_v6 = vpop.f32.mrf.mxu0 }
 0x5fc   :  { %v8764_v22 = vmax.f32 %v7848_v48, 0.0  ;;  %12306 = vst.msk [vmem:[%s22381_s7 + $0x8b0] sm:$0xff] %vm12027_vm2, %v11093_v52  ;;  %v11085_v51 = vadd.f32 %v20874_v35, %v11084_v6  ;;  %15350 = vmatprep.mubr.msk.bf16.mxu1 %vm5537_vm1, %v22746_v53  ;;  %v9088_v56 = vpack.c.bf16 %v8766_v45, %v8765_v2  ;;  %v7869_v33 = vadd.f32 %v20767_v49, %v15252_v61 }
 0x5fd   :  { %v7860_v54 = vpop.f32.mrf.mxu1  ;;  %v15665_v40 = vpop.f32.mrf.mxu0 }
 0x5fe   :  { %v9087_v41 = vpack.c.bf16 %v8764_v22, %v8763_v1  ;;  %12304 = vst.msk [vmem:[%s22381_s7 + $0x8a0] sm:$0xff] %vm12027_vm2, %v11085_v51  ;;  %v11096_v57 = vadd.f32 %v20874_v35, %v15665_v40  ;;  %v7861_v59 = vadd.f32 %v20767_v49, %v7860_v54  ;;  %v8769_v0 = vmax.f32 %v7869_v33, 0.0 }
 0x5ff   :  { %v15253_v15 = vpop.f32.mrf.mxu1  ;;  %v11087_v23 = vpop.f32.mrf.mxu0 }
 0x600   :  { %12307 = vst.msk [vmem:[%s22381_s7 + $0x8b8] sm:$0xff] %vm12027_vm2, %v11096_v57  ;;  %v7872_v37 = vadd.f32 %v20767_v49, %v15253_v15  ;;  %v11088_v62 = vadd.f32 %v20874_v35, %v11087_v23  ;;  %15762 = vmatprep.mubr.msk.bf16.mxu0 %vm5537_vm1, %v9087_v41  ;;  %v8767_v29 = vmax.f32 %v7861_v59, 0.0  ;;  %v22751_v57 = vld [vmem:[#allocation71_spill] sm:$0xff] }
 0x601   :  { %v7863_v47 = vpop.f32.mrf.mxu1  ;;  %v15668_v44 = vpop.f32.mrf.mxu0  ;;  %15763 = vmatmul.mubr.msk.bf16.gmra.mxu0 %vm5537_vm1, %v9088_v56 }
 0x602   :  { %12305 = vst.msk [vmem:[%s22381_s7 + $0x8a8] sm:$0xff] %vm12027_vm2, %v11088_v62  ;;  %v7864_v13 = vadd.f32 %v20767_v49, %v7863_v47  ;;  %v11109_v43 = vadd.f32 %v20874_v35, %v15668_v44  ;;  %v8770_v60 = vmax.f32 %v7872_v37, 0.0  ;;  %v22752_v37 = vld [vmem:[#allocation166_spill] sm:$0xff] }
 0x603   :  { %v15256_v24 = vpop.f32.mrf.mxu1  ;;  %15351 = vmatmul.mubr.msk.bf16.gmra.mxu1 %vm5537_vm1, %v22747_v50  ;;  %v11100_v34 = vpop.f32.mrf.mxu0 }
 0x604   :  { %v8768_v8 = vmax.f32 %v7864_v13, 0.0  ;;  %12310 = vst.msk [vmem:[%s22381_s7 + $0x8d0] sm:$0xff] %vm12027_vm2, %v11109_v43  ;;  %v11101_v31 = vadd.f32 %v20874_v35, %v11100_v34  ;;  %15354 = vmatprep.mubr.msk.bf16.mxu1 %vm5537_vm1, %v22748_v42  ;;  %v9090_v19 = vpack.c.bf16 %v8770_v60, %v8769_v0  ;;  %v7885_v55 = vadd.f32 %v20767_v49, %v15256_v24 }
 0x605   :  { %v7876_v4 = vpop.f32.mrf.mxu1  ;;  %v15669_v25 = vpop.f32.mrf.mxu0 }
 0x606   :  { %v9089_v7 = vpack.c.bf16 %v8768_v8, %v8767_v29  ;;  %12308 = vst.msk [vmem:[%s22381_s7 + $0x8c0] sm:$0xff] %vm12027_vm2, %v11101_v31  ;;  %v11112_v38 = vadd.f32 %v20874_v35, %v15669_v25  ;;  %v7877_v36 = vadd.f32 %v20767_v49, %v7876_v4  ;;  %v8773_v16 = vmax.f32 %v7885_v55, 0.0 }
 0x607   :  { %v15257_v58 = vpop.f32.mrf.mxu1  ;;  %v11103_v39 = vpop.f32.mrf.mxu0 }
 0x608   :  { %12311 = vst.msk [vmem:[%s22381_s7 + $0x8d8] sm:$0xff] %vm12027_vm2, %v11112_v38  ;;  %v7888_v17 = vadd.f32 %v20767_v49, %v15257_v58  ;;  %v11104_v63 = vadd.f32 %v20874_v35, %v11103_v39  ;;  %15766 = vmatprep.mubr.msk.bf16.mxu0 %vm5537_vm1, %v9089_v7  ;;  %v8771_v46 = vmax.f32 %v7877_v36, 0.0  ;;  %v22753_v38 = vld [vmem:[#allocation74_spill] sm:$0xff] }
 0x609   :  { %v7879_v26 = vpop.f32.mrf.mxu1  ;;  %v15672_v20 = vpop.f32.mrf.mxu0  ;;  %15767 = vmatmul.mubr.msk.bf16.gmra.mxu0 %vm5537_vm1, %v9090_v19 }
 0x60a   :  { %12309 = vst.msk [vmem:[%s22381_s7 + $0x8c8] sm:$0xff] %vm12027_vm2, %v11104_v63  ;;  %v7880_v32 = vadd.f32 %v20767_v49, %v7879_v26  ;;  %v11125_v27 = vadd.f32 %v20874_v35, %v15672_v20  ;;  %v8774_v11 = vmax.f32 %v7888_v17, 0.0  ;;  %v22754_v17 = vld [vmem:[#allocation169_spill] sm:$0xff] }
 0x60b   :  { %v15260_v21 = vpop.f32.mrf.mxu1  ;;  %15355 = vmatmul.mubr.msk.bf16.gmra.mxu1 %vm5537_vm1, %v22749_v12  ;;  %v11116_v30 = vpop.f32.mrf.mxu0 }
 0x60c   :  { %v8772_v14 = vmax.f32 %v7880_v32, 0.0  ;;  %12314 = vst.msk [vmem:[%s22381_s7 + $0x8f0] sm:$0xff] %vm12027_vm2, %v11125_v27  ;;  %v11117_v5 = vadd.f32 %v20874_v35, %v11116_v30  ;;  %15358 = vmatprep.mubr.msk.bf16.mxu1 %vm5537_vm1, %v22750_v28  ;;  %v9092_v52 = vpack.c.bf16 %v8774_v11, %v8773_v16  ;;  %v7901_v22 = vadd.f32 %v20767_v49, %v15260_v21 }
 0x60d   :  { %v7892_v3 = vpop.f32.mrf.mxu1  ;;  %v15673_v10 = vpop.f32.mrf.mxu0 }
 0x60e   :  { %v9091_v18 = vpack.c.bf16 %v8772_v14, %v8771_v46  ;;  %12312 = vst.msk [vmem:[%s22381_s7 + $0x8e0] sm:$0xff] %vm12027_vm2, %v11117_v5  ;;  %v11128_v48 = vadd.f32 %v20874_v35, %v15673_v10  ;;  %v7893_v9 = vadd.f32 %v20767_v49, %v7892_v3  ;;  %v8777_v62 = vmax.f32 %v7901_v22, 0.0 }
 0x60f   :  { %v15261_v45 = vpop.f32.mrf.mxu1  ;;  %v11119_v61 = vpop.f32.mrf.mxu0 }
 0x610   :  { %12315 = vst.msk [vmem:[%s22381_s7 + $0x8f8] sm:$0xff] %vm12027_vm2, %v11128_v48  ;;  %v7904_v6 = vadd.f32 %v20767_v49, %v15261_v45  ;;  %v11120_v1 = vadd.f32 %v20874_v35, %v11119_v61  ;;  %15770 = vmatprep.mubr.msk.bf16.mxu0 %vm5537_vm1, %v9091_v18  ;;  %v8775_v15 = vmax.f32 %v7893_v9, 0.0  ;;  %v22755_v48 = vld [vmem:[#allocation78_spill] sm:$0xff] }
 0x611   :  { %v7895_v51 = vpop.f32.mrf.mxu1  ;;  %v15676_v53 = vpop.f32.mrf.mxu0  ;;  %15771 = vmatmul.mubr.msk.bf16.gmra.mxu0 %vm5537_vm1, %v9092_v52 }
 0x612   :  { %12313 = vst.msk [vmem:[%s22381_s7 + $0x8e8] sm:$0xff] %vm12027_vm2, %v11120_v1  ;;  %v7896_v2 = vadd.f32 %v20767_v49, %v7895_v51  ;;  %v11141_v54 = vadd.f32 %v20874_v35, %v15676_v53  ;;  %v8778_v40 = vmax.f32 %v7904_v6, 0.0  ;;  %v22756_v6 = vld [vmem:[#allocation172_spill] sm:$0xff] }
 0x613   :  { %v15264_v41 = vpop.f32.mrf.mxu1  ;;  %15359 = vmatmul.mubr.msk.bf16.gmra.mxu1 %vm5537_vm1, %v22751_v57  ;;  %v11132_v56 = vpop.f32.mrf.mxu0 }
 0x614   :  { %v8776_v23 = vmax.f32 %v7896_v2, 0.0  ;;  %12318 = vst.msk [vmem:[%s22381_s7 + $0x910] sm:$0xff] %vm12027_vm2, %v11141_v54  ;;  %v11133_v59 = vadd.f32 %v20874_v35, %v11132_v56  ;;  %15362 = vmatprep.mubr.msk.bf16.mxu1 %vm5537_vm1, %v22752_v37  ;;  %v9094_v43 = vpack.c.bf16 %v8778_v40, %v8777_v62  ;;  %v7917_v8 = vadd.f32 %v20767_v49, %v15264_v41 }
 0x615   :  { %v7908_v33 = vpop.f32.mrf.mxu1  ;;  %v15677_v47 = vpop.f32.mrf.mxu0 }
 0x616   :  { %v9093_v44 = vpack.c.bf16 %v8776_v23, %v8775_v15  ;;  %12316 = vst.msk [vmem:[%s22381_s7 + $0x900] sm:$0xff] %vm12027_vm2, %v11133_v59  ;;  %v11144_v13 = vadd.f32 %v20874_v35, %v15677_v47  ;;  %v7909_v50 = vadd.f32 %v20767_v49, %v7908_v33  ;;  %v8781_v63 = vmax.f32 %v7917_v8, 0.0 }
 0x617   :  { %v15265_v60 = vpop.f32.mrf.mxu1  ;;  %v11135_v24 = vpop.f32.mrf.mxu0 }
 0x618   :  { %12319 = vst.msk [vmem:[%s22381_s7 + $0x918] sm:$0xff] %vm12027_vm2, %v11144_v13  ;;  %v7920_v34 = vadd.f32 %v20767_v49, %v15265_v60  ;;  %v11136_v29 = vadd.f32 %v20874_v35, %v11135_v24  ;;  %15774 = vmatprep.mubr.msk.bf16.mxu0 %vm5537_vm1, %v9093_v44  ;;  %v8779_v58 = vmax.f32 %v7909_v50, 0.0  ;;  %v22757_v13 = vld [vmem:[#allocation82_spill] sm:$0xff] }
 0x619   :  { %v7911_v31 = vpop.f32.mrf.mxu1  ;;  %v15680_v42 = vpop.f32.mrf.mxu0  ;;  %15775 = vmatmul.mubr.msk.bf16.gmra.mxu0 %vm5537_vm1, %v9094_v43 }
 0x61a   :  { %12317 = vst.msk [vmem:[%s22381_s7 + $0x908] sm:$0xff] %vm12027_vm2, %v11136_v29  ;;  %v7912_v0 = vadd.f32 %v20767_v49, %v7911_v31  ;;  %v11157_v4 = vadd.f32 %v20874_v35, %v15680_v42  ;;  %v8782_v25 = vmax.f32 %v7920_v34, 0.0  ;;  %v22758_v34 = vld [vmem:[#allocation175_spill] sm:$0xff] }
 0x61b   :  { %v15268_v7 = vpop.f32.mrf.mxu1  ;;  %15363 = vmatmul.mubr.msk.bf16.gmra.mxu1 %vm5537_vm1, %v22753_v38  ;;  %v11148_v19 = vpop.f32.mrf.mxu0 }
 0x61c   :  { %v8780_v39 = vmax.f32 %v7912_v0, 0.0  ;;  %12322 = vst.msk [vmem:[%s22381_s7 + $0x930] sm:$0xff] %vm12027_vm2, %v11157_v4  ;;  %v11149_v36 = vadd.f32 %v20874_v35, %v11148_v19  ;;  %15366 = vmatprep.mubr.msk.bf16.mxu1 %vm5537_vm1, %v22754_v17  ;;  %v9096_v27 = vpack.c.bf16 %v8782_v25, %v8781_v63  ;;  %v7933_v14 = vadd.f32 %v20767_v49, %v15268_v7 }
 0x61d   :  { %v7924_v55 = vpop.f32.mrf.mxu1  ;;  %v15681_v26 = vpop.f32.mrf.mxu0 }
 0x61e   :  { %v9095_v20 = vpack.c.bf16 %v8780_v39, %v8779_v58  ;;  %12320 = vst.msk [vmem:[%s22381_s7 + $0x920] sm:$0xff] %vm12027_vm2, %v11149_v36  ;;  %v11160_v32 = vadd.f32 %v20874_v35, %v15681_v26  ;;  %v7925_v12 = vadd.f32 %v20767_v49, %v7924_v55  ;;  %v8785_v1 = vmax.f32 %v7933_v14, 0.0 }
 0x61f   :  { %v15269_v11 = vpop.f32.mrf.mxu1  ;;  %v11151_v21 = vpop.f32.mrf.mxu0 }
 0x620   :  { %12323 = vst.msk [vmem:[%s22381_s7 + $0x938] sm:$0xff] %vm12027_vm2, %v11160_v32  ;;  %v7936_v30 = vadd.f32 %v20767_v49, %v15269_v11  ;;  %v11152_v46 = vadd.f32 %v20874_v35, %v11151_v21  ;;  %15778 = vmatprep.mubr.msk.bf16.mxu0 %vm5537_vm1, %v9095_v20  ;;  %v8783_v45 = vmax.f32 %v7925_v12, 0.0  ;;  %v22759_v32 = vld [vmem:[#allocation86_spill] sm:$0xff] }
 0x621   :  { %v7927_v5 = vpop.f32.mrf.mxu1  ;;  %v15684_v28 = vpop.f32.mrf.mxu0  ;;  %15779 = vmatmul.mubr.msk.bf16.gmra.mxu0 %vm5537_vm1, %v9096_v27 }
 0x622   :  { %12321 = vst.msk [vmem:[%s22381_s7 + $0x928] sm:$0xff] %vm12027_vm2, %v11152_v46  ;;  %v7928_v16 = vadd.f32 %v20767_v49, %v7927_v5  ;;  %v11173_v3 = vadd.f32 %v20874_v35, %v15684_v28  ;;  %v8786_v10 = vmax.f32 %v7936_v30, 0.0  ;;  %v22760_v30 = vld [vmem:[#allocation178_spill] sm:$0xff] }
 0x623   :  { %v15272_v18 = vpop.f32.mrf.mxu1  ;;  %15367 = vmatmul.mubr.msk.bf16.gmra.mxu1 %vm5537_vm1, %v22755_v48  ;;  %v11164_v52 = vpop.f32.mrf.mxu0 }
 0x624   :  { %v8784_v61 = vmax.f32 %v7928_v16, 0.0  ;;  %12326 = vst.msk [vmem:[%s22381_s7 + $0x950] sm:$0xff] %vm12027_vm2, %v11173_v3  ;;  %v11165_v9 = vadd.f32 %v20874_v35, %v11164_v52  ;;  %15370 = vmatprep.mubr.msk.bf16.mxu1 %vm5537_vm1, %v22756_v6  ;;  %v9098_v54 = vpack.c.bf16 %v8786_v10, %v8785_v1  ;;  %v7949_v23 = vadd.f32 %v20767_v49, %v15272_v18 }
 0x625   :  { %v7940_v22 = vpop.f32.mrf.mxu1  ;;  %v15685_v51 = vpop.f32.mrf.mxu0 }
 0x626   :  { %v9097_v53 = vpack.c.bf16 %v8784_v61, %v8783_v45  ;;  %12324 = vst.msk [vmem:[%s22381_s7 + $0x940] sm:$0xff] %vm12027_vm2, %v11165_v9  ;;  %v11176_v2 = vadd.f32 %v20874_v35, %v15685_v51  ;;  %v7941_v57 = vadd.f32 %v20767_v49, %v7940_v22  ;;  %v8789_v29 = vmax.f32 %v7949_v23, 0.0 }
 0x627   :  { %v15273_v40 = vpop.f32.mrf.mxu1  ;;  %v11167_v41 = vpop.f32.mrf.mxu0 }
 0x628   :  { %12327 = vst.msk [vmem:[%s22381_s7 + $0x958] sm:$0xff] %vm12027_vm2, %v11176_v2  ;;  %v7952_v56 = vadd.f32 %v20767_v49, %v15273_v40  ;;  %v11168_v15 = vadd.f32 %v20874_v35, %v11167_v41  ;;  %15782 = vmatprep.mubr.msk.bf16.mxu0 %vm5537_vm1, %v9097_v53  ;;  %v8787_v60 = vmax.f32 %v7941_v57, 0.0  ;;  %v22761_v2 = vld [vmem:[#allocation90_spill] sm:$0xff] }
 0x629   :  { %v7943_v59 = vpop.f32.mrf.mxu1  ;;  %v15688_v37 = vpop.f32.mrf.mxu0  ;;  %15783 = vmatmul.mubr.msk.bf16.gmra.mxu0 %vm5537_vm1, %v9098_v54 }
 0x62a   :  { %12325 = vst.msk [vmem:[%s22381_s7 + $0x948] sm:$0xff] %vm12027_vm2, %v11168_v15  ;;  %v7944_v62 = vadd.f32 %v20767_v49, %v7943_v59  ;;  %v11189_v33 = vadd.f32 %v20874_v35, %v15688_v37  ;;  %v8790_v47 = vmax.f32 %v7952_v56, 0.0 }
 0x62b   :  { %v15276_v44 = vpop.f32.mrf.mxu1  ;;  %15371 = vmatmul.mubr.msk.bf16.gmra.mxu1 %vm5537_vm1, %v22757_v13  ;;  %v11180_v43 = vpop.f32.mrf.mxu0 }
 0x62c   :  { %v8788_v24 = vmax.f32 %v7944_v62, 0.0  ;;  %12330 = vst.msk [vmem:[%s22381_s7 + $0x970] sm:$0xff] %vm12027_vm2, %v11189_v33  ;;  %v11181_v50 = vadd.f32 %v20874_v35, %v11180_v43  ;;  %15374 = vmatprep.mubr.msk.bf16.mxu1 %vm5537_vm1, %v22758_v34  ;;  %v9100_v4 = vpack.c.bf16 %v8790_v47, %v8789_v29  ;;  %v7965_v39 = vadd.f32 %v20767_v49, %v15276_v44 }
 0x62d   :  { %v7956_v8 = vpop.f32.mrf.mxu1  ;;  %v15689_v31 = vpop.f32.mrf.mxu0 }
 0x62e   :  { %v9099_v42 = vpack.c.bf16 %v8788_v24, %v8787_v60  ;;  %12328 = vst.msk [vmem:[%s22381_s7 + $0x960] sm:$0xff] %vm12027_vm2, %v11181_v50  ;;  %v11192_v0 = vadd.f32 %v20874_v35, %v15689_v31  ;;  %v7957_v38 = vadd.f32 %v20767_v49, %v7956_v8  ;;  %v8793_v46 = vmax.f32 %v7965_v39, 0.0 }
 0x62f   :  { %v15277_v25 = vpop.f32.mrf.mxu1  ;;  %v11183_v7 = vpop.f32.mrf.mxu0 }
 0x630   :  { %12331 = vst.msk [vmem:[%s22381_s7 + $0x978] sm:$0xff] %vm12027_vm2, %v11192_v0  ;;  %v7968_v19 = vadd.f32 %v20767_v49, %v15277_v25  ;;  %v11184_v58 = vadd.f32 %v20874_v35, %v11183_v7  ;;  %15786 = vmatprep.mubr.msk.bf16.mxu0 %vm5537_vm1, %v9099_v42  ;;  %v8791_v11 = vmax.f32 %v7957_v38, 0.0 }
 0x631   :  { %v7959_v36 = vpop.f32.mrf.mxu1  ;;  %v15692_v17 = vpop.f32.mrf.mxu0  ;;  %15787 = vmatmul.mubr.msk.bf16.gmra.mxu0 %vm5537_vm1, %v9100_v4 }
 0x632   :  { %12329 = vst.msk [vmem:[%s22381_s7 + $0x968] sm:$0xff] %vm12027_vm2, %v11184_v58  ;;  %v7960_v63 = vadd.f32 %v20767_v49, %v7959_v36  ;;  %v11205_v55 = vadd.f32 %v20874_v35, %v15692_v17  ;;  %v8794_v26 = vmax.f32 %v7968_v19, 0.0 }
 0x633   :  { %v15280_v20 = vpop.f32.mrf.mxu1  ;;  %15375 = vmatmul.mubr.msk.bf16.gmra.mxu1 %vm5537_vm1, %v22759_v32  ;;  %v11196_v27 = vpop.f32.mrf.mxu0 }
 0x634   :  { %v8792_v21 = vmax.f32 %v7960_v63, 0.0  ;;  %12334 = vst.msk [vmem:[%s22381_s7 + $0x990] sm:$0xff] %vm12027_vm2, %v11205_v55  ;;  %v11197_v12 = vadd.f32 %v20874_v35, %v11196_v27  ;;  %15378 = vmatprep.mubr.msk.bf16.mxu1 %vm5537_vm1, %v22760_v30  ;;  %v9102_v3 = vpack.c.bf16 %v8794_v26, %v8793_v46  ;;  %v7981_v61 = vadd.f32 %v20767_v49, %v15280_v20 }
 0x635   :  { %v7972_v14 = vpop.f32.mrf.mxu1  ;;  %v15693_v5 = vpop.f32.mrf.mxu0 }
 0x636   :  { %v9101_v28 = vpack.c.bf16 %v8792_v21, %v8791_v11  ;;  %12332 = vst.msk [vmem:[%s22381_s7 + $0x980] sm:$0xff] %vm12027_vm2, %v11197_v12  ;;  %v11208_v16 = vadd.f32 %v20874_v35, %v15693_v5  ;;  %v7973_v48 = vadd.f32 %v20767_v49, %v7972_v14  ;;  %v8797_v56 = vmax.f32 %v7981_v61, 0.0 }
 0x637   :  { %v15281_v10 = vpop.f32.mrf.mxu1  ;;  %v11199_v18 = vpop.f32.mrf.mxu0 }
 0x638   :  { %12335 = vst.msk [vmem:[%s22381_s7 + $0x998] sm:$0xff] %vm12027_vm2, %v11208_v16  ;;  %v7984_v52 = vadd.f32 %v20767_v49, %v15281_v10  ;;  %v11200_v45 = vadd.f32 %v20874_v35, %v11199_v18  ;;  %15790 = vmatprep.mubr.msk.bf16.mxu0 %vm5537_vm1, %v9101_v28  ;;  %v8795_v40 = vmax.f32 %v7973_v48, 0.0 }
 0x639   :  { %v7975_v9 = vpop.f32.mrf.mxu1  ;;  %v15696_v6 = vpop.f32.mrf.mxu0  ;;  %15791 = vmatmul.mubr.msk.bf16.gmra.mxu0 %vm5537_vm1, %v9102_v3 }
 0x63a   :  { %12333 = vst.msk [vmem:[%s22381_s7 + $0x988] sm:$0xff] %vm12027_vm2, %v11200_v45  ;;  %v7976_v1 = vadd.f32 %v20767_v49, %v7975_v9  ;;  %v11221_v22 = vadd.f32 %v20874_v35, %v15696_v6  ;;  %v8798_v51 = vmax.f32 %v7984_v52, 0.0 }
 0x63b   :  { %v15284_v53 = vpop.f32.mrf.mxu1  ;;  %15379 = vmatmul.mubr.msk.bf16.gmra.mxu1 %vm5537_vm1, %v22761_v2  ;;  %v11212_v54 = vpop.f32.mrf.mxu0 }
 0x63c   :  { %v8796_v41 = vmax.f32 %v7976_v1, 0.0  ;;  %12338 = vst.msk [vmem:[%s22381_s7 + $0x9b0] sm:$0xff] %vm12027_vm2, %v11221_v22  ;;  %v11213_v57 = vadd.f32 %v20874_v35, %v11212_v54  ;;  %v9104_v62 = vpack.c.bf16 %v8798_v51, %v8797_v56  ;;  %v7997_v60 = vadd.f32 %v20767_v49, %v15284_v53 }
 0x63d   :  { %v7988_v15 = vpop.f32.mrf.mxu1  ;;  %v15697_v23 = vpop.f32.mrf.mxu0 }
 0x63e   :  { %v9103_v59 = vpack.c.bf16 %v8796_v41, %v8795_v40  ;;  %12336 = vst.msk [vmem:[%s22381_s7 + $0x9a0] sm:$0xff] %vm12027_vm2, %v11213_v57  ;;  %v11224_v37 = vadd.f32 %v20874_v35, %v15697_v23  ;;  %v7989_v44 = vadd.f32 %v20767_v49, %v7988_v15  ;;  %v8801_v7 = vmax.f32 %v7997_v60, 0.0  ;;  %v21283_v60 = vld [vmem:[#allocation7] ss:$0 sm:$0xff] }
 0x63f   :  { %v15285_v33 = vpop.f32.mrf.mxu1  ;;  %v11215_v47 = vpop.f32.mrf.mxu0 }
 0x640   :  { %12339 = vst.msk [vmem:[%s22381_s7 + $0x9b8] sm:$0xff] %vm12027_vm2, %v11224_v37  ;;  %v8000_v13 = vadd.f32 %v20767_v49, %v15285_v33  ;;  %v11216_v43 = vadd.f32 %v20874_v35, %v11215_v47  ;;  %15794 = vmatprep.mubr.msk.bf16.mxu0 %vm5537_vm1, %v9103_v59  ;;  %v8799_v0 = vmax.f32 %v7989_v44, 0.0 }
 0x641   :  { %v7991_v24 = vpop.f32.mrf.mxu1  ;;  %v15700_v50 = vpop.f32.mrf.mxu0  ;;  %15795 = vmatmul.mubr.msk.bf16.gmra.mxu0 %vm5537_vm1, %v9104_v62 }
 0x642   :  { %12337 = vst.msk [vmem:[%s22381_s7 + $0x9a8] sm:$0xff] %vm12027_vm2, %v11216_v43  ;;  %v7992_v34 = vadd.f32 %v20767_v49, %v7991_v24  ;;  %v11237_v29 = vadd.f32 %v20874_v35, %v15700_v50  ;;  %v8802_v8 = vmax.f32 %v8000_v13, 0.0 }
 0x643   :  { %v15288_v31 = vpop.f32.mrf.mxu1  ;;  %v11228_v42 = vpop.f32.mrf.mxu0 }
 0x644   :  { %v8800_v4 = vmax.f32 %v7992_v34, 0.0  ;;  %12342 = vst.msk [vmem:[%s22381_s7 + $0x9d0] sm:$0xff] %vm12027_vm2, %v11237_v29  ;;  %v11229_v25 = vadd.f32 %v20874_v35, %v11228_v42  ;;  %v9106_v36 = vpack.c.bf16 %v8802_v8, %v8801_v7  ;;  %v8013_v32 = vadd.f32 %v20767_v49, %v15288_v31 }
 0x645   :  { %v8004_v38 = vpop.f32.mrf.mxu1  ;;  %v15701_v19 = vpop.f32.mrf.mxu0 }
 0x646   :  { %v9105_v58 = vpack.c.bf16 %v8800_v4, %v8799_v0  ;;  %12340 = vst.msk [vmem:[%s22381_s7 + $0x9c0] sm:$0xff] %vm12027_vm2, %v11229_v25  ;;  %v11240_v39 = vadd.f32 %v20874_v35, %v15701_v19  ;;  %v8005_v55 = vadd.f32 %v20767_v49, %v8004_v38  ;;  %v8805_v3 = vmax.f32 %v8013_v32, 0.0 }
 0x647   :  { %v15289_v17 = vpop.f32.mrf.mxu1  ;;  %v11231_v63 = vpop.f32.mrf.mxu0 }
 0x648   :  { %12343 = vst.msk [vmem:[%s22381_s7 + $0x9d8] sm:$0xff] %vm12027_vm2, %v11240_v39  ;;  %v8016_v26 = vadd.f32 %v20767_v49, %v15289_v17  ;;  %v11232_v20 = vadd.f32 %v20874_v35, %v11231_v63  ;;  %15798 = vmatprep.mubr.msk.bf16.mxu0 %vm5537_vm1, %v9105_v58  ;;  %v8803_v5 = vmax.f32 %v8005_v55, 0.0 }
 0x649   :  { %v8007_v27 = vpop.f32.mrf.mxu1  ;;  %v15704_v11 = vpop.f32.mrf.mxu0  ;;  %15799 = vmatmul.mubr.msk.bf16.gmra.mxu0 %vm5537_vm1, %v9106_v36 }
 0x64a   :  { %12341 = vst.msk [vmem:[%s22381_s7 + $0x9c8] sm:$0xff] %vm12027_vm2, %v11232_v20  ;;  %v8008_v21 = vadd.f32 %v20767_v49, %v8007_v27  ;;  %v11253_v12 = vadd.f32 %v20874_v35, %v15704_v11  ;;  %v8806_v30 = vmax.f32 %v8016_v26, 0.0 }
 0x64b   :  { %v15292_v46 = vpop.f32.mrf.mxu1  ;;  %v11244_v14 = vpop.f32.mrf.mxu0 }
 0x64c   :  { %v8804_v28 = vmax.f32 %v8008_v21, 0.0  ;;  %12346 = vst.msk [vmem:[%s22381_s7 + $0x9f0] sm:$0xff] %vm12027_vm2, %v11253_v12  ;;  %v11245_v16 = vadd.f32 %v20874_v35, %v11244_v14  ;;  %v9108_v45 = vpack.c.bf16 %v8806_v30, %v8805_v3  ;;  %v8029_v51 = vadd.f32 %v20767_v49, %v15292_v46 }
 0x64d   :  { %v8020_v10 = vpop.f32.mrf.mxu1  ;;  %v15705_v18 = vpop.f32.mrf.mxu0 }
 0x64e   :  { %v9107_v48 = vpack.c.bf16 %v8804_v28, %v8803_v5  ;;  %12344 = vst.msk [vmem:[%s22381_s7 + $0x9e0] sm:$0xff] %vm12027_vm2, %v11245_v16  ;;  %v11256_v52 = vadd.f32 %v20874_v35, %v15705_v18  ;;  %v8021_v6 = vadd.f32 %v20767_v49, %v8020_v10  ;;  %v8809_v37 = vmax.f32 %v8029_v51, 0.0 }
 0x64f   :  { %v15293_v61 = vpop.f32.mrf.mxu1  ;;  %v11247_v9 = vpop.f32.mrf.mxu0 }
 0x650   :  { %12347 = vst.msk [vmem:[%s22381_s7 + $0x9f8] sm:$0xff] %vm12027_vm2, %v11256_v52  ;;  %v8032_v1 = vadd.f32 %v20767_v49, %v15293_v61  ;;  %v11248_v22 = vadd.f32 %v20874_v35, %v11247_v9  ;;  %15802 = vmatprep.mubr.msk.bf16.mxu0 %vm5537_vm1, %v9107_v48  ;;  %v8807_v15 = vmax.f32 %v8021_v6, 0.0 }
 0x651   :  { %v8023_v53 = vpop.f32.mrf.mxu1  ;;  %v15708_v2 = vpop.f32.mrf.mxu0  ;;  %15803 = vmatmul.mubr.msk.bf16.gmra.mxu0 %vm5537_vm1, %v9108_v45 }
 0x652   :  { %12345 = vst.msk [vmem:[%s22381_s7 + $0x9e8] sm:$0xff] %vm12027_vm2, %v11248_v22  ;;  %v8024_v54 = vadd.f32 %v20767_v49, %v8023_v53  ;;  %v11269_v40 = vadd.f32 %v20874_v35, %v15708_v2  ;;  %v8810_v41 = vmax.f32 %v8032_v1, 0.0 }
 0x653   :  { %v15296_v57 = vpop.f32.mrf.mxu1  ;;  %v11260_v56 = vpop.f32.mrf.mxu0 }
 0x654   :  { %v8808_v23 = vmax.f32 %v8024_v54, 0.0  ;;  %12350 = vst.msk [vmem:[%s22381_s7 + $0xa10] sm:$0xff] %vm12027_vm2, %v11269_v40  ;;  %v11261_v59 = vadd.f32 %v20874_v35, %v11260_v56  ;;  %v9110_v44 = vpack.c.bf16 %v8810_v41, %v8809_v37  ;;  %v8045_v29 = vadd.f32 %v21283_v60, %v15296_v57 }
 0x655   :  { %v8036_v62 = vpop.f32.mrf.mxu1  ;;  %v15709_v33 = vpop.f32.mrf.mxu0 }
 0x656   :  { %v9109_v47 = vpack.c.bf16 %v8808_v23, %v8807_v15  ;;  %12348 = vst.msk [vmem:[%s22381_s7 + $0xa00] sm:$0xff] %vm12027_vm2, %v11261_v59  ;;  %v11272_v49 = vadd.f32 %v20874_v35, %v15709_v33  ;;  %v8037_v24 = vadd.f32 %v21283_v60, %v8036_v62  ;;  %v8813_v39 = vmax.f32 %v8045_v29, 0.0 }
 0x657   :  { %v15297_v13 = vpop.f32.mrf.mxu1  ;;  %v11263_v43 = vpop.f32.mrf.mxu0 }
 0x658   :  { %12351 = vst.msk [vmem:[%s22381_s7 + $0xa18] sm:$0xff] %vm12027_vm2, %v11272_v49  ;;  %v8048_v50 = vadd.f32 %v21283_v60, %v15297_v13  ;;  %v11264_v34 = vadd.f32 %v20874_v35, %v11263_v43  ;;  %15806 = vmatprep.mubr.msk.bf16.mxu0 %vm5537_vm1, %v9109_v47  ;;  %v8811_v38 = vmax.f32 %v8037_v24, 0.0 }
 0x659   :  { %v8039_v8 = vpop.f32.mrf.mxu1  ;;  %v15712_v31 = vpop.f32.mrf.mxu0  ;;  %15807 = vmatmul.mubr.msk.bf16.gmra.mxu0 %vm5537_vm1, %v9110_v44 }
 0x65a   :  { %12349 = vst.msk [vmem:[%s22381_s7 + $0xa08] sm:$0xff] %vm12027_vm2, %v11264_v34  ;;  %v8040_v42 = vadd.f32 %v21283_v60, %v8039_v8  ;;  %v11285_v0 = vadd.f32 %v20874_v35, %v15712_v31  ;;  %v8814_v4 = vmax.f32 %v8048_v50, 0.0 }
 0x65b   :  { %v15300_v25 = vpop.f32.mrf.mxu1  ;;  %v11276_v7 = vpop.f32.mrf.mxu0 }
 0x65c   :  { %v8812_v19 = vmax.f32 %v8040_v42, 0.0  ;;  %12354 = vst.msk [vmem:[%s22381_s7 + $0xa30] sm:$0xff] %vm12027_vm2, %v11285_v0  ;;  %v11277_v58 = vadd.f32 %v20874_v35, %v11276_v7  ;;  %v9112_v26 = vpack.c.bf16 %v8814_v4, %v8813_v39  ;;  %v8061_v12 = vadd.f32 %v21283_v60, %v15300_v25 }
 0x65d   :  { %v8052_v36 = vpop.f32.mrf.mxu1  ;;  %v15713_v17 = vpop.f32.mrf.mxu0 }
 0x65e   :  { %v9111_v63 = vpack.c.bf16 %v8812_v19, %v8811_v38  ;;  %12352 = vst.msk [vmem:[%s22381_s7 + $0xa20] sm:$0xff] %vm12027_vm2, %v11277_v58  ;;  %v11288_v55 = vadd.f32 %v20874_v35, %v15713_v17  ;;  %v8053_v27 = vadd.f32 %v21283_v60, %v8052_v36  ;;  %v8817_v52 = vmax.f32 %v8061_v12, 0.0  ;;  %v21378_v38 = vld [vmem:[#allocation9] ss:$0 sm:$0xff] }
 0x65f   :  { %v15301_v20 = vpop.f32.mrf.mxu1  ;;  %v11279_v32 = vpop.f32.mrf.mxu0 }
 0x660   :  { %12355 = vst.msk [vmem:[%s22381_s7 + $0xa38] sm:$0xff] %vm12027_vm2, %v11288_v55  ;;  %v8064_v11 = vadd.f32 %v21283_v60, %v15301_v20  ;;  %v11280_v21 = vadd.f32 %v20874_v35, %v11279_v32  ;;  %15810 = vmatprep.mubr.msk.bf16.mxu0 %vm5537_vm1, %v9111_v63  ;;  %v8815_v10 = vmax.f32 %v8053_v27, 0.0 }
 0x661   :  { %v8055_v30 = vpop.f32.mrf.mxu1  ;;  %v15716_v46 = vpop.f32.mrf.mxu0  ;;  %15811 = vmatmul.mubr.msk.bf16.gmra.mxu0 %vm5537_vm1, %v9112_v26 }
 0x662   :  { %12353 = vst.msk [vmem:[%s22381_s7 + $0xa28] sm:$0xff] %vm12027_vm2, %v11280_v21  ;;  %v8056_v14 = vadd.f32 %v21283_v60, %v8055_v30  ;;  %v11301_v5 = vadd.f32 %v20874_v35, %v15716_v46  ;;  %v8818_v28 = vmax.f32 %v8064_v11, 0.0 }
 0x663   :  { %v15304_v16 = vpop.f32.mrf.mxu1  ;;  %v11292_v3 = vpop.f32.mrf.mxu0 }
 0x664   :  { %v8816_v18 = vmax.f32 %v8056_v14, 0.0  ;;  %12358 = vst.msk [vmem:[%s22381_s7 + $0xa50] sm:$0xff] %vm12027_vm2, %v11301_v5  ;;  %v11293_v48 = vadd.f32 %v20874_v35, %v11292_v3  ;;  %v9114_v1 = vpack.c.bf16 %v8818_v28, %v8817_v52  ;;  %v8077_v40 = vadd.f32 %v21283_v60, %v15304_v16 }
 0x665   :  { %v8068_v45 = vpop.f32.mrf.mxu1  ;;  %v15717_v61 = vpop.f32.mrf.mxu0 }
 0x666   :  { %v9113_v9 = vpack.c.bf16 %v8816_v18, %v8815_v10  ;;  %12356 = vst.msk [vmem:[%s22381_s7 + $0xa40] sm:$0xff] %vm12027_vm2, %v11293_v48  ;;  %v11304_v6 = vadd.f32 %v20874_v35, %v15717_v61  ;;  %v8069_v53 = vadd.f32 %v21283_v60, %v8068_v45  ;;  %v8821_v49 = vmax.f32 %v8077_v40, 0.0 }
 0x667   :  { %v15305_v22 = vpop.f32.mrf.mxu1  ;;  %v11295_v51 = vpop.f32.mrf.mxu0 }
 0x668   :  { %12359 = vst.msk [vmem:[%s22381_s7 + $0xa58] sm:$0xff] %vm12027_vm2, %v11304_v6  ;;  %v8080_v2 = vadd.f32 %v21283_v60, %v15305_v22  ;;  %v11296_v54 = vadd.f32 %v20874_v35, %v11295_v51  ;;  %15814 = vmatprep.mubr.msk.bf16.mxu0 %vm5537_vm1, %v9113_v9  ;;  %v8819_v62 = vmax.f32 %v8069_v53, 0.0 }
 0x669   :  { %v8071_v41 = vpop.f32.mrf.mxu1  ;;  %v15720_v57 = vpop.f32.mrf.mxu0  ;;  %15815 = vmatmul.mubr.msk.bf16.gmra.mxu0 %vm5537_vm1, %v9114_v1 }
 0x66a   :  { %12357 = vst.msk [vmem:[%s22381_s7 + $0xa48] sm:$0xff] %vm12027_vm2, %v11296_v54  ;;  %v8072_v56 = vadd.f32 %v21283_v60, %v8071_v41  ;;  %v11317_v15 = vadd.f32 %v20874_v35, %v15720_v57  ;;  %v8822_v23 = vmax.f32 %v8080_v2, 0.0 }
 0x66b   :  { %v15308_v59 = vpop.f32.mrf.mxu1  ;;  %v11308_v37 = vpop.f32.mrf.mxu0 }
 0x66c   :  { %v8820_v33 = vmax.f32 %v8072_v56, 0.0  ;;  %12362 = vst.msk [vmem:[%s22381_s7 + $0xa70] sm:$0xff] %vm12027_vm2, %v11317_v15  ;;  %v11309_v47 = vadd.f32 %v20874_v35, %v11308_v37  ;;  %v9116_v50 = vpack.c.bf16 %v8822_v23, %v8821_v49  ;;  %v8093_v0 = vadd.f32 %v21283_v60, %v15308_v59 }
 0x66d   :  { %v8084_v44 = vpop.f32.mrf.mxu1  ;;  %v15721_v13 = vpop.f32.mrf.mxu0 }
 0x66e   :  { %v9115_v43 = vpack.c.bf16 %v8820_v33, %v8819_v62  ;;  %12360 = vst.msk [vmem:[%s22381_s7 + $0xa60] sm:$0xff] %vm12027_vm2, %v11309_v47  ;;  %v11320_v24 = vadd.f32 %v20874_v35, %v15721_v13  ;;  %v8085_v8 = vadd.f32 %v21283_v60, %v8084_v44  ;;  %v8825_v55 = vmax.f32 %v8093_v0, 0.0 }
 0x66f   :  { %v15309_v34 = vpop.f32.mrf.mxu1  ;;  %v11311_v29 = vpop.f32.mrf.mxu0 }
 0x670   :  { %12363 = vst.msk [vmem:[%s22381_s7 + $0xa78] sm:$0xff] %vm12027_vm2, %v11320_v24  ;;  %v8096_v31 = vadd.f32 %v21283_v60, %v15309_v34  ;;  %v11312_v42 = vadd.f32 %v20874_v35, %v11311_v29  ;;  %15818 = vmatprep.mubr.msk.bf16.mxu0 %vm5537_vm1, %v9115_v43  ;;  %v8823_v36 = vmax.f32 %v8085_v8, 0.0 }
 0x671   :  { %v8087_v4 = vpop.f32.mrf.mxu1  ;;  %v15724_v25 = vpop.f32.mrf.mxu0  ;;  %15819 = vmatmul.mubr.msk.bf16.gmra.mxu0 %vm5537_vm1, %v9116_v50 }
 0x672   :  { %12361 = vst.msk [vmem:[%s22381_s7 + $0xa68] sm:$0xff] %vm12027_vm2, %v11312_v42  ;;  %v8088_v7 = vadd.f32 %v21283_v60, %v8087_v4  ;;  %v11333_v19 = vadd.f32 %v21378_v38, %v15724_v25  ;;  %v8826_v35 = vmax.f32 %v8096_v31, 0.0 }
 0x673   :  { %v15312_v58 = vpop.f32.mrf.mxu1  ;;  %v11324_v39 = vpop.f32.mrf.mxu0 }
 0x674   :  { %v8824_v17 = vmax.f32 %v8088_v7, 0.0  ;;  %12366 = vst.msk [vmem:[%s22381_s7 + $0xa90] sm:$0xff] %vm12027_vm2, %v11333_v19  ;;  %v11325_v63 = vadd.f32 %v21378_v38, %v11324_v39  ;;  %v9118_v11 = vpack.c.bf16 %v8826_v35, %v8825_v55  ;;  %v8109_v5 = vadd.f32 %v21283_v60, %v15312_v58 }
 0x675   :  { %v8100_v26 = vpop.f32.mrf.mxu1  ;;  %v15725_v20 = vpop.f32.mrf.mxu0 }
 0x676   :  { %v9117_v32 = vpack.c.bf16 %v8824_v17, %v8823_v36  ;;  %12364 = vst.msk [vmem:[%s22381_s7 + $0xa80] sm:$0xff] %vm12027_vm2, %v11325_v63  ;;  %v11336_v27 = vadd.f32 %v21378_v38, %v15725_v20  ;;  %v8101_v30 = vadd.f32 %v21283_v60, %v8100_v26  ;;  %v8829_v6 = vmax.f32 %v8109_v5, 0.0 }
 0x677   :  { %v15313_v21 = vpop.f32.mrf.mxu1  ;;  %v11327_v12 = vpop.f32.mrf.mxu0 }
 0x678   :  { %12367 = vst.msk [vmem:[%s22381_s7 + $0xa98] sm:$0xff] %vm12027_vm2, %v11336_v27  ;;  %v8112_v46 = vadd.f32 %v21283_v60, %v15313_v21  ;;  %v11328_v14 = vadd.f32 %v21378_v38, %v11327_v12  ;;  %15822 = vmatprep.mubr.msk.bf16.mxu0 %vm5537_vm1, %v9117_v32  ;;  %v8827_v45 = vmax.f32 %v8101_v30, 0.0 }
 0x679   :  { %v8103_v28 = vpop.f32.mrf.mxu1  ;;  %v15728_v16 = vpop.f32.mrf.mxu0  ;;  %15823 = vmatmul.mubr.msk.bf16.gmra.mxu0 %vm5537_vm1, %v9118_v11 }
 0x67a   :  { %12365 = vst.msk [vmem:[%s22381_s7 + $0xa88] sm:$0xff] %vm12027_vm2, %v11328_v14  ;;  %v8104_v3 = vadd.f32 %v21283_v60, %v8103_v28  ;;  %v11349_v10 = vadd.f32 %v21378_v38, %v15728_v16  ;;  %v8830_v18 = vmax.f32 %v8112_v46, 0.0 }
 0x67b   :  { %v15316_v48 = vpop.f32.mrf.mxu1  ;;  %v11340_v52 = vpop.f32.mrf.mxu0 }
 0x67c   :  { %v8828_v61 = vmax.f32 %v8104_v3, 0.0  ;;  %12370 = vst.msk [vmem:[%s22381_s7 + $0xab0] sm:$0xff] %vm12027_vm2, %v11349_v10  ;;  %v11341_v9 = vadd.f32 %v21378_v38, %v11340_v52  ;;  %v9120_v2 = vpack.c.bf16 %v8830_v18, %v8829_v6  ;;  %v8125_v15 = vadd.f32 %v21283_v60, %v15316_v48 }
 0x67d   :  { %v8116_v1 = vpop.f32.mrf.mxu1  ;;  %v15729_v22 = vpop.f32.mrf.mxu0 }
 0x67e   :  { %v9119_v51 = vpack.c.bf16 %v8828_v61, %v8827_v45  ;;  %12368 = vst.msk [vmem:[%s22381_s7 + $0xaa0] sm:$0xff] %vm12027_vm2, %v11341_v9  ;;  %v11352_v53 = vadd.f32 %v21378_v38, %v15729_v22  ;;  %v8117_v41 = vadd.f32 %v21283_v60, %v8116_v1  ;;  %v8833_v24 = vmax.f32 %v8125_v15, 0.0 }
 0x67f   :  { %v15317_v54 = vpop.f32.mrf.mxu1  ;;  %v11343_v40 = vpop.f32.mrf.mxu0 }
 0x680   :  { %12371 = vst.msk [vmem:[%s22381_s7 + $0xab8] sm:$0xff] %vm12027_vm2, %v11352_v53  ;;  %v8128_v57 = vadd.f32 %v21283_v60, %v15317_v54  ;;  %v11344_v56 = vadd.f32 %v21378_v38, %v11343_v40  ;;  %15826 = vmatprep.mubr.msk.bf16.mxu0 %vm5537_vm1, %v9119_v51  ;;  %v8831_v44 = vmax.f32 %v8117_v41, 0.0 }
 0x681   :  { %v8119_v23 = vpop.f32.mrf.mxu1  ;;  %v15732_v59 = vpop.f32.mrf.mxu0  ;;  %15827 = vmatmul.mubr.msk.bf16.gmra.mxu0 %vm5537_vm1, %v9120_v2 }
 0x682   :  { %12369 = vst.msk [vmem:[%s22381_s7 + $0xaa8] sm:$0xff] %vm12027_vm2, %v11344_v56  ;;  %v8120_v37 = vadd.f32 %v21283_v60, %v8119_v23  ;;  %v11365_v62 = vadd.f32 %v21378_v38, %v15732_v59  ;;  %v8834_v33 = vmax.f32 %v8128_v57, 0.0 }
 0x683   :  { %v15320_v47 = vpop.f32.mrf.mxu1  ;;  %v11356_v49 = vpop.f32.mrf.mxu0 }
 0x684   :  { %v8832_v13 = vmax.f32 %v8120_v37, 0.0  ;;  %12374 = vst.msk [vmem:[%s22381_s7 + $0xad0] sm:$0xff] %vm12027_vm2, %v11365_v62  ;;  %v11357_v43 = vadd.f32 %v21378_v38, %v11356_v49  ;;  %v9122_v31 = vpack.c.bf16 %v8834_v33, %v8833_v24  ;;  %v8141_v19 = vadd.f32 %v21283_v60, %v15320_v47 }
 0x685   :  { %v8132_v50 = vpop.f32.mrf.mxu1  ;;  %v15733_v34 = vpop.f32.mrf.mxu0 }
 0x686   :  { %v9121_v29 = vpack.c.bf16 %v8832_v13, %v8831_v44  ;;  %12372 = vst.msk [vmem:[%s22381_s7 + $0xac0] sm:$0xff] %vm12027_vm2, %v11357_v43  ;;  %v11368_v8 = vadd.f32 %v21378_v38, %v15733_v34  ;;  %v8133_v4 = vadd.f32 %v21283_v60, %v8132_v50  ;;  %v8837_v27 = vmax.f32 %v8141_v19, 0.0 }
 0x687   :  { %v15321_v42 = vpop.f32.mrf.mxu1  ;;  %v11359_v0 = vpop.f32.mrf.mxu0 }
 0x688   :  { %12375 = vst.msk [vmem:[%s22381_s7 + $0xad8] sm:$0xff] %vm12027_vm2, %v11368_v8  ;;  %v8144_v25 = vadd.f32 %v21283_v60, %v15321_v42  ;;  %v11360_v7 = vadd.f32 %v21378_v38, %v11359_v0  ;;  %15830 = vmatprep.mubr.msk.bf16.mxu0 %vm5537_vm1, %v9121_v29  ;;  %v8835_v26 = vmax.f32 %v8133_v4, 0.0 }
 0x689   :  { %v8135_v35 = vpop.f32.mrf.mxu1  ;;  %v15736_v58 = vpop.f32.mrf.mxu0  ;;  %15831 = vmatmul.mubr.msk.bf16.gmra.mxu0 %vm5537_vm1, %v9122_v31 }
 0x68a   :  { %12373 = vst.msk [vmem:[%s22381_s7 + $0xac8] sm:$0xff] %vm12027_vm2, %v11360_v7  ;;  %v8136_v39 = vadd.f32 %v21283_v60, %v8135_v35  ;;  %v11381_v36 = vadd.f32 %v21378_v38, %v15736_v58  ;;  %v8838_v17 = vmax.f32 %v8144_v25, 0.0 }
 0x68b   :  { %v15324_v63 = vpop.f32.mrf.mxu1  ;;  %v11372_v55 = vpop.f32.mrf.mxu0 }
 0x68c   :  { %v8836_v20 = vmax.f32 %v8136_v39, 0.0  ;;  %12378 = vst.msk [vmem:[%s22381_s7 + $0xaf0] sm:$0xff] %vm12027_vm2, %v11381_v36  ;;  %v11373_v32 = vadd.f32 %v21378_v38, %v11372_v55  ;;  %v9124_v46 = vpack.c.bf16 %v8838_v17, %v8837_v27  ;;  %v8157_v10 = vadd.f32 %v21283_v60, %v15324_v63 }
 0x68d   :  { %v8148_v11 = vpop.f32.mrf.mxu1  ;;  %v15737_v21 = vpop.f32.mrf.mxu0 }
 0x68e   :  { %v9123_v12 = vpack.c.bf16 %v8836_v20, %v8835_v26  ;;  %12376 = vst.msk [vmem:[%s22381_s7 + $0xae0] sm:$0xff] %vm12027_vm2, %v11373_v32  ;;  %v11384_v30 = vadd.f32 %v21378_v38, %v15737_v21  ;;  %v8149_v28 = vadd.f32 %v21283_v60, %v8148_v11  ;;  %v8841_v53 = vmax.f32 %v8157_v10, 0.0 }
 0x68f   :  { %v15325_v14 = vpop.f32.mrf.mxu1  ;;  %v11375_v5 = vpop.f32.mrf.mxu0 }
 0x690   :  { %12379 = vst.msk [vmem:[%s22381_s7 + $0xaf8] sm:$0xff] %vm12027_vm2, %v11384_v30  ;;  %v8160_v16 = vadd.f32 %v21283_v60, %v15325_v14  ;;  %v11376_v3 = vadd.f32 %v21378_v38, %v11375_v5  ;;  %15834 = vmatprep.mubr.msk.bf16.mxu0 %vm5537_vm1, %v9123_v12  ;;  %v8839_v1 = vmax.f32 %v8149_v28, 0.0 }
 0x691   :  { %v8151_v18 = vpop.f32.mrf.mxu1  ;;  %v15740_v48 = vpop.f32.mrf.mxu0  ;;  %15835 = vmatmul.mubr.msk.bf16.gmra.mxu0 %vm5537_vm1, %v9124_v46 }
 0x692   :  { %12377 = vst.msk [vmem:[%s22381_s7 + $0xae8] sm:$0xff] %vm12027_vm2, %v11376_v3  ;;  %v8152_v52 = vadd.f32 %v21283_v60, %v8151_v18  ;;  %v11397_v45 = vadd.f32 %v21378_v38, %v15740_v48  ;;  %v8842_v61 = vmax.f32 %v8160_v16, 0.0 }
 0x693   :  { %v15328_v9 = vpop.f32.mrf.mxu1  ;;  %v11388_v6 = vpop.f32.mrf.mxu0 }
 0x694   :  { %v8840_v22 = vmax.f32 %v8152_v52, 0.0  ;;  %12382 = vst.msk [vmem:[%s22381_s7 + $0xb10] sm:$0xff] %vm12027_vm2, %v11397_v45  ;;  %v11389_v51 = vadd.f32 %v21378_v38, %v11388_v6  ;;  %v9126_v57 = vpack.c.bf16 %v8842_v61, %v8841_v53  ;;  %v8173_v62 = vadd.f32 %v21283_v60, %v15328_v9 }
 0x695   :  { %v8164_v2 = vpop.f32.mrf.mxu1  ;;  %v15741_v54 = vpop.f32.mrf.mxu0 }
 0x696   :  { %v9125_v40 = vpack.c.bf16 %v8840_v22, %v8839_v1  ;;  %12380 = vst.msk [vmem:[%s22381_s7 + $0xb00] sm:$0xff] %vm12027_vm2, %v11389_v51  ;;  %v11400_v41 = vadd.f32 %v21378_v38, %v15741_v54  ;;  %v8165_v23 = vadd.f32 %v21283_v60, %v8164_v2  ;;  %v8845_v8 = vmax.f32 %v8173_v62, 0.0 }
 0x697   :  { %v15329_v56 = vpop.f32.mrf.mxu1  ;;  %v11391_v15 = vpop.f32.mrf.mxu0 }
 0x698   :  { %12383 = vst.msk [vmem:[%s22381_s7 + $0xb18] sm:$0xff] %vm12027_vm2, %v11400_v41  ;;  %v8176_v59 = vadd.f32 %v21283_v60, %v15329_v56  ;;  %v11392_v37 = vadd.f32 %v21378_v38, %v11391_v15  ;;  %15838 = vmatprep.mubr.msk.bf16.mxu0 %vm5537_vm1, %v9125_v40  ;;  %v8843_v50 = vmax.f32 %v8165_v23, 0.0 }
 0x699   :  { %v8167_v33 = vpop.f32.mrf.mxu1  ;;  %v15744_v47 = vpop.f32.mrf.mxu0  ;;  %15839 = vmatmul.mubr.msk.bf16.gmra.mxu0 %vm5537_vm1, %v9126_v57 }
 0x69a   :  { %12381 = vst.msk [vmem:[%s22381_s7 + $0xb08] sm:$0xff] %vm12027_vm2, %v11392_v37  ;;  %v8168_v49 = vadd.f32 %v21283_v60, %v8167_v33  ;;  %v11413_v44 = vadd.f32 %v21378_v38, %v15744_v47  ;;  %v8846_v13 = vmax.f32 %v8176_v59, 0.0 }
 0x69b   :  { %v15332_v43 = vpop.f32.mrf.mxu1  ;;  %v11404_v24 = vpop.f32.mrf.mxu0 }
 0x69c   :  { %v8844_v34 = vmax.f32 %v8168_v49, 0.0  ;;  %12386 = vst.msk [vmem:[%s22381_s7 + $0xb30] sm:$0xff] %vm12027_vm2, %v11413_v44  ;;  %v11405_v29 = vadd.f32 %v21378_v38, %v11404_v24  ;;  %v9128_v25 = vpack.c.bf16 %v8846_v13, %v8845_v8  ;;  %v8189_v36 = vadd.f32 %v21283_v60, %v15332_v43 }
 0x69d   :  { %v8180_v31 = vpop.f32.mrf.mxu1  ;;  %v15745_v42 = vpop.f32.mrf.mxu0 }
 0x69e   :  { %v9127_v0 = vpack.c.bf16 %v8844_v34, %v8843_v50  ;;  %12384 = vst.msk [vmem:[%s22381_s7 + $0xb20] sm:$0xff] %vm12027_vm2, %v11405_v29  ;;  %v11416_v4 = vadd.f32 %v21378_v38, %v15745_v42  ;;  %v8181_v35 = vadd.f32 %v21283_v60, %v8180_v31  ;;  %v8849_v30 = vmax.f32 %v8189_v36, 0.0 }
 0x69f   :  { %v15333_v7 = vpop.f32.mrf.mxu1  ;;  %v11407_v19 = vpop.f32.mrf.mxu0 }
 0x6a0   :  { %12387 = vst.msk [vmem:[%s22381_s7 + $0xb38] sm:$0xff] %vm12027_vm2, %v11416_v4  ;;  %v8192_v58 = vadd.f32 %v21283_v60, %v15333_v7  ;;  %v11408_v39 = vadd.f32 %v21378_v38, %v11407_v19  ;;  %15842 = vmatprep.mubr.msk.bf16.mxu0 %vm5537_vm1, %v9127_v0  ;;  %v8847_v11 = vmax.f32 %v8181_v35, 0.0 }
 0x6a1   :  { %v8183_v17 = vpop.f32.mrf.mxu1  ;;  %v15748_v63 = vpop.f32.mrf.mxu0  ;;  %15843 = vmatmul.mubr.msk.bf16.gmra.mxu0 %vm5537_vm1, %v9128_v25 }
 0x6a2   :  { %12385 = vst.msk [vmem:[%s22381_s7 + $0xb28] sm:$0xff] %vm12027_vm2, %v11408_v39  ;;  %v8184_v55 = vadd.f32 %v21283_v60, %v8183_v17  ;;  %v11429_v26 = vadd.f32 %v21378_v38, %v15748_v63  ;;  %v8850_v20 = vmax.f32 %v8192_v58, 0.0 }
 0x6a3   :  { %v15336_v32 = vpop.f32.mrf.mxu1  ;;  %v11420_v27 = vpop.f32.mrf.mxu0 }
 0x6a4   :  { %v8848_v21 = vmax.f32 %v8184_v55, 0.0  ;;  %12390 = vst.msk [vmem:[%s22381_s7 + $0xb50] sm:$0xff] %vm12027_vm2, %v11429_v26  ;;  %v11421_v12 = vadd.f32 %v21378_v38, %v11420_v27  ;;  %v9130_v16 = vpack.c.bf16 %v8850_v20, %v8849_v30  ;;  %v8205_v45 = vadd.f32 %v21283_v60, %v15336_v32 }
 0x6a5   :  { %v8196_v46 = vpop.f32.mrf.mxu1  ;;  %v15749_v14 = vpop.f32.mrf.mxu0 }
 0x6a6   :  { %v9129_v5 = vpack.c.bf16 %v8848_v21, %v8847_v11  ;;  %12388 = vst.msk [vmem:[%s22381_s7 + $0xb40] sm:$0xff] %vm12027_vm2, %v11421_v12  ;;  %v11432_v28 = vadd.f32 %v21378_v38, %v15749_v14  ;;  %v8197_v18 = vadd.f32 %v21283_v60, %v8196_v46  ;;  %v8853_v41 = vmax.f32 %v8205_v45, 0.0 }
 0x6a7   :  { %v15337_v3 = vpop.f32.mrf.mxu1  ;;  %v11423_v10 = vpop.f32.mrf.mxu0 }
 0x6a8   :  { %12391 = vst.msk [vmem:[%s22381_s7 + $0xb58] sm:$0xff] %vm12027_vm2, %v11432_v28  ;;  %v8208_v48 = vadd.f32 %v21283_v60, %v15337_v3  ;;  %v11424_v52 = vadd.f32 %v21378_v38, %v11423_v10  ;;  %15846 = vmatprep.mubr.msk.bf16.mxu0 %vm5537_vm1, %v9129_v5  ;;  %v8851_v2 = vmax.f32 %v8197_v18, 0.0 }
 0x6a9   :  { %v8199_v61 = vpop.f32.mrf.mxu1  ;;  %v15752_v9 = vpop.f32.mrf.mxu0  ;;  %15847 = vmatmul.mubr.msk.bf16.gmra.mxu0 %vm5537_vm1, %v9130_v16 }
 0x6aa   :  { %12389 = vst.msk [vmem:[%s22381_s7 + $0xb48] sm:$0xff] %vm12027_vm2, %v11424_v52  ;;  %v8200_v6 = vadd.f32 %v21283_v60, %v8199_v61  ;;  %v11445_v1 = vadd.f32 %v21378_v38, %v15752_v9  ;;  %v8854_v22 = vmax.f32 %v8208_v48, 0.0 }
 0x6ab   :  { %v15340_v51 = vpop.f32.mrf.mxu1  ;;  %v11436_v53 = vpop.f32.mrf.mxu0 }
 0x6ac   :  { %v8852_v54 = vmax.f32 %v8200_v6, 0.0  ;;  %12394 = vst.msk [vmem:[%s22381_s7 + $0xb70] sm:$0xff] %vm12027_vm2, %v11445_v1  ;;  %v11437_v40 = vadd.f32 %v21378_v38, %v11436_v53  ;;  %v9132_v59 = vpack.c.bf16 %v8854_v22, %v8853_v41  ;;  %v8221_v44 = vadd.f32 %v21283_v60, %v15340_v51 }
 0x6ad   :  { %v8212_v57 = vpop.f32.mrf.mxu1  ;;  %v15753_v56 = vpop.f32.mrf.mxu0 }
 0x6ae   :  { %v9131_v15 = vpack.c.bf16 %v8852_v54, %v8851_v2  ;;  %12392 = vst.msk [vmem:[%s22381_s7 + $0xb60] sm:$0xff] %vm12027_vm2, %v11437_v40  ;;  %v11448_v23 = vadd.f32 %v21378_v38, %v15753_v56  ;;  %v8213_v33 = vadd.f32 %v21283_v60, %v8212_v57  ;;  %v8857_v4 = vmax.f32 %v8221_v44, 0.0 }
 0x6af   :  { %v15341_v37 = vpop.f32.mrf.mxu1  ;;  %v11439_v62 = vpop.f32.mrf.mxu0 }
 0x6b0   :  { %12395 = vst.msk [vmem:[%s22381_s7 + $0xb78] sm:$0xff] %vm12027_vm2, %v11448_v23  ;;  %v8224_v47 = vadd.f32 %v21283_v60, %v15341_v37  ;;  %v11440_v49 = vadd.f32 %v21378_v38, %v11439_v62  ;;  %15850 = vmatprep.mubr.msk.bf16.mxu0 %vm5537_vm1, %v9131_v15  ;;  %v8855_v31 = vmax.f32 %v8213_v33, 0.0 }
 0x6b1   :  { %v8215_v13 = vpop.f32.mrf.mxu1  ;;  %v15756_v43 = vpop.f32.mrf.mxu0  ;;  %15851 = vmatmul.mubr.msk.bf16.gmra.mxu0 %vm5537_vm1, %v9132_v59 }
 0x6b2   :  { %12393 = vst.msk [vmem:[%s22381_s7 + $0xb68] sm:$0xff] %vm12027_vm2, %v11440_v49  ;;  %v8216_v24 = vadd.f32 %v21283_v60, %v8215_v13  ;;  %v11461_v50 = vadd.f32 %v21378_v38, %v15756_v43  ;;  %v8858_v34 = vmax.f32 %v8224_v47, 0.0 }
 0x6b3   :  { %v15344_v29 = vpop.f32.mrf.mxu1  ;;  %v11452_v8 = vpop.f32.mrf.mxu0 }
 0x6b4   :  { %v8856_v42 = vmax.f32 %v8216_v24, 0.0  ;;  %12398 = vst.msk [vmem:[%s22381_s7 + $0xb90] sm:$0xff] %vm12027_vm2, %v11461_v50  ;;  %v11453_v0 = vadd.f32 %v21378_v38, %v11452_v8  ;;  %v9134_v58 = vpack.c.bf16 %v8858_v34, %v8857_v4  ;;  %v8237_v26 = vadd.f32 %v21283_v60, %v15344_v29 }
 0x6b5   :  { %v8228_v25 = vpop.f32.mrf.mxu1  ;;  %v15757_v7 = vpop.f32.mrf.mxu0 }
 0x6b6   :  { %v9133_v19 = vpack.c.bf16 %v8856_v42, %v8855_v31  ;;  %12396 = vst.msk [vmem:[%s22381_s7 + $0xb80] sm:$0xff] %vm12027_vm2, %v11453_v0  ;;  %v11464_v35 = vadd.f32 %v21378_v38, %v15757_v7  ;;  %v8229_v17 = vadd.f32 %v21283_v60, %v8228_v25  ;;  %v8861_v28 = vmax.f32 %v8237_v26, 0.0 }
 0x6b7   :  { %v15345_v39 = vpop.f32.mrf.mxu1  ;;  %v11455_v36 = vpop.f32.mrf.mxu0 }
 0x6b8   :  { %12399 = vst.msk [vmem:[%s22381_s7 + $0xb98] sm:$0xff] %vm12027_vm2, %v11464_v35  ;;  %v8240_v63 = vadd.f32 %v21283_v60, %v15345_v39  ;;  %v11456_v55 = vadd.f32 %v21378_v38, %v11455_v36  ;;  %15854 = vmatprep.mubr.msk.bf16.mxu0 %vm5537_vm1, %v9133_v19  ;;  %v8859_v46 = vmax.f32 %v8229_v17, 0.0 }
 0x6b9   :  { %v8231_v20 = vpop.f32.mrf.mxu1  ;;  %v15760_v32 = vpop.f32.mrf.mxu0  ;;  %15855 = vmatmul.mubr.msk.bf16.gmra.mxu0 %vm5537_vm1, %v9134_v58 }
 0x6ba   :  { %12397 = vst.msk [vmem:[%s22381_s7 + $0xb88] sm:$0xff] %vm12027_vm2, %v11456_v55  ;;  %v8232_v27 = vadd.f32 %v21283_v60, %v8231_v20  ;;  %v11477_v11 = vadd.f32 %v21378_v38, %v15760_v32  ;;  %v8862_v21 = vmax.f32 %v8240_v63, 0.0 }
 0x6bb   :  { %v15348_v12 = vpop.f32.mrf.mxu1  ;;  %v11468_v30 = vpop.f32.mrf.mxu0 }
 0x6bc   :  { %v8860_v14 = vmax.f32 %v8232_v27, 0.0  ;;  %12402 = vst.msk [vmem:[%s22381_s7 + $0xbb0] sm:$0xff] %vm12027_vm2, %v11477_v11  ;;  %v11469_v5 = vadd.f32 %v21378_v38, %v11468_v30  ;;  %v9136_v48 = vpack.c.bf16 %v8862_v21, %v8861_v28  ;;  %v8253_v1 = vadd.f32 %v21283_v60, %v15348_v12 }
 0x6bd   :  { %v8244_v16 = vpop.f32.mrf.mxu1  ;;  %v15761_v3 = vpop.f32.mrf.mxu0 }
 0x6be   :  { %v9135_v10 = vpack.c.bf16 %v8860_v14, %v8859_v46  ;;  %12400 = vst.msk [vmem:[%s22381_s7 + $0xba0] sm:$0xff] %vm12027_vm2, %v11469_v5  ;;  %v11480_v18 = vadd.f32 %v21378_v38, %v15761_v3  ;;  %v8245_v61 = vadd.f32 %v21283_v60, %v8244_v16  ;;  %v8865_v23 = vmax.f32 %v8253_v1, 0.0 }
 0x6bf   :  { %v15349_v52 = vpop.f32.mrf.mxu1  ;;  %v11471_v45 = vpop.f32.mrf.mxu0 }
 0x6c0   :  { %12403 = vst.msk [vmem:[%s22381_s7 + $0xbb8] sm:$0xff] %vm12027_vm2, %v11480_v18  ;;  %v8256_v9 = vadd.f32 %v21283_v60, %v15349_v52  ;;  %v11472_v6 = vadd.f32 %v21378_v38, %v11471_v45  ;;  %15858 = vmatprep.mubr.msk.bf16.mxu0 %vm5537_vm1, %v9135_v10  ;;  %v8863_v57 = vmax.f32 %v8245_v61, 0.0 }
 0x6c1   :  { %v8247_v22 = vpop.f32.mrf.mxu1  ;;  %v15764_v51 = vpop.f32.mrf.mxu0  ;;  %15859 = vmatmul.mubr.msk.bf16.gmra.mxu0 %vm5537_vm1, %v9136_v48 }
 0x6c2   :  { %12401 = vst.msk [vmem:[%s22381_s7 + $0xba8] sm:$0xff] %vm12027_vm2, %v11472_v6  ;;  %v8248_v53 = vadd.f32 %v21283_v60, %v8247_v22  ;;  %v11493_v2 = vadd.f32 %v21378_v38, %v15764_v51  ;;  %v8866_v54 = vmax.f32 %v8256_v9, 0.0 }
 0x6c3   :  { %v15352_v40 = vpop.f32.mrf.mxu1  ;;  %v11484_v41 = vpop.f32.mrf.mxu0 }
 0x6c4   :  { %v8864_v56 = vmax.f32 %v8248_v53, 0.0  ;;  %12406 = vst.msk [vmem:[%s22381_s7 + $0xbd0] sm:$0xff] %vm12027_vm2, %v11493_v2  ;;  %v11485_v15 = vadd.f32 %v21378_v38, %v11484_v41  ;;  %v9138_v47 = vpack.c.bf16 %v8866_v54, %v8865_v23  ;;  %v8269_v50 = vadd.f32 %v21283_v60, %v15352_v40 }
 0x6c5   :  { %v8260_v59 = vpop.f32.mrf.mxu1  ;;  %v15765_v37 = vpop.f32.mrf.mxu0 }
 0x6c6   :  { %v9137_v62 = vpack.c.bf16 %v8864_v56, %v8863_v57  ;;  %12404 = vst.msk [vmem:[%s22381_s7 + $0xbc0] sm:$0xff] %vm12027_vm2, %v11485_v15  ;;  %v11496_v33 = vadd.f32 %v21378_v38, %v15765_v37  ;;  %v8261_v13 = vadd.f32 %v21283_v60, %v8260_v59  ;;  %v8869_v35 = vmax.f32 %v8269_v50, 0.0 }
 0x6c7   :  { %v15353_v49 = vpop.f32.mrf.mxu1  ;;  %v11487_v44 = vpop.f32.mrf.mxu0 }
 0x6c8   :  { %12407 = vst.msk [vmem:[%s22381_s7 + $0xbd8] sm:$0xff] %vm12027_vm2, %v11496_v33  ;;  %v8272_v43 = vadd.f32 %v21283_v60, %v15353_v49  ;;  %v11488_v24 = vadd.f32 %v21378_v38, %v11487_v44  ;;  %15862 = vmatprep.mubr.msk.bf16.mxu0 %vm5537_vm1, %v9137_v62  ;;  %v8867_v25 = vmax.f32 %v8261_v13, 0.0 }
 0x6c9   :  { %v8263_v34 = vpop.f32.mrf.mxu1  ;;  %v15768_v29 = vpop.f32.mrf.mxu0  ;;  %15863 = vmatmul.mubr.msk.bf16.gmra.mxu0 %vm5537_vm1, %v9138_v47 }
 0x6ca   :  { %12405 = vst.msk [vmem:[%s22381_s7 + $0xbc8] sm:$0xff] %vm12027_vm2, %v11488_v24  ;;  %v8264_v8 = vadd.f32 %v21283_v60, %v8263_v34  ;;  %v11509_v31 = vadd.f32 %v21378_v38, %v15768_v29  ;;  %v8870_v42 = vmax.f32 %v8272_v43, 0.0 }
 0x6cb   :  { %v15356_v0 = vpop.f32.mrf.mxu1  ;;  %v11500_v4 = vpop.f32.mrf.mxu0 }
 0x6cc   :  { %v8868_v7 = vmax.f32 %v8264_v8, 0.0  ;;  %12410 = vst.msk [vmem:[%s22381_s7 + $0xbf0] sm:$0xff] %vm12027_vm2, %v11509_v31  ;;  %v11501_v19 = vadd.f32 %v21378_v38, %v11500_v4  ;;  %v9140_v63 = vpack.c.bf16 %v8870_v42, %v8869_v35  ;;  %v8285_v11 = vadd.f32 %v21283_v60, %v15356_v0 }
 0x6cd   :  { %v8276_v58 = vpop.f32.mrf.mxu1  ;;  %v15769_v39 = vpop.f32.mrf.mxu0 }
 0x6ce   :  { %v9139_v36 = vpack.c.bf16 %v8868_v7, %v8867_v25  ;;  %12408 = vst.msk [vmem:[%s22381_s7 + $0xbe0] sm:$0xff] %vm12027_vm2, %v11501_v19  ;;  %v11512_v17 = vadd.f32 %v21378_v38, %v15769_v39  ;;  %v8277_v20 = vadd.f32 %v21283_v60, %v8276_v58  ;;  %v8873_v18 = vmax.f32 %v8285_v11, 0.0 }
 0x6cf   :  { %v15357_v55 = vpop.f32.mrf.mxu1  ;;  %v11503_v26 = vpop.f32.mrf.mxu0 }
 0x6d0   :  { %12411 = vst.msk [vmem:[%s22381_s7 + $0xbf8] sm:$0xff] %vm12027_vm2, %v11512_v17  ;;  %v8288_v32 = vadd.f32 %v21283_v60, %v15357_v55  ;;  %v11504_v27 = vadd.f32 %v21378_v38, %v11503_v26  ;;  %15866 = vmatprep.mubr.msk.bf16.mxu0 %vm5537_vm1, %v9139_v36  ;;  %v8871_v16 = vmax.f32 %v8277_v20, 0.0 }
 0x6d1   :  { %v8279_v21 = vpop.f32.mrf.mxu1  ;;  %v15772_v12 = vpop.f32.mrf.mxu0  ;;  %15867 = vmatmul.mubr.msk.bf16.gmra.mxu0 %vm5537_vm1, %v9140_v63 }
 0x6d2   :  { %12409 = vst.msk [vmem:[%s22381_s7 + $0xbe8] sm:$0xff] %vm12027_vm2, %v11504_v27  ;;  %v8280_v30 = vadd.f32 %v21283_v60, %v8279_v21  ;;  %v11525_v46 = vadd.f32 %v21378_v38, %v15772_v12  ;;  %v8874_v14 = vmax.f32 %v8288_v32, 0.0 }
 0x6d3   :  { %v15360_v5 = vpop.f32.mrf.mxu1  ;;  %v11516_v28 = vpop.f32.mrf.mxu0 }
 0x6d4   :  { %v8872_v3 = vmax.f32 %v8280_v30, 0.0  ;;  %12414 = vst.msk [vmem:[%s22381_s7 + $0xc10] sm:$0xff] %vm12027_vm2, %v11525_v46  ;;  %v11517_v10 = vadd.f32 %v21378_v38, %v11516_v28  ;;  %v9142_v9 = vpack.c.bf16 %v8874_v14, %v8873_v18  ;;  %v8301_v2 = vadd.f32 %v21283_v60, %v15360_v5  ;;  %v21769_v28 = vld [vmem:[#allocation7] ss:$0 sm:$0xff] }
 0x6d5   :  { %v8292_v48 = vpop.f32.mrf.mxu1  ;;  %v15773_v52 = vpop.f32.mrf.mxu0 }
 0x6d6   :  { %v9141_v45 = vpack.c.bf16 %v8872_v3, %v8871_v16  ;;  %12412 = vst.msk [vmem:[%s22381_s7 + $0xc00] sm:$0xff] %vm12027_vm2, %v11517_v10  ;;  %v11528_v61 = vadd.f32 %v21378_v38, %v15773_v52  ;;  %v8293_v22 = vadd.f32 %v21283_v60, %v8292_v48  ;;  %v8877_v33 = vmax.f32 %v8301_v2, 0.0 }
 0x6d7   :  { %v15361_v6 = vpop.f32.mrf.mxu1  ;;  %v11519_v1 = vpop.f32.mrf.mxu0 }
 0x6d8   :  { %12415 = vst.msk [vmem:[%s22381_s7 + $0xc18] sm:$0xff] %vm12027_vm2, %v11528_v61  ;;  %v8304_v51 = vadd.f32 %v21283_v60, %v15361_v6  ;;  %v11520_v53 = vadd.f32 %v21378_v38, %v11519_v1  ;;  %15870 = vmatprep.mubr.msk.bf16.mxu0 %vm5537_vm1, %v9141_v45  ;;  %v8875_v59 = vmax.f32 %v8293_v22, 0.0 }
 0x6d9   :  { %v8295_v54 = vpop.f32.mrf.mxu1  ;;  %v15776_v40 = vpop.f32.mrf.mxu0  ;;  %15871 = vmatmul.mubr.msk.bf16.gmra.mxu0 %vm5537_vm1, %v9142_v9 }
 0x6da   :  { %12413 = vst.msk [vmem:[%s22381_s7 + $0xc08] sm:$0xff] %vm12027_vm2, %v11520_v53  ;;  %v8296_v41 = vadd.f32 %v21283_v60, %v8295_v54  ;;  %v11541_v57 = vadd.f32 %v21378_v38, %v15776_v40  ;;  %v8878_v56 = vmax.f32 %v8304_v51, 0.0 }
 0x6db   :  { %v15364_v15 = vpop.f32.mrf.mxu1  ;;  %v11532_v23 = vpop.f32.mrf.mxu0 }
 0x6dc   :  { %v8876_v37 = vmax.f32 %v8296_v41, 0.0  ;;  %12418 = vst.msk [vmem:[%s22381_s7 + $0xc30] sm:$0xff] %vm12027_vm2, %v11541_v57  ;;  %v11533_v62 = vadd.f32 %v21378_v38, %v11532_v23  ;;  %v9144_v43 = vpack.c.bf16 %v8878_v56, %v8877_v33  ;;  %v8317_v31 = vadd.f32 %v21283_v60, %v15364_v15 }
 0x6dd   :  { %v8308_v47 = vpop.f32.mrf.mxu1  ;;  %v15777_v49 = vpop.f32.mrf.mxu0 }
 0x6de   :  { %v9143_v44 = vpack.c.bf16 %v8876_v37, %v8875_v59  ;;  %12416 = vst.msk [vmem:[%s22381_s7 + $0xc20] sm:$0xff] %vm12027_vm2, %v11533_v62  ;;  %v11544_v13 = vadd.f32 %v21378_v38, %v15777_v49  ;;  %v8309_v34 = vadd.f32 %v21283_v60, %v8308_v47  ;;  %v8881_v17 = vmax.f32 %v8317_v31, 0.0 }
 0x6df   :  { %v15365_v24 = vpop.f32.mrf.mxu1  ;;  %v11535_v50 = vpop.f32.mrf.mxu0 }
 0x6e0   :  { %12419 = vst.msk [vmem:[%s22381_s7 + $0xc38] sm:$0xff] %vm12027_vm2, %v11544_v13  ;;  %v8320_v29 = vadd.f32 %v21283_v60, %v15365_v24  ;;  %v11536_v8 = vadd.f32 %v21378_v38, %v11535_v50  ;;  %15874 = vmatprep.mubr.msk.bf16.mxu0 %vm5537_vm1, %v9143_v44  ;;  %v8879_v58 = vmax.f32 %v8309_v34, 0.0 }
 0x6e1   :  { %v8311_v42 = vpop.f32.mrf.mxu1  ;;  %v15780_v0 = vpop.f32.mrf.mxu0  ;;  %15875 = vmatmul.mubr.msk.bf16.gmra.mxu0 %vm5537_vm1, %v9144_v43 }
 0x6e2   :  { %12417 = vst.msk [vmem:[%s22381_s7 + $0xc28] sm:$0xff] %vm12027_vm2, %v11536_v8  ;;  %v8312_v4 = vadd.f32 %v21283_v60, %v8311_v42  ;;  %v11557_v25 = vadd.f32 %v21378_v38, %v15780_v0  ;;  %v8882_v7 = vmax.f32 %v8320_v29, 0.0 }
 0x6e3   :  { %v15368_v19 = vpop.f32.mrf.mxu1  ;;  %v11548_v35 = vpop.f32.mrf.mxu0 }
 0x6e4   :  { %v8880_v39 = vmax.f32 %v8312_v4, 0.0  ;;  %12422 = vst.msk [vmem:[%s22381_s7 + $0xc50] sm:$0xff] %vm12027_vm2, %v11557_v25  ;;  %v11549_v36 = vadd.f32 %v21378_v38, %v11548_v35  ;;  %v9146_v32 = vpack.c.bf16 %v8882_v7, %v8881_v17  ;;  %v8333_v46 = vadd.f32 %v21283_v60, %v15368_v19 }
 0x6e5   :  { %v8324_v63 = vpop.f32.mrf.mxu1  ;;  %v15781_v55 = vpop.f32.mrf.mxu0 }
 0x6e6   :  { %v9145_v26 = vpack.c.bf16 %v8880_v39, %v8879_v58  ;;  %12420 = vst.msk [vmem:[%s22381_s7 + $0xc40] sm:$0xff] %vm12027_vm2, %v11549_v36  ;;  %v11560_v20 = vadd.f32 %v21378_v38, %v15781_v55  ;;  %v8325_v21 = vadd.f32 %v21283_v60, %v8324_v63  ;;  %v8885_v61 = vmax.f32 %v8333_v46, 0.0 }
 0x6e7   :  { %v15369_v27 = vpop.f32.mrf.mxu1  ;;  %v11551_v11 = vpop.f32.mrf.mxu0 }
 0x6e8   :  { %12423 = vst.msk [vmem:[%s22381_s7 + $0xc58] sm:$0xff] %vm12027_vm2, %v11560_v20  ;;  %v8336_v12 = vadd.f32 %v21283_v60, %v15369_v27  ;;  %v11552_v30 = vadd.f32 %v21378_v38, %v11551_v11  ;;  %15878 = vmatprep.mubr.msk.bf16.mxu0 %vm5537_vm1, %v9145_v26  ;;  %v8883_v52 = vmax.f32 %v8325_v21, 0.0 }
 0x6e9   :  { %v8327_v14 = vpop.f32.mrf.mxu1  ;;  %v15784_v5 = vpop.f32.mrf.mxu0  ;;  %15879 = vmatmul.mubr.msk.bf16.gmra.mxu0 %vm5537_vm1, %v9146_v32 }
 0x6ea   :  { %12421 = vst.msk [vmem:[%s22381_s7 + $0xc48] sm:$0xff] %vm12027_vm2, %v11552_v30  ;;  %v8328_v16 = vadd.f32 %v21769_v28, %v8327_v14  ;;  %v11573_v3 = vadd.f32 %v21378_v38, %v15784_v5  ;;  %v8886_v10 = vmax.f32 %v8336_v12, 0.0 }
 0x6eb   :  { %v15372_v18 = vpop.f32.mrf.mxu1  ;;  %v11564_v48 = vpop.f32.mrf.mxu0 }
 0x6ec   :  { %v8884_v60 = vmax.f32 %v8328_v16, 0.0  ;;  %12426 = vst.msk [vmem:[%s22381_s7 + $0xc70] sm:$0xff] %vm12027_vm2, %v11573_v3  ;;  %v11565_v45 = vadd.f32 %v21378_v38, %v11564_v48  ;;  %v9148_v51 = vpack.c.bf16 %v8886_v10, %v8885_v61  ;;  %v8349_v57 = vadd.f32 %v21769_v28, %v15372_v18 }
 0x6ed   :  { %v8340_v9 = vpop.f32.mrf.mxu1  ;;  %v15785_v6 = vpop.f32.mrf.mxu0 }
 0x6ee   :  { %v9147_v1 = vpack.c.bf16 %v8884_v60, %v8883_v52  ;;  %12424 = vst.msk [vmem:[%s22381_s7 + $0xc60] sm:$0xff] %vm12027_vm2, %v11565_v45  ;;  %v11576_v22 = vadd.f32 %v21378_v38, %v15785_v6  ;;  %v8341_v54 = vadd.f32 %v21769_v28, %v8340_v9  ;;  %v8889_v13 = vmax.f32 %v8349_v57, 0.0 }
 0x6ef   :  { %v15373_v53 = vpop.f32.mrf.mxu1  ;;  %v11567_v2 = vpop.f32.mrf.mxu0 }
 0x6f0   :  { %12427 = vst.msk [vmem:[%s22381_s7 + $0xc78] sm:$0xff] %vm12027_vm2, %v11576_v22  ;;  %v8352_v40 = vadd.f32 %v21769_v28, %v15373_v53  ;;  %v11568_v41 = vadd.f32 %v21378_v38, %v11567_v2  ;;  %15882 = vmatprep.mubr.msk.bf16.mxu0 %vm5537_vm1, %v9147_v1  ;;  %v8887_v47 = vmax.f32 %v8341_v54, 0.0 }
 0x6f1   :  { %v8343_v56 = vpop.f32.mrf.mxu1  ;;  %v15788_v15 = vpop.f32.mrf.mxu0  ;;  %15883 = vmatmul.mubr.msk.bf16.gmra.mxu0 %vm5537_vm1, %v9148_v51 }
 0x6f2   :  { %12425 = vst.msk [vmem:[%s22381_s7 + $0xc68] sm:$0xff] %vm12027_vm2, %v11568_v41  ;;  %v8344_v23 = vadd.f32 %v21769_v28, %v8343_v56  ;;  %v11589_v59 = vadd.f32 %v21378_v38, %v15788_v15  ;;  %v8890_v37 = vmax.f32 %v8352_v40, 0.0 }
 0x6f3   :  { %v15376_v62 = vpop.f32.mrf.mxu1  ;;  %v11580_v33 = vpop.f32.mrf.mxu0 }
 0x6f4   :  { %v8888_v49 = vmax.f32 %v8344_v23, 0.0  ;;  %12430 = vst.msk [vmem:[%s22381_s7 + $0xc90] sm:$0xff] %vm12027_vm2, %v11589_v59  ;;  %v11581_v44 = vadd.f32 %v21378_v38, %v11580_v33  ;;  %v9150_v29 = vpack.c.bf16 %v8890_v37, %v8889_v13  ;;  %v8365_v25 = vadd.f32 %v21769_v28, %v15376_v62 }
 0x6f5   :  { %v8356_v43 = vpop.f32.mrf.mxu1  ;;  %v15789_v24 = vpop.f32.mrf.mxu0 }
 0x6f6   :  { %v9149_v50 = vpack.c.bf16 %v8888_v49, %v8887_v47  ;;  %12428 = vst.msk [vmem:[%s22381_s7 + $0xc80] sm:$0xff] %vm12027_vm2, %v11581_v44  ;;  %v11592_v34 = vadd.f32 %v21378_v38, %v15789_v24  ;;  %v8357_v42 = vadd.f32 %v21769_v28, %v8356_v43  ;;  %v8893_v20 = vmax.f32 %v8365_v25, 0.0 }
 0x6f7   :  { %v15377_v8 = vpop.f32.mrf.mxu1  ;;  %v11583_v31 = vpop.f32.mrf.mxu0 }
 0x6f8   :  { %12431 = vst.msk [vmem:[%s22381_s7 + $0xc98] sm:$0xff] %vm12027_vm2, %v11592_v34  ;;  %v8368_v0 = vadd.f32 %v21769_v28, %v15377_v8  ;;  %v11584_v4 = vadd.f32 %v21378_v38, %v11583_v31  ;;  %15886 = vmatprep.mubr.msk.bf16.mxu0 %vm5537_vm1, %v9149_v50  ;;  %v8891_v63 = vmax.f32 %v8357_v42, 0.0 }
 0x6f9   :  { %v8359_v7 = vpop.f32.mrf.mxu1  ;;  %v15792_v19 = vpop.f32.mrf.mxu0  ;;  %15887 = vmatmul.mubr.msk.bf16.gmra.mxu0 %vm5537_vm1, %v9150_v29 }
 0x6fa   :  { %12429 = vst.msk [vmem:[%s22381_s7 + $0xc88] sm:$0xff] %vm12027_vm2, %v11584_v4  ;;  %v8360_v35 = vadd.f32 %v21769_v28, %v8359_v7  ;;  %v11605_v58 = vadd.f32 %v21378_v38, %v15792_v19  ;;  %v8894_v39 = vmax.f32 %v8368_v0, 0.0 }
 0x6fb   :  { %v15380_v36 = vpop.f32.mrf.mxu1  ;;  %v11596_v17 = vpop.f32.mrf.mxu0 }
 0x6fc   :  { %v8892_v55 = vmax.f32 %v8360_v35, 0.0  ;;  %12434 = vst.msk [vmem:[%s22381_s7 + $0xcb0] sm:$0xff] %vm12027_vm2, %v11605_v58  ;;  %v11597_v26 = vadd.f32 %v21378_v38, %v11596_v17  ;;  %v9152_v12 = vpack.c.bf16 %v8894_v39, %v8893_v20  ;;  %v8381_v3 = vadd.f32 %v21769_v28, %v15380_v36 }
 0x6fd   :  { %v8372_v32 = vpop.f32.mrf.mxu1  ;;  %v15793_v27 = vpop.f32.mrf.mxu0 }
 0x6fe   :  { %v9151_v11 = vpack.c.bf16 %v8892_v55, %v8891_v63  ;;  %12432 = vst.msk [vmem:[%s22381_s7 + $0xca0] sm:$0xff] %vm12027_vm2, %v11597_v26  ;;  %v11608_v21 = vadd.f32 %v21378_v38, %v15793_v27  ;;  %v8373_v14 = vadd.f32 %v21769_v28, %v8372_v32  ;;  %v8897_v1 = vmax.f32 %v8381_v3, 0.0 }
 0x6ff   :  { %v15381_v30 = vpop.f32.mrf.mxu1  ;;  %v11599_v46 = vpop.f32.mrf.mxu0 }
 0x700   :  { %12435 = vst.msk [vmem:[%s22381_s7 + $0xcb8] sm:$0xff] %vm12027_vm2, %v11608_v21  ;;  %v8384_v5 = vadd.f32 %v21769_v28, %v15381_v30  ;;  %v11600_v16 = vadd.f32 %v21378_v38, %v11599_v46  ;;  %15890 = vmatprep.mubr.msk.bf16.mxu0 %vm5537_vm1, %v9151_v11  ;;  %v8895_v61 = vmax.f32 %v8373_v14, 0.0 }
 0x701   :  { %v8375_v10 = vpop.f32.mrf.mxu1  ;;  %v15796_v18 = vpop.f32.mrf.mxu0  ;;  %15891 = vmatmul.mubr.msk.bf16.gmra.mxu0 %vm5537_vm1, %v9152_v12 }
 0x702   :  { %12433 = vst.msk [vmem:[%s22381_s7 + $0xca8] sm:$0xff] %vm12027_vm2, %v11600_v16  ;;  %v8376_v48 = vadd.f32 %v21769_v28, %v8375_v10  ;;  %v11621_v52 = vadd.f32 %v21378_v38, %v15796_v18  ;;  %v8898_v60 = vmax.f32 %v8384_v5, 0.0  ;;  %v21860_v28 = vld [vmem:[#allocation9] ss:$0 sm:$0xff] }
 0x703   :  { %v11612_v45 = vpop.f32.mrf.mxu0 }
 0x704   :  { %v8896_v9 = vmax.f32 %v8376_v48, 0.0  ;;  %12438 = vst.msk [vmem:[%s22381_s7 + $0xcd0] sm:$0xff] %vm12027_vm2, %v11621_v52  ;;  %v11613_v6 = vadd.f32 %v21378_v38, %v11612_v45  ;;  %v9154_v2 = vpack.c.bf16 %v8898_v60, %v8897_v1 }
 0x705   :  { %v15797_v22 = vpop.f32.mrf.mxu0 }
 0x706   :  { %v9153_v51 = vpack.c.bf16 %v8896_v9, %v8895_v61  ;;  %12436 = vst.msk [vmem:[%s22381_s7 + $0xcc0] sm:$0xff] %vm12027_vm2, %v11613_v6  ;;  %v11624_v53 = vadd.f32 %v21860_v28, %v15797_v22 }
 0x707   :  { %v11615_v54 = vpop.f32.mrf.mxu0 }
 0x708   :  { %12439 = vst.msk [vmem:[%s22381_s7 + $0xcd8] sm:$0xff] %vm12027_vm2, %v11624_v53  ;;  %v11616_v38 = vadd.f32 %v21860_v28, %v11615_v54  ;;  %15894 = vmatprep.mubr.msk.bf16.mxu0 %vm5537_vm1, %v9153_v51 }
 0x709   :  { %v15800_v40 = vpop.f32.mrf.mxu0  ;;  %15895 = vmatmul.mubr.msk.bf16.gmra.mxu0 %vm5537_vm1, %v9154_v2 }
 0x70a   :  { %12437 = vst.msk [vmem:[%s22381_s7 + $0xcc8] sm:$0xff] %vm12027_vm2, %v11616_v38  ;;  %v11637_v41 = vadd.f32 %v21860_v28, %v15800_v40 }
 0x70b   :  { %v11628_v57 = vpop.f32.mrf.mxu0 }
 0x70c   :  { %12442 = vst.msk [vmem:[%s22381_s7 + $0xcf0] sm:$0xff] %vm12027_vm2, %v11637_v41  ;;  %v11629_v56 = vadd.f32 %v21860_v28, %v11628_v57 }
 0x70d   :  { %v15801_v15 = vpop.f32.mrf.mxu0 }
 0x70e   :  { %12440 = vst.msk [vmem:[%s22381_s7 + $0xce0] sm:$0xff] %vm12027_vm2, %v11629_v56  ;;  %v11640_v23 = vadd.f32 %v21860_v28, %v15801_v15 }
 0x70f   :  { %v11631_v59 = vpop.f32.mrf.mxu0 }
 0x710   :  { %12443 = vst.msk [vmem:[%s22381_s7 + $0xcf8] sm:$0xff] %vm12027_vm2, %v11640_v23  ;;  %v11632_v37 = vadd.f32 %v21860_v28, %v11631_v59 }
 0x711   :  { %v15804_v62 = vpop.f32.mrf.mxu0 }
 0x712   :  { %12441 = vst.msk [vmem:[%s22381_s7 + $0xce8] sm:$0xff] %vm12027_vm2, %v11632_v37  ;;  %v11653_v33 = vadd.f32 %v21860_v28, %v15804_v62 }
 0x713   :  { %v11644_v47 = vpop.f32.mrf.mxu0 }
 0x714   :  { %12446 = vst.msk [vmem:[%s22381_s7 + $0xd10] sm:$0xff] %vm12027_vm2, %v11653_v33  ;;  %v11645_v49 = vadd.f32 %v21860_v28, %v11644_v47 }
 0x715   :  { %v15805_v44 = vpop.f32.mrf.mxu0 }
 0x716   :  { %12444 = vst.msk [vmem:[%s22381_s7 + $0xd00] sm:$0xff] %vm12027_vm2, %v11645_v49  ;;  %v11656_v13 = vadd.f32 %v21860_v28, %v15805_v44 }
 0x717   :  { %v11647_v43 = vpop.f32.mrf.mxu0 }
 0x718   :  { %12447 = vst.msk [vmem:[%s22381_s7 + $0xd18] sm:$0xff] %vm12027_vm2, %v11656_v13  ;;  %v11648_v24 = vadd.f32 %v21860_v28, %v11647_v43 }
 0x719   :  { %v15808_v50 = vpop.f32.mrf.mxu0 }
 0x71a   :  { %12445 = vst.msk [vmem:[%s22381_s7 + $0xd08] sm:$0xff] %vm12027_vm2, %v11648_v24  ;;  %v11669_v34 = vadd.f32 %v21860_v28, %v15808_v50 }
 0x71b   :  { %v11660_v29 = vpop.f32.mrf.mxu0 }
 0x71c   :  { %12450 = vst.msk [vmem:[%s22381_s7 + $0xd30] sm:$0xff] %vm12027_vm2, %v11669_v34  ;;  %v11661_v8 = vadd.f32 %v21860_v28, %v11660_v29 }
 0x71d   :  { %v15809_v31 = vpop.f32.mrf.mxu0 }
 0x71e   :  { %12448 = vst.msk [vmem:[%s22381_s7 + $0xd20] sm:$0xff] %vm12027_vm2, %v11661_v8  ;;  %v11672_v42 = vadd.f32 %v21860_v28, %v15809_v31 }
 0x71f   :  { %v11663_v0 = vpop.f32.mrf.mxu0 }
 0x720   :  { %12451 = vst.msk [vmem:[%s22381_s7 + $0xd38] sm:$0xff] %vm12027_vm2, %v11672_v42  ;;  %v11664_v4 = vadd.f32 %v21860_v28, %v11663_v0 }
 0x721   :  { %v15812_v25 = vpop.f32.mrf.mxu0 }
 0x722   :  { %12449 = vst.msk [vmem:[%s22381_s7 + $0xd28] sm:$0xff] %vm12027_vm2, %v11664_v4  ;;  %v11685_v7 = vadd.f32 %v21860_v28, %v15812_v25 }
 0x723   :  { %v11676_v19 = vpop.f32.mrf.mxu0 }
 0x724   :  { %12454 = vst.msk [vmem:[%s22381_s7 + $0xd50] sm:$0xff] %vm12027_vm2, %v11685_v7  ;;  %v11677_v35 = vadd.f32 %v21860_v28, %v11676_v19 }
 0x725   :  { %v15813_v58 = vpop.f32.mrf.mxu0 }
 0x726   :  { %12452 = vst.msk [vmem:[%s22381_s7 + $0xd40] sm:$0xff] %vm12027_vm2, %v11677_v35  ;;  %v11688_v39 = vadd.f32 %v21860_v28, %v15813_v58 }
 0x727   :  { %v11679_v36 = vpop.f32.mrf.mxu0 }
 0x728   :  { %12455 = vst.msk [vmem:[%s22381_s7 + $0xd58] sm:$0xff] %vm12027_vm2, %v11688_v39  ;;  %v11680_v17 = vadd.f32 %v21860_v28, %v11679_v36 }
 0x729   :  { %v15816_v63 = vpop.f32.mrf.mxu0 }
 0x72a   :  { %12453 = vst.msk [vmem:[%s22381_s7 + $0xd48] sm:$0xff] %vm12027_vm2, %v11680_v17  ;;  %v11701_v55 = vadd.f32 %v21860_v28, %v15816_v63 }
 0x72b   :  { %v11692_v26 = vpop.f32.mrf.mxu0 }
 0x72c   :  { %12458 = vst.msk [vmem:[%s22381_s7 + $0xd70] sm:$0xff] %vm12027_vm2, %v11701_v55  ;;  %v11693_v20 = vadd.f32 %v21860_v28, %v11692_v26 }
 0x72d   :  { %v15817_v32 = vpop.f32.mrf.mxu0 }
 0x72e   :  { %12456 = vst.msk [vmem:[%s22381_s7 + $0xd60] sm:$0xff] %vm12027_vm2, %v11693_v20  ;;  %v11704_v27 = vadd.f32 %v21860_v28, %v15817_v32 }
 0x72f   :  { %v11695_v11 = vpop.f32.mrf.mxu0 }
 0x730   :  { %12459 = vst.msk [vmem:[%s22381_s7 + $0xd78] sm:$0xff] %vm12027_vm2, %v11704_v27  ;;  %v11696_v21 = vadd.f32 %v21860_v28, %v11695_v11 }
 0x731   :  { %v15820_v12 = vpop.f32.mrf.mxu0 }
 0x732   :  { %12457 = vst.msk [vmem:[%s22381_s7 + $0xd68] sm:$0xff] %vm12027_vm2, %v11696_v21  ;;  %v11717_v30 = vadd.f32 %v21860_v28, %v15820_v12 }
 0x733   :  { %v11708_v46 = vpop.f32.mrf.mxu0 }
 0x734   :  { %12462 = vst.msk [vmem:[%s22381_s7 + $0xd90] sm:$0xff] %vm12027_vm2, %v11717_v30  ;;  %v11709_v14 = vadd.f32 %v21860_v28, %v11708_v46 }
 0x735   :  { %v15821_v5 = vpop.f32.mrf.mxu0 }
 0x736   :  { %12460 = vst.msk [vmem:[%s22381_s7 + $0xd80] sm:$0xff] %vm12027_vm2, %v11709_v14  ;;  %v11720_v16 = vadd.f32 %v21860_v28, %v15821_v5 }
 0x737   :  { %v11711_v3 = vpop.f32.mrf.mxu0 }
 0x738   :  { %12463 = vst.msk [vmem:[%s22381_s7 + $0xd98] sm:$0xff] %vm12027_vm2, %v11720_v16  ;;  %v11712_v10 = vadd.f32 %v21860_v28, %v11711_v3 }
 0x739   :  { %v15824_v18 = vpop.f32.mrf.mxu0 }
 0x73a   :  { %12461 = vst.msk [vmem:[%s22381_s7 + $0xd88] sm:$0xff] %vm12027_vm2, %v11712_v10  ;;  %v11733_v48 = vadd.f32 %v21860_v28, %v15824_v18 }
 0x73b   :  { %v11724_v52 = vpop.f32.mrf.mxu0 }
 0x73c   :  { %12466 = vst.msk [vmem:[%s22381_s7 + $0xdb0] sm:$0xff] %vm12027_vm2, %v11733_v48  ;;  %v11725_v60 = vadd.f32 %v21860_v28, %v11724_v52 }
 0x73d   :  { %v15825_v45 = vpop.f32.mrf.mxu0 }
 0x73e   :  { %12464 = vst.msk [vmem:[%s22381_s7 + $0xda0] sm:$0xff] %vm12027_vm2, %v11725_v60  ;;  %v11736_v61 = vadd.f32 %v21860_v28, %v15825_v45 }
 0x73f   :  { %v11727_v9 = vpop.f32.mrf.mxu0 }
 0x740   :  { %12467 = vst.msk [vmem:[%s22381_s7 + $0xdb8] sm:$0xff] %vm12027_vm2, %v11736_v61  ;;  %v11728_v6 = vadd.f32 %v21860_v28, %v11727_v9 }
 0x741   :  { %v15828_v1 = vpop.f32.mrf.mxu0 }
 0x742   :  { %12465 = vst.msk [vmem:[%s22381_s7 + $0xda8] sm:$0xff] %vm12027_vm2, %v11728_v6  ;;  %v11749_v22 = vadd.f32 %v21860_v28, %v15828_v1 }
 0x743   :  { %v11740_v51 = vpop.f32.mrf.mxu0 }
 0x744   :  { %12470 = vst.msk [vmem:[%s22381_s7 + $0xdd0] sm:$0xff] %vm12027_vm2, %v11749_v22  ;;  %v11741_v53 = vadd.f32 %v21860_v28, %v11740_v51 }
 0x745   :  { %v15829_v2 = vpop.f32.mrf.mxu0 }
 0x746   :  { %12468 = vst.msk [vmem:[%s22381_s7 + $0xdc0] sm:$0xff] %vm12027_vm2, %v11741_v53  ;;  %v11752_v54 = vadd.f32 %v21860_v28, %v15829_v2 }
 0x747   :  { %v11743_v38 = vpop.f32.mrf.mxu0 }
 0x748   :  { %12471 = vst.msk [vmem:[%s22381_s7 + $0xdd8] sm:$0xff] %vm12027_vm2, %v11752_v54  ;;  %v11744_v40 = vadd.f32 %v21860_v28, %v11743_v38 }
 0x749   :  { %v15832_v41 = vpop.f32.mrf.mxu0 }
 0x74a   :  { %12469 = vst.msk [vmem:[%s22381_s7 + $0xdc8] sm:$0xff] %vm12027_vm2, %v11744_v40  ;;  %v11765_v57 = vadd.f32 %v21860_v28, %v15832_v41 }
 0x74b   :  { %v11756_v56 = vpop.f32.mrf.mxu0 }
 0x74c   :  { %12474 = vst.msk [vmem:[%s22381_s7 + $0xdf0] sm:$0xff] %vm12027_vm2, %v11765_v57  ;;  %v11757_v15 = vadd.f32 %v21860_v28, %v11756_v56 }
 0x74d   :  { %v15833_v23 = vpop.f32.mrf.mxu0 }
 0x74e   :  { %12472 = vst.msk [vmem:[%s22381_s7 + $0xde0] sm:$0xff] %vm12027_vm2, %v11757_v15  ;;  %v11768_v59 = vadd.f32 %v21860_v28, %v15833_v23 }
 0x74f   :  { %v11759_v37 = vpop.f32.mrf.mxu0 }
 0x750   :  { %12475 = vst.msk [vmem:[%s22381_s7 + $0xdf8] sm:$0xff] %vm12027_vm2, %v11768_v59  ;;  %v11760_v62 = vadd.f32 %v21860_v28, %v11759_v37 }
 0x751   :  { %v15836_v33 = vpop.f32.mrf.mxu0 }
 0x752   :  { %12473 = vst.msk [vmem:[%s22381_s7 + $0xde8] sm:$0xff] %vm12027_vm2, %v11760_v62  ;;  %v11781_v47 = vadd.f32 %v21860_v28, %v15836_v33 }
 0x753   :  { %v11772_v49 = vpop.f32.mrf.mxu0 }
 0x754   :  { %12478 = vst.msk [vmem:[%s22381_s7 + $0xe10] sm:$0xff] %vm12027_vm2, %v11781_v47  ;;  %v11773_v44 = vadd.f32 %v21860_v28, %v11772_v49 }
 0x755   :  { %v15837_v13 = vpop.f32.mrf.mxu0 }
 0x756   :  { %12476 = vst.msk [vmem:[%s22381_s7 + $0xe00] sm:$0xff] %vm12027_vm2, %v11773_v44  ;;  %v11784_v43 = vadd.f32 %v21860_v28, %v15837_v13 }
 0x757   :  { %v11775_v24 = vpop.f32.mrf.mxu0 }
 0x758   :  { %12479 = vst.msk [vmem:[%s22381_s7 + $0xe18] sm:$0xff] %vm12027_vm2, %v11784_v43  ;;  %v11776_v50 = vadd.f32 %v21860_v28, %v11775_v24 }
 0x759   :  { %v15840_v34 = vpop.f32.mrf.mxu0 }
 0x75a   :  { %12477 = vst.msk [vmem:[%s22381_s7 + $0xe08] sm:$0xff] %vm12027_vm2, %v11776_v50  ;;  %v11797_v29 = vadd.f32 %v21860_v28, %v15840_v34 }
 0x75b   :  { %v11788_v8 = vpop.f32.mrf.mxu0 }
 0x75c   :  { %12482 = vst.msk [vmem:[%s22381_s7 + $0xe30] sm:$0xff] %vm12027_vm2, %v11797_v29  ;;  %v11789_v31 = vadd.f32 %v21860_v28, %v11788_v8 }
 0x75d   :  { %v15841_v42 = vpop.f32.mrf.mxu0 }
 0x75e   :  { %12480 = vst.msk [vmem:[%s22381_s7 + $0xe20] sm:$0xff] %vm12027_vm2, %v11789_v31  ;;  %v11800_v0 = vadd.f32 %v21860_v28, %v15841_v42 }
 0x75f   :  { %v11791_v4 = vpop.f32.mrf.mxu0 }
 0x760   :  { %12483 = vst.msk [vmem:[%s22381_s7 + $0xe38] sm:$0xff] %vm12027_vm2, %v11800_v0  ;;  %v11792_v25 = vadd.f32 %v21860_v28, %v11791_v4 }
 0x761   :  { %v15844_v7 = vpop.f32.mrf.mxu0 }
 0x762   :  { %12481 = vst.msk [vmem:[%s22381_s7 + $0xe28] sm:$0xff] %vm12027_vm2, %v11792_v25  ;;  %v11813_v19 = vadd.f32 %v21860_v28, %v15844_v7 }
 0x763   :  { %v11804_v35 = vpop.f32.mrf.mxu0 }
 0x764   :  { %12486 = vst.msk [vmem:[%s22381_s7 + $0xe50] sm:$0xff] %vm12027_vm2, %v11813_v19  ;;  %v11805_v58 = vadd.f32 %v21860_v28, %v11804_v35 }
 0x765   :  { %v15845_v39 = vpop.f32.mrf.mxu0 }
 0x766   :  { %12484 = vst.msk [vmem:[%s22381_s7 + $0xe40] sm:$0xff] %vm12027_vm2, %v11805_v58  ;;  %v11816_v36 = vadd.f32 %v21860_v28, %v15845_v39 }
 0x767   :  { %v11807_v17 = vpop.f32.mrf.mxu0 }
 0x768   :  { %12487 = vst.msk [vmem:[%s22381_s7 + $0xe58] sm:$0xff] %vm12027_vm2, %v11816_v36  ;;  %v11808_v63 = vadd.f32 %v21860_v28, %v11807_v17 }
 0x769   :  { %v15848_v55 = vpop.f32.mrf.mxu0 }
 0x76a   :  { %12485 = vst.msk [vmem:[%s22381_s7 + $0xe48] sm:$0xff] %vm12027_vm2, %v11808_v63  ;;  %v11829_v26 = vadd.f32 %v21860_v28, %v15848_v55 }
 0x76b   :  { %v11820_v20 = vpop.f32.mrf.mxu0 }
 0x76c   :  { %12490 = vst.msk [vmem:[%s22381_s7 + $0xe70] sm:$0xff] %vm12027_vm2, %v11829_v26  ;;  %v11821_v32 = vadd.f32 %v21860_v28, %v11820_v20 }
 0x76d   :  { %v15849_v27 = vpop.f32.mrf.mxu0 }
 0x76e   :  { %12488 = vst.msk [vmem:[%s22381_s7 + $0xe60] sm:$0xff] %vm12027_vm2, %v11821_v32  ;;  %v11832_v11 = vadd.f32 %v21860_v28, %v15849_v27 }
 0x76f   :  { %v11823_v21 = vpop.f32.mrf.mxu0 }
 0x770   :  { %12491 = vst.msk [vmem:[%s22381_s7 + $0xe78] sm:$0xff] %vm12027_vm2, %v11832_v11  ;;  %v11824_v12 = vadd.f32 %v21860_v28, %v11823_v21 }
 0x771   :  { %v15852_v30 = vpop.f32.mrf.mxu0 }
 0x772   :  { %12489 = vst.msk [vmem:[%s22381_s7 + $0xe68] sm:$0xff] %vm12027_vm2, %v11824_v12  ;;  %v11845_v46 = vadd.f32 %v21860_v28, %v15852_v30 }
 0x773   :  { %v11836_v14 = vpop.f32.mrf.mxu0 }
 0x774   :  { %12494 = vst.msk [vmem:[%s22381_s7 + $0xe90] sm:$0xff] %vm12027_vm2, %v11845_v46  ;;  %v11837_v5 = vadd.f32 %v21860_v28, %v11836_v14 }
 0x775   :  { %v15853_v16 = vpop.f32.mrf.mxu0 }
 0x776   :  { %12492 = vst.msk [vmem:[%s22381_s7 + $0xe80] sm:$0xff] %vm12027_vm2, %v11837_v5  ;;  %v11848_v3 = vadd.f32 %v21860_v28, %v15853_v16 }
 0x777   :  { %v11839_v10 = vpop.f32.mrf.mxu0 }
 0x778   :  { %12495 = vst.msk [vmem:[%s22381_s7 + $0xe98] sm:$0xff] %vm12027_vm2, %v11848_v3  ;;  %v11840_v18 = vadd.f32 %v21860_v28, %v11839_v10 }
 0x779   :  { %v15856_v48 = vpop.f32.mrf.mxu0 }
 0x77a   :  { %12493 = vst.msk [vmem:[%s22381_s7 + $0xe88] sm:$0xff] %vm12027_vm2, %v11840_v18  ;;  %v11861_v52 = vadd.f32 %v21860_v28, %v15856_v48 }
 0x77b   :  { %v11852_v60 = vpop.f32.mrf.mxu0 }
 0x77c   :  { %12498 = vst.msk [vmem:[%s22381_s7 + $0xeb0] sm:$0xff] %vm12027_vm2, %v11861_v52  ;;  %v11853_v45 = vadd.f32 %v21860_v28, %v11852_v60 }
 0x77d   :  { %v15857_v61 = vpop.f32.mrf.mxu0 }
 0x77e   :  { %12496 = vst.msk [vmem:[%s22381_s7 + $0xea0] sm:$0xff] %vm12027_vm2, %v11853_v45  ;;  %v11864_v9 = vadd.f32 %v21860_v28, %v15857_v61 }
 0x77f   :  { %v11855_v6 = vpop.f32.mrf.mxu0 }
 0x780   :  { %12499 = vst.msk [vmem:[%s22381_s7 + $0xeb8] sm:$0xff] %vm12027_vm2, %v11864_v9  ;;  %v11856_v1 = vadd.f32 %v21860_v28, %v11855_v6 }
 0x781   :  { %v15860_v22 = vpop.f32.mrf.mxu0 }
 0x782   :  { %12497 = vst.msk [vmem:[%s22381_s7 + $0xea8] sm:$0xff] %vm12027_vm2, %v11856_v1  ;;  %v11877_v51 = vadd.f32 %v21860_v28, %v15860_v22 }
 0x783   :  { %v11868_v53 = vpop.f32.mrf.mxu0 }
 0x784   :  { %12502 = vst.msk [vmem:[%s22381_s7 + $0xed0] sm:$0xff] %vm12027_vm2, %v11877_v51  ;;  %v11869_v2 = vadd.f32 %v21860_v28, %v11868_v53 }
 0x785   :  { %v15861_v54 = vpop.f32.mrf.mxu0 }
 0x786   :  { %12500 = vst.msk [vmem:[%s22381_s7 + $0xec0] sm:$0xff] %vm12027_vm2, %v11869_v2  ;;  %v11880_v38 = vadd.f32 %v21860_v28, %v15861_v54 }
 0x787   :  { %v11871_v40 = vpop.f32.mrf.mxu0 }
 0x788   :  { %12503 = vst.msk [vmem:[%s22381_s7 + $0xed8] sm:$0xff] %vm12027_vm2, %v11880_v38  ;;  %v11872_v41 = vadd.f32 %v21860_v28, %v11871_v40 }
 0x789   :  { %v15864_v57 = vpop.f32.mrf.mxu0 }
 0x78a   :  { %12501 = vst.msk [vmem:[%s22381_s7 + $0xec8] sm:$0xff] %vm12027_vm2, %v11872_v41  ;;  %v11893_v56 = vadd.f32 %v21860_v28, %v15864_v57 }
 0x78b   :  { %v11884_v15 = vpop.f32.mrf.mxu0 }
 0x78c   :  { %12506 = vst.msk [vmem:[%s22381_s7 + $0xef0] sm:$0xff] %vm12027_vm2, %v11893_v56  ;;  %v11885_v23 = vadd.f32 %v21860_v28, %v11884_v15 }
 0x78d   :  { %v15865_v59 = vpop.f32.mrf.mxu0 }
 0x78e   :  { %12504 = vst.msk [vmem:[%s22381_s7 + $0xee0] sm:$0xff] %vm12027_vm2, %v11885_v23  ;;  %v11896_v37 = vadd.f32 %v21860_v28, %v15865_v59 }
 0x78f   :  { %v11887_v62 = vpop.f32.mrf.mxu0 }
 0x790   :  { %12507 = vst.msk [vmem:[%s22381_s7 + $0xef8] sm:$0xff] %vm12027_vm2, %v11896_v37  ;;  %v11888_v33 = vadd.f32 %v21860_v28, %v11887_v62 }
 0x791   :  { %v15868_v47 = vpop.f32.mrf.mxu0 }
 0x792   :  { %12505 = vst.msk [vmem:[%s22381_s7 + $0xee8] sm:$0xff] %vm12027_vm2, %v11888_v33  ;;  %v11909_v49 = vadd.f32 %v21860_v28, %v15868_v47 }
 0x793   :  { %v11900_v44 = vpop.f32.mrf.mxu0 }
 0x794   :  { %12510 = vst.msk [vmem:[%s22381_s7 + $0xf10] sm:$0xff] %vm12027_vm2, %v11909_v49  ;;  %v11901_v13 = vadd.f32 %v21860_v28, %v11900_v44 }
 0x795   :  { %v15869_v43 = vpop.f32.mrf.mxu0 }
 0x796   :  { %12508 = vst.msk [vmem:[%s22381_s7 + $0xf00] sm:$0xff] %vm12027_vm2, %v11901_v13  ;;  %v11912_v24 = vadd.f32 %v21860_v28, %v15869_v43 }
 0x797   :  { %v11903_v50 = vpop.f32.mrf.mxu0 }
 0x798   :  { %12511 = vst.msk [vmem:[%s22381_s7 + $0xf18] sm:$0xff] %vm12027_vm2, %v11912_v24  ;;  %v11904_v34 = vadd.f32 %v21860_v28, %v11903_v50 }
 0x799   :  { %v15872_v29 = vpop.f32.mrf.mxu0 }
 0x79a   :  { %12509 = vst.msk [vmem:[%s22381_s7 + $0xf08] sm:$0xff] %vm12027_vm2, %v11904_v34  ;;  %v11925_v8 = vadd.f32 %v21860_v28, %v15872_v29 }
 0x79b   :  { %v11916_v31 = vpop.f32.mrf.mxu0 }
 0x79c   :  { %12514 = vst.msk [vmem:[%s22381_s7 + $0xf30] sm:$0xff] %vm12027_vm2, %v11925_v8  ;;  %v11917_v42 = vadd.f32 %v21860_v28, %v11916_v31 }
 0x79d   :  { %v15873_v0 = vpop.f32.mrf.mxu0 }
 0x79e   :  { %12512 = vst.msk [vmem:[%s22381_s7 + $0xf20] sm:$0xff] %vm12027_vm2, %v11917_v42  ;;  %v11928_v4 = vadd.f32 %v21860_v28, %v15873_v0 }
 0x79f   :  { %v11919_v25 = vpop.f32.mrf.mxu0 }
 0x7a0   :  { %12515 = vst.msk [vmem:[%s22381_s7 + $0xf38] sm:$0xff] %vm12027_vm2, %v11928_v4  ;;  %v11920_v7 = vadd.f32 %v21860_v28, %v11919_v25 }
 0x7a1   :  { %v15876_v19 = vpop.f32.mrf.mxu0 }
 0x7a2   :  { %12513 = vst.msk [vmem:[%s22381_s7 + $0xf28] sm:$0xff] %vm12027_vm2, %v11920_v7  ;;  %v11941_v35 = vadd.f32 %v21860_v28, %v15876_v19 }
 0x7a3   :  { %v11932_v58 = vpop.f32.mrf.mxu0 }
 0x7a4   :  { %12518 = vst.msk [vmem:[%s22381_s7 + $0xf50] sm:$0xff] %vm12027_vm2, %v11941_v35  ;;  %v11933_v39 = vadd.f32 %v21860_v28, %v11932_v58 }
 0x7a5   :  { %v15877_v36 = vpop.f32.mrf.mxu0 }
 0x7a6   :  { %12516 = vst.msk [vmem:[%s22381_s7 + $0xf40] sm:$0xff] %vm12027_vm2, %v11933_v39  ;;  %v11944_v17 = vadd.f32 %v21860_v28, %v15877_v36 }
 0x7a7   :  { %v11935_v63 = vpop.f32.mrf.mxu0 }
 0x7a8   :  { %12519 = vst.msk [vmem:[%s22381_s7 + $0xf58] sm:$0xff] %vm12027_vm2, %v11944_v17  ;;  %v11936_v55 = vadd.f32 %v21860_v28, %v11935_v63 }
 0x7a9   :  { %v15880_v26 = vpop.f32.mrf.mxu0 }
 0x7aa   :  { %12517 = vst.msk [vmem:[%s22381_s7 + $0xf48] sm:$0xff] %vm12027_vm2, %v11936_v55  ;;  %v11957_v20 = vadd.f32 %v21860_v28, %v15880_v26 }
 0x7ab   :  { %v11948_v32 = vpop.f32.mrf.mxu0 }
 0x7ac   :  { %12522 = vst.msk [vmem:[%s22381_s7 + $0xf70] sm:$0xff] %vm12027_vm2, %v11957_v20  ;;  %v11949_v27 = vadd.f32 %v21860_v28, %v11948_v32 }
 0x7ad   :  { %v15881_v11 = vpop.f32.mrf.mxu0 }
 0x7ae   :  { %12520 = vst.msk [vmem:[%s22381_s7 + $0xf60] sm:$0xff] %vm12027_vm2, %v11949_v27  ;;  %v11960_v21 = vadd.f32 %v21860_v28, %v15881_v11 }
 0x7af   :  { %v11951_v12 = vpop.f32.mrf.mxu0 }
 0x7b0   :  { %12523 = vst.msk [vmem:[%s22381_s7 + $0xf78] sm:$0xff] %vm12027_vm2, %v11960_v21  ;;  %v11952_v30 = vadd.f32 %v21860_v28, %v11951_v12 }
 0x7b1   :  { %v15884_v46 = vpop.f32.mrf.mxu0 }
 0x7b2   :  { %12521 = vst.msk [vmem:[%s22381_s7 + $0xf68] sm:$0xff] %vm12027_vm2, %v11952_v30  ;;  %v11973_v14 = vadd.f32 %v21860_v28, %v15884_v46 }
 0x7b3   :  { %v11964_v5 = vpop.f32.mrf.mxu0 }
 0x7b4   :  { %12526 = vst.msk [vmem:[%s22381_s7 + $0xf90] sm:$0xff] %vm12027_vm2, %v11973_v14  ;;  %v11965_v16 = vadd.f32 %v21860_v28, %v11964_v5 }
 0x7b5   :  { %v15885_v3 = vpop.f32.mrf.mxu0 }
 0x7b6   :  { %12524 = vst.msk [vmem:[%s22381_s7 + $0xf80] sm:$0xff] %vm12027_vm2, %v11965_v16  ;;  %v11976_v10 = vadd.f32 %v21860_v28, %v15885_v3 }
 0x7b7   :  { %v11967_v18 = vpop.f32.mrf.mxu0 }
 0x7b8   :  { %12527 = vst.msk [vmem:[%s22381_s7 + $0xf98] sm:$0xff] %vm12027_vm2, %v11976_v10  ;;  %v11968_v48 = vadd.f32 %v21860_v28, %v11967_v18 }
 0x7b9   :  { %v15888_v52 = vpop.f32.mrf.mxu0 }
 0x7ba   :  { %12525 = vst.msk [vmem:[%s22381_s7 + $0xf88] sm:$0xff] %vm12027_vm2, %v11968_v48  ;;  %v11989_v60 = vadd.f32 %v21860_v28, %v15888_v52 }
 0x7bb   :  { %v11980_v45 = vpop.f32.mrf.mxu0 }
 0x7bc   :  { %12530 = vst.msk [vmem:[%s22381_s7 + $0xfb0] sm:$0xff] %vm12027_vm2, %v11989_v60  ;;  %v11981_v61 = vadd.f32 %v21860_v28, %v11980_v45 }
 0x7bd   :  { %v15889_v9 = vpop.f32.mrf.mxu0 }
 0x7be   :  { %12528 = vst.msk [vmem:[%s22381_s7 + $0xfa0] sm:$0xff] %vm12027_vm2, %v11981_v61  ;;  %v11992_v6 = vadd.f32 %v21860_v28, %v15889_v9 }
 0x7bf   :  { %v11983_v1 = vpop.f32.mrf.mxu0 }
 0x7c0   :  { %12531 = vst.msk [vmem:[%s22381_s7 + $0xfb8] sm:$0xff] %vm12027_vm2, %v11992_v6  ;;  %v11984_v22 = vadd.f32 %v21860_v28, %v11983_v1 }
 0x7c1   :  { %v15892_v51 = vpop.f32.mrf.mxu0 }
 0x7c2   :  { %12529 = vst.msk [vmem:[%s22381_s7 + $0xfa8] sm:$0xff] %vm12027_vm2, %v11984_v22  ;;  %v12005_v53 = vadd.f32 %v21860_v28, %v15892_v51 }
 0x7c3   :  { %v11996_v2 = vpop.f32.mrf.mxu0 }
 0x7c4   :  { %12534 = vst.msk [vmem:[%s22381_s7 + $0xfd0] sm:$0xff] %vm12027_vm2, %v12005_v53  ;;  %v11997_v54 = vadd.f32 %v21860_v28, %v11996_v2 }
 0x7c5   :  { %v15893_v38 = vpop.f32.mrf.mxu0 }
 0x7c6   :  { %12532 = vst.msk [vmem:[%s22381_s7 + $0xfc0] sm:$0xff] %vm12027_vm2, %v11997_v54  ;;  %v12008_v40 = vadd.f32 %v21860_v28, %v15893_v38 }
 0x7c7   :  { %v11999_v41 = vpop.f32.mrf.mxu0 }
 0x7c8   :  { %12535 = vst.msk [vmem:[%s22381_s7 + $0xfd8] sm:$0xff] %vm12027_vm2, %v12008_v40  ;;  %v12000_v57 = vadd.f32 %v21860_v28, %v11999_v41 }
 0x7c9   :  { %v15896_v56 = vpop.f32.mrf.mxu0 }
 0x7ca   :  { %12533 = vst.msk [vmem:[%s22381_s7 + $0xfc8] sm:$0xff] %vm12027_vm2, %v12000_v57  ;;  %v12021_v15 = vadd.f32 %v21860_v28, %v15896_v56 }
 0x7cb   :  { %v12012_v23 = vpop.f32.mrf.mxu0 }
 0x7cc   :  { %12538 = vst.msk [vmem:[%s22381_s7 + $0xff0] sm:$0xff] %vm12027_vm2, %v12021_v15  ;;  %v12013_v59 = vadd.f32 %v21860_v28, %v12012_v23 }
 0x7cd   :  { %v15897_v37 = vpop.f32.mrf.mxu0 }
 0x7ce   :  { %12536 = vst.msk [vmem:[%s22381_s7 + $0xfe0] sm:$0xff] %vm12027_vm2, %v12013_v59  ;;  %v12024_v62 = vadd.f32 %v21860_v28, %v15897_v37 }
 0x7cf   :  { %v12015_v33 = vpop.f32.mrf.mxu0 }
 0x7d0   :  { %12539 = vst.msk [vmem:[%s22381_s7 + $0xff8] sm:$0xff] %vm12027_vm2, %v12024_v62  ;;  %v12016_v47 = vadd.f32 %v21860_v28, %v12015_v33 }
 0x7d2   :  { %12537 = vst.msk [vmem:[%s22381_s7 + $0xfe8] sm:$0xff] %vm12027_vm2, %v12016_v47 }
 0x7d3   :  { %12544 = vsyncpa [#allocation3], 1 }
 0x7d4   :  { %12545 = vsyncpa [#allocation5], 1 }
 0x7d5   :  { %12546 = vsyncpa [#allocation8], 1 }

</bundles_post_ra>
